<compile_context>
chip_gen: v7x
topology: tpu7x:2x2x1
jax: 0.10.0
libtpu: 0.0.40
codegen_flags: <defaults>
</compile_context>

<pallas_src>
import numpy as np

import jax
import jax.numpy as jnp
from jax.experimental import pallas as pl
from jax.experimental.pallas import tpu as pltpu


# ----------------------------------------------------------------------------
# Kernel input ordering (x is prepended separately)
# ----------------------------------------------------------------------------
CONV_NAMES = [
    "enc1_1", "enc1_2", "enc2_1", "enc2_2", "enc3_1", "enc3_2",
    "enc4_1", "enc4_2", "enc5_1",
    "dec5_1", "dec4_2", "dec4_1", "dec3_2", "dec3_1",
    "dec2_2", "dec2_1", "dec1_2", "dec1_1",
]

PARAM_NAMES = (
    [f"{n}_{k}" for n in CONV_NAMES for k in ("w", "s")]
    + [f"unpool{l}_{k}" for l in (4, 3, 2, 1) for k in ("w", "b")]
    + ["fc_w", "fc_b"]
    + [f"M{l}" for l in range(1, 6)]     # per-level column masks (3, P)
    + [f"G{l}" for l in range(1, 5)]     # 2x2 maxpool gather (P, P/4)
    + [f"E{l}" for l in range(1, 5)]     # 2x2/stride-2 unpool scatter (4, Pin, Pout)
)


# ----------------------------------------------------------------------------
# Fused kernel: the entire encoder + decoder for ONE image per grid step.
# ----------------------------------------------------------------------------
def _make_kernel(param_names, level_dims):
    """level_dims: {level: (hl, wl, P)} with level 1 = full resolution."""

    def kernel(*refs):
        x_ref = refs[0]
        o_ref = refs[-1]
        R = {name: refs[1 + i] for i, name in enumerate(param_names)}

        def dot32(a, b):
            return jnp.dot(a, b, preferred_element_type=jnp.float32)

        def elu(z):
            # exp(min(z,0)) avoids inf on the (discarded) positive branch.
            return jnp.where(z > 0.0, z, jnp.exp(jnp.minimum(z, 0.0)) - 1.0)

        def conv3x3(act, name, lvl):
            """3x3 conv (pad=1) + folded BN affine + ELU, on (C, P) activations.

            One im2col matmul: 9 shifted copies (lane slices of a zero-padded
            buffer, column-masked) stacked along sublanes -> (9C, P), then a single
            (Cout, 9C) x (9C, P) bf16 matmul with f32 accumulation.
            """
            _, wl, P = level_dims[lvl]
            C = act.shape[0]
            pad = jnp.zeros((C, wl + 1), jnp.float32)
            xpad = jnp.concatenate([pad, act, pad], axis=1)       # (C, P + 2wl + 2)
            M = R[f"M{lvl}"][...]                                 # (3, P) col masks
            pieces = []
            for t in range(9):
                dy, dx = divmod(t, 3)
                dy -= 1
                dx -= 1
                off = (wl + 1) + dy * wl + dx                     # static slice start
                sh = xpad[:, off:off + P]                         # shifted copy
                if dx != 0:
                    sh = sh * M[dx + 1]                           # kill column wrap
                pieces.append(sh)
            im2col = jnp.concatenate(pieces, axis=0).astype(jnp.bfloat16)   # (9C, P)
            z = dot32(R[name + "_w"][...], im2col) + R[name + "_s"][...]
            return elu(z)

        def maxpool2(act, lvl):
            """2x2/stride-2 maxpool: VPU max of 4 shifted copies + one gather matmul."""
            _, wl, P = level_dims[lvl]
            C = act.shape[0]
            pad = jnp.zeros((C, wl + 1), jnp.float32)
            xpad = jnp.concatenate([act, pad], axis=1)
            m = act
            for s in (1, wl, wl + 1):
                m = jnp.maximum(m, xpad[:, s:s + P])
            # Exact 0/1 gather (one nonzero per column) kept in f32.
            return dot32(m, R[f"G{lvl}"][...])

        def unpool2x2(act, l):
            """ConvTranspose2d(k=2, s=2): 4 weight matmuls + 4 exact scatter matmuls."""
            Wt = R[f"unpool{l}_w"]                                # (4, Cout, Cin) bf16
            E = R[f"E{l}"]                                        # (4, Pin, Pout) f32
            a16 = act.astype(jnp.bfloat16)
            out = None
            for k in range(4):
                y = dot32(Wt[k], a16)                             # (Cout, Pin) f32
                s = dot32(y, E[k])                                # scatter -> (Cout, Pout)
                out = s if out is None else out + s
            return out + R[f"unpool{l}_b"][...]

        x = x_ref[0]                                              # (Cin, H*W), lane-dense

        # ---- encoder (eval mode, matches the injected encoder_unet) ----
        e11 = conv3x3(x, "enc1_1", 1)
        e12 = conv3x3(e11, "enc1_2", 1)
        p1 = maxpool2(e12, 1)
        e21 = conv3x3(p1, "enc2_1", 2)
        e22 = conv3x3(e21, "enc2_2", 2)
        p2 = maxpool2(e22, 2)
        e31 = conv3x3(p2, "enc3_1", 3)
        e32 = conv3x3(e31, "enc3_2", 3)
        p3 = maxpool2(e32, 3)
        e41 = conv3x3(p3, "enc4_1", 4)
        e42 = conv3x3(e41, "enc4_2", 4)
        p4 = maxpool2(e42, 4)
        e51 = conv3x3(p4, "enc5_1", 5)

        # ---- decoder (this module) ----
        d51 = conv3x3(e51, "dec5_1", 5)
        u4 = unpool2x2(d51, 4)
        d42 = conv3x3(jnp.concatenate([u4, e42], axis=0), "dec4_2", 4)
        d41 = conv3x3(d42, "dec4_1", 4)
        u3 = unpool2x2(d41, 3)
        d32 = conv3x3(jnp.concatenate([u3, e32], axis=0), "dec3_2", 3)
        d31 = conv3x3(d32, "dec3_1", 3)
        u2 = unpool2x2(d31, 2)
        d22 = conv3x3(jnp.concatenate([u2, e22], axis=0), "dec2_2", 2)
        d21 = conv3x3(d22, "dec2_1", 2)
        u1 = unpool2x2(d21, 1)
        d12 = conv3x3(jnp.concatenate([u1, e12], axis=0), "dec1_2", 1)
        d11 = conv3x3(d12, "dec1_1", 1)

        # fc_segmentation: 1x1 conv -> (1, H*W), stored lane-dense
        seg = dot32(R["fc_w"][...], d11.astype(jnp.bfloat16)) + R["fc_b"][...]
        o_ref[0] = seg

    return kernel


def _const_spec(arr):
    nd = arr.ndim
    return pl.BlockSpec(arr.shape, lambda i, _nd=nd: (0,) * _nd)


def combined_model_forward(model_inputs, x_nchw):
    """Fused Pallas forward.  x_nchw: (N, Cin, H, W) -> (N, 1, H, W)."""
    n, cin, h, w = x_nchw.shape
    assert h % 16 == 0 and w % 16 == 0, "needs 4 levels of 2x2 pooling"
    p1 = h * w
    level_dims = {l: (h >> (l - 1), w >> (l - 1), (h >> (l - 1)) * (w >> (l - 1)))
                  for l in range(1, 6)}
    x3 = x_nchw.reshape(n, cin, p1)                   # pixels onto the lane axis

    kernel = _make_kernel(PARAM_NAMES, level_dims)
    args = [x3] + [model_inputs[name] for name in PARAM_NAMES]
    in_specs = [pl.BlockSpec((1, cin, p1), lambda i: (i, 0, 0))]
    in_specs += [_const_spec(model_inputs[name]) for name in PARAM_NAMES]

    out = pl.pallas_call(
        kernel,
        out_shape=jax.ShapeDtypeStruct((n, 1, p1), jnp.float32),
        grid=(n,),                                    # one image per grid step
        in_specs=in_specs,
        out_specs=pl.BlockSpec((1, 1, p1), lambda i: (i, 0, 0)),
        compiler_params=pltpu.CompilerParams(
            dimension_semantics=("parallel",),        # split batch across TCs on v7x
        ),
    )(*args)
    return out.reshape(n, 1, h, w)


# ----------------------------------------------------------------------------
# Constant structure arrays (numpy, exact): column masks, pool gather, unpool scatter
# ----------------------------------------------------------------------------
def _col_mask(hl, wl):
    P = hl * wl
    col = np.arange(P) % wl
    m = np.ones((3, P), np.float32)
    m[0] = (col > 0).astype(np.float32)       # tap dx = -1
    m[2] = (col < wl - 1).astype(np.float32)  # tap dx = +1
    return m


def _pool_gather(hl, wl):
    P, Po = hl * wl, (hl // 2) * (wl // 2)
    g = np.zeros((P, Po), np.float32)
    for y in range(hl // 2):
        for x in range(wl // 2):
            g[(2 * y) * wl + 2 * x, y * (wl // 2) + x] = 1.0
    return g


def _unpool_scatter(hl_in, wl_in):
    P, Po = hl_in * wl_in, 4 * hl_in * wl_in
    e = np.zeros((4, P, Po), np.float32)
    for k in range(4):
        a, b = divmod(k, 2)
        for y in range(hl_in):
            for x in range(wl_in):
                e[k, y * wl_in + x, (2 * y + a) * (2 * wl_in) + (2 * x + b)] = 1.0
    return e


def build_structure(h, w):
    d = {}
    for l in range(1, 6):
        hl, wl = h >> (l - 1), w >> (l - 1)
        d[f"M{l}"] = jnp.asarray(_col_mask(hl, wl))
        if l <= 4:
            d[f"G{l}"] = jnp.asarray(_pool_gather(hl, wl))
            d[f"E{l}"] = jnp.asarray(_unpool_scatter(h >> l, w >> l))
    return d


# ----------------------------------------------------------------------------
# Deterministic parameters (canonical f32 layout; BN folded into conv weights)
# ----------------------------------------------------------------------------
def _init_cbr(key, cin, cout):
    k = jax.random.split(key, 6)
    w = jax.random.normal(k[0], (9, cout, cin), jnp.float32) / (3.0 * cin ** 0.5)
    b = 0.01 * jax.random.normal(k[1], (cout,), jnp.float32)
    gamma = 1.0 + 0.1 * jax.random.normal(k[2], (cout,), jnp.float32)
    beta = 0.1 * jax.random.normal(k[3], (cout,), jnp.float32)
    mean = 0.1 * jax.random.normal(k[4], (cout,), jnp.float32)
    var = jnp.abs(jax.random.normal(k[5], (cout,), jnp.float32)) + 0.5
    scale = gamma / jnp.sqrt(var + 1e-5)
    shift = beta - mean * scale
    w_fold = w * scale[None, :, None]                 # fold BN scale into weights
    s_fold = (b * scale + shift).reshape(cout, 1)     # fold conv bias + BN shift
    return w_fold, s_fold


def _init_convT(key, cin, cout):
    k1, k2 = jax.random.split(key)
    w = jax.random.normal(k1, (4, cout, cin), jnp.float32) / (2.0 * cin ** 0.5)
    b = 0.01 * jax.random.normal(k2, (cout, 1), jnp.float32)
    return w, b


def build_params(key, in_ch, f):
    conv_defs = {
        "enc1_1": (in_ch, f[0]), "enc1_2": (f[0], f[0]),
        "enc2_1": (f[0], f[1]), "enc2_2": (f[1], f[1]),
        "enc3_1": (f[1], f[2]), "enc3_2": (f[2], f[2]),
        "enc4_1": (f[2], f[3]), "enc4_2": (f[3], f[3]),
        "enc5_1": (f[3], f[4]),
        "dec5_1": (f[4], f[3]),
        "dec4_2": (2 * f[3], f[3]), "dec4_1": (f[3], f[2]),
        "dec3_2": (2 * f[2], f[2]), "dec3_1": (f[2], f[1]),
        "dec2_2": (2 * f[1], f[1]), "dec2_1": (f[1], f[0]),
        "dec1_2": (2 * f[0], f[0]), "dec1_1": (f[0], f[0]),
    }
    unpool_defs = {"unpool4": f[3], "unpool3": f[2], "unpool2": f[1], "unpool1": f[0]}
    keys = iter(jax.random.split(key, len(conv_defs) + len(unpool_defs) + 1))
    p = {}
    for name, (cin, cout) in conv_defs.items():
        w, s = _init_cbr(next(keys), cin, cout)
        p[name + "_w"], p[name + "_s"] = w, s
    for name, c in unpool_defs.items():
        w, b = _init_convT(next(keys), c, c)
        p[name + "_w"], p[name + "_b"] = w, b
    kw, kb = jax.random.split(next(keys))
    p["fc_w"] = jax.random.normal(kw, (1, f[0]), jnp.float32) / (f[0] ** 0.5)
    p["fc_b"] = 0.01 * jax.random.normal(kb, (1, 1), jnp.float32)
    return p


def to_kernel_params(p):
    """Canonical (9, Cout, Cin) f32 -> lane-dense (Cout, 9*Cin) bf16 kernel layout."""
    kp = {}
    for name in CONV_NAMES:
        w = p[name + "_w"]                                        # (9, Cout, Cin)
        cout = w.shape[1]
        kp[name + "_w"] = jnp.transpose(w, (1, 0, 2)).reshape(cout, -1).astype(jnp.bfloat16)
        kp[name + "_s"] = p[name + "_s"]                          # (Cout, 1) f32
    for l in (1, 2, 3, 4):
        kp[f"unpool{l}_w"] = p[f"unpool{l}_w"].astype(jnp.bfloat16)
        kp[f"unpool{l}_b"] = p[f"unpool{l}_b"]
    kp["fc_w"] = p["fc_w"].astype(jnp.bfloat16)
    kp["fc_b"] = p["fc_b"]
    return kp


# ----------------------------------------------------------------------------
# Pure-JAX (XLA) reference in NCHW, mirroring the kernel's bf16 matmul boundaries.
# ----------------------------------------------------------------------------
def reference_forward(p, x):
    f32, bf16 = jnp.float32, jnp.bfloat16

    def elu(z):
        return jnp.where(z > 0.0, z, jnp.exp(jnp.minimum(z, 0.0)) - 1.0)

    def cbr(xx, w, s):
        n, c, hh, ww = xx.shape
        xp = jnp.pad(xx, ((0, 0), (0, 0), (1, 1), (1, 1))).astype(bf16)
        w16 = w.astype(bf16)
        z = s.reshape(1, -1, 1, 1)
        for t in range(9):
            dy, dx = divmod(t, 3)
            tap = xp[:, :, dy:dy + hh, dx:dx + ww]
            z = z + jnp.einsum("oc,nchw->nohw", w16[t], tap, preferred_element_type=f32)
        return elu(z)

    def pool(xx):
        n, c, hh, ww = xx.shape
        return xx.reshape(n, c, hh // 2, 2, ww // 2, 2).max(axis=(3, 5))

    def unpool(xx, w, b):
        n, c, hh, ww = xx.shape
        cout = w.shape[1]
        y = jnp.einsum("koc,nchw->nkohw", w.astype(bf16), xx.astype(bf16),
                       preferred_element_type=f32)
        y = y.reshape(n, 2, 2, cout, hh, ww).transpose(0, 3, 4, 1, 5, 2)
        return y.reshape(n, cout, 2 * hh, 2 * ww) + b.reshape(1, cout, 1, 1)

    e11 = cbr(x, p["enc1_1_w"], p["enc1_1_s"]); e12 = cbr(e11, p["enc1_2_w"], p["enc1_2_s"])
    p1 = pool(e12)
    e21 = cbr(p1, p["enc2_1_w"], p["enc2_1_s"]); e22 = cbr(e21, p["enc2_2_w"], p["enc2_2_s"])
    p2 = pool(e22)
    e31 = cbr(p2, p["enc3_1_w"], p["enc3_1_s"]); e32 = cbr(e31, p["enc3_2_w"], p["enc3_2_s"])
    p3 = pool(e32)
    e41 = cbr(p3, p["enc4_1_w"], p["enc4_1_s"]); e42 = cbr(e41, p["enc4_2_w"], p["enc4_2_s"])
    p4 = pool(e42)
    e51 = cbr(p4, p["enc5_1_w"], p["enc5_1_s"])

    d51 = cbr(e51, p["dec5_1_w"], p["dec5_1_s"])
    u4 = unpool(d51, p["unpool4_w"], p["unpool4_b"])
    d42 = cbr(jnp.concatenate([u4, e42], axis=1), p["dec4_2_w"], p["dec4_2_s"])
    d41 = cbr(d42, p["dec4_1_w"], p["dec4_1_s"])
    u3 = unpool(d41, p["unpool3_w"], p["unpool3_b"])
    d32 = cbr(jnp.concatenate([u3, e32], axis=1), p["dec3_2_w"], p["dec3_2_s"])
    d31 = cbr(d32, p["dec3_1_w"], p["dec3_1_s"])
    u2 = unpool(d31, p["unpool2_w"], p["unpool2_b"])
    d22 = cbr(jnp.concatenate([u2, e22], axis=1), p["dec2_2_w"], p["dec2_2_s"])
    d21 = cbr(d22, p["dec2_1_w"], p["dec2_1_s"])
    u1 = unpool(d21, p["unpool1_w"], p["unpool1_b"])
    d12 = cbr(jnp.concatenate([u1, e12], axis=1), p["dec1_2_w"], p["dec1_2_s"])
    d11 = cbr(d12, p["dec1_1_w"], p["dec1_1_s"])
    seg = jnp.einsum("oc,nchw->nohw", p["fc_w"].astype(bf16), d11.astype(bf16),
                     preferred_element_type=f32) + p["fc_b"].reshape(1, 1, 1, 1)
    return seg


# ----------------------------------------------------------------------------
if __name__ == "__main__":
    key = jax.random.PRNGKey(0)
    k_par, k_x = jax.random.split(key)

    filters = [4, 8, 16, 16, 32]            # config.unet_n_filters
    in_channels, batch, spatial = 4, 2, 16  # 4 pools: 16 -> 8 -> 4 -> 2 -> 1

    params = build_params(k_par, in_channels, filters)          # canonical f32
    model_inputs = {**to_kernel_params(params), **build_structure(spatial, spatial)}

    x = jax.random.normal(k_x, (batch, in_channels, spatial, spatial), jnp.float32)

    fwd = jax.jit(combined_model_forward)
    seg = jax.block_until_ready(fwd(model_inputs, x))

    assert seg.shape == (batch, 1, spatial, spatial), seg.shape
    assert seg.dtype == jnp.float32
    assert bool(jnp.all(jnp.isfinite(seg)))

    # Validate against a pure-XLA reference that mirrors the kernel's bf16 matmul
    # boundaries (so the only divergence is f32 accumulation order).
    ref = jax.block_until_ready(jax.jit(reference_forward)(params, x))
    out_scale = float(jnp.max(jnp.abs(ref))) + 1e-6
    max_diff = float(jnp.max(jnp.abs(seg - ref)))
    assert max_diff <= 0.05 * out_scale + 1e-3, (max_diff, out_scale)

    print("KERNEL_OK")
</pallas_src>

<mosaic_0001>
module attributes {stable_mosaic.version = 11 : i64} {
  func.func @kernel(%arg0: i32, %arg1: memref<1x4x256xf32, #tpu.memory_space<vmem>>, %arg2: memref<4x36xbf16, #tpu.memory_space<vmem>>, %arg3: memref<4x1xf32, #tpu.memory_space<vmem>>, %arg4: memref<4x36xbf16, #tpu.memory_space<vmem>>, %arg5: memref<4x1xf32, #tpu.memory_space<vmem>>, %arg6: memref<8x36xbf16, #tpu.memory_space<vmem>>, %arg7: memref<8x1xf32, #tpu.memory_space<vmem>>, %arg8: memref<8x72xbf16, #tpu.memory_space<vmem>>, %arg9: memref<8x1xf32, #tpu.memory_space<vmem>>, %arg10: memref<16x72xbf16, #tpu.memory_space<vmem>>, %arg11: memref<16x1xf32, #tpu.memory_space<vmem>>, %arg12: memref<16x144xbf16, #tpu.memory_space<vmem>>, %arg13: memref<16x1xf32, #tpu.memory_space<vmem>>, %arg14: memref<16x144xbf16, #tpu.memory_space<vmem>>, %arg15: memref<16x1xf32, #tpu.memory_space<vmem>>, %arg16: memref<16x144xbf16, #tpu.memory_space<vmem>>, %arg17: memref<16x1xf32, #tpu.memory_space<vmem>>, %arg18: memref<32x144xbf16, #tpu.memory_space<vmem>>, %arg19: memref<32x1xf32, #tpu.memory_space<vmem>>, %arg20: memref<16x288xbf16, #tpu.memory_space<vmem>>, %arg21: memref<16x1xf32, #tpu.memory_space<vmem>>, %arg22: memref<16x288xbf16, #tpu.memory_space<vmem>>, %arg23: memref<16x1xf32, #tpu.memory_space<vmem>>, %arg24: memref<16x144xbf16, #tpu.memory_space<vmem>>, %arg25: memref<16x1xf32, #tpu.memory_space<vmem>>, %arg26: memref<16x288xbf16, #tpu.memory_space<vmem>>, %arg27: memref<16x1xf32, #tpu.memory_space<vmem>>, %arg28: memref<8x144xbf16, #tpu.memory_space<vmem>>, %arg29: memref<8x1xf32, #tpu.memory_space<vmem>>, %arg30: memref<8x144xbf16, #tpu.memory_space<vmem>>, %arg31: memref<8x1xf32, #tpu.memory_space<vmem>>, %arg32: memref<4x72xbf16, #tpu.memory_space<vmem>>, %arg33: memref<4x1xf32, #tpu.memory_space<vmem>>, %arg34: memref<4x72xbf16, #tpu.memory_space<vmem>>, %arg35: memref<4x1xf32, #tpu.memory_space<vmem>>, %arg36: memref<4x36xbf16, #tpu.memory_space<vmem>>, %arg37: memref<4x1xf32, #tpu.memory_space<vmem>>, %arg38: memref<4x16x16xbf16, #tpu.memory_space<vmem>>, %arg39: memref<16x1xf32, #tpu.memory_space<vmem>>, %arg40: memref<4x16x16xbf16, #tpu.memory_space<vmem>>, %arg41: memref<16x1xf32, #tpu.memory_space<vmem>>, %arg42: memref<4x8x8xbf16, #tpu.memory_space<vmem>>, %arg43: memref<8x1xf32, #tpu.memory_space<vmem>>, %arg44: memref<4x4x4xbf16, #tpu.memory_space<vmem>>, %arg45: memref<4x1xf32, #tpu.memory_space<vmem>>, %arg46: memref<1x4xbf16, #tpu.memory_space<vmem>>, %arg47: memref<1x1xf32, #tpu.memory_space<vmem>>, %arg48: memref<3x256xf32, #tpu.memory_space<vmem>>, %arg49: memref<3x64xf32, #tpu.memory_space<vmem>>, %arg50: memref<3x16xf32, #tpu.memory_space<vmem>>, %arg51: memref<3x4xf32, #tpu.memory_space<vmem>>, %arg52: memref<3x1xf32, #tpu.memory_space<vmem>>, %arg53: memref<256x64xf32, #tpu.memory_space<vmem>>, %arg54: memref<64x16xf32, #tpu.memory_space<vmem>>, %arg55: memref<16x4xf32, #tpu.memory_space<vmem>>, %arg56: memref<4x1xf32, #tpu.memory_space<vmem>>, %arg57: memref<4x64x256xf32, #tpu.memory_space<vmem>>, %arg58: memref<4x16x64xf32, #tpu.memory_space<vmem>>, %arg59: memref<4x4x16xf32, #tpu.memory_space<vmem>>, %arg60: memref<4x1x4xf32, #tpu.memory_space<vmem>>, %arg61: memref<1x1x256xf32, #tpu.memory_space<vmem>>) attributes {dimension_semantics = [#tpu.dimension_semantics<parallel>], iteration_bounds = array<i64: 2>, scalar_prefetch = 0 : i64, scratch_operands = 0 : i64, tpu.core_type = #tpu.core_type<tc>, window_params = [{transform_indices = @transform_0, window_bounds = array<i64: 1, 4, 256>}, {pipeline_mode = #tpu.pipeline_mode<synchronous>, transform_indices = @transform_1, window_bounds = array<i64: 4, 36>}, {pipeline_mode = #tpu.pipeline_mode<synchronous>, transform_indices = @transform_2, window_bounds = array<i64: 4, 1>}, {pipeline_mode = #tpu.pipeline_mode<synchronous>, transform_indices = @transform_3, window_bounds = array<i64: 4, 36>}, {pipeline_mode = #tpu.pipeline_mode<synchronous>, transform_indices = @transform_4, window_bounds = array<i64: 4, 1>}, {pipeline_mode = #tpu.pipeline_mode<synchronous>, transform_indices = @transform_5, window_bounds = array<i64: 8, 36>}, {pipeline_mode = #tpu.pipeline_mode<synchronous>, transform_indices = @transform_6, window_bounds = array<i64: 8, 1>}, {pipeline_mode = #tpu.pipeline_mode<synchronous>, transform_indices = @transform_7, window_bounds = array<i64: 8, 72>}, {pipeline_mode = #tpu.pipeline_mode<synchronous>, transform_indices = @transform_8, window_bounds = array<i64: 8, 1>}, {pipeline_mode = #tpu.pipeline_mode<synchronous>, transform_indices = @transform_9, window_bounds = array<i64: 16, 72>}, {pipeline_mode = #tpu.pipeline_mode<synchronous>, transform_indices = @transform_10, window_bounds = array<i64: 16, 1>}, {pipeline_mode = #tpu.pipeline_mode<synchronous>, transform_indices = @transform_11, window_bounds = array<i64: 16, 144>}, {pipeline_mode = #tpu.pipeline_mode<synchronous>, transform_indices = @transform_12, window_bounds = array<i64: 16, 1>}, {pipeline_mode = #tpu.pipeline_mode<synchronous>, transform_indices = @transform_13, window_bounds = array<i64: 16, 144>}, {pipeline_mode = #tpu.pipeline_mode<synchronous>, transform_indices = @transform_14, window_bounds = array<i64: 16, 1>}, {pipeline_mode = #tpu.pipeline_mode<synchronous>, transform_indices = @transform_15, window_bounds = array<i64: 16, 144>}, {pipeline_mode = #tpu.pipeline_mode<synchronous>, transform_indices = @transform_16, window_bounds = array<i64: 16, 1>}, {pipeline_mode = #tpu.pipeline_mode<synchronous>, transform_indices = @transform_17, window_bounds = array<i64: 32, 144>}, {pipeline_mode = #tpu.pipeline_mode<synchronous>, transform_indices = @transform_18, window_bounds = array<i64: 32, 1>}, {pipeline_mode = #tpu.pipeline_mode<synchronous>, transform_indices = @transform_19, window_bounds = array<i64: 16, 288>}, {pipeline_mode = #tpu.pipeline_mode<synchronous>, transform_indices = @transform_20, window_bounds = array<i64: 16, 1>}, {pipeline_mode = #tpu.pipeline_mode<synchronous>, transform_indices = @transform_21, window_bounds = array<i64: 16, 288>}, {pipeline_mode = #tpu.pipeline_mode<synchronous>, transform_indices = @transform_22, window_bounds = array<i64: 16, 1>}, {pipeline_mode = #tpu.pipeline_mode<synchronous>, transform_indices = @transform_23, window_bounds = array<i64: 16, 144>}, {pipeline_mode = #tpu.pipeline_mode<synchronous>, transform_indices = @transform_24, window_bounds = array<i64: 16, 1>}, {pipeline_mode = #tpu.pipeline_mode<synchronous>, transform_indices = @transform_25, window_bounds = array<i64: 16, 288>}, {pipeline_mode = #tpu.pipeline_mode<synchronous>, transform_indices = @transform_26, window_bounds = array<i64: 16, 1>}, {pipeline_mode = #tpu.pipeline_mode<synchronous>, transform_indices = @transform_27, window_bounds = array<i64: 8, 144>}, {pipeline_mode = #tpu.pipeline_mode<synchronous>, transform_indices = @transform_28, window_bounds = array<i64: 8, 1>}, {pipeline_mode = #tpu.pipeline_mode<synchronous>, transform_indices = @transform_29, window_bounds = array<i64: 8, 144>}, {pipeline_mode = #tpu.pipeline_mode<synchronous>, transform_indices = @transform_30, window_bounds = array<i64: 8, 1>}, {pipeline_mode = #tpu.pipeline_mode<synchronous>, transform_indices = @transform_31, window_bounds = array<i64: 4, 72>}, {pipeline_mode = #tpu.pipeline_mode<synchronous>, transform_indices = @transform_32, window_bounds = array<i64: 4, 1>}, {pipeline_mode = #tpu.pipeline_mode<synchronous>, transform_indices = @transform_33, window_bounds = array<i64: 4, 72>}, {pipeline_mode = #tpu.pipeline_mode<synchronous>, transform_indices = @transform_34, window_bounds = array<i64: 4, 1>}, {pipeline_mode = #tpu.pipeline_mode<synchronous>, transform_indices = @transform_35, window_bounds = array<i64: 4, 36>}, {pipeline_mode = #tpu.pipeline_mode<synchronous>, transform_indices = @transform_36, window_bounds = array<i64: 4, 1>}, {pipeline_mode = #tpu.pipeline_mode<synchronous>, transform_indices = @transform_37, window_bounds = array<i64: 4, 16, 16>}, {pipeline_mode = #tpu.pipeline_mode<synchronous>, transform_indices = @transform_38, window_bounds = array<i64: 16, 1>}, {pipeline_mode = #tpu.pipeline_mode<synchronous>, transform_indices = @transform_39, window_bounds = array<i64: 4, 16, 16>}, {pipeline_mode = #tpu.pipeline_mode<synchronous>, transform_indices = @transform_40, window_bounds = array<i64: 16, 1>}, {pipeline_mode = #tpu.pipeline_mode<synchronous>, transform_indices = @transform_41, window_bounds = array<i64: 4, 8, 8>}, {pipeline_mode = #tpu.pipeline_mode<synchronous>, transform_indices = @transform_42, window_bounds = array<i64: 8, 1>}, {pipeline_mode = #tpu.pipeline_mode<synchronous>, transform_indices = @transform_43, window_bounds = array<i64: 4, 4, 4>}, {pipeline_mode = #tpu.pipeline_mode<synchronous>, transform_indices = @transform_44, window_bounds = array<i64: 4, 1>}, {pipeline_mode = #tpu.pipeline_mode<synchronous>, transform_indices = @transform_45, window_bounds = array<i64: 1, 4>}, {pipeline_mode = #tpu.pipeline_mode<synchronous>, transform_indices = @transform_46, window_bounds = array<i64: 1, 1>}, {pipeline_mode = #tpu.pipeline_mode<synchronous>, transform_indices = @transform_47, window_bounds = array<i64: 3, 256>}, {pipeline_mode = #tpu.pipeline_mode<synchronous>, transform_indices = @transform_48, window_bounds = array<i64: 3, 64>}, {pipeline_mode = #tpu.pipeline_mode<synchronous>, transform_indices = @transform_49, window_bounds = array<i64: 3, 16>}, {pipeline_mode = #tpu.pipeline_mode<synchronous>, transform_indices = @transform_50, window_bounds = array<i64: 3, 4>}, {pipeline_mode = #tpu.pipeline_mode<synchronous>, transform_indices = @transform_51, window_bounds = array<i64: 3, 1>}, {pipeline_mode = #tpu.pipeline_mode<synchronous>, transform_indices = @transform_52, window_bounds = array<i64: 256, 64>}, {pipeline_mode = #tpu.pipeline_mode<synchronous>, transform_indices = @transform_53, window_bounds = array<i64: 64, 16>}, {pipeline_mode = #tpu.pipeline_mode<synchronous>, transform_indices = @transform_54, window_bounds = array<i64: 16, 4>}, {pipeline_mode = #tpu.pipeline_mode<synchronous>, transform_indices = @transform_55, window_bounds = array<i64: 4, 1>}, {pipeline_mode = #tpu.pipeline_mode<synchronous>, transform_indices = @transform_56, window_bounds = array<i64: 4, 64, 256>}, {pipeline_mode = #tpu.pipeline_mode<synchronous>, transform_indices = @transform_57, window_bounds = array<i64: 4, 16, 64>}, {pipeline_mode = #tpu.pipeline_mode<synchronous>, transform_indices = @transform_58, window_bounds = array<i64: 4, 4, 16>}, {pipeline_mode = #tpu.pipeline_mode<synchronous>, transform_indices = @transform_59, window_bounds = array<i64: 4, 1, 4>}, {transform_indices = @transform_60, window_bounds = array<i64: 1, 1, 256>}]} {
    %c0 = arith.constant 0 : index
    %c0_0 = arith.constant 0 : index
    %c0_1 = arith.constant 0 : index
    %0 = vector.load %arg1[%c0, %c0_0, %c0_1] : memref<1x4x256xf32, #tpu.memory_space<vmem>>, vector<1x4x256xf32>
    %1 = vector.shape_cast %0 : vector<1x4x256xf32> to vector<4x256xf32>
    %cst = arith.constant 0.000000e+00 : f32
    %2 = vector.broadcast %cst : f32 to vector<4x17xf32>
    %3 = tpu.concatenate %2, %1, %2 in 1 : vector<4x17xf32>, vector<4x256xf32>, vector<4x17xf32> -> vector<4x290xf32>
    %c0_2 = arith.constant 0 : index
    %c0_3 = arith.constant 0 : index
    %4 = vector.load %arg48[%c0_2, %c0_3] : memref<3x256xf32, #tpu.memory_space<vmem>>, vector<3x256xf32>
    %5 = vector.extract_strided_slice %3 {offsets = [0, 0], sizes = [4, 256], strides = [1, 1]} : vector<4x290xf32> to vector<4x256xf32>
    %6 = vector.extract_strided_slice %4 {offsets = [0, 0], sizes = [1, 256], strides = [1, 1]} : vector<3x256xf32> to vector<1x256xf32>
    %7 = vector.shape_cast %6 : vector<1x256xf32> to vector<256xf32>
    %8 = vector.shape_cast %7 : vector<256xf32> to vector<1x256xf32>
    %9 = vector.broadcast %8 : vector<1x256xf32> to vector<4x256xf32>
    %10 = arith.mulf %5, %9 : vector<4x256xf32>
    %11 = vector.extract_strided_slice %3 {offsets = [0, 1], sizes = [4, 256], strides = [1, 1]} : vector<4x290xf32> to vector<4x256xf32>
    %12 = vector.extract_strided_slice %3 {offsets = [0, 2], sizes = [4, 256], strides = [1, 1]} : vector<4x290xf32> to vector<4x256xf32>
    %13 = vector.extract_strided_slice %4 {offsets = [2, 0], sizes = [1, 256], strides = [1, 1]} : vector<3x256xf32> to vector<1x256xf32>
    %14 = vector.shape_cast %13 : vector<1x256xf32> to vector<256xf32>
    %15 = vector.shape_cast %14 : vector<256xf32> to vector<1x256xf32>
    %16 = vector.broadcast %15 : vector<1x256xf32> to vector<4x256xf32>
    %17 = arith.mulf %12, %16 : vector<4x256xf32>
    %18 = vector.extract_strided_slice %3 {offsets = [0, 16], sizes = [4, 256], strides = [1, 1]} : vector<4x290xf32> to vector<4x256xf32>
    %19 = vector.extract_strided_slice %4 {offsets = [0, 0], sizes = [1, 256], strides = [1, 1]} : vector<3x256xf32> to vector<1x256xf32>
    %20 = vector.shape_cast %19 : vector<1x256xf32> to vector<256xf32>
    %21 = vector.shape_cast %20 : vector<256xf32> to vector<1x256xf32>
    %22 = vector.broadcast %21 : vector<1x256xf32> to vector<4x256xf32>
    %23 = arith.mulf %18, %22 : vector<4x256xf32>
    %24 = vector.extract_strided_slice %3 {offsets = [0, 17], sizes = [4, 256], strides = [1, 1]} : vector<4x290xf32> to vector<4x256xf32>
    %25 = vector.extract_strided_slice %3 {offsets = [0, 18], sizes = [4, 256], strides = [1, 1]} : vector<4x290xf32> to vector<4x256xf32>
    %26 = vector.extract_strided_slice %4 {offsets = [2, 0], sizes = [1, 256], strides = [1, 1]} : vector<3x256xf32> to vector<1x256xf32>
    %27 = vector.shape_cast %26 : vector<1x256xf32> to vector<256xf32>
    %28 = vector.shape_cast %27 : vector<256xf32> to vector<1x256xf32>
    %29 = vector.broadcast %28 : vector<1x256xf32> to vector<4x256xf32>
    %30 = arith.mulf %25, %29 : vector<4x256xf32>
    %31 = vector.extract_strided_slice %3 {offsets = [0, 32], sizes = [4, 256], strides = [1, 1]} : vector<4x290xf32> to vector<4x256xf32>
    %32 = vector.extract_strided_slice %4 {offsets = [0, 0], sizes = [1, 256], strides = [1, 1]} : vector<3x256xf32> to vector<1x256xf32>
    %33 = vector.shape_cast %32 : vector<1x256xf32> to vector<256xf32>
    %34 = vector.shape_cast %33 : vector<256xf32> to vector<1x256xf32>
    %35 = vector.broadcast %34 : vector<1x256xf32> to vector<4x256xf32>
    %36 = arith.mulf %31, %35 : vector<4x256xf32>
    %37 = vector.extract_strided_slice %3 {offsets = [0, 33], sizes = [4, 256], strides = [1, 1]} : vector<4x290xf32> to vector<4x256xf32>
    %38 = vector.extract_strided_slice %3 {offsets = [0, 34], sizes = [4, 256], strides = [1, 1]} : vector<4x290xf32> to vector<4x256xf32>
    %39 = vector.extract_strided_slice %4 {offsets = [2, 0], sizes = [1, 256], strides = [1, 1]} : vector<3x256xf32> to vector<1x256xf32>
    %40 = vector.shape_cast %39 : vector<1x256xf32> to vector<256xf32>
    %41 = vector.shape_cast %40 : vector<256xf32> to vector<1x256xf32>
    %42 = vector.broadcast %41 : vector<1x256xf32> to vector<4x256xf32>
    %43 = arith.mulf %38, %42 : vector<4x256xf32>
    %44 = tpu.concatenate %10, %11, %17, %23, %24, %30, %36, %37, %43 in 0 : vector<4x256xf32>, vector<4x256xf32>, vector<4x256xf32>, vector<4x256xf32>, vector<4x256xf32>, vector<4x256xf32>, vector<4x256xf32>, vector<4x256xf32>, vector<4x256xf32> -> vector<36x256xf32>
    %45 = arith.truncf %44 : vector<36x256xf32> to vector<36x256xbf16>
    %c0_4 = arith.constant 0 : index
    %c0_5 = arith.constant 0 : index
    %46 = vector.load %arg2[%c0_4, %c0_5] : memref<4x36xbf16, #tpu.memory_space<vmem>>, vector<4x36xbf16>
    %cst_6 = arith.constant dense<0.000000e+00> : vector<4x256xf32>
    %47 = tpu.matmul %46, %45, %cst_6 {dimension_numbers = #tpu.dot_dimension_numbers<[1], [0], [0], [1], [0, 0, 1, 1], [], []>} : vector<4x36xbf16>, vector<36x256xbf16>, vector<4x256xf32> -> vector<4x256xf32>
    %c0_7 = arith.constant 0 : index
    %c0_8 = arith.constant 0 : index
    %48 = vector.load %arg3[%c0_7, %c0_8] : memref<4x1xf32, #tpu.memory_space<vmem>>, vector<4x1xf32>
    %49 = vector.broadcast %48 : vector<4x1xf32> to vector<4x256xf32>
    %50 = arith.addf %47, %49 : vector<4x256xf32>
    %cst_9 = arith.constant 0.000000e+00 : f32
    %51 = vector.broadcast %cst_9 : f32 to vector<4x256xf32>
    %52 = arith.cmpf ogt, %50, %51 : vector<4x256xf32>
    %cst_10 = arith.constant 0.000000e+00 : f32
    %53 = vector.broadcast %cst_10 : f32 to vector<4x256xf32>
    %54 = arith.minimumf %50, %53 : vector<4x256xf32>
    %55 = math.exp %54 : vector<4x256xf32>
    %cst_11 = arith.constant 1.000000e+00 : f32
    %56 = vector.broadcast %cst_11 : f32 to vector<4x256xf32>
    %57 = arith.subf %55, %56 : vector<4x256xf32>
    %58 = arith.select %52, %50, %57 : vector<4x256xi1>, vector<4x256xf32>
    %cst_12 = arith.constant 0.000000e+00 : f32
    %59 = vector.broadcast %cst_12 : f32 to vector<4x17xf32>
    %60 = tpu.concatenate %59, %58, %59 in 1 : vector<4x17xf32>, vector<4x256xf32>, vector<4x17xf32> -> vector<4x290xf32>
    %c0_13 = arith.constant 0 : index
    %c0_14 = arith.constant 0 : index
    %61 = vector.load %arg48[%c0_13, %c0_14] : memref<3x256xf32, #tpu.memory_space<vmem>>, vector<3x256xf32>
    %62 = vector.extract_strided_slice %60 {offsets = [0, 0], sizes = [4, 256], strides = [1, 1]} : vector<4x290xf32> to vector<4x256xf32>
    %63 = vector.extract_strided_slice %61 {offsets = [0, 0], sizes = [1, 256], strides = [1, 1]} : vector<3x256xf32> to vector<1x256xf32>
    %64 = vector.shape_cast %63 : vector<1x256xf32> to vector<256xf32>
    %65 = vector.shape_cast %64 : vector<256xf32> to vector<1x256xf32>
    %66 = vector.broadcast %65 : vector<1x256xf32> to vector<4x256xf32>
    %67 = arith.mulf %62, %66 : vector<4x256xf32>
    %68 = vector.extract_strided_slice %60 {offsets = [0, 1], sizes = [4, 256], strides = [1, 1]} : vector<4x290xf32> to vector<4x256xf32>
    %69 = vector.extract_strided_slice %60 {offsets = [0, 2], sizes = [4, 256], strides = [1, 1]} : vector<4x290xf32> to vector<4x256xf32>
    %70 = vector.extract_strided_slice %61 {offsets = [2, 0], sizes = [1, 256], strides = [1, 1]} : vector<3x256xf32> to vector<1x256xf32>
    %71 = vector.shape_cast %70 : vector<1x256xf32> to vector<256xf32>
    %72 = vector.shape_cast %71 : vector<256xf32> to vector<1x256xf32>
    %73 = vector.broadcast %72 : vector<1x256xf32> to vector<4x256xf32>
    %74 = arith.mulf %69, %73 : vector<4x256xf32>
    %75 = vector.extract_strided_slice %60 {offsets = [0, 16], sizes = [4, 256], strides = [1, 1]} : vector<4x290xf32> to vector<4x256xf32>
    %76 = vector.extract_strided_slice %61 {offsets = [0, 0], sizes = [1, 256], strides = [1, 1]} : vector<3x256xf32> to vector<1x256xf32>
    %77 = vector.shape_cast %76 : vector<1x256xf32> to vector<256xf32>
    %78 = vector.shape_cast %77 : vector<256xf32> to vector<1x256xf32>
    %79 = vector.broadcast %78 : vector<1x256xf32> to vector<4x256xf32>
    %80 = arith.mulf %75, %79 : vector<4x256xf32>
    %81 = vector.extract_strided_slice %60 {offsets = [0, 17], sizes = [4, 256], strides = [1, 1]} : vector<4x290xf32> to vector<4x256xf32>
    %82 = vector.extract_strided_slice %60 {offsets = [0, 18], sizes = [4, 256], strides = [1, 1]} : vector<4x290xf32> to vector<4x256xf32>
    %83 = vector.extract_strided_slice %61 {offsets = [2, 0], sizes = [1, 256], strides = [1, 1]} : vector<3x256xf32> to vector<1x256xf32>
    %84 = vector.shape_cast %83 : vector<1x256xf32> to vector<256xf32>
    %85 = vector.shape_cast %84 : vector<256xf32> to vector<1x256xf32>
    %86 = vector.broadcast %85 : vector<1x256xf32> to vector<4x256xf32>
    %87 = arith.mulf %82, %86 : vector<4x256xf32>
    %88 = vector.extract_strided_slice %60 {offsets = [0, 32], sizes = [4, 256], strides = [1, 1]} : vector<4x290xf32> to vector<4x256xf32>
    %89 = vector.extract_strided_slice %61 {offsets = [0, 0], sizes = [1, 256], strides = [1, 1]} : vector<3x256xf32> to vector<1x256xf32>
    %90 = vector.shape_cast %89 : vector<1x256xf32> to vector<256xf32>
    %91 = vector.shape_cast %90 : vector<256xf32> to vector<1x256xf32>
    %92 = vector.broadcast %91 : vector<1x256xf32> to vector<4x256xf32>
    %93 = arith.mulf %88, %92 : vector<4x256xf32>
    %94 = vector.extract_strided_slice %60 {offsets = [0, 33], sizes = [4, 256], strides = [1, 1]} : vector<4x290xf32> to vector<4x256xf32>
    %95 = vector.extract_strided_slice %60 {offsets = [0, 34], sizes = [4, 256], strides = [1, 1]} : vector<4x290xf32> to vector<4x256xf32>
    %96 = vector.extract_strided_slice %61 {offsets = [2, 0], sizes = [1, 256], strides = [1, 1]} : vector<3x256xf32> to vector<1x256xf32>
    %97 = vector.shape_cast %96 : vector<1x256xf32> to vector<256xf32>
    %98 = vector.shape_cast %97 : vector<256xf32> to vector<1x256xf32>
    %99 = vector.broadcast %98 : vector<1x256xf32> to vector<4x256xf32>
    %100 = arith.mulf %95, %99 : vector<4x256xf32>
    %101 = tpu.concatenate %67, %68, %74, %80, %81, %87, %93, %94, %100 in 0 : vector<4x256xf32>, vector<4x256xf32>, vector<4x256xf32>, vector<4x256xf32>, vector<4x256xf32>, vector<4x256xf32>, vector<4x256xf32>, vector<4x256xf32>, vector<4x256xf32> -> vector<36x256xf32>
    %102 = arith.truncf %101 : vector<36x256xf32> to vector<36x256xbf16>
    %c0_15 = arith.constant 0 : index
    %c0_16 = arith.constant 0 : index
    %103 = vector.load %arg4[%c0_15, %c0_16] : memref<4x36xbf16, #tpu.memory_space<vmem>>, vector<4x36xbf16>
    %cst_17 = arith.constant dense<0.000000e+00> : vector<4x256xf32>
    %104 = tpu.matmul %103, %102, %cst_17 {dimension_numbers = #tpu.dot_dimension_numbers<[1], [0], [0], [1], [0, 0, 1, 1], [], []>} : vector<4x36xbf16>, vector<36x256xbf16>, vector<4x256xf32> -> vector<4x256xf32>
    %c0_18 = arith.constant 0 : index
    %c0_19 = arith.constant 0 : index
    %105 = vector.load %arg5[%c0_18, %c0_19] : memref<4x1xf32, #tpu.memory_space<vmem>>, vector<4x1xf32>
    %106 = vector.broadcast %105 : vector<4x1xf32> to vector<4x256xf32>
    %107 = arith.addf %104, %106 : vector<4x256xf32>
    %cst_20 = arith.constant 0.000000e+00 : f32
    %108 = vector.broadcast %cst_20 : f32 to vector<4x256xf32>
    %109 = arith.cmpf ogt, %107, %108 : vector<4x256xf32>
    %cst_21 = arith.constant 0.000000e+00 : f32
    %110 = vector.broadcast %cst_21 : f32 to vector<4x256xf32>
    %111 = arith.minimumf %107, %110 : vector<4x256xf32>
    %112 = math.exp %111 : vector<4x256xf32>
    %cst_22 = arith.constant 1.000000e+00 : f32
    %113 = vector.broadcast %cst_22 : f32 to vector<4x256xf32>
    %114 = arith.subf %112, %113 : vector<4x256xf32>
    %115 = arith.select %109, %107, %114 : vector<4x256xi1>, vector<4x256xf32>
    %cst_23 = arith.constant 0.000000e+00 : f32
    %116 = vector.broadcast %cst_23 : f32 to vector<4x17xf32>
    %117 = tpu.concatenate %115, %116 in 1 : vector<4x256xf32>, vector<4x17xf32> -> vector<4x273xf32>
    %118 = vector.extract_strided_slice %117 {offsets = [0, 1], sizes = [4, 256], strides = [1, 1]} : vector<4x273xf32> to vector<4x256xf32>
    %119 = arith.maximumf %115, %118 : vector<4x256xf32>
    %120 = vector.extract_strided_slice %117 {offsets = [0, 16], sizes = [4, 256], strides = [1, 1]} : vector<4x273xf32> to vector<4x256xf32>
    %121 = arith.maximumf %119, %120 : vector<4x256xf32>
    %122 = vector.extract_strided_slice %117 {offsets = [0, 17], sizes = [4, 256], strides = [1, 1]} : vector<4x273xf32> to vector<4x256xf32>
    %123 = arith.maximumf %121, %122 : vector<4x256xf32>
    %c0_24 = arith.constant 0 : index
    %c0_25 = arith.constant 0 : index
    %124 = vector.load %arg53[%c0_24, %c0_25] : memref<256x64xf32, #tpu.memory_space<vmem>>, vector<256x64xf32>
    %cst_26 = arith.constant dense<0.000000e+00> : vector<4x64xf32>
    %125 = tpu.matmul %123, %124, %cst_26 {dimension_numbers = #tpu.dot_dimension_numbers<[1], [0], [0], [1], [0, 0, 1, 1], [], []>} : vector<4x256xf32>, vector<256x64xf32>, vector<4x64xf32> -> vector<4x64xf32>
    %cst_27 = arith.constant 0.000000e+00 : f32
    %126 = vector.broadcast %cst_27 : f32 to vector<4x9xf32>
    %127 = tpu.concatenate %126, %125, %126 in 1 : vector<4x9xf32>, vector<4x64xf32>, vector<4x9xf32> -> vector<4x82xf32>
    %c0_28 = arith.constant 0 : index
    %c0_29 = arith.constant 0 : index
    %128 = vector.load %arg49[%c0_28, %c0_29] : memref<3x64xf32, #tpu.memory_space<vmem>>, vector<3x64xf32>
    %129 = vector.extract_strided_slice %127 {offsets = [0, 0], sizes = [4, 64], strides = [1, 1]} : vector<4x82xf32> to vector<4x64xf32>
    %130 = vector.extract_strided_slice %128 {offsets = [0, 0], sizes = [1, 64], strides = [1, 1]} : vector<3x64xf32> to vector<1x64xf32>
    %131 = vector.shape_cast %130 : vector<1x64xf32> to vector<64xf32>
    %132 = vector.shape_cast %131 : vector<64xf32> to vector<1x64xf32>
    %133 = vector.broadcast %132 : vector<1x64xf32> to vector<4x64xf32>
    %134 = arith.mulf %129, %133 : vector<4x64xf32>
    %135 = vector.extract_strided_slice %127 {offsets = [0, 1], sizes = [4, 64], strides = [1, 1]} : vector<4x82xf32> to vector<4x64xf32>
    %136 = vector.extract_strided_slice %127 {offsets = [0, 2], sizes = [4, 64], strides = [1, 1]} : vector<4x82xf32> to vector<4x64xf32>
    %137 = vector.extract_strided_slice %128 {offsets = [2, 0], sizes = [1, 64], strides = [1, 1]} : vector<3x64xf32> to vector<1x64xf32>
    %138 = vector.shape_cast %137 : vector<1x64xf32> to vector<64xf32>
    %139 = vector.shape_cast %138 : vector<64xf32> to vector<1x64xf32>
    %140 = vector.broadcast %139 : vector<1x64xf32> to vector<4x64xf32>
    %141 = arith.mulf %136, %140 : vector<4x64xf32>
    %142 = vector.extract_strided_slice %127 {offsets = [0, 8], sizes = [4, 64], strides = [1, 1]} : vector<4x82xf32> to vector<4x64xf32>
    %143 = vector.extract_strided_slice %128 {offsets = [0, 0], sizes = [1, 64], strides = [1, 1]} : vector<3x64xf32> to vector<1x64xf32>
    %144 = vector.shape_cast %143 : vector<1x64xf32> to vector<64xf32>
    %145 = vector.shape_cast %144 : vector<64xf32> to vector<1x64xf32>
    %146 = vector.broadcast %145 : vector<1x64xf32> to vector<4x64xf32>
    %147 = arith.mulf %142, %146 : vector<4x64xf32>
    %148 = vector.extract_strided_slice %127 {offsets = [0, 9], sizes = [4, 64], strides = [1, 1]} : vector<4x82xf32> to vector<4x64xf32>
    %149 = vector.extract_strided_slice %127 {offsets = [0, 10], sizes = [4, 64], strides = [1, 1]} : vector<4x82xf32> to vector<4x64xf32>
    %150 = vector.extract_strided_slice %128 {offsets = [2, 0], sizes = [1, 64], strides = [1, 1]} : vector<3x64xf32> to vector<1x64xf32>
    %151 = vector.shape_cast %150 : vector<1x64xf32> to vector<64xf32>
    %152 = vector.shape_cast %151 : vector<64xf32> to vector<1x64xf32>
    %153 = vector.broadcast %152 : vector<1x64xf32> to vector<4x64xf32>
    %154 = arith.mulf %149, %153 : vector<4x64xf32>
    %155 = vector.extract_strided_slice %127 {offsets = [0, 16], sizes = [4, 64], strides = [1, 1]} : vector<4x82xf32> to vector<4x64xf32>
    %156 = vector.extract_strided_slice %128 {offsets = [0, 0], sizes = [1, 64], strides = [1, 1]} : vector<3x64xf32> to vector<1x64xf32>
    %157 = vector.shape_cast %156 : vector<1x64xf32> to vector<64xf32>
    %158 = vector.shape_cast %157 : vector<64xf32> to vector<1x64xf32>
    %159 = vector.broadcast %158 : vector<1x64xf32> to vector<4x64xf32>
    %160 = arith.mulf %155, %159 : vector<4x64xf32>
    %161 = vector.extract_strided_slice %127 {offsets = [0, 17], sizes = [4, 64], strides = [1, 1]} : vector<4x82xf32> to vector<4x64xf32>
    %162 = vector.extract_strided_slice %127 {offsets = [0, 18], sizes = [4, 64], strides = [1, 1]} : vector<4x82xf32> to vector<4x64xf32>
    %163 = vector.extract_strided_slice %128 {offsets = [2, 0], sizes = [1, 64], strides = [1, 1]} : vector<3x64xf32> to vector<1x64xf32>
    %164 = vector.shape_cast %163 : vector<1x64xf32> to vector<64xf32>
    %165 = vector.shape_cast %164 : vector<64xf32> to vector<1x64xf32>
    %166 = vector.broadcast %165 : vector<1x64xf32> to vector<4x64xf32>
    %167 = arith.mulf %162, %166 : vector<4x64xf32>
    %168 = tpu.concatenate %134, %135, %141, %147, %148, %154, %160, %161, %167 in 0 : vector<4x64xf32>, vector<4x64xf32>, vector<4x64xf32>, vector<4x64xf32>, vector<4x64xf32>, vector<4x64xf32>, vector<4x64xf32>, vector<4x64xf32>, vector<4x64xf32> -> vector<36x64xf32>
    %169 = arith.truncf %168 : vector<36x64xf32> to vector<36x64xbf16>
    %c0_30 = arith.constant 0 : index
    %c0_31 = arith.constant 0 : index
    %170 = vector.load %arg6[%c0_30, %c0_31] : memref<8x36xbf16, #tpu.memory_space<vmem>>, vector<8x36xbf16>
    %cst_32 = arith.constant dense<0.000000e+00> : vector<8x64xf32>
    %171 = tpu.matmul %170, %169, %cst_32 {dimension_numbers = #tpu.dot_dimension_numbers<[1], [0], [0], [1], [0, 0, 1, 1], [], []>} : vector<8x36xbf16>, vector<36x64xbf16>, vector<8x64xf32> -> vector<8x64xf32>
    %c0_33 = arith.constant 0 : index
    %c0_34 = arith.constant 0 : index
    %172 = vector.load %arg7[%c0_33, %c0_34] : memref<8x1xf32, #tpu.memory_space<vmem>>, vector<8x1xf32>
    %173 = vector.broadcast %172 : vector<8x1xf32> to vector<8x64xf32>
    %174 = arith.addf %171, %173 : vector<8x64xf32>
    %cst_35 = arith.constant 0.000000e+00 : f32
    %175 = vector.broadcast %cst_35 : f32 to vector<8x64xf32>
    %176 = arith.cmpf ogt, %174, %175 : vector<8x64xf32>
    %cst_36 = arith.constant 0.000000e+00 : f32
    %177 = vector.broadcast %cst_36 : f32 to vector<8x64xf32>
    %178 = arith.minimumf %174, %177 : vector<8x64xf32>
    %179 = math.exp %178 : vector<8x64xf32>
    %cst_37 = arith.constant 1.000000e+00 : f32
    %180 = vector.broadcast %cst_37 : f32 to vector<8x64xf32>
    %181 = arith.subf %179, %180 : vector<8x64xf32>
    %182 = arith.select %176, %174, %181 : vector<8x64xi1>, vector<8x64xf32>
    %cst_38 = arith.constant 0.000000e+00 : f32
    %183 = vector.broadcast %cst_38 : f32 to vector<8x9xf32>
    %184 = tpu.concatenate %183, %182, %183 in 1 : vector<8x9xf32>, vector<8x64xf32>, vector<8x9xf32> -> vector<8x82xf32>
    %c0_39 = arith.constant 0 : index
    %c0_40 = arith.constant 0 : index
    %185 = vector.load %arg49[%c0_39, %c0_40] : memref<3x64xf32, #tpu.memory_space<vmem>>, vector<3x64xf32>
    %186 = vector.extract_strided_slice %184 {offsets = [0, 0], sizes = [8, 64], strides = [1, 1]} : vector<8x82xf32> to vector<8x64xf32>
    %187 = vector.extract_strided_slice %185 {offsets = [0, 0], sizes = [1, 64], strides = [1, 1]} : vector<3x64xf32> to vector<1x64xf32>
    %188 = vector.shape_cast %187 : vector<1x64xf32> to vector<64xf32>
    %189 = vector.shape_cast %188 : vector<64xf32> to vector<1x64xf32>
    %190 = vector.broadcast %189 : vector<1x64xf32> to vector<8x64xf32>
    %191 = arith.mulf %186, %190 : vector<8x64xf32>
    %192 = vector.extract_strided_slice %184 {offsets = [0, 1], sizes = [8, 64], strides = [1, 1]} : vector<8x82xf32> to vector<8x64xf32>
    %193 = vector.extract_strided_slice %184 {offsets = [0, 2], sizes = [8, 64], strides = [1, 1]} : vector<8x82xf32> to vector<8x64xf32>
    %194 = vector.extract_strided_slice %185 {offsets = [2, 0], sizes = [1, 64], strides = [1, 1]} : vector<3x64xf32> to vector<1x64xf32>
    %195 = vector.shape_cast %194 : vector<1x64xf32> to vector<64xf32>
    %196 = vector.shape_cast %195 : vector<64xf32> to vector<1x64xf32>
    %197 = vector.broadcast %196 : vector<1x64xf32> to vector<8x64xf32>
    %198 = arith.mulf %193, %197 : vector<8x64xf32>
    %199 = vector.extract_strided_slice %184 {offsets = [0, 8], sizes = [8, 64], strides = [1, 1]} : vector<8x82xf32> to vector<8x64xf32>
    %200 = vector.extract_strided_slice %185 {offsets = [0, 0], sizes = [1, 64], strides = [1, 1]} : vector<3x64xf32> to vector<1x64xf32>
    %201 = vector.shape_cast %200 : vector<1x64xf32> to vector<64xf32>
    %202 = vector.shape_cast %201 : vector<64xf32> to vector<1x64xf32>
    %203 = vector.broadcast %202 : vector<1x64xf32> to vector<8x64xf32>
    %204 = arith.mulf %199, %203 : vector<8x64xf32>
    %205 = vector.extract_strided_slice %184 {offsets = [0, 9], sizes = [8, 64], strides = [1, 1]} : vector<8x82xf32> to vector<8x64xf32>
    %206 = vector.extract_strided_slice %184 {offsets = [0, 10], sizes = [8, 64], strides = [1, 1]} : vector<8x82xf32> to vector<8x64xf32>
    %207 = vector.extract_strided_slice %185 {offsets = [2, 0], sizes = [1, 64], strides = [1, 1]} : vector<3x64xf32> to vector<1x64xf32>
    %208 = vector.shape_cast %207 : vector<1x64xf32> to vector<64xf32>
    %209 = vector.shape_cast %208 : vector<64xf32> to vector<1x64xf32>
    %210 = vector.broadcast %209 : vector<1x64xf32> to vector<8x64xf32>
    %211 = arith.mulf %206, %210 : vector<8x64xf32>
    %212 = vector.extract_strided_slice %184 {offsets = [0, 16], sizes = [8, 64], strides = [1, 1]} : vector<8x82xf32> to vector<8x64xf32>
    %213 = vector.extract_strided_slice %185 {offsets = [0, 0], sizes = [1, 64], strides = [1, 1]} : vector<3x64xf32> to vector<1x64xf32>
    %214 = vector.shape_cast %213 : vector<1x64xf32> to vector<64xf32>
    %215 = vector.shape_cast %214 : vector<64xf32> to vector<1x64xf32>
    %216 = vector.broadcast %215 : vector<1x64xf32> to vector<8x64xf32>
    %217 = arith.mulf %212, %216 : vector<8x64xf32>
    %218 = vector.extract_strided_slice %184 {offsets = [0, 17], sizes = [8, 64], strides = [1, 1]} : vector<8x82xf32> to vector<8x64xf32>
    %219 = vector.extract_strided_slice %184 {offsets = [0, 18], sizes = [8, 64], strides = [1, 1]} : vector<8x82xf32> to vector<8x64xf32>
    %220 = vector.extract_strided_slice %185 {offsets = [2, 0], sizes = [1, 64], strides = [1, 1]} : vector<3x64xf32> to vector<1x64xf32>
    %221 = vector.shape_cast %220 : vector<1x64xf32> to vector<64xf32>
    %222 = vector.shape_cast %221 : vector<64xf32> to vector<1x64xf32>
    %223 = vector.broadcast %222 : vector<1x64xf32> to vector<8x64xf32>
    %224 = arith.mulf %219, %223 : vector<8x64xf32>
    %225 = tpu.concatenate %191, %192, %198, %204, %205, %211, %217, %218, %224 in 0 : vector<8x64xf32>, vector<8x64xf32>, vector<8x64xf32>, vector<8x64xf32>, vector<8x64xf32>, vector<8x64xf32>, vector<8x64xf32>, vector<8x64xf32>, vector<8x64xf32> -> vector<72x64xf32>
    %226 = arith.truncf %225 : vector<72x64xf32> to vector<72x64xbf16>
    %c0_41 = arith.constant 0 : index
    %c0_42 = arith.constant 0 : index
    %227 = vector.load %arg8[%c0_41, %c0_42] : memref<8x72xbf16, #tpu.memory_space<vmem>>, vector<8x72xbf16>
    %cst_43 = arith.constant dense<0.000000e+00> : vector<8x64xf32>
    %228 = tpu.matmul %227, %226, %cst_43 {dimension_numbers = #tpu.dot_dimension_numbers<[1], [0], [0], [1], [0, 0, 1, 1], [], []>} : vector<8x72xbf16>, vector<72x64xbf16>, vector<8x64xf32> -> vector<8x64xf32>
    %c0_44 = arith.constant 0 : index
    %c0_45 = arith.constant 0 : index
    %229 = vector.load %arg9[%c0_44, %c0_45] : memref<8x1xf32, #tpu.memory_space<vmem>>, vector<8x1xf32>
    %230 = vector.broadcast %229 : vector<8x1xf32> to vector<8x64xf32>
    %231 = arith.addf %228, %230 : vector<8x64xf32>
    %cst_46 = arith.constant 0.000000e+00 : f32
    %232 = vector.broadcast %cst_46 : f32 to vector<8x64xf32>
    %233 = arith.cmpf ogt, %231, %232 : vector<8x64xf32>
    %cst_47 = arith.constant 0.000000e+00 : f32
    %234 = vector.broadcast %cst_47 : f32 to vector<8x64xf32>
    %235 = arith.minimumf %231, %234 : vector<8x64xf32>
    %236 = math.exp %235 : vector<8x64xf32>
    %cst_48 = arith.constant 1.000000e+00 : f32
    %237 = vector.broadcast %cst_48 : f32 to vector<8x64xf32>
    %238 = arith.subf %236, %237 : vector<8x64xf32>
    %239 = arith.select %233, %231, %238 : vector<8x64xi1>, vector<8x64xf32>
    %cst_49 = arith.constant 0.000000e+00 : f32
    %240 = vector.broadcast %cst_49 : f32 to vector<8x9xf32>
    %241 = tpu.concatenate %239, %240 in 1 : vector<8x64xf32>, vector<8x9xf32> -> vector<8x73xf32>
    %242 = vector.extract_strided_slice %241 {offsets = [0, 1], sizes = [8, 64], strides = [1, 1]} : vector<8x73xf32> to vector<8x64xf32>
    %243 = arith.maximumf %239, %242 : vector<8x64xf32>
    %244 = vector.extract_strided_slice %241 {offsets = [0, 8], sizes = [8, 64], strides = [1, 1]} : vector<8x73xf32> to vector<8x64xf32>
    %245 = arith.maximumf %243, %244 : vector<8x64xf32>
    %246 = vector.extract_strided_slice %241 {offsets = [0, 9], sizes = [8, 64], strides = [1, 1]} : vector<8x73xf32> to vector<8x64xf32>
    %247 = arith.maximumf %245, %246 : vector<8x64xf32>
    %c0_50 = arith.constant 0 : index
    %c0_51 = arith.constant 0 : index
    %248 = vector.load %arg54[%c0_50, %c0_51] : memref<64x16xf32, #tpu.memory_space<vmem>>, vector<64x16xf32>
    %cst_52 = arith.constant dense<0.000000e+00> : vector<8x16xf32>
    %249 = tpu.matmul %247, %248, %cst_52 {dimension_numbers = #tpu.dot_dimension_numbers<[1], [0], [0], [1], [0, 0, 1, 1], [], []>} : vector<8x64xf32>, vector<64x16xf32>, vector<8x16xf32> -> vector<8x16xf32>
    %cst_53 = arith.constant 0.000000e+00 : f32
    %250 = vector.broadcast %cst_53 : f32 to vector<8x5xf32>
    %251 = tpu.concatenate %250, %249, %250 in 1 : vector<8x5xf32>, vector<8x16xf32>, vector<8x5xf32> -> vector<8x26xf32>
    %c0_54 = arith.constant 0 : index
    %c0_55 = arith.constant 0 : index
    %252 = vector.load %arg50[%c0_54, %c0_55] : memref<3x16xf32, #tpu.memory_space<vmem>>, vector<3x16xf32>
    %253 = vector.extract_strided_slice %251 {offsets = [0, 0], sizes = [8, 16], strides = [1, 1]} : vector<8x26xf32> to vector<8x16xf32>
    %254 = vector.extract_strided_slice %252 {offsets = [0, 0], sizes = [1, 16], strides = [1, 1]} : vector<3x16xf32> to vector<1x16xf32>
    %255 = vector.shape_cast %254 : vector<1x16xf32> to vector<16xf32>
    %256 = vector.shape_cast %255 : vector<16xf32> to vector<1x16xf32>
    %257 = vector.broadcast %256 : vector<1x16xf32> to vector<8x16xf32>
    %258 = arith.mulf %253, %257 : vector<8x16xf32>
    %259 = vector.extract_strided_slice %251 {offsets = [0, 1], sizes = [8, 16], strides = [1, 1]} : vector<8x26xf32> to vector<8x16xf32>
    %260 = vector.extract_strided_slice %251 {offsets = [0, 2], sizes = [8, 16], strides = [1, 1]} : vector<8x26xf32> to vector<8x16xf32>
    %261 = vector.extract_strided_slice %252 {offsets = [2, 0], sizes = [1, 16], strides = [1, 1]} : vector<3x16xf32> to vector<1x16xf32>
    %262 = vector.shape_cast %261 : vector<1x16xf32> to vector<16xf32>
    %263 = vector.shape_cast %262 : vector<16xf32> to vector<1x16xf32>
    %264 = vector.broadcast %263 : vector<1x16xf32> to vector<8x16xf32>
    %265 = arith.mulf %260, %264 : vector<8x16xf32>
    %266 = vector.extract_strided_slice %251 {offsets = [0, 4], sizes = [8, 16], strides = [1, 1]} : vector<8x26xf32> to vector<8x16xf32>
    %267 = vector.extract_strided_slice %252 {offsets = [0, 0], sizes = [1, 16], strides = [1, 1]} : vector<3x16xf32> to vector<1x16xf32>
    %268 = vector.shape_cast %267 : vector<1x16xf32> to vector<16xf32>
    %269 = vector.shape_cast %268 : vector<16xf32> to vector<1x16xf32>
    %270 = vector.broadcast %269 : vector<1x16xf32> to vector<8x16xf32>
    %271 = arith.mulf %266, %270 : vector<8x16xf32>
    %272 = vector.extract_strided_slice %251 {offsets = [0, 5], sizes = [8, 16], strides = [1, 1]} : vector<8x26xf32> to vector<8x16xf32>
    %273 = vector.extract_strided_slice %251 {offsets = [0, 6], sizes = [8, 16], strides = [1, 1]} : vector<8x26xf32> to vector<8x16xf32>
    %274 = vector.extract_strided_slice %252 {offsets = [2, 0], sizes = [1, 16], strides = [1, 1]} : vector<3x16xf32> to vector<1x16xf32>
    %275 = vector.shape_cast %274 : vector<1x16xf32> to vector<16xf32>
    %276 = vector.shape_cast %275 : vector<16xf32> to vector<1x16xf32>
    %277 = vector.broadcast %276 : vector<1x16xf32> to vector<8x16xf32>
    %278 = arith.mulf %273, %277 : vector<8x16xf32>
    %279 = vector.extract_strided_slice %251 {offsets = [0, 8], sizes = [8, 16], strides = [1, 1]} : vector<8x26xf32> to vector<8x16xf32>
    %280 = vector.extract_strided_slice %252 {offsets = [0, 0], sizes = [1, 16], strides = [1, 1]} : vector<3x16xf32> to vector<1x16xf32>
    %281 = vector.shape_cast %280 : vector<1x16xf32> to vector<16xf32>
    %282 = vector.shape_cast %281 : vector<16xf32> to vector<1x16xf32>
    %283 = vector.broadcast %282 : vector<1x16xf32> to vector<8x16xf32>
    %284 = arith.mulf %279, %283 : vector<8x16xf32>
    %285 = vector.extract_strided_slice %251 {offsets = [0, 9], sizes = [8, 16], strides = [1, 1]} : vector<8x26xf32> to vector<8x16xf32>
    %286 = vector.extract_strided_slice %251 {offsets = [0, 10], sizes = [8, 16], strides = [1, 1]} : vector<8x26xf32> to vector<8x16xf32>
    %287 = vector.extract_strided_slice %252 {offsets = [2, 0], sizes = [1, 16], strides = [1, 1]} : vector<3x16xf32> to vector<1x16xf32>
    %288 = vector.shape_cast %287 : vector<1x16xf32> to vector<16xf32>
    %289 = vector.shape_cast %288 : vector<16xf32> to vector<1x16xf32>
    %290 = vector.broadcast %289 : vector<1x16xf32> to vector<8x16xf32>
    %291 = arith.mulf %286, %290 : vector<8x16xf32>
    %292 = tpu.concatenate %258, %259, %265, %271, %272, %278, %284, %285, %291 in 0 : vector<8x16xf32>, vector<8x16xf32>, vector<8x16xf32>, vector<8x16xf32>, vector<8x16xf32>, vector<8x16xf32>, vector<8x16xf32>, vector<8x16xf32>, vector<8x16xf32> -> vector<72x16xf32>
    %293 = arith.truncf %292 : vector<72x16xf32> to vector<72x16xbf16>
    %c0_56 = arith.constant 0 : index
    %c0_57 = arith.constant 0 : index
    %294 = vector.load %arg10[%c0_56, %c0_57] : memref<16x72xbf16, #tpu.memory_space<vmem>>, vector<16x72xbf16>
    %cst_58 = arith.constant dense<0.000000e+00> : vector<16x16xf32>
    %295 = tpu.matmul %294, %293, %cst_58 {dimension_numbers = #tpu.dot_dimension_numbers<[1], [0], [0], [1], [0, 0, 1, 1], [], []>} : vector<16x72xbf16>, vector<72x16xbf16>, vector<16x16xf32> -> vector<16x16xf32>
    %c0_59 = arith.constant 0 : index
    %c0_60 = arith.constant 0 : index
    %296 = vector.load %arg11[%c0_59, %c0_60] : memref<16x1xf32, #tpu.memory_space<vmem>>, vector<16x1xf32>
    %297 = vector.broadcast %296 : vector<16x1xf32> to vector<16x16xf32>
    %298 = arith.addf %295, %297 : vector<16x16xf32>
    %cst_61 = arith.constant 0.000000e+00 : f32
    %299 = vector.broadcast %cst_61 : f32 to vector<16x16xf32>
    %300 = arith.cmpf ogt, %298, %299 : vector<16x16xf32>
    %cst_62 = arith.constant 0.000000e+00 : f32
    %301 = vector.broadcast %cst_62 : f32 to vector<16x16xf32>
    %302 = arith.minimumf %298, %301 : vector<16x16xf32>
    %303 = math.exp %302 : vector<16x16xf32>
    %cst_63 = arith.constant 1.000000e+00 : f32
    %304 = vector.broadcast %cst_63 : f32 to vector<16x16xf32>
    %305 = arith.subf %303, %304 : vector<16x16xf32>
    %306 = arith.select %300, %298, %305 : vector<16x16xi1>, vector<16x16xf32>
    %cst_64 = arith.constant 0.000000e+00 : f32
    %307 = vector.broadcast %cst_64 : f32 to vector<16x5xf32>
    %308 = tpu.concatenate %307, %306, %307 in 1 : vector<16x5xf32>, vector<16x16xf32>, vector<16x5xf32> -> vector<16x26xf32>
    %c0_65 = arith.constant 0 : index
    %c0_66 = arith.constant 0 : index
    %309 = vector.load %arg50[%c0_65, %c0_66] : memref<3x16xf32, #tpu.memory_space<vmem>>, vector<3x16xf32>
    %310 = vector.extract_strided_slice %308 {offsets = [0, 0], sizes = [16, 16], strides = [1, 1]} : vector<16x26xf32> to vector<16x16xf32>
    %311 = vector.extract_strided_slice %309 {offsets = [0, 0], sizes = [1, 16], strides = [1, 1]} : vector<3x16xf32> to vector<1x16xf32>
    %312 = vector.shape_cast %311 : vector<1x16xf32> to vector<16xf32>
    %313 = vector.shape_cast %312 : vector<16xf32> to vector<1x16xf32>
    %314 = vector.broadcast %313 : vector<1x16xf32> to vector<16x16xf32>
    %315 = arith.mulf %310, %314 : vector<16x16xf32>
    %316 = vector.extract_strided_slice %308 {offsets = [0, 1], sizes = [16, 16], strides = [1, 1]} : vector<16x26xf32> to vector<16x16xf32>
    %317 = vector.extract_strided_slice %308 {offsets = [0, 2], sizes = [16, 16], strides = [1, 1]} : vector<16x26xf32> to vector<16x16xf32>
    %318 = vector.extract_strided_slice %309 {offsets = [2, 0], sizes = [1, 16], strides = [1, 1]} : vector<3x16xf32> to vector<1x16xf32>
    %319 = vector.shape_cast %318 : vector<1x16xf32> to vector<16xf32>
    %320 = vector.shape_cast %319 : vector<16xf32> to vector<1x16xf32>
    %321 = vector.broadcast %320 : vector<1x16xf32> to vector<16x16xf32>
    %322 = arith.mulf %317, %321 : vector<16x16xf32>
    %323 = vector.extract_strided_slice %308 {offsets = [0, 4], sizes = [16, 16], strides = [1, 1]} : vector<16x26xf32> to vector<16x16xf32>
    %324 = vector.extract_strided_slice %309 {offsets = [0, 0], sizes = [1, 16], strides = [1, 1]} : vector<3x16xf32> to vector<1x16xf32>
    %325 = vector.shape_cast %324 : vector<1x16xf32> to vector<16xf32>
    %326 = vector.shape_cast %325 : vector<16xf32> to vector<1x16xf32>
    %327 = vector.broadcast %326 : vector<1x16xf32> to vector<16x16xf32>
    %328 = arith.mulf %323, %327 : vector<16x16xf32>
    %329 = vector.extract_strided_slice %308 {offsets = [0, 5], sizes = [16, 16], strides = [1, 1]} : vector<16x26xf32> to vector<16x16xf32>
    %330 = vector.extract_strided_slice %308 {offsets = [0, 6], sizes = [16, 16], strides = [1, 1]} : vector<16x26xf32> to vector<16x16xf32>
    %331 = vector.extract_strided_slice %309 {offsets = [2, 0], sizes = [1, 16], strides = [1, 1]} : vector<3x16xf32> to vector<1x16xf32>
    %332 = vector.shape_cast %331 : vector<1x16xf32> to vector<16xf32>
    %333 = vector.shape_cast %332 : vector<16xf32> to vector<1x16xf32>
    %334 = vector.broadcast %333 : vector<1x16xf32> to vector<16x16xf32>
    %335 = arith.mulf %330, %334 : vector<16x16xf32>
    %336 = vector.extract_strided_slice %308 {offsets = [0, 8], sizes = [16, 16], strides = [1, 1]} : vector<16x26xf32> to vector<16x16xf32>
    %337 = vector.extract_strided_slice %309 {offsets = [0, 0], sizes = [1, 16], strides = [1, 1]} : vector<3x16xf32> to vector<1x16xf32>
    %338 = vector.shape_cast %337 : vector<1x16xf32> to vector<16xf32>
    %339 = vector.shape_cast %338 : vector<16xf32> to vector<1x16xf32>
    %340 = vector.broadcast %339 : vector<1x16xf32> to vector<16x16xf32>
    %341 = arith.mulf %336, %340 : vector<16x16xf32>
    %342 = vector.extract_strided_slice %308 {offsets = [0, 9], sizes = [16, 16], strides = [1, 1]} : vector<16x26xf32> to vector<16x16xf32>
    %343 = vector.extract_strided_slice %308 {offsets = [0, 10], sizes = [16, 16], strides = [1, 1]} : vector<16x26xf32> to vector<16x16xf32>
    %344 = vector.extract_strided_slice %309 {offsets = [2, 0], sizes = [1, 16], strides = [1, 1]} : vector<3x16xf32> to vector<1x16xf32>
    %345 = vector.shape_cast %344 : vector<1x16xf32> to vector<16xf32>
    %346 = vector.shape_cast %345 : vector<16xf32> to vector<1x16xf32>
    %347 = vector.broadcast %346 : vector<1x16xf32> to vector<16x16xf32>
    %348 = arith.mulf %343, %347 : vector<16x16xf32>
    %349 = tpu.concatenate %315, %316, %322, %328, %329, %335, %341, %342, %348 in 0 : vector<16x16xf32>, vector<16x16xf32>, vector<16x16xf32>, vector<16x16xf32>, vector<16x16xf32>, vector<16x16xf32>, vector<16x16xf32>, vector<16x16xf32>, vector<16x16xf32> -> vector<144x16xf32>
    %350 = arith.truncf %349 : vector<144x16xf32> to vector<144x16xbf16>
    %c0_67 = arith.constant 0 : index
    %c0_68 = arith.constant 0 : index
    %351 = vector.load %arg12[%c0_67, %c0_68] : memref<16x144xbf16, #tpu.memory_space<vmem>>, vector<16x144xbf16>
    %cst_69 = arith.constant dense<0.000000e+00> : vector<16x16xf32>
    %352 = tpu.matmul %351, %350, %cst_69 {dimension_numbers = #tpu.dot_dimension_numbers<[1], [0], [0], [1], [0, 0, 1, 1], [], []>} : vector<16x144xbf16>, vector<144x16xbf16>, vector<16x16xf32> -> vector<16x16xf32>
    %c0_70 = arith.constant 0 : index
    %c0_71 = arith.constant 0 : index
    %353 = vector.load %arg13[%c0_70, %c0_71] : memref<16x1xf32, #tpu.memory_space<vmem>>, vector<16x1xf32>
    %354 = vector.broadcast %353 : vector<16x1xf32> to vector<16x16xf32>
    %355 = arith.addf %352, %354 : vector<16x16xf32>
    %cst_72 = arith.constant 0.000000e+00 : f32
    %356 = vector.broadcast %cst_72 : f32 to vector<16x16xf32>
    %357 = arith.cmpf ogt, %355, %356 : vector<16x16xf32>
    %cst_73 = arith.constant 0.000000e+00 : f32
    %358 = vector.broadcast %cst_73 : f32 to vector<16x16xf32>
    %359 = arith.minimumf %355, %358 : vector<16x16xf32>
    %360 = math.exp %359 : vector<16x16xf32>
    %cst_74 = arith.constant 1.000000e+00 : f32
    %361 = vector.broadcast %cst_74 : f32 to vector<16x16xf32>
    %362 = arith.subf %360, %361 : vector<16x16xf32>
    %363 = arith.select %357, %355, %362 : vector<16x16xi1>, vector<16x16xf32>
    %cst_75 = arith.constant 0.000000e+00 : f32
    %364 = vector.broadcast %cst_75 : f32 to vector<16x5xf32>
    %365 = tpu.concatenate %363, %364 in 1 : vector<16x16xf32>, vector<16x5xf32> -> vector<16x21xf32>
    %366 = vector.extract_strided_slice %365 {offsets = [0, 1], sizes = [16, 16], strides = [1, 1]} : vector<16x21xf32> to vector<16x16xf32>
    %367 = arith.maximumf %363, %366 : vector<16x16xf32>
    %368 = vector.extract_strided_slice %365 {offsets = [0, 4], sizes = [16, 16], strides = [1, 1]} : vector<16x21xf32> to vector<16x16xf32>
    %369 = arith.maximumf %367, %368 : vector<16x16xf32>
    %370 = vector.extract_strided_slice %365 {offsets = [0, 5], sizes = [16, 16], strides = [1, 1]} : vector<16x21xf32> to vector<16x16xf32>
    %371 = arith.maximumf %369, %370 : vector<16x16xf32>
    %c0_76 = arith.constant 0 : index
    %c0_77 = arith.constant 0 : index
    %372 = vector.load %arg55[%c0_76, %c0_77] : memref<16x4xf32, #tpu.memory_space<vmem>>, vector<16x4xf32>
    %cst_78 = arith.constant dense<0.000000e+00> : vector<16x4xf32>
    %373 = tpu.matmul %371, %372, %cst_78 {dimension_numbers = #tpu.dot_dimension_numbers<[1], [0], [0], [1], [0, 0, 1, 1], [], []>} : vector<16x16xf32>, vector<16x4xf32>, vector<16x4xf32> -> vector<16x4xf32>
    %cst_79 = arith.constant 0.000000e+00 : f32
    %374 = vector.broadcast %cst_79 : f32 to vector<16x3xf32>
    %375 = tpu.concatenate %374, %373, %374 in 1 : vector<16x3xf32>, vector<16x4xf32>, vector<16x3xf32> -> vector<16x10xf32>
    %c0_80 = arith.constant 0 : index
    %c0_81 = arith.constant 0 : index
    %376 = vector.load %arg51[%c0_80, %c0_81] : memref<3x4xf32, #tpu.memory_space<vmem>>, vector<3x4xf32>
    %377 = vector.extract_strided_slice %375 {offsets = [0, 0], sizes = [16, 4], strides = [1, 1]} : vector<16x10xf32> to vector<16x4xf32>
    %378 = vector.extract_strided_slice %376 {offsets = [0, 0], sizes = [1, 4], strides = [1, 1]} : vector<3x4xf32> to vector<1x4xf32>
    %379 = vector.shape_cast %378 : vector<1x4xf32> to vector<4xf32>
    %380 = vector.shape_cast %379 : vector<4xf32> to vector<1x4xf32>
    %381 = vector.broadcast %380 : vector<1x4xf32> to vector<16x4xf32>
    %382 = arith.mulf %377, %381 : vector<16x4xf32>
    %383 = vector.extract_strided_slice %375 {offsets = [0, 1], sizes = [16, 4], strides = [1, 1]} : vector<16x10xf32> to vector<16x4xf32>
    %384 = vector.extract_strided_slice %375 {offsets = [0, 2], sizes = [16, 4], strides = [1, 1]} : vector<16x10xf32> to vector<16x4xf32>
    %385 = vector.extract_strided_slice %376 {offsets = [2, 0], sizes = [1, 4], strides = [1, 1]} : vector<3x4xf32> to vector<1x4xf32>
    %386 = vector.shape_cast %385 : vector<1x4xf32> to vector<4xf32>
    %387 = vector.shape_cast %386 : vector<4xf32> to vector<1x4xf32>
    %388 = vector.broadcast %387 : vector<1x4xf32> to vector<16x4xf32>
    %389 = arith.mulf %384, %388 : vector<16x4xf32>
    %390 = vector.extract_strided_slice %375 {offsets = [0, 2], sizes = [16, 4], strides = [1, 1]} : vector<16x10xf32> to vector<16x4xf32>
    %391 = vector.extract_strided_slice %376 {offsets = [0, 0], sizes = [1, 4], strides = [1, 1]} : vector<3x4xf32> to vector<1x4xf32>
    %392 = vector.shape_cast %391 : vector<1x4xf32> to vector<4xf32>
    %393 = vector.shape_cast %392 : vector<4xf32> to vector<1x4xf32>
    %394 = vector.broadcast %393 : vector<1x4xf32> to vector<16x4xf32>
    %395 = arith.mulf %390, %394 : vector<16x4xf32>
    %396 = vector.extract_strided_slice %375 {offsets = [0, 3], sizes = [16, 4], strides = [1, 1]} : vector<16x10xf32> to vector<16x4xf32>
    %397 = vector.extract_strided_slice %375 {offsets = [0, 4], sizes = [16, 4], strides = [1, 1]} : vector<16x10xf32> to vector<16x4xf32>
    %398 = vector.extract_strided_slice %376 {offsets = [2, 0], sizes = [1, 4], strides = [1, 1]} : vector<3x4xf32> to vector<1x4xf32>
    %399 = vector.shape_cast %398 : vector<1x4xf32> to vector<4xf32>
    %400 = vector.shape_cast %399 : vector<4xf32> to vector<1x4xf32>
    %401 = vector.broadcast %400 : vector<1x4xf32> to vector<16x4xf32>
    %402 = arith.mulf %397, %401 : vector<16x4xf32>
    %403 = vector.extract_strided_slice %375 {offsets = [0, 4], sizes = [16, 4], strides = [1, 1]} : vector<16x10xf32> to vector<16x4xf32>
    %404 = vector.extract_strided_slice %376 {offsets = [0, 0], sizes = [1, 4], strides = [1, 1]} : vector<3x4xf32> to vector<1x4xf32>
    %405 = vector.shape_cast %404 : vector<1x4xf32> to vector<4xf32>
    %406 = vector.shape_cast %405 : vector<4xf32> to vector<1x4xf32>
    %407 = vector.broadcast %406 : vector<1x4xf32> to vector<16x4xf32>
    %408 = arith.mulf %403, %407 : vector<16x4xf32>
    %409 = vector.extract_strided_slice %375 {offsets = [0, 5], sizes = [16, 4], strides = [1, 1]} : vector<16x10xf32> to vector<16x4xf32>
    %410 = vector.extract_strided_slice %375 {offsets = [0, 6], sizes = [16, 4], strides = [1, 1]} : vector<16x10xf32> to vector<16x4xf32>
    %411 = vector.extract_strided_slice %376 {offsets = [2, 0], sizes = [1, 4], strides = [1, 1]} : vector<3x4xf32> to vector<1x4xf32>
    %412 = vector.shape_cast %411 : vector<1x4xf32> to vector<4xf32>
    %413 = vector.shape_cast %412 : vector<4xf32> to vector<1x4xf32>
    %414 = vector.broadcast %413 : vector<1x4xf32> to vector<16x4xf32>
    %415 = arith.mulf %410, %414 : vector<16x4xf32>
    %416 = tpu.concatenate %382, %383, %389, %395, %396, %402, %408, %409, %415 in 0 : vector<16x4xf32>, vector<16x4xf32>, vector<16x4xf32>, vector<16x4xf32>, vector<16x4xf32>, vector<16x4xf32>, vector<16x4xf32>, vector<16x4xf32>, vector<16x4xf32> -> vector<144x4xf32>
    %417 = arith.truncf %416 : vector<144x4xf32> to vector<144x4xbf16>
    %c0_82 = arith.constant 0 : index
    %c0_83 = arith.constant 0 : index
    %418 = vector.load %arg14[%c0_82, %c0_83] : memref<16x144xbf16, #tpu.memory_space<vmem>>, vector<16x144xbf16>
    %cst_84 = arith.constant dense<0.000000e+00> : vector<16x4xf32>
    %419 = tpu.matmul %418, %417, %cst_84 {dimension_numbers = #tpu.dot_dimension_numbers<[1], [0], [0], [1], [0, 0, 1, 1], [], []>} : vector<16x144xbf16>, vector<144x4xbf16>, vector<16x4xf32> -> vector<16x4xf32>
    %c0_85 = arith.constant 0 : index
    %c0_86 = arith.constant 0 : index
    %420 = vector.load %arg15[%c0_85, %c0_86] : memref<16x1xf32, #tpu.memory_space<vmem>>, vector<16x1xf32>
    %421 = vector.broadcast %420 : vector<16x1xf32> to vector<16x4xf32>
    %422 = arith.addf %419, %421 : vector<16x4xf32>
    %cst_87 = arith.constant 0.000000e+00 : f32
    %423 = vector.broadcast %cst_87 : f32 to vector<16x4xf32>
    %424 = arith.cmpf ogt, %422, %423 : vector<16x4xf32>
    %cst_88 = arith.constant 0.000000e+00 : f32
    %425 = vector.broadcast %cst_88 : f32 to vector<16x4xf32>
    %426 = arith.minimumf %422, %425 : vector<16x4xf32>
    %427 = math.exp %426 : vector<16x4xf32>
    %cst_89 = arith.constant 1.000000e+00 : f32
    %428 = vector.broadcast %cst_89 : f32 to vector<16x4xf32>
    %429 = arith.subf %427, %428 : vector<16x4xf32>
    %430 = arith.select %424, %422, %429 : vector<16x4xi1>, vector<16x4xf32>
    %cst_90 = arith.constant 0.000000e+00 : f32
    %431 = vector.broadcast %cst_90 : f32 to vector<16x3xf32>
    %432 = tpu.concatenate %431, %430, %431 in 1 : vector<16x3xf32>, vector<16x4xf32>, vector<16x3xf32> -> vector<16x10xf32>
    %c0_91 = arith.constant 0 : index
    %c0_92 = arith.constant 0 : index
    %433 = vector.load %arg51[%c0_91, %c0_92] : memref<3x4xf32, #tpu.memory_space<vmem>>, vector<3x4xf32>
    %434 = vector.extract_strided_slice %432 {offsets = [0, 0], sizes = [16, 4], strides = [1, 1]} : vector<16x10xf32> to vector<16x4xf32>
    %435 = vector.extract_strided_slice %433 {offsets = [0, 0], sizes = [1, 4], strides = [1, 1]} : vector<3x4xf32> to vector<1x4xf32>
    %436 = vector.shape_cast %435 : vector<1x4xf32> to vector<4xf32>
    %437 = vector.shape_cast %436 : vector<4xf32> to vector<1x4xf32>
    %438 = vector.broadcast %437 : vector<1x4xf32> to vector<16x4xf32>
    %439 = arith.mulf %434, %438 : vector<16x4xf32>
    %440 = vector.extract_strided_slice %432 {offsets = [0, 1], sizes = [16, 4], strides = [1, 1]} : vector<16x10xf32> to vector<16x4xf32>
    %441 = vector.extract_strided_slice %432 {offsets = [0, 2], sizes = [16, 4], strides = [1, 1]} : vector<16x10xf32> to vector<16x4xf32>
    %442 = vector.extract_strided_slice %433 {offsets = [2, 0], sizes = [1, 4], strides = [1, 1]} : vector<3x4xf32> to vector<1x4xf32>
    %443 = vector.shape_cast %442 : vector<1x4xf32> to vector<4xf32>
    %444 = vector.shape_cast %443 : vector<4xf32> to vector<1x4xf32>
    %445 = vector.broadcast %444 : vector<1x4xf32> to vector<16x4xf32>
    %446 = arith.mulf %441, %445 : vector<16x4xf32>
    %447 = vector.extract_strided_slice %432 {offsets = [0, 2], sizes = [16, 4], strides = [1, 1]} : vector<16x10xf32> to vector<16x4xf32>
    %448 = vector.extract_strided_slice %433 {offsets = [0, 0], sizes = [1, 4], strides = [1, 1]} : vector<3x4xf32> to vector<1x4xf32>
    %449 = vector.shape_cast %448 : vector<1x4xf32> to vector<4xf32>
    %450 = vector.shape_cast %449 : vector<4xf32> to vector<1x4xf32>
    %451 = vector.broadcast %450 : vector<1x4xf32> to vector<16x4xf32>
    %452 = arith.mulf %447, %451 : vector<16x4xf32>
    %453 = vector.extract_strided_slice %432 {offsets = [0, 3], sizes = [16, 4], strides = [1, 1]} : vector<16x10xf32> to vector<16x4xf32>
    %454 = vector.extract_strided_slice %432 {offsets = [0, 4], sizes = [16, 4], strides = [1, 1]} : vector<16x10xf32> to vector<16x4xf32>
    %455 = vector.extract_strided_slice %433 {offsets = [2, 0], sizes = [1, 4], strides = [1, 1]} : vector<3x4xf32> to vector<1x4xf32>
    %456 = vector.shape_cast %455 : vector<1x4xf32> to vector<4xf32>
    %457 = vector.shape_cast %456 : vector<4xf32> to vector<1x4xf32>
    %458 = vector.broadcast %457 : vector<1x4xf32> to vector<16x4xf32>
    %459 = arith.mulf %454, %458 : vector<16x4xf32>
    %460 = vector.extract_strided_slice %432 {offsets = [0, 4], sizes = [16, 4], strides = [1, 1]} : vector<16x10xf32> to vector<16x4xf32>
    %461 = vector.extract_strided_slice %433 {offsets = [0, 0], sizes = [1, 4], strides = [1, 1]} : vector<3x4xf32> to vector<1x4xf32>
    %462 = vector.shape_cast %461 : vector<1x4xf32> to vector<4xf32>
    %463 = vector.shape_cast %462 : vector<4xf32> to vector<1x4xf32>
    %464 = vector.broadcast %463 : vector<1x4xf32> to vector<16x4xf32>
    %465 = arith.mulf %460, %464 : vector<16x4xf32>
    %466 = vector.extract_strided_slice %432 {offsets = [0, 5], sizes = [16, 4], strides = [1, 1]} : vector<16x10xf32> to vector<16x4xf32>
    %467 = vector.extract_strided_slice %432 {offsets = [0, 6], sizes = [16, 4], strides = [1, 1]} : vector<16x10xf32> to vector<16x4xf32>
    %468 = vector.extract_strided_slice %433 {offsets = [2, 0], sizes = [1, 4], strides = [1, 1]} : vector<3x4xf32> to vector<1x4xf32>
    %469 = vector.shape_cast %468 : vector<1x4xf32> to vector<4xf32>
    %470 = vector.shape_cast %469 : vector<4xf32> to vector<1x4xf32>
    %471 = vector.broadcast %470 : vector<1x4xf32> to vector<16x4xf32>
    %472 = arith.mulf %467, %471 : vector<16x4xf32>
    %473 = tpu.concatenate %439, %440, %446, %452, %453, %459, %465, %466, %472 in 0 : vector<16x4xf32>, vector<16x4xf32>, vector<16x4xf32>, vector<16x4xf32>, vector<16x4xf32>, vector<16x4xf32>, vector<16x4xf32>, vector<16x4xf32>, vector<16x4xf32> -> vector<144x4xf32>
    %474 = arith.truncf %473 : vector<144x4xf32> to vector<144x4xbf16>
    %c0_93 = arith.constant 0 : index
    %c0_94 = arith.constant 0 : index
    %475 = vector.load %arg16[%c0_93, %c0_94] : memref<16x144xbf16, #tpu.memory_space<vmem>>, vector<16x144xbf16>
    %cst_95 = arith.constant dense<0.000000e+00> : vector<16x4xf32>
    %476 = tpu.matmul %475, %474, %cst_95 {dimension_numbers = #tpu.dot_dimension_numbers<[1], [0], [0], [1], [0, 0, 1, 1], [], []>} : vector<16x144xbf16>, vector<144x4xbf16>, vector<16x4xf32> -> vector<16x4xf32>
    %c0_96 = arith.constant 0 : index
    %c0_97 = arith.constant 0 : index
    %477 = vector.load %arg17[%c0_96, %c0_97] : memref<16x1xf32, #tpu.memory_space<vmem>>, vector<16x1xf32>
    %478 = vector.broadcast %477 : vector<16x1xf32> to vector<16x4xf32>
    %479 = arith.addf %476, %478 : vector<16x4xf32>
    %cst_98 = arith.constant 0.000000e+00 : f32
    %480 = vector.broadcast %cst_98 : f32 to vector<16x4xf32>
    %481 = arith.cmpf ogt, %479, %480 : vector<16x4xf32>
    %cst_99 = arith.constant 0.000000e+00 : f32
    %482 = vector.broadcast %cst_99 : f32 to vector<16x4xf32>
    %483 = arith.minimumf %479, %482 : vector<16x4xf32>
    %484 = math.exp %483 : vector<16x4xf32>
    %cst_100 = arith.constant 1.000000e+00 : f32
    %485 = vector.broadcast %cst_100 : f32 to vector<16x4xf32>
    %486 = arith.subf %484, %485 : vector<16x4xf32>
    %487 = arith.select %481, %479, %486 : vector<16x4xi1>, vector<16x4xf32>
    %cst_101 = arith.constant 0.000000e+00 : f32
    %488 = vector.broadcast %cst_101 : f32 to vector<16x3xf32>
    %489 = tpu.concatenate %487, %488 in 1 : vector<16x4xf32>, vector<16x3xf32> -> vector<16x7xf32>
    %490 = vector.extract_strided_slice %489 {offsets = [0, 1], sizes = [16, 4], strides = [1, 1]} : vector<16x7xf32> to vector<16x4xf32>
    %491 = arith.maximumf %487, %490 : vector<16x4xf32>
    %492 = vector.extract_strided_slice %489 {offsets = [0, 2], sizes = [16, 4], strides = [1, 1]} : vector<16x7xf32> to vector<16x4xf32>
    %493 = arith.maximumf %491, %492 : vector<16x4xf32>
    %494 = vector.extract_strided_slice %489 {offsets = [0, 3], sizes = [16, 4], strides = [1, 1]} : vector<16x7xf32> to vector<16x4xf32>
    %495 = arith.maximumf %493, %494 : vector<16x4xf32>
    %c0_102 = arith.constant 0 : index
    %c0_103 = arith.constant 0 : index
    %496 = vector.load %arg56[%c0_102, %c0_103] : memref<4x1xf32, #tpu.memory_space<vmem>>, vector<4x1xf32>
    %cst_104 = arith.constant dense<0.000000e+00> : vector<16x1xf32>
    %497 = tpu.matmul %495, %496, %cst_104 {dimension_numbers = #tpu.dot_dimension_numbers<[1], [0], [0], [1], [0, 0, 1, 1], [], []>} : vector<16x4xf32>, vector<4x1xf32>, vector<16x1xf32> -> vector<16x1xf32>
    %cst_105 = arith.constant 0.000000e+00 : f32
    %498 = vector.broadcast %cst_105 : f32 to vector<16x2xf32>
    %499 = tpu.concatenate %498, %497, %498 in 1 : vector<16x2xf32>, vector<16x1xf32>, vector<16x2xf32> -> vector<16x5xf32>
    %c0_106 = arith.constant 0 : index
    %c0_107 = arith.constant 0 : index
    %500 = vector.load %arg52[%c0_106, %c0_107] : memref<3x1xf32, #tpu.memory_space<vmem>>, vector<3x1xf32>
    %501 = vector.extract_strided_slice %499 {offsets = [0, 0], sizes = [16, 1], strides = [1, 1]} : vector<16x5xf32> to vector<16x1xf32>
    %502 = vector.extract_strided_slice %500 {offsets = [0, 0], sizes = [1, 1], strides = [1, 1]} : vector<3x1xf32> to vector<1x1xf32>
    %503 = vector.shape_cast %502 : vector<1x1xf32> to vector<1xf32>
    %504 = vector.shape_cast %503 : vector<1xf32> to vector<1x1xf32>
    %505 = vector.broadcast %504 : vector<1x1xf32> to vector<16x1xf32>
    %506 = arith.mulf %501, %505 : vector<16x1xf32>
    %507 = vector.extract_strided_slice %499 {offsets = [0, 1], sizes = [16, 1], strides = [1, 1]} : vector<16x5xf32> to vector<16x1xf32>
    %508 = vector.extract_strided_slice %499 {offsets = [0, 2], sizes = [16, 1], strides = [1, 1]} : vector<16x5xf32> to vector<16x1xf32>
    %509 = vector.extract_strided_slice %500 {offsets = [2, 0], sizes = [1, 1], strides = [1, 1]} : vector<3x1xf32> to vector<1x1xf32>
    %510 = vector.shape_cast %509 : vector<1x1xf32> to vector<1xf32>
    %511 = vector.shape_cast %510 : vector<1xf32> to vector<1x1xf32>
    %512 = vector.broadcast %511 : vector<1x1xf32> to vector<16x1xf32>
    %513 = arith.mulf %508, %512 : vector<16x1xf32>
    %514 = vector.extract_strided_slice %499 {offsets = [0, 1], sizes = [16, 1], strides = [1, 1]} : vector<16x5xf32> to vector<16x1xf32>
    %515 = vector.extract_strided_slice %500 {offsets = [0, 0], sizes = [1, 1], strides = [1, 1]} : vector<3x1xf32> to vector<1x1xf32>
    %516 = vector.shape_cast %515 : vector<1x1xf32> to vector<1xf32>
    %517 = vector.shape_cast %516 : vector<1xf32> to vector<1x1xf32>
    %518 = vector.broadcast %517 : vector<1x1xf32> to vector<16x1xf32>
    %519 = arith.mulf %514, %518 : vector<16x1xf32>
    %520 = vector.extract_strided_slice %499 {offsets = [0, 2], sizes = [16, 1], strides = [1, 1]} : vector<16x5xf32> to vector<16x1xf32>
    %521 = vector.extract_strided_slice %499 {offsets = [0, 3], sizes = [16, 1], strides = [1, 1]} : vector<16x5xf32> to vector<16x1xf32>
    %522 = vector.extract_strided_slice %500 {offsets = [2, 0], sizes = [1, 1], strides = [1, 1]} : vector<3x1xf32> to vector<1x1xf32>
    %523 = vector.shape_cast %522 : vector<1x1xf32> to vector<1xf32>
    %524 = vector.shape_cast %523 : vector<1xf32> to vector<1x1xf32>
    %525 = vector.broadcast %524 : vector<1x1xf32> to vector<16x1xf32>
    %526 = arith.mulf %521, %525 : vector<16x1xf32>
    %527 = vector.extract_strided_slice %499 {offsets = [0, 2], sizes = [16, 1], strides = [1, 1]} : vector<16x5xf32> to vector<16x1xf32>
    %528 = vector.extract_strided_slice %500 {offsets = [0, 0], sizes = [1, 1], strides = [1, 1]} : vector<3x1xf32> to vector<1x1xf32>
    %529 = vector.shape_cast %528 : vector<1x1xf32> to vector<1xf32>
    %530 = vector.shape_cast %529 : vector<1xf32> to vector<1x1xf32>
    %531 = vector.broadcast %530 : vector<1x1xf32> to vector<16x1xf32>
    %532 = arith.mulf %527, %531 : vector<16x1xf32>
    %533 = vector.extract_strided_slice %499 {offsets = [0, 3], sizes = [16, 1], strides = [1, 1]} : vector<16x5xf32> to vector<16x1xf32>
    %534 = vector.extract_strided_slice %499 {offsets = [0, 4], sizes = [16, 1], strides = [1, 1]} : vector<16x5xf32> to vector<16x1xf32>
    %535 = vector.extract_strided_slice %500 {offsets = [2, 0], sizes = [1, 1], strides = [1, 1]} : vector<3x1xf32> to vector<1x1xf32>
    %536 = vector.shape_cast %535 : vector<1x1xf32> to vector<1xf32>
    %537 = vector.shape_cast %536 : vector<1xf32> to vector<1x1xf32>
    %538 = vector.broadcast %537 : vector<1x1xf32> to vector<16x1xf32>
    %539 = arith.mulf %534, %538 : vector<16x1xf32>
    %540 = tpu.concatenate %506, %507, %513, %519, %520, %526, %532, %533, %539 in 0 : vector<16x1xf32>, vector<16x1xf32>, vector<16x1xf32>, vector<16x1xf32>, vector<16x1xf32>, vector<16x1xf32>, vector<16x1xf32>, vector<16x1xf32>, vector<16x1xf32> -> vector<144x1xf32>
    %541 = arith.truncf %540 : vector<144x1xf32> to vector<144x1xbf16>
    %c0_108 = arith.constant 0 : index
    %c0_109 = arith.constant 0 : index
    %542 = vector.load %arg18[%c0_108, %c0_109] : memref<32x144xbf16, #tpu.memory_space<vmem>>, vector<32x144xbf16>
    %cst_110 = arith.constant dense<0.000000e+00> : vector<32x1xf32>
    %543 = tpu.matmul %542, %541, %cst_110 {dimension_numbers = #tpu.dot_dimension_numbers<[1], [0], [0], [1], [0, 0, 1, 1], [], []>} : vector<32x144xbf16>, vector<144x1xbf16>, vector<32x1xf32> -> vector<32x1xf32>
    %c0_111 = arith.constant 0 : index
    %c0_112 = arith.constant 0 : index
    %544 = vector.load %arg19[%c0_111, %c0_112] : memref<32x1xf32, #tpu.memory_space<vmem>>, vector<32x1xf32>
    %545 = arith.addf %543, %544 : vector<32x1xf32>
    %cst_113 = arith.constant 0.000000e+00 : f32
    %546 = vector.broadcast %cst_113 : f32 to vector<32x1xf32>
    %547 = arith.cmpf ogt, %545, %546 : vector<32x1xf32>
    %cst_114 = arith.constant 0.000000e+00 : f32
    %548 = vector.broadcast %cst_114 : f32 to vector<32x1xf32>
    %549 = arith.minimumf %545, %548 : vector<32x1xf32>
    %550 = math.exp %549 : vector<32x1xf32>
    %cst_115 = arith.constant 1.000000e+00 : f32
    %551 = vector.broadcast %cst_115 : f32 to vector<32x1xf32>
    %552 = arith.subf %550, %551 : vector<32x1xf32>
    %553 = arith.select %547, %545, %552 : vector<32x1xi1>, vector<32x1xf32>
    %cst_116 = arith.constant 0.000000e+00 : f32
    %554 = vector.broadcast %cst_116 : f32 to vector<32x2xf32>
    %555 = tpu.concatenate %554, %553, %554 in 1 : vector<32x2xf32>, vector<32x1xf32>, vector<32x2xf32> -> vector<32x5xf32>
    %c0_117 = arith.constant 0 : index
    %c0_118 = arith.constant 0 : index
    %556 = vector.load %arg52[%c0_117, %c0_118] : memref<3x1xf32, #tpu.memory_space<vmem>>, vector<3x1xf32>
    %557 = vector.extract_strided_slice %555 {offsets = [0, 0], sizes = [32, 1], strides = [1, 1]} : vector<32x5xf32> to vector<32x1xf32>
    %558 = vector.extract_strided_slice %556 {offsets = [0, 0], sizes = [1, 1], strides = [1, 1]} : vector<3x1xf32> to vector<1x1xf32>
    %559 = vector.shape_cast %558 : vector<1x1xf32> to vector<1xf32>
    %560 = vector.shape_cast %559 : vector<1xf32> to vector<1x1xf32>
    %561 = vector.broadcast %560 : vector<1x1xf32> to vector<32x1xf32>
    %562 = arith.mulf %557, %561 : vector<32x1xf32>
    %563 = vector.extract_strided_slice %555 {offsets = [0, 1], sizes = [32, 1], strides = [1, 1]} : vector<32x5xf32> to vector<32x1xf32>
    %564 = vector.extract_strided_slice %555 {offsets = [0, 2], sizes = [32, 1], strides = [1, 1]} : vector<32x5xf32> to vector<32x1xf32>
    %565 = vector.extract_strided_slice %556 {offsets = [2, 0], sizes = [1, 1], strides = [1, 1]} : vector<3x1xf32> to vector<1x1xf32>
    %566 = vector.shape_cast %565 : vector<1x1xf32> to vector<1xf32>
    %567 = vector.shape_cast %566 : vector<1xf32> to vector<1x1xf32>
    %568 = vector.broadcast %567 : vector<1x1xf32> to vector<32x1xf32>
    %569 = arith.mulf %564, %568 : vector<32x1xf32>
    %570 = vector.extract_strided_slice %555 {offsets = [0, 1], sizes = [32, 1], strides = [1, 1]} : vector<32x5xf32> to vector<32x1xf32>
    %571 = vector.extract_strided_slice %556 {offsets = [0, 0], sizes = [1, 1], strides = [1, 1]} : vector<3x1xf32> to vector<1x1xf32>
    %572 = vector.shape_cast %571 : vector<1x1xf32> to vector<1xf32>
    %573 = vector.shape_cast %572 : vector<1xf32> to vector<1x1xf32>
    %574 = vector.broadcast %573 : vector<1x1xf32> to vector<32x1xf32>
    %575 = arith.mulf %570, %574 : vector<32x1xf32>
    %576 = vector.extract_strided_slice %555 {offsets = [0, 2], sizes = [32, 1], strides = [1, 1]} : vector<32x5xf32> to vector<32x1xf32>
    %577 = vector.extract_strided_slice %555 {offsets = [0, 3], sizes = [32, 1], strides = [1, 1]} : vector<32x5xf32> to vector<32x1xf32>
    %578 = vector.extract_strided_slice %556 {offsets = [2, 0], sizes = [1, 1], strides = [1, 1]} : vector<3x1xf32> to vector<1x1xf32>
    %579 = vector.shape_cast %578 : vector<1x1xf32> to vector<1xf32>
    %580 = vector.shape_cast %579 : vector<1xf32> to vector<1x1xf32>
    %581 = vector.broadcast %580 : vector<1x1xf32> to vector<32x1xf32>
    %582 = arith.mulf %577, %581 : vector<32x1xf32>
    %583 = vector.extract_strided_slice %555 {offsets = [0, 2], sizes = [32, 1], strides = [1, 1]} : vector<32x5xf32> to vector<32x1xf32>
    %584 = vector.extract_strided_slice %556 {offsets = [0, 0], sizes = [1, 1], strides = [1, 1]} : vector<3x1xf32> to vector<1x1xf32>
    %585 = vector.shape_cast %584 : vector<1x1xf32> to vector<1xf32>
    %586 = vector.shape_cast %585 : vector<1xf32> to vector<1x1xf32>
    %587 = vector.broadcast %586 : vector<1x1xf32> to vector<32x1xf32>
    %588 = arith.mulf %583, %587 : vector<32x1xf32>
    %589 = vector.extract_strided_slice %555 {offsets = [0, 3], sizes = [32, 1], strides = [1, 1]} : vector<32x5xf32> to vector<32x1xf32>
    %590 = vector.extract_strided_slice %555 {offsets = [0, 4], sizes = [32, 1], strides = [1, 1]} : vector<32x5xf32> to vector<32x1xf32>
    %591 = vector.extract_strided_slice %556 {offsets = [2, 0], sizes = [1, 1], strides = [1, 1]} : vector<3x1xf32> to vector<1x1xf32>
    %592 = vector.shape_cast %591 : vector<1x1xf32> to vector<1xf32>
    %593 = vector.shape_cast %592 : vector<1xf32> to vector<1x1xf32>
    %594 = vector.broadcast %593 : vector<1x1xf32> to vector<32x1xf32>
    %595 = arith.mulf %590, %594 : vector<32x1xf32>
    %596 = tpu.concatenate %562, %563, %569, %575, %576, %582, %588, %589, %595 in 0 : vector<32x1xf32>, vector<32x1xf32>, vector<32x1xf32>, vector<32x1xf32>, vector<32x1xf32>, vector<32x1xf32>, vector<32x1xf32>, vector<32x1xf32>, vector<32x1xf32> -> vector<288x1xf32>
    %597 = arith.truncf %596 : vector<288x1xf32> to vector<288x1xbf16>
    %c0_119 = arith.constant 0 : index
    %c0_120 = arith.constant 0 : index
    %598 = vector.load %arg20[%c0_119, %c0_120] : memref<16x288xbf16, #tpu.memory_space<vmem>>, vector<16x288xbf16>
    %cst_121 = arith.constant dense<0.000000e+00> : vector<16x1xf32>
    %599 = tpu.matmul %598, %597, %cst_121 {dimension_numbers = #tpu.dot_dimension_numbers<[1], [0], [0], [1], [0, 0, 1, 1], [], []>} : vector<16x288xbf16>, vector<288x1xbf16>, vector<16x1xf32> -> vector<16x1xf32>
    %c0_122 = arith.constant 0 : index
    %c0_123 = arith.constant 0 : index
    %600 = vector.load %arg21[%c0_122, %c0_123] : memref<16x1xf32, #tpu.memory_space<vmem>>, vector<16x1xf32>
    %601 = arith.addf %599, %600 : vector<16x1xf32>
    %cst_124 = arith.constant 0.000000e+00 : f32
    %602 = vector.broadcast %cst_124 : f32 to vector<16x1xf32>
    %603 = arith.cmpf ogt, %601, %602 : vector<16x1xf32>
    %cst_125 = arith.constant 0.000000e+00 : f32
    %604 = vector.broadcast %cst_125 : f32 to vector<16x1xf32>
    %605 = arith.minimumf %601, %604 : vector<16x1xf32>
    %606 = math.exp %605 : vector<16x1xf32>
    %cst_126 = arith.constant 1.000000e+00 : f32
    %607 = vector.broadcast %cst_126 : f32 to vector<16x1xf32>
    %608 = arith.subf %606, %607 : vector<16x1xf32>
    %609 = arith.select %603, %601, %608 : vector<16x1xi1>, vector<16x1xf32>
    %610 = arith.truncf %609 : vector<16x1xf32> to vector<16x1xbf16>
    %c0_127 = arith.constant 0 : index
    %c0_128 = arith.constant 0 : index
    %c0_129 = arith.constant 0 : index
    %611 = vector.load %arg38[%c0_127, %c0_128, %c0_129] : memref<4x16x16xbf16, #tpu.memory_space<vmem>>, vector<1x16x16xbf16>
    %612 = vector.shape_cast %611 : vector<1x16x16xbf16> to vector<16x16xbf16>
    %cst_130 = arith.constant dense<0.000000e+00> : vector<16x1xf32>
    %613 = tpu.matmul %612, %610, %cst_130 {dimension_numbers = #tpu.dot_dimension_numbers<[1], [0], [0], [1], [0, 0, 1, 1], [], []>} : vector<16x16xbf16>, vector<16x1xbf16>, vector<16x1xf32> -> vector<16x1xf32>
    %c0_131 = arith.constant 0 : index
    %c0_132 = arith.constant 0 : index
    %c0_133 = arith.constant 0 : index
    %614 = vector.load %arg60[%c0_131, %c0_132, %c0_133] : memref<4x1x4xf32, #tpu.memory_space<vmem>>, vector<1x1x4xf32>
    %615 = vector.shape_cast %614 : vector<1x1x4xf32> to vector<1x4xf32>
    %cst_134 = arith.constant dense<0.000000e+00> : vector<16x4xf32>
    %616 = tpu.matmul %613, %615, %cst_134 {dimension_numbers = #tpu.dot_dimension_numbers<[1], [0], [0], [1], [0, 0, 1, 1], [], []>} : vector<16x1xf32>, vector<1x4xf32>, vector<16x4xf32> -> vector<16x4xf32>
    %c1 = arith.constant 1 : index
    %c0_135 = arith.constant 0 : index
    %c0_136 = arith.constant 0 : index
    %617 = vector.load %arg38[%c1, %c0_135, %c0_136] : memref<4x16x16xbf16, #tpu.memory_space<vmem>>, vector<1x16x16xbf16>
    %618 = vector.shape_cast %617 : vector<1x16x16xbf16> to vector<16x16xbf16>
    %cst_137 = arith.constant dense<0.000000e+00> : vector<16x1xf32>
    %619 = tpu.matmul %618, %610, %cst_137 {dimension_numbers = #tpu.dot_dimension_numbers<[1], [0], [0], [1], [0, 0, 1, 1], [], []>} : vector<16x16xbf16>, vector<16x1xbf16>, vector<16x1xf32> -> vector<16x1xf32>
    %c1_138 = arith.constant 1 : index
    %c0_139 = arith.constant 0 : index
    %c0_140 = arith.constant 0 : index
    %620 = vector.load %arg60[%c1_138, %c0_139, %c0_140] : memref<4x1x4xf32, #tpu.memory_space<vmem>>, vector<1x1x4xf32>
    %621 = vector.shape_cast %620 : vector<1x1x4xf32> to vector<1x4xf32>
    %cst_141 = arith.constant dense<0.000000e+00> : vector<16x4xf32>
    %622 = tpu.matmul %619, %621, %cst_141 {dimension_numbers = #tpu.dot_dimension_numbers<[1], [0], [0], [1], [0, 0, 1, 1], [], []>} : vector<16x1xf32>, vector<1x4xf32>, vector<16x4xf32> -> vector<16x4xf32>
    %623 = arith.addf %616, %622 : vector<16x4xf32>
    %c2 = arith.constant 2 : index
    %c0_142 = arith.constant 0 : index
    %c0_143 = arith.constant 0 : index
    %624 = vector.load %arg38[%c2, %c0_142, %c0_143] : memref<4x16x16xbf16, #tpu.memory_space<vmem>>, vector<1x16x16xbf16>
    %625 = vector.shape_cast %624 : vector<1x16x16xbf16> to vector<16x16xbf16>
    %cst_144 = arith.constant dense<0.000000e+00> : vector<16x1xf32>
    %626 = tpu.matmul %625, %610, %cst_144 {dimension_numbers = #tpu.dot_dimension_numbers<[1], [0], [0], [1], [0, 0, 1, 1], [], []>} : vector<16x16xbf16>, vector<16x1xbf16>, vector<16x1xf32> -> vector<16x1xf32>
    %c2_145 = arith.constant 2 : index
    %c0_146 = arith.constant 0 : index
    %c0_147 = arith.constant 0 : index
    %627 = vector.load %arg60[%c2_145, %c0_146, %c0_147] : memref<4x1x4xf32, #tpu.memory_space<vmem>>, vector<1x1x4xf32>
    %628 = vector.shape_cast %627 : vector<1x1x4xf32> to vector<1x4xf32>
    %cst_148 = arith.constant dense<0.000000e+00> : vector<16x4xf32>
    %629 = tpu.matmul %626, %628, %cst_148 {dimension_numbers = #tpu.dot_dimension_numbers<[1], [0], [0], [1], [0, 0, 1, 1], [], []>} : vector<16x1xf32>, vector<1x4xf32>, vector<16x4xf32> -> vector<16x4xf32>
    %630 = arith.addf %623, %629 : vector<16x4xf32>
    %c3 = arith.constant 3 : index
    %c0_149 = arith.constant 0 : index
    %c0_150 = arith.constant 0 : index
    %631 = vector.load %arg38[%c3, %c0_149, %c0_150] : memref<4x16x16xbf16, #tpu.memory_space<vmem>>, vector<1x16x16xbf16>
    %632 = vector.shape_cast %631 : vector<1x16x16xbf16> to vector<16x16xbf16>
    %cst_151 = arith.constant dense<0.000000e+00> : vector<16x1xf32>
    %633 = tpu.matmul %632, %610, %cst_151 {dimension_numbers = #tpu.dot_dimension_numbers<[1], [0], [0], [1], [0, 0, 1, 1], [], []>} : vector<16x16xbf16>, vector<16x1xbf16>, vector<16x1xf32> -> vector<16x1xf32>
    %c3_152 = arith.constant 3 : index
    %c0_153 = arith.constant 0 : index
    %c0_154 = arith.constant 0 : index
    %634 = vector.load %arg60[%c3_152, %c0_153, %c0_154] : memref<4x1x4xf32, #tpu.memory_space<vmem>>, vector<1x1x4xf32>
    %635 = vector.shape_cast %634 : vector<1x1x4xf32> to vector<1x4xf32>
    %cst_155 = arith.constant dense<0.000000e+00> : vector<16x4xf32>
    %636 = tpu.matmul %633, %635, %cst_155 {dimension_numbers = #tpu.dot_dimension_numbers<[1], [0], [0], [1], [0, 0, 1, 1], [], []>} : vector<16x1xf32>, vector<1x4xf32>, vector<16x4xf32> -> vector<16x4xf32>
    %637 = arith.addf %630, %636 : vector<16x4xf32>
    %c0_156 = arith.constant 0 : index
    %c0_157 = arith.constant 0 : index
    %638 = vector.load %arg39[%c0_156, %c0_157] : memref<16x1xf32, #tpu.memory_space<vmem>>, vector<16x1xf32>
    %639 = vector.broadcast %638 : vector<16x1xf32> to vector<16x4xf32>
    %640 = arith.addf %637, %639 : vector<16x4xf32>
    %641 = tpu.concatenate %640, %487 in 0 : vector<16x4xf32>, vector<16x4xf32> -> vector<32x4xf32>
    %cst_158 = arith.constant 0.000000e+00 : f32
    %642 = vector.broadcast %cst_158 : f32 to vector<32x3xf32>
    %643 = tpu.concatenate %642, %641, %642 in 1 : vector<32x3xf32>, vector<32x4xf32>, vector<32x3xf32> -> vector<32x10xf32>
    %c0_159 = arith.constant 0 : index
    %c0_160 = arith.constant 0 : index
    %644 = vector.load %arg51[%c0_159, %c0_160] : memref<3x4xf32, #tpu.memory_space<vmem>>, vector<3x4xf32>
    %645 = vector.extract_strided_slice %643 {offsets = [0, 0], sizes = [32, 4], strides = [1, 1]} : vector<32x10xf32> to vector<32x4xf32>
    %646 = vector.extract_strided_slice %644 {offsets = [0, 0], sizes = [1, 4], strides = [1, 1]} : vector<3x4xf32> to vector<1x4xf32>
    %647 = vector.shape_cast %646 : vector<1x4xf32> to vector<4xf32>
    %648 = vector.shape_cast %647 : vector<4xf32> to vector<1x4xf32>
    %649 = vector.broadcast %648 : vector<1x4xf32> to vector<32x4xf32>
    %650 = arith.mulf %645, %649 : vector<32x4xf32>
    %651 = vector.extract_strided_slice %643 {offsets = [0, 1], sizes = [32, 4], strides = [1, 1]} : vector<32x10xf32> to vector<32x4xf32>
    %652 = vector.extract_strided_slice %643 {offsets = [0, 2], sizes = [32, 4], strides = [1, 1]} : vector<32x10xf32> to vector<32x4xf32>
    %653 = vector.extract_strided_slice %644 {offsets = [2, 0], sizes = [1, 4], strides = [1, 1]} : vector<3x4xf32> to vector<1x4xf32>
    %654 = vector.shape_cast %653 : vector<1x4xf32> to vector<4xf32>
    %655 = vector.shape_cast %654 : vector<4xf32> to vector<1x4xf32>
    %656 = vector.broadcast %655 : vector<1x4xf32> to vector<32x4xf32>
    %657 = arith.mulf %652, %656 : vector<32x4xf32>
    %658 = vector.extract_strided_slice %643 {offsets = [0, 2], sizes = [32, 4], strides = [1, 1]} : vector<32x10xf32> to vector<32x4xf32>
    %659 = vector.extract_strided_slice %644 {offsets = [0, 0], sizes = [1, 4], strides = [1, 1]} : vector<3x4xf32> to vector<1x4xf32>
    %660 = vector.shape_cast %659 : vector<1x4xf32> to vector<4xf32>
    %661 = vector.shape_cast %660 : vector<4xf32> to vector<1x4xf32>
    %662 = vector.broadcast %661 : vector<1x4xf32> to vector<32x4xf32>
    %663 = arith.mulf %658, %662 : vector<32x4xf32>
    %664 = vector.extract_strided_slice %643 {offsets = [0, 3], sizes = [32, 4], strides = [1, 1]} : vector<32x10xf32> to vector<32x4xf32>
    %665 = vector.extract_strided_slice %643 {offsets = [0, 4], sizes = [32, 4], strides = [1, 1]} : vector<32x10xf32> to vector<32x4xf32>
    %666 = vector.extract_strided_slice %644 {offsets = [2, 0], sizes = [1, 4], strides = [1, 1]} : vector<3x4xf32> to vector<1x4xf32>
    %667 = vector.shape_cast %666 : vector<1x4xf32> to vector<4xf32>
    %668 = vector.shape_cast %667 : vector<4xf32> to vector<1x4xf32>
    %669 = vector.broadcast %668 : vector<1x4xf32> to vector<32x4xf32>
    %670 = arith.mulf %665, %669 : vector<32x4xf32>
    %671 = vector.extract_strided_slice %643 {offsets = [0, 4], sizes = [32, 4], strides = [1, 1]} : vector<32x10xf32> to vector<32x4xf32>
    %672 = vector.extract_strided_slice %644 {offsets = [0, 0], sizes = [1, 4], strides = [1, 1]} : vector<3x4xf32> to vector<1x4xf32>
    %673 = vector.shape_cast %672 : vector<1x4xf32> to vector<4xf32>
    %674 = vector.shape_cast %673 : vector<4xf32> to vector<1x4xf32>
    %675 = vector.broadcast %674 : vector<1x4xf32> to vector<32x4xf32>
    %676 = arith.mulf %671, %675 : vector<32x4xf32>
    %677 = vector.extract_strided_slice %643 {offsets = [0, 5], sizes = [32, 4], strides = [1, 1]} : vector<32x10xf32> to vector<32x4xf32>
    %678 = vector.extract_strided_slice %643 {offsets = [0, 6], sizes = [32, 4], strides = [1, 1]} : vector<32x10xf32> to vector<32x4xf32>
    %679 = vector.extract_strided_slice %644 {offsets = [2, 0], sizes = [1, 4], strides = [1, 1]} : vector<3x4xf32> to vector<1x4xf32>
    %680 = vector.shape_cast %679 : vector<1x4xf32> to vector<4xf32>
    %681 = vector.shape_cast %680 : vector<4xf32> to vector<1x4xf32>
    %682 = vector.broadcast %681 : vector<1x4xf32> to vector<32x4xf32>
    %683 = arith.mulf %678, %682 : vector<32x4xf32>
    %684 = tpu.concatenate %650, %651, %657, %663, %664, %670, %676, %677, %683 in 0 : vector<32x4xf32>, vector<32x4xf32>, vector<32x4xf32>, vector<32x4xf32>, vector<32x4xf32>, vector<32x4xf32>, vector<32x4xf32>, vector<32x4xf32>, vector<32x4xf32> -> vector<288x4xf32>
    %685 = arith.truncf %684 : vector<288x4xf32> to vector<288x4xbf16>
    %c0_161 = arith.constant 0 : index
    %c0_162 = arith.constant 0 : index
    %686 = vector.load %arg22[%c0_161, %c0_162] : memref<16x288xbf16, #tpu.memory_space<vmem>>, vector<16x288xbf16>
    %cst_163 = arith.constant dense<0.000000e+00> : vector<16x4xf32>
    %687 = tpu.matmul %686, %685, %cst_163 {dimension_numbers = #tpu.dot_dimension_numbers<[1], [0], [0], [1], [0, 0, 1, 1], [], []>} : vector<16x288xbf16>, vector<288x4xbf16>, vector<16x4xf32> -> vector<16x4xf32>
    %c0_164 = arith.constant 0 : index
    %c0_165 = arith.constant 0 : index
    %688 = vector.load %arg23[%c0_164, %c0_165] : memref<16x1xf32, #tpu.memory_space<vmem>>, vector<16x1xf32>
    %689 = vector.broadcast %688 : vector<16x1xf32> to vector<16x4xf32>
    %690 = arith.addf %687, %689 : vector<16x4xf32>
    %cst_166 = arith.constant 0.000000e+00 : f32
    %691 = vector.broadcast %cst_166 : f32 to vector<16x4xf32>
    %692 = arith.cmpf ogt, %690, %691 : vector<16x4xf32>
    %cst_167 = arith.constant 0.000000e+00 : f32
    %693 = vector.broadcast %cst_167 : f32 to vector<16x4xf32>
    %694 = arith.minimumf %690, %693 : vector<16x4xf32>
    %695 = math.exp %694 : vector<16x4xf32>
    %cst_168 = arith.constant 1.000000e+00 : f32
    %696 = vector.broadcast %cst_168 : f32 to vector<16x4xf32>
    %697 = arith.subf %695, %696 : vector<16x4xf32>
    %698 = arith.select %692, %690, %697 : vector<16x4xi1>, vector<16x4xf32>
    %cst_169 = arith.constant 0.000000e+00 : f32
    %699 = vector.broadcast %cst_169 : f32 to vector<16x3xf32>
    %700 = tpu.concatenate %699, %698, %699 in 1 : vector<16x3xf32>, vector<16x4xf32>, vector<16x3xf32> -> vector<16x10xf32>
    %c0_170 = arith.constant 0 : index
    %c0_171 = arith.constant 0 : index
    %701 = vector.load %arg51[%c0_170, %c0_171] : memref<3x4xf32, #tpu.memory_space<vmem>>, vector<3x4xf32>
    %702 = vector.extract_strided_slice %700 {offsets = [0, 0], sizes = [16, 4], strides = [1, 1]} : vector<16x10xf32> to vector<16x4xf32>
    %703 = vector.extract_strided_slice %701 {offsets = [0, 0], sizes = [1, 4], strides = [1, 1]} : vector<3x4xf32> to vector<1x4xf32>
    %704 = vector.shape_cast %703 : vector<1x4xf32> to vector<4xf32>
    %705 = vector.shape_cast %704 : vector<4xf32> to vector<1x4xf32>
    %706 = vector.broadcast %705 : vector<1x4xf32> to vector<16x4xf32>
    %707 = arith.mulf %702, %706 : vector<16x4xf32>
    %708 = vector.extract_strided_slice %700 {offsets = [0, 1], sizes = [16, 4], strides = [1, 1]} : vector<16x10xf32> to vector<16x4xf32>
    %709 = vector.extract_strided_slice %700 {offsets = [0, 2], sizes = [16, 4], strides = [1, 1]} : vector<16x10xf32> to vector<16x4xf32>
    %710 = vector.extract_strided_slice %701 {offsets = [2, 0], sizes = [1, 4], strides = [1, 1]} : vector<3x4xf32> to vector<1x4xf32>
    %711 = vector.shape_cast %710 : vector<1x4xf32> to vector<4xf32>
    %712 = vector.shape_cast %711 : vector<4xf32> to vector<1x4xf32>
    %713 = vector.broadcast %712 : vector<1x4xf32> to vector<16x4xf32>
    %714 = arith.mulf %709, %713 : vector<16x4xf32>
    %715 = vector.extract_strided_slice %700 {offsets = [0, 2], sizes = [16, 4], strides = [1, 1]} : vector<16x10xf32> to vector<16x4xf32>
    %716 = vector.extract_strided_slice %701 {offsets = [0, 0], sizes = [1, 4], strides = [1, 1]} : vector<3x4xf32> to vector<1x4xf32>
    %717 = vector.shape_cast %716 : vector<1x4xf32> to vector<4xf32>
    %718 = vector.shape_cast %717 : vector<4xf32> to vector<1x4xf32>
    %719 = vector.broadcast %718 : vector<1x4xf32> to vector<16x4xf32>
    %720 = arith.mulf %715, %719 : vector<16x4xf32>
    %721 = vector.extract_strided_slice %700 {offsets = [0, 3], sizes = [16, 4], strides = [1, 1]} : vector<16x10xf32> to vector<16x4xf32>
    %722 = vector.extract_strided_slice %700 {offsets = [0, 4], sizes = [16, 4], strides = [1, 1]} : vector<16x10xf32> to vector<16x4xf32>
    %723 = vector.extract_strided_slice %701 {offsets = [2, 0], sizes = [1, 4], strides = [1, 1]} : vector<3x4xf32> to vector<1x4xf32>
    %724 = vector.shape_cast %723 : vector<1x4xf32> to vector<4xf32>
    %725 = vector.shape_cast %724 : vector<4xf32> to vector<1x4xf32>
    %726 = vector.broadcast %725 : vector<1x4xf32> to vector<16x4xf32>
    %727 = arith.mulf %722, %726 : vector<16x4xf32>
    %728 = vector.extract_strided_slice %700 {offsets = [0, 4], sizes = [16, 4], strides = [1, 1]} : vector<16x10xf32> to vector<16x4xf32>
    %729 = vector.extract_strided_slice %701 {offsets = [0, 0], sizes = [1, 4], strides = [1, 1]} : vector<3x4xf32> to vector<1x4xf32>
    %730 = vector.shape_cast %729 : vector<1x4xf32> to vector<4xf32>
    %731 = vector.shape_cast %730 : vector<4xf32> to vector<1x4xf32>
    %732 = vector.broadcast %731 : vector<1x4xf32> to vector<16x4xf32>
    %733 = arith.mulf %728, %732 : vector<16x4xf32>
    %734 = vector.extract_strided_slice %700 {offsets = [0, 5], sizes = [16, 4], strides = [1, 1]} : vector<16x10xf32> to vector<16x4xf32>
    %735 = vector.extract_strided_slice %700 {offsets = [0, 6], sizes = [16, 4], strides = [1, 1]} : vector<16x10xf32> to vector<16x4xf32>
    %736 = vector.extract_strided_slice %701 {offsets = [2, 0], sizes = [1, 4], strides = [1, 1]} : vector<3x4xf32> to vector<1x4xf32>
    %737 = vector.shape_cast %736 : vector<1x4xf32> to vector<4xf32>
    %738 = vector.shape_cast %737 : vector<4xf32> to vector<1x4xf32>
    %739 = vector.broadcast %738 : vector<1x4xf32> to vector<16x4xf32>
    %740 = arith.mulf %735, %739 : vector<16x4xf32>
    %741 = tpu.concatenate %707, %708, %714, %720, %721, %727, %733, %734, %740 in 0 : vector<16x4xf32>, vector<16x4xf32>, vector<16x4xf32>, vector<16x4xf32>, vector<16x4xf32>, vector<16x4xf32>, vector<16x4xf32>, vector<16x4xf32>, vector<16x4xf32> -> vector<144x4xf32>
    %742 = arith.truncf %741 : vector<144x4xf32> to vector<144x4xbf16>
    %c0_172 = arith.constant 0 : index
    %c0_173 = arith.constant 0 : index
    %743 = vector.load %arg24[%c0_172, %c0_173] : memref<16x144xbf16, #tpu.memory_space<vmem>>, vector<16x144xbf16>
    %cst_174 = arith.constant dense<0.000000e+00> : vector<16x4xf32>
    %744 = tpu.matmul %743, %742, %cst_174 {dimension_numbers = #tpu.dot_dimension_numbers<[1], [0], [0], [1], [0, 0, 1, 1], [], []>} : vector<16x144xbf16>, vector<144x4xbf16>, vector<16x4xf32> -> vector<16x4xf32>
    %c0_175 = arith.constant 0 : index
    %c0_176 = arith.constant 0 : index
    %745 = vector.load %arg25[%c0_175, %c0_176] : memref<16x1xf32, #tpu.memory_space<vmem>>, vector<16x1xf32>
    %746 = vector.broadcast %745 : vector<16x1xf32> to vector<16x4xf32>
    %747 = arith.addf %744, %746 : vector<16x4xf32>
    %cst_177 = arith.constant 0.000000e+00 : f32
    %748 = vector.broadcast %cst_177 : f32 to vector<16x4xf32>
    %749 = arith.cmpf ogt, %747, %748 : vector<16x4xf32>
    %cst_178 = arith.constant 0.000000e+00 : f32
    %750 = vector.broadcast %cst_178 : f32 to vector<16x4xf32>
    %751 = arith.minimumf %747, %750 : vector<16x4xf32>
    %752 = math.exp %751 : vector<16x4xf32>
    %cst_179 = arith.constant 1.000000e+00 : f32
    %753 = vector.broadcast %cst_179 : f32 to vector<16x4xf32>
    %754 = arith.subf %752, %753 : vector<16x4xf32>
    %755 = arith.select %749, %747, %754 : vector<16x4xi1>, vector<16x4xf32>
    %756 = arith.truncf %755 : vector<16x4xf32> to vector<16x4xbf16>
    %c0_180 = arith.constant 0 : index
    %c0_181 = arith.constant 0 : index
    %c0_182 = arith.constant 0 : index
    %757 = vector.load %arg40[%c0_180, %c0_181, %c0_182] : memref<4x16x16xbf16, #tpu.memory_space<vmem>>, vector<1x16x16xbf16>
    %758 = vector.shape_cast %757 : vector<1x16x16xbf16> to vector<16x16xbf16>
    %cst_183 = arith.constant dense<0.000000e+00> : vector<16x4xf32>
    %759 = tpu.matmul %758, %756, %cst_183 {dimension_numbers = #tpu.dot_dimension_numbers<[1], [0], [0], [1], [0, 0, 1, 1], [], []>} : vector<16x16xbf16>, vector<16x4xbf16>, vector<16x4xf32> -> vector<16x4xf32>
    %c0_184 = arith.constant 0 : index
    %c0_185 = arith.constant 0 : index
    %c0_186 = arith.constant 0 : index
    %760 = vector.load %arg59[%c0_184, %c0_185, %c0_186] : memref<4x4x16xf32, #tpu.memory_space<vmem>>, vector<1x4x16xf32>
    %761 = vector.shape_cast %760 : vector<1x4x16xf32> to vector<4x16xf32>
    %cst_187 = arith.constant dense<0.000000e+00> : vector<16x16xf32>
    %762 = tpu.matmul %759, %761, %cst_187 {dimension_numbers = #tpu.dot_dimension_numbers<[1], [0], [0], [1], [0, 0, 1, 1], [], []>} : vector<16x4xf32>, vector<4x16xf32>, vector<16x16xf32> -> vector<16x16xf32>
    %c1_188 = arith.constant 1 : index
    %c0_189 = arith.constant 0 : index
    %c0_190 = arith.constant 0 : index
    %763 = vector.load %arg40[%c1_188, %c0_189, %c0_190] : memref<4x16x16xbf16, #tpu.memory_space<vmem>>, vector<1x16x16xbf16>
    %764 = vector.shape_cast %763 : vector<1x16x16xbf16> to vector<16x16xbf16>
    %cst_191 = arith.constant dense<0.000000e+00> : vector<16x4xf32>
    %765 = tpu.matmul %764, %756, %cst_191 {dimension_numbers = #tpu.dot_dimension_numbers<[1], [0], [0], [1], [0, 0, 1, 1], [], []>} : vector<16x16xbf16>, vector<16x4xbf16>, vector<16x4xf32> -> vector<16x4xf32>
    %c1_192 = arith.constant 1 : index
    %c0_193 = arith.constant 0 : index
    %c0_194 = arith.constant 0 : index
    %766 = vector.load %arg59[%c1_192, %c0_193, %c0_194] : memref<4x4x16xf32, #tpu.memory_space<vmem>>, vector<1x4x16xf32>
    %767 = vector.shape_cast %766 : vector<1x4x16xf32> to vector<4x16xf32>
    %cst_195 = arith.constant dense<0.000000e+00> : vector<16x16xf32>
    %768 = tpu.matmul %765, %767, %cst_195 {dimension_numbers = #tpu.dot_dimension_numbers<[1], [0], [0], [1], [0, 0, 1, 1], [], []>} : vector<16x4xf32>, vector<4x16xf32>, vector<16x16xf32> -> vector<16x16xf32>
    %769 = arith.addf %762, %768 : vector<16x16xf32>
    %c2_196 = arith.constant 2 : index
    %c0_197 = arith.constant 0 : index
    %c0_198 = arith.constant 0 : index
    %770 = vector.load %arg40[%c2_196, %c0_197, %c0_198] : memref<4x16x16xbf16, #tpu.memory_space<vmem>>, vector<1x16x16xbf16>
    %771 = vector.shape_cast %770 : vector<1x16x16xbf16> to vector<16x16xbf16>
    %cst_199 = arith.constant dense<0.000000e+00> : vector<16x4xf32>
    %772 = tpu.matmul %771, %756, %cst_199 {dimension_numbers = #tpu.dot_dimension_numbers<[1], [0], [0], [1], [0, 0, 1, 1], [], []>} : vector<16x16xbf16>, vector<16x4xbf16>, vector<16x4xf32> -> vector<16x4xf32>
    %c2_200 = arith.constant 2 : index
    %c0_201 = arith.constant 0 : index
    %c0_202 = arith.constant 0 : index
    %773 = vector.load %arg59[%c2_200, %c0_201, %c0_202] : memref<4x4x16xf32, #tpu.memory_space<vmem>>, vector<1x4x16xf32>
    %774 = vector.shape_cast %773 : vector<1x4x16xf32> to vector<4x16xf32>
    %cst_203 = arith.constant dense<0.000000e+00> : vector<16x16xf32>
    %775 = tpu.matmul %772, %774, %cst_203 {dimension_numbers = #tpu.dot_dimension_numbers<[1], [0], [0], [1], [0, 0, 1, 1], [], []>} : vector<16x4xf32>, vector<4x16xf32>, vector<16x16xf32> -> vector<16x16xf32>
    %776 = arith.addf %769, %775 : vector<16x16xf32>
    %c3_204 = arith.constant 3 : index
    %c0_205 = arith.constant 0 : index
    %c0_206 = arith.constant 0 : index
    %777 = vector.load %arg40[%c3_204, %c0_205, %c0_206] : memref<4x16x16xbf16, #tpu.memory_space<vmem>>, vector<1x16x16xbf16>
    %778 = vector.shape_cast %777 : vector<1x16x16xbf16> to vector<16x16xbf16>
    %cst_207 = arith.constant dense<0.000000e+00> : vector<16x4xf32>
    %779 = tpu.matmul %778, %756, %cst_207 {dimension_numbers = #tpu.dot_dimension_numbers<[1], [0], [0], [1], [0, 0, 1, 1], [], []>} : vector<16x16xbf16>, vector<16x4xbf16>, vector<16x4xf32> -> vector<16x4xf32>
    %c3_208 = arith.constant 3 : index
    %c0_209 = arith.constant 0 : index
    %c0_210 = arith.constant 0 : index
    %780 = vector.load %arg59[%c3_208, %c0_209, %c0_210] : memref<4x4x16xf32, #tpu.memory_space<vmem>>, vector<1x4x16xf32>
    %781 = vector.shape_cast %780 : vector<1x4x16xf32> to vector<4x16xf32>
    %cst_211 = arith.constant dense<0.000000e+00> : vector<16x16xf32>
    %782 = tpu.matmul %779, %781, %cst_211 {dimension_numbers = #tpu.dot_dimension_numbers<[1], [0], [0], [1], [0, 0, 1, 1], [], []>} : vector<16x4xf32>, vector<4x16xf32>, vector<16x16xf32> -> vector<16x16xf32>
    %783 = arith.addf %776, %782 : vector<16x16xf32>
    %c0_212 = arith.constant 0 : index
    %c0_213 = arith.constant 0 : index
    %784 = vector.load %arg41[%c0_212, %c0_213] : memref<16x1xf32, #tpu.memory_space<vmem>>, vector<16x1xf32>
    %785 = vector.broadcast %784 : vector<16x1xf32> to vector<16x16xf32>
    %786 = arith.addf %783, %785 : vector<16x16xf32>
    %787 = tpu.concatenate %786, %363 in 0 : vector<16x16xf32>, vector<16x16xf32> -> vector<32x16xf32>
    %cst_214 = arith.constant 0.000000e+00 : f32
    %788 = vector.broadcast %cst_214 : f32 to vector<32x5xf32>
    %789 = tpu.concatenate %788, %787, %788 in 1 : vector<32x5xf32>, vector<32x16xf32>, vector<32x5xf32> -> vector<32x26xf32>
    %c0_215 = arith.constant 0 : index
    %c0_216 = arith.constant 0 : index
    %790 = vector.load %arg50[%c0_215, %c0_216] : memref<3x16xf32, #tpu.memory_space<vmem>>, vector<3x16xf32>
    %791 = vector.extract_strided_slice %789 {offsets = [0, 0], sizes = [32, 16], strides = [1, 1]} : vector<32x26xf32> to vector<32x16xf32>
    %792 = vector.extract_strided_slice %790 {offsets = [0, 0], sizes = [1, 16], strides = [1, 1]} : vector<3x16xf32> to vector<1x16xf32>
    %793 = vector.shape_cast %792 : vector<1x16xf32> to vector<16xf32>
    %794 = vector.shape_cast %793 : vector<16xf32> to vector<1x16xf32>
    %795 = vector.broadcast %794 : vector<1x16xf32> to vector<32x16xf32>
    %796 = arith.mulf %791, %795 : vector<32x16xf32>
    %797 = vector.extract_strided_slice %789 {offsets = [0, 1], sizes = [32, 16], strides = [1, 1]} : vector<32x26xf32> to vector<32x16xf32>
    %798 = vector.extract_strided_slice %789 {offsets = [0, 2], sizes = [32, 16], strides = [1, 1]} : vector<32x26xf32> to vector<32x16xf32>
    %799 = vector.extract_strided_slice %790 {offsets = [2, 0], sizes = [1, 16], strides = [1, 1]} : vector<3x16xf32> to vector<1x16xf32>
    %800 = vector.shape_cast %799 : vector<1x16xf32> to vector<16xf32>
    %801 = vector.shape_cast %800 : vector<16xf32> to vector<1x16xf32>
    %802 = vector.broadcast %801 : vector<1x16xf32> to vector<32x16xf32>
    %803 = arith.mulf %798, %802 : vector<32x16xf32>
    %804 = vector.extract_strided_slice %789 {offsets = [0, 4], sizes = [32, 16], strides = [1, 1]} : vector<32x26xf32> to vector<32x16xf32>
    %805 = vector.extract_strided_slice %790 {offsets = [0, 0], sizes = [1, 16], strides = [1, 1]} : vector<3x16xf32> to vector<1x16xf32>
    %806 = vector.shape_cast %805 : vector<1x16xf32> to vector<16xf32>
    %807 = vector.shape_cast %806 : vector<16xf32> to vector<1x16xf32>
    %808 = vector.broadcast %807 : vector<1x16xf32> to vector<32x16xf32>
    %809 = arith.mulf %804, %808 : vector<32x16xf32>
    %810 = vector.extract_strided_slice %789 {offsets = [0, 5], sizes = [32, 16], strides = [1, 1]} : vector<32x26xf32> to vector<32x16xf32>
    %811 = vector.extract_strided_slice %789 {offsets = [0, 6], sizes = [32, 16], strides = [1, 1]} : vector<32x26xf32> to vector<32x16xf32>
    %812 = vector.extract_strided_slice %790 {offsets = [2, 0], sizes = [1, 16], strides = [1, 1]} : vector<3x16xf32> to vector<1x16xf32>
    %813 = vector.shape_cast %812 : vector<1x16xf32> to vector<16xf32>
    %814 = vector.shape_cast %813 : vector<16xf32> to vector<1x16xf32>
    %815 = vector.broadcast %814 : vector<1x16xf32> to vector<32x16xf32>
    %816 = arith.mulf %811, %815 : vector<32x16xf32>
    %817 = vector.extract_strided_slice %789 {offsets = [0, 8], sizes = [32, 16], strides = [1, 1]} : vector<32x26xf32> to vector<32x16xf32>
    %818 = vector.extract_strided_slice %790 {offsets = [0, 0], sizes = [1, 16], strides = [1, 1]} : vector<3x16xf32> to vector<1x16xf32>
    %819 = vector.shape_cast %818 : vector<1x16xf32> to vector<16xf32>
    %820 = vector.shape_cast %819 : vector<16xf32> to vector<1x16xf32>
    %821 = vector.broadcast %820 : vector<1x16xf32> to vector<32x16xf32>
    %822 = arith.mulf %817, %821 : vector<32x16xf32>
    %823 = vector.extract_strided_slice %789 {offsets = [0, 9], sizes = [32, 16], strides = [1, 1]} : vector<32x26xf32> to vector<32x16xf32>
    %824 = vector.extract_strided_slice %789 {offsets = [0, 10], sizes = [32, 16], strides = [1, 1]} : vector<32x26xf32> to vector<32x16xf32>
    %825 = vector.extract_strided_slice %790 {offsets = [2, 0], sizes = [1, 16], strides = [1, 1]} : vector<3x16xf32> to vector<1x16xf32>
    %826 = vector.shape_cast %825 : vector<1x16xf32> to vector<16xf32>
    %827 = vector.shape_cast %826 : vector<16xf32> to vector<1x16xf32>
    %828 = vector.broadcast %827 : vector<1x16xf32> to vector<32x16xf32>
    %829 = arith.mulf %824, %828 : vector<32x16xf32>
    %830 = tpu.concatenate %796, %797, %803, %809, %810, %816, %822, %823, %829 in 0 : vector<32x16xf32>, vector<32x16xf32>, vector<32x16xf32>, vector<32x16xf32>, vector<32x16xf32>, vector<32x16xf32>, vector<32x16xf32>, vector<32x16xf32>, vector<32x16xf32> -> vector<288x16xf32>
    %831 = arith.truncf %830 : vector<288x16xf32> to vector<288x16xbf16>
    %c0_217 = arith.constant 0 : index
    %c0_218 = arith.constant 0 : index
    %832 = vector.load %arg26[%c0_217, %c0_218] : memref<16x288xbf16, #tpu.memory_space<vmem>>, vector<16x288xbf16>
    %cst_219 = arith.constant dense<0.000000e+00> : vector<16x16xf32>
    %833 = tpu.matmul %832, %831, %cst_219 {dimension_numbers = #tpu.dot_dimension_numbers<[1], [0], [0], [1], [0, 0, 1, 1], [], []>} : vector<16x288xbf16>, vector<288x16xbf16>, vector<16x16xf32> -> vector<16x16xf32>
    %c0_220 = arith.constant 0 : index
    %c0_221 = arith.constant 0 : index
    %834 = vector.load %arg27[%c0_220, %c0_221] : memref<16x1xf32, #tpu.memory_space<vmem>>, vector<16x1xf32>
    %835 = vector.broadcast %834 : vector<16x1xf32> to vector<16x16xf32>
    %836 = arith.addf %833, %835 : vector<16x16xf32>
    %cst_222 = arith.constant 0.000000e+00 : f32
    %837 = vector.broadcast %cst_222 : f32 to vector<16x16xf32>
    %838 = arith.cmpf ogt, %836, %837 : vector<16x16xf32>
    %cst_223 = arith.constant 0.000000e+00 : f32
    %839 = vector.broadcast %cst_223 : f32 to vector<16x16xf32>
    %840 = arith.minimumf %836, %839 : vector<16x16xf32>
    %841 = math.exp %840 : vector<16x16xf32>
    %cst_224 = arith.constant 1.000000e+00 : f32
    %842 = vector.broadcast %cst_224 : f32 to vector<16x16xf32>
    %843 = arith.subf %841, %842 : vector<16x16xf32>
    %844 = arith.select %838, %836, %843 : vector<16x16xi1>, vector<16x16xf32>
    %cst_225 = arith.constant 0.000000e+00 : f32
    %845 = vector.broadcast %cst_225 : f32 to vector<16x5xf32>
    %846 = tpu.concatenate %845, %844, %845 in 1 : vector<16x5xf32>, vector<16x16xf32>, vector<16x5xf32> -> vector<16x26xf32>
    %c0_226 = arith.constant 0 : index
    %c0_227 = arith.constant 0 : index
    %847 = vector.load %arg50[%c0_226, %c0_227] : memref<3x16xf32, #tpu.memory_space<vmem>>, vector<3x16xf32>
    %848 = vector.extract_strided_slice %846 {offsets = [0, 0], sizes = [16, 16], strides = [1, 1]} : vector<16x26xf32> to vector<16x16xf32>
    %849 = vector.extract_strided_slice %847 {offsets = [0, 0], sizes = [1, 16], strides = [1, 1]} : vector<3x16xf32> to vector<1x16xf32>
    %850 = vector.shape_cast %849 : vector<1x16xf32> to vector<16xf32>
    %851 = vector.shape_cast %850 : vector<16xf32> to vector<1x16xf32>
    %852 = vector.broadcast %851 : vector<1x16xf32> to vector<16x16xf32>
    %853 = arith.mulf %848, %852 : vector<16x16xf32>
    %854 = vector.extract_strided_slice %846 {offsets = [0, 1], sizes = [16, 16], strides = [1, 1]} : vector<16x26xf32> to vector<16x16xf32>
    %855 = vector.extract_strided_slice %846 {offsets = [0, 2], sizes = [16, 16], strides = [1, 1]} : vector<16x26xf32> to vector<16x16xf32>
    %856 = vector.extract_strided_slice %847 {offsets = [2, 0], sizes = [1, 16], strides = [1, 1]} : vector<3x16xf32> to vector<1x16xf32>
    %857 = vector.shape_cast %856 : vector<1x16xf32> to vector<16xf32>
    %858 = vector.shape_cast %857 : vector<16xf32> to vector<1x16xf32>
    %859 = vector.broadcast %858 : vector<1x16xf32> to vector<16x16xf32>
    %860 = arith.mulf %855, %859 : vector<16x16xf32>
    %861 = vector.extract_strided_slice %846 {offsets = [0, 4], sizes = [16, 16], strides = [1, 1]} : vector<16x26xf32> to vector<16x16xf32>
    %862 = vector.extract_strided_slice %847 {offsets = [0, 0], sizes = [1, 16], strides = [1, 1]} : vector<3x16xf32> to vector<1x16xf32>
    %863 = vector.shape_cast %862 : vector<1x16xf32> to vector<16xf32>
    %864 = vector.shape_cast %863 : vector<16xf32> to vector<1x16xf32>
    %865 = vector.broadcast %864 : vector<1x16xf32> to vector<16x16xf32>
    %866 = arith.mulf %861, %865 : vector<16x16xf32>
    %867 = vector.extract_strided_slice %846 {offsets = [0, 5], sizes = [16, 16], strides = [1, 1]} : vector<16x26xf32> to vector<16x16xf32>
    %868 = vector.extract_strided_slice %846 {offsets = [0, 6], sizes = [16, 16], strides = [1, 1]} : vector<16x26xf32> to vector<16x16xf32>
    %869 = vector.extract_strided_slice %847 {offsets = [2, 0], sizes = [1, 16], strides = [1, 1]} : vector<3x16xf32> to vector<1x16xf32>
    %870 = vector.shape_cast %869 : vector<1x16xf32> to vector<16xf32>
    %871 = vector.shape_cast %870 : vector<16xf32> to vector<1x16xf32>
    %872 = vector.broadcast %871 : vector<1x16xf32> to vector<16x16xf32>
    %873 = arith.mulf %868, %872 : vector<16x16xf32>
    %874 = vector.extract_strided_slice %846 {offsets = [0, 8], sizes = [16, 16], strides = [1, 1]} : vector<16x26xf32> to vector<16x16xf32>
    %875 = vector.extract_strided_slice %847 {offsets = [0, 0], sizes = [1, 16], strides = [1, 1]} : vector<3x16xf32> to vector<1x16xf32>
    %876 = vector.shape_cast %875 : vector<1x16xf32> to vector<16xf32>
    %877 = vector.shape_cast %876 : vector<16xf32> to vector<1x16xf32>
    %878 = vector.broadcast %877 : vector<1x16xf32> to vector<16x16xf32>
    %879 = arith.mulf %874, %878 : vector<16x16xf32>
    %880 = vector.extract_strided_slice %846 {offsets = [0, 9], sizes = [16, 16], strides = [1, 1]} : vector<16x26xf32> to vector<16x16xf32>
    %881 = vector.extract_strided_slice %846 {offsets = [0, 10], sizes = [16, 16], strides = [1, 1]} : vector<16x26xf32> to vector<16x16xf32>
    %882 = vector.extract_strided_slice %847 {offsets = [2, 0], sizes = [1, 16], strides = [1, 1]} : vector<3x16xf32> to vector<1x16xf32>
    %883 = vector.shape_cast %882 : vector<1x16xf32> to vector<16xf32>
    %884 = vector.shape_cast %883 : vector<16xf32> to vector<1x16xf32>
    %885 = vector.broadcast %884 : vector<1x16xf32> to vector<16x16xf32>
    %886 = arith.mulf %881, %885 : vector<16x16xf32>
    %887 = tpu.concatenate %853, %854, %860, %866, %867, %873, %879, %880, %886 in 0 : vector<16x16xf32>, vector<16x16xf32>, vector<16x16xf32>, vector<16x16xf32>, vector<16x16xf32>, vector<16x16xf32>, vector<16x16xf32>, vector<16x16xf32>, vector<16x16xf32> -> vector<144x16xf32>
    %888 = arith.truncf %887 : vector<144x16xf32> to vector<144x16xbf16>
    %c0_228 = arith.constant 0 : index
    %c0_229 = arith.constant 0 : index
    %889 = vector.load %arg28[%c0_228, %c0_229] : memref<8x144xbf16, #tpu.memory_space<vmem>>, vector<8x144xbf16>
    %cst_230 = arith.constant dense<0.000000e+00> : vector<8x16xf32>
    %890 = tpu.matmul %889, %888, %cst_230 {dimension_numbers = #tpu.dot_dimension_numbers<[1], [0], [0], [1], [0, 0, 1, 1], [], []>} : vector<8x144xbf16>, vector<144x16xbf16>, vector<8x16xf32> -> vector<8x16xf32>
    %c0_231 = arith.constant 0 : index
    %c0_232 = arith.constant 0 : index
    %891 = vector.load %arg29[%c0_231, %c0_232] : memref<8x1xf32, #tpu.memory_space<vmem>>, vector<8x1xf32>
    %892 = vector.broadcast %891 : vector<8x1xf32> to vector<8x16xf32>
    %893 = arith.addf %890, %892 : vector<8x16xf32>
    %cst_233 = arith.constant 0.000000e+00 : f32
    %894 = vector.broadcast %cst_233 : f32 to vector<8x16xf32>
    %895 = arith.cmpf ogt, %893, %894 : vector<8x16xf32>
    %cst_234 = arith.constant 0.000000e+00 : f32
    %896 = vector.broadcast %cst_234 : f32 to vector<8x16xf32>
    %897 = arith.minimumf %893, %896 : vector<8x16xf32>
    %898 = math.exp %897 : vector<8x16xf32>
    %cst_235 = arith.constant 1.000000e+00 : f32
    %899 = vector.broadcast %cst_235 : f32 to vector<8x16xf32>
    %900 = arith.subf %898, %899 : vector<8x16xf32>
    %901 = arith.select %895, %893, %900 : vector<8x16xi1>, vector<8x16xf32>
    %902 = arith.truncf %901 : vector<8x16xf32> to vector<8x16xbf16>
    %c0_236 = arith.constant 0 : index
    %c0_237 = arith.constant 0 : index
    %c0_238 = arith.constant 0 : index
    %903 = vector.load %arg42[%c0_236, %c0_237, %c0_238] : memref<4x8x8xbf16, #tpu.memory_space<vmem>>, vector<1x8x8xbf16>
    %904 = vector.shape_cast %903 : vector<1x8x8xbf16> to vector<8x8xbf16>
    %cst_239 = arith.constant dense<0.000000e+00> : vector<8x16xf32>
    %905 = tpu.matmul %904, %902, %cst_239 {dimension_numbers = #tpu.dot_dimension_numbers<[1], [0], [0], [1], [0, 0, 1, 1], [], []>} : vector<8x8xbf16>, vector<8x16xbf16>, vector<8x16xf32> -> vector<8x16xf32>
    %c0_240 = arith.constant 0 : index
    %c0_241 = arith.constant 0 : index
    %c0_242 = arith.constant 0 : index
    %906 = vector.load %arg58[%c0_240, %c0_241, %c0_242] : memref<4x16x64xf32, #tpu.memory_space<vmem>>, vector<1x16x64xf32>
    %907 = vector.shape_cast %906 : vector<1x16x64xf32> to vector<16x64xf32>
    %cst_243 = arith.constant dense<0.000000e+00> : vector<8x64xf32>
    %908 = tpu.matmul %905, %907, %cst_243 {dimension_numbers = #tpu.dot_dimension_numbers<[1], [0], [0], [1], [0, 0, 1, 1], [], []>} : vector<8x16xf32>, vector<16x64xf32>, vector<8x64xf32> -> vector<8x64xf32>
    %c1_244 = arith.constant 1 : index
    %c0_245 = arith.constant 0 : index
    %c0_246 = arith.constant 0 : index
    %909 = vector.load %arg42[%c1_244, %c0_245, %c0_246] : memref<4x8x8xbf16, #tpu.memory_space<vmem>>, vector<1x8x8xbf16>
    %910 = vector.shape_cast %909 : vector<1x8x8xbf16> to vector<8x8xbf16>
    %cst_247 = arith.constant dense<0.000000e+00> : vector<8x16xf32>
    %911 = tpu.matmul %910, %902, %cst_247 {dimension_numbers = #tpu.dot_dimension_numbers<[1], [0], [0], [1], [0, 0, 1, 1], [], []>} : vector<8x8xbf16>, vector<8x16xbf16>, vector<8x16xf32> -> vector<8x16xf32>
    %c1_248 = arith.constant 1 : index
    %c0_249 = arith.constant 0 : index
    %c0_250 = arith.constant 0 : index
    %912 = vector.load %arg58[%c1_248, %c0_249, %c0_250] : memref<4x16x64xf32, #tpu.memory_space<vmem>>, vector<1x16x64xf32>
    %913 = vector.shape_cast %912 : vector<1x16x64xf32> to vector<16x64xf32>
    %cst_251 = arith.constant dense<0.000000e+00> : vector<8x64xf32>
    %914 = tpu.matmul %911, %913, %cst_251 {dimension_numbers = #tpu.dot_dimension_numbers<[1], [0], [0], [1], [0, 0, 1, 1], [], []>} : vector<8x16xf32>, vector<16x64xf32>, vector<8x64xf32> -> vector<8x64xf32>
    %915 = arith.addf %908, %914 : vector<8x64xf32>
    %c2_252 = arith.constant 2 : index
    %c0_253 = arith.constant 0 : index
    %c0_254 = arith.constant 0 : index
    %916 = vector.load %arg42[%c2_252, %c0_253, %c0_254] : memref<4x8x8xbf16, #tpu.memory_space<vmem>>, vector<1x8x8xbf16>
    %917 = vector.shape_cast %916 : vector<1x8x8xbf16> to vector<8x8xbf16>
    %cst_255 = arith.constant dense<0.000000e+00> : vector<8x16xf32>
    %918 = tpu.matmul %917, %902, %cst_255 {dimension_numbers = #tpu.dot_dimension_numbers<[1], [0], [0], [1], [0, 0, 1, 1], [], []>} : vector<8x8xbf16>, vector<8x16xbf16>, vector<8x16xf32> -> vector<8x16xf32>
    %c2_256 = arith.constant 2 : index
    %c0_257 = arith.constant 0 : index
    %c0_258 = arith.constant 0 : index
    %919 = vector.load %arg58[%c2_256, %c0_257, %c0_258] : memref<4x16x64xf32, #tpu.memory_space<vmem>>, vector<1x16x64xf32>
    %920 = vector.shape_cast %919 : vector<1x16x64xf32> to vector<16x64xf32>
    %cst_259 = arith.constant dense<0.000000e+00> : vector<8x64xf32>
    %921 = tpu.matmul %918, %920, %cst_259 {dimension_numbers = #tpu.dot_dimension_numbers<[1], [0], [0], [1], [0, 0, 1, 1], [], []>} : vector<8x16xf32>, vector<16x64xf32>, vector<8x64xf32> -> vector<8x64xf32>
    %922 = arith.addf %915, %921 : vector<8x64xf32>
    %c3_260 = arith.constant 3 : index
    %c0_261 = arith.constant 0 : index
    %c0_262 = arith.constant 0 : index
    %923 = vector.load %arg42[%c3_260, %c0_261, %c0_262] : memref<4x8x8xbf16, #tpu.memory_space<vmem>>, vector<1x8x8xbf16>
    %924 = vector.shape_cast %923 : vector<1x8x8xbf16> to vector<8x8xbf16>
    %cst_263 = arith.constant dense<0.000000e+00> : vector<8x16xf32>
    %925 = tpu.matmul %924, %902, %cst_263 {dimension_numbers = #tpu.dot_dimension_numbers<[1], [0], [0], [1], [0, 0, 1, 1], [], []>} : vector<8x8xbf16>, vector<8x16xbf16>, vector<8x16xf32> -> vector<8x16xf32>
    %c3_264 = arith.constant 3 : index
    %c0_265 = arith.constant 0 : index
    %c0_266 = arith.constant 0 : index
    %926 = vector.load %arg58[%c3_264, %c0_265, %c0_266] : memref<4x16x64xf32, #tpu.memory_space<vmem>>, vector<1x16x64xf32>
    %927 = vector.shape_cast %926 : vector<1x16x64xf32> to vector<16x64xf32>
    %cst_267 = arith.constant dense<0.000000e+00> : vector<8x64xf32>
    %928 = tpu.matmul %925, %927, %cst_267 {dimension_numbers = #tpu.dot_dimension_numbers<[1], [0], [0], [1], [0, 0, 1, 1], [], []>} : vector<8x16xf32>, vector<16x64xf32>, vector<8x64xf32> -> vector<8x64xf32>
    %929 = arith.addf %922, %928 : vector<8x64xf32>
    %c0_268 = arith.constant 0 : index
    %c0_269 = arith.constant 0 : index
    %930 = vector.load %arg43[%c0_268, %c0_269] : memref<8x1xf32, #tpu.memory_space<vmem>>, vector<8x1xf32>
    %931 = vector.broadcast %930 : vector<8x1xf32> to vector<8x64xf32>
    %932 = arith.addf %929, %931 : vector<8x64xf32>
    %933 = tpu.concatenate %932, %239 in 0 : vector<8x64xf32>, vector<8x64xf32> -> vector<16x64xf32>
    %cst_270 = arith.constant 0.000000e+00 : f32
    %934 = vector.broadcast %cst_270 : f32 to vector<16x9xf32>
    %935 = tpu.concatenate %934, %933, %934 in 1 : vector<16x9xf32>, vector<16x64xf32>, vector<16x9xf32> -> vector<16x82xf32>
    %c0_271 = arith.constant 0 : index
    %c0_272 = arith.constant 0 : index
    %936 = vector.load %arg49[%c0_271, %c0_272] : memref<3x64xf32, #tpu.memory_space<vmem>>, vector<3x64xf32>
    %937 = vector.extract_strided_slice %935 {offsets = [0, 0], sizes = [16, 64], strides = [1, 1]} : vector<16x82xf32> to vector<16x64xf32>
    %938 = vector.extract_strided_slice %936 {offsets = [0, 0], sizes = [1, 64], strides = [1, 1]} : vector<3x64xf32> to vector<1x64xf32>
    %939 = vector.shape_cast %938 : vector<1x64xf32> to vector<64xf32>
    %940 = vector.shape_cast %939 : vector<64xf32> to vector<1x64xf32>
    %941 = vector.broadcast %940 : vector<1x64xf32> to vector<16x64xf32>
    %942 = arith.mulf %937, %941 : vector<16x64xf32>
    %943 = vector.extract_strided_slice %935 {offsets = [0, 1], sizes = [16, 64], strides = [1, 1]} : vector<16x82xf32> to vector<16x64xf32>
    %944 = vector.extract_strided_slice %935 {offsets = [0, 2], sizes = [16, 64], strides = [1, 1]} : vector<16x82xf32> to vector<16x64xf32>
    %945 = vector.extract_strided_slice %936 {offsets = [2, 0], sizes = [1, 64], strides = [1, 1]} : vector<3x64xf32> to vector<1x64xf32>
    %946 = vector.shape_cast %945 : vector<1x64xf32> to vector<64xf32>
    %947 = vector.shape_cast %946 : vector<64xf32> to vector<1x64xf32>
    %948 = vector.broadcast %947 : vector<1x64xf32> to vector<16x64xf32>
    %949 = arith.mulf %944, %948 : vector<16x64xf32>
    %950 = vector.extract_strided_slice %935 {offsets = [0, 8], sizes = [16, 64], strides = [1, 1]} : vector<16x82xf32> to vector<16x64xf32>
    %951 = vector.extract_strided_slice %936 {offsets = [0, 0], sizes = [1, 64], strides = [1, 1]} : vector<3x64xf32> to vector<1x64xf32>
    %952 = vector.shape_cast %951 : vector<1x64xf32> to vector<64xf32>
    %953 = vector.shape_cast %952 : vector<64xf32> to vector<1x64xf32>
    %954 = vector.broadcast %953 : vector<1x64xf32> to vector<16x64xf32>
    %955 = arith.mulf %950, %954 : vector<16x64xf32>
    %956 = vector.extract_strided_slice %935 {offsets = [0, 9], sizes = [16, 64], strides = [1, 1]} : vector<16x82xf32> to vector<16x64xf32>
    %957 = vector.extract_strided_slice %935 {offsets = [0, 10], sizes = [16, 64], strides = [1, 1]} : vector<16x82xf32> to vector<16x64xf32>
    %958 = vector.extract_strided_slice %936 {offsets = [2, 0], sizes = [1, 64], strides = [1, 1]} : vector<3x64xf32> to vector<1x64xf32>
    %959 = vector.shape_cast %958 : vector<1x64xf32> to vector<64xf32>
    %960 = vector.shape_cast %959 : vector<64xf32> to vector<1x64xf32>
    %961 = vector.broadcast %960 : vector<1x64xf32> to vector<16x64xf32>
    %962 = arith.mulf %957, %961 : vector<16x64xf32>
    %963 = vector.extract_strided_slice %935 {offsets = [0, 16], sizes = [16, 64], strides = [1, 1]} : vector<16x82xf32> to vector<16x64xf32>
    %964 = vector.extract_strided_slice %936 {offsets = [0, 0], sizes = [1, 64], strides = [1, 1]} : vector<3x64xf32> to vector<1x64xf32>
    %965 = vector.shape_cast %964 : vector<1x64xf32> to vector<64xf32>
    %966 = vector.shape_cast %965 : vector<64xf32> to vector<1x64xf32>
    %967 = vector.broadcast %966 : vector<1x64xf32> to vector<16x64xf32>
    %968 = arith.mulf %963, %967 : vector<16x64xf32>
    %969 = vector.extract_strided_slice %935 {offsets = [0, 17], sizes = [16, 64], strides = [1, 1]} : vector<16x82xf32> to vector<16x64xf32>
    %970 = vector.extract_strided_slice %935 {offsets = [0, 18], sizes = [16, 64], strides = [1, 1]} : vector<16x82xf32> to vector<16x64xf32>
    %971 = vector.extract_strided_slice %936 {offsets = [2, 0], sizes = [1, 64], strides = [1, 1]} : vector<3x64xf32> to vector<1x64xf32>
    %972 = vector.shape_cast %971 : vector<1x64xf32> to vector<64xf32>
    %973 = vector.shape_cast %972 : vector<64xf32> to vector<1x64xf32>
    %974 = vector.broadcast %973 : vector<1x64xf32> to vector<16x64xf32>
    %975 = arith.mulf %970, %974 : vector<16x64xf32>
    %976 = tpu.concatenate %942, %943, %949, %955, %956, %962, %968, %969, %975 in 0 : vector<16x64xf32>, vector<16x64xf32>, vector<16x64xf32>, vector<16x64xf32>, vector<16x64xf32>, vector<16x64xf32>, vector<16x64xf32>, vector<16x64xf32>, vector<16x64xf32> -> vector<144x64xf32>
    %977 = arith.truncf %976 : vector<144x64xf32> to vector<144x64xbf16>
    %c0_273 = arith.constant 0 : index
    %c0_274 = arith.constant 0 : index
    %978 = vector.load %arg30[%c0_273, %c0_274] : memref<8x144xbf16, #tpu.memory_space<vmem>>, vector<8x144xbf16>
    %cst_275 = arith.constant dense<0.000000e+00> : vector<8x64xf32>
    %979 = tpu.matmul %978, %977, %cst_275 {dimension_numbers = #tpu.dot_dimension_numbers<[1], [0], [0], [1], [0, 0, 1, 1], [], []>} : vector<8x144xbf16>, vector<144x64xbf16>, vector<8x64xf32> -> vector<8x64xf32>
    %c0_276 = arith.constant 0 : index
    %c0_277 = arith.constant 0 : index
    %980 = vector.load %arg31[%c0_276, %c0_277] : memref<8x1xf32, #tpu.memory_space<vmem>>, vector<8x1xf32>
    %981 = vector.broadcast %980 : vector<8x1xf32> to vector<8x64xf32>
    %982 = arith.addf %979, %981 : vector<8x64xf32>
    %cst_278 = arith.constant 0.000000e+00 : f32
    %983 = vector.broadcast %cst_278 : f32 to vector<8x64xf32>
    %984 = arith.cmpf ogt, %982, %983 : vector<8x64xf32>
    %cst_279 = arith.constant 0.000000e+00 : f32
    %985 = vector.broadcast %cst_279 : f32 to vector<8x64xf32>
    %986 = arith.minimumf %982, %985 : vector<8x64xf32>
    %987 = math.exp %986 : vector<8x64xf32>
    %cst_280 = arith.constant 1.000000e+00 : f32
    %988 = vector.broadcast %cst_280 : f32 to vector<8x64xf32>
    %989 = arith.subf %987, %988 : vector<8x64xf32>
    %990 = arith.select %984, %982, %989 : vector<8x64xi1>, vector<8x64xf32>
    %cst_281 = arith.constant 0.000000e+00 : f32
    %991 = vector.broadcast %cst_281 : f32 to vector<8x9xf32>
    %992 = tpu.concatenate %991, %990, %991 in 1 : vector<8x9xf32>, vector<8x64xf32>, vector<8x9xf32> -> vector<8x82xf32>
    %c0_282 = arith.constant 0 : index
    %c0_283 = arith.constant 0 : index
    %993 = vector.load %arg49[%c0_282, %c0_283] : memref<3x64xf32, #tpu.memory_space<vmem>>, vector<3x64xf32>
    %994 = vector.extract_strided_slice %992 {offsets = [0, 0], sizes = [8, 64], strides = [1, 1]} : vector<8x82xf32> to vector<8x64xf32>
    %995 = vector.extract_strided_slice %993 {offsets = [0, 0], sizes = [1, 64], strides = [1, 1]} : vector<3x64xf32> to vector<1x64xf32>
    %996 = vector.shape_cast %995 : vector<1x64xf32> to vector<64xf32>
    %997 = vector.shape_cast %996 : vector<64xf32> to vector<1x64xf32>
    %998 = vector.broadcast %997 : vector<1x64xf32> to vector<8x64xf32>
    %999 = arith.mulf %994, %998 : vector<8x64xf32>
    %1000 = vector.extract_strided_slice %992 {offsets = [0, 1], sizes = [8, 64], strides = [1, 1]} : vector<8x82xf32> to vector<8x64xf32>
    %1001 = vector.extract_strided_slice %992 {offsets = [0, 2], sizes = [8, 64], strides = [1, 1]} : vector<8x82xf32> to vector<8x64xf32>
    %1002 = vector.extract_strided_slice %993 {offsets = [2, 0], sizes = [1, 64], strides = [1, 1]} : vector<3x64xf32> to vector<1x64xf32>
    %1003 = vector.shape_cast %1002 : vector<1x64xf32> to vector<64xf32>
    %1004 = vector.shape_cast %1003 : vector<64xf32> to vector<1x64xf32>
    %1005 = vector.broadcast %1004 : vector<1x64xf32> to vector<8x64xf32>
    %1006 = arith.mulf %1001, %1005 : vector<8x64xf32>
    %1007 = vector.extract_strided_slice %992 {offsets = [0, 8], sizes = [8, 64], strides = [1, 1]} : vector<8x82xf32> to vector<8x64xf32>
    %1008 = vector.extract_strided_slice %993 {offsets = [0, 0], sizes = [1, 64], strides = [1, 1]} : vector<3x64xf32> to vector<1x64xf32>
    %1009 = vector.shape_cast %1008 : vector<1x64xf32> to vector<64xf32>
    %1010 = vector.shape_cast %1009 : vector<64xf32> to vector<1x64xf32>
    %1011 = vector.broadcast %1010 : vector<1x64xf32> to vector<8x64xf32>
    %1012 = arith.mulf %1007, %1011 : vector<8x64xf32>
    %1013 = vector.extract_strided_slice %992 {offsets = [0, 9], sizes = [8, 64], strides = [1, 1]} : vector<8x82xf32> to vector<8x64xf32>
    %1014 = vector.extract_strided_slice %992 {offsets = [0, 10], sizes = [8, 64], strides = [1, 1]} : vector<8x82xf32> to vector<8x64xf32>
    %1015 = vector.extract_strided_slice %993 {offsets = [2, 0], sizes = [1, 64], strides = [1, 1]} : vector<3x64xf32> to vector<1x64xf32>
    %1016 = vector.shape_cast %1015 : vector<1x64xf32> to vector<64xf32>
    %1017 = vector.shape_cast %1016 : vector<64xf32> to vector<1x64xf32>
    %1018 = vector.broadcast %1017 : vector<1x64xf32> to vector<8x64xf32>
    %1019 = arith.mulf %1014, %1018 : vector<8x64xf32>
    %1020 = vector.extract_strided_slice %992 {offsets = [0, 16], sizes = [8, 64], strides = [1, 1]} : vector<8x82xf32> to vector<8x64xf32>
    %1021 = vector.extract_strided_slice %993 {offsets = [0, 0], sizes = [1, 64], strides = [1, 1]} : vector<3x64xf32> to vector<1x64xf32>
    %1022 = vector.shape_cast %1021 : vector<1x64xf32> to vector<64xf32>
    %1023 = vector.shape_cast %1022 : vector<64xf32> to vector<1x64xf32>
    %1024 = vector.broadcast %1023 : vector<1x64xf32> to vector<8x64xf32>
    %1025 = arith.mulf %1020, %1024 : vector<8x64xf32>
    %1026 = vector.extract_strided_slice %992 {offsets = [0, 17], sizes = [8, 64], strides = [1, 1]} : vector<8x82xf32> to vector<8x64xf32>
    %1027 = vector.extract_strided_slice %992 {offsets = [0, 18], sizes = [8, 64], strides = [1, 1]} : vector<8x82xf32> to vector<8x64xf32>
    %1028 = vector.extract_strided_slice %993 {offsets = [2, 0], sizes = [1, 64], strides = [1, 1]} : vector<3x64xf32> to vector<1x64xf32>
    %1029 = vector.shape_cast %1028 : vector<1x64xf32> to vector<64xf32>
    %1030 = vector.shape_cast %1029 : vector<64xf32> to vector<1x64xf32>
    %1031 = vector.broadcast %1030 : vector<1x64xf32> to vector<8x64xf32>
    %1032 = arith.mulf %1027, %1031 : vector<8x64xf32>
    %1033 = tpu.concatenate %999, %1000, %1006, %1012, %1013, %1019, %1025, %1026, %1032 in 0 : vector<8x64xf32>, vector<8x64xf32>, vector<8x64xf32>, vector<8x64xf32>, vector<8x64xf32>, vector<8x64xf32>, vector<8x64xf32>, vector<8x64xf32>, vector<8x64xf32> -> vector<72x64xf32>
    %1034 = arith.truncf %1033 : vector<72x64xf32> to vector<72x64xbf16>
    %c0_284 = arith.constant 0 : index
    %c0_285 = arith.constant 0 : index
    %1035 = vector.load %arg32[%c0_284, %c0_285] : memref<4x72xbf16, #tpu.memory_space<vmem>>, vector<4x72xbf16>
    %cst_286 = arith.constant dense<0.000000e+00> : vector<4x64xf32>
    %1036 = tpu.matmul %1035, %1034, %cst_286 {dimension_numbers = #tpu.dot_dimension_numbers<[1], [0], [0], [1], [0, 0, 1, 1], [], []>} : vector<4x72xbf16>, vector<72x64xbf16>, vector<4x64xf32> -> vector<4x64xf32>
    %c0_287 = arith.constant 0 : index
    %c0_288 = arith.constant 0 : index
    %1037 = vector.load %arg33[%c0_287, %c0_288] : memref<4x1xf32, #tpu.memory_space<vmem>>, vector<4x1xf32>
    %1038 = vector.broadcast %1037 : vector<4x1xf32> to vector<4x64xf32>
    %1039 = arith.addf %1036, %1038 : vector<4x64xf32>
    %cst_289 = arith.constant 0.000000e+00 : f32
    %1040 = vector.broadcast %cst_289 : f32 to vector<4x64xf32>
    %1041 = arith.cmpf ogt, %1039, %1040 : vector<4x64xf32>
    %cst_290 = arith.constant 0.000000e+00 : f32
    %1042 = vector.broadcast %cst_290 : f32 to vector<4x64xf32>
    %1043 = arith.minimumf %1039, %1042 : vector<4x64xf32>
    %1044 = math.exp %1043 : vector<4x64xf32>
    %cst_291 = arith.constant 1.000000e+00 : f32
    %1045 = vector.broadcast %cst_291 : f32 to vector<4x64xf32>
    %1046 = arith.subf %1044, %1045 : vector<4x64xf32>
    %1047 = arith.select %1041, %1039, %1046 : vector<4x64xi1>, vector<4x64xf32>
    %1048 = arith.truncf %1047 : vector<4x64xf32> to vector<4x64xbf16>
    %c0_292 = arith.constant 0 : index
    %c0_293 = arith.constant 0 : index
    %c0_294 = arith.constant 0 : index
    %1049 = vector.load %arg44[%c0_292, %c0_293, %c0_294] : memref<4x4x4xbf16, #tpu.memory_space<vmem>>, vector<1x4x4xbf16>
    %1050 = vector.shape_cast %1049 : vector<1x4x4xbf16> to vector<4x4xbf16>
    %cst_295 = arith.constant dense<0.000000e+00> : vector<4x64xf32>
    %1051 = tpu.matmul %1050, %1048, %cst_295 {dimension_numbers = #tpu.dot_dimension_numbers<[1], [0], [0], [1], [0, 0, 1, 1], [], []>} : vector<4x4xbf16>, vector<4x64xbf16>, vector<4x64xf32> -> vector<4x64xf32>
    %c0_296 = arith.constant 0 : index
    %c0_297 = arith.constant 0 : index
    %c0_298 = arith.constant 0 : index
    %1052 = vector.load %arg57[%c0_296, %c0_297, %c0_298] : memref<4x64x256xf32, #tpu.memory_space<vmem>>, vector<1x64x256xf32>
    %1053 = vector.shape_cast %1052 : vector<1x64x256xf32> to vector<64x256xf32>
    %cst_299 = arith.constant dense<0.000000e+00> : vector<4x256xf32>
    %1054 = tpu.matmul %1051, %1053, %cst_299 {dimension_numbers = #tpu.dot_dimension_numbers<[1], [0], [0], [1], [0, 0, 1, 1], [], []>} : vector<4x64xf32>, vector<64x256xf32>, vector<4x256xf32> -> vector<4x256xf32>
    %c1_300 = arith.constant 1 : index
    %c0_301 = arith.constant 0 : index
    %c0_302 = arith.constant 0 : index
    %1055 = vector.load %arg44[%c1_300, %c0_301, %c0_302] : memref<4x4x4xbf16, #tpu.memory_space<vmem>>, vector<1x4x4xbf16>
    %1056 = vector.shape_cast %1055 : vector<1x4x4xbf16> to vector<4x4xbf16>
    %cst_303 = arith.constant dense<0.000000e+00> : vector<4x64xf32>
    %1057 = tpu.matmul %1056, %1048, %cst_303 {dimension_numbers = #tpu.dot_dimension_numbers<[1], [0], [0], [1], [0, 0, 1, 1], [], []>} : vector<4x4xbf16>, vector<4x64xbf16>, vector<4x64xf32> -> vector<4x64xf32>
    %c1_304 = arith.constant 1 : index
    %c0_305 = arith.constant 0 : index
    %c0_306 = arith.constant 0 : index
    %1058 = vector.load %arg57[%c1_304, %c0_305, %c0_306] : memref<4x64x256xf32, #tpu.memory_space<vmem>>, vector<1x64x256xf32>
    %1059 = vector.shape_cast %1058 : vector<1x64x256xf32> to vector<64x256xf32>
    %cst_307 = arith.constant dense<0.000000e+00> : vector<4x256xf32>
    %1060 = tpu.matmul %1057, %1059, %cst_307 {dimension_numbers = #tpu.dot_dimension_numbers<[1], [0], [0], [1], [0, 0, 1, 1], [], []>} : vector<4x64xf32>, vector<64x256xf32>, vector<4x256xf32> -> vector<4x256xf32>
    %1061 = arith.addf %1054, %1060 : vector<4x256xf32>
    %c2_308 = arith.constant 2 : index
    %c0_309 = arith.constant 0 : index
    %c0_310 = arith.constant 0 : index
    %1062 = vector.load %arg44[%c2_308, %c0_309, %c0_310] : memref<4x4x4xbf16, #tpu.memory_space<vmem>>, vector<1x4x4xbf16>
    %1063 = vector.shape_cast %1062 : vector<1x4x4xbf16> to vector<4x4xbf16>
    %cst_311 = arith.constant dense<0.000000e+00> : vector<4x64xf32>
    %1064 = tpu.matmul %1063, %1048, %cst_311 {dimension_numbers = #tpu.dot_dimension_numbers<[1], [0], [0], [1], [0, 0, 1, 1], [], []>} : vector<4x4xbf16>, vector<4x64xbf16>, vector<4x64xf32> -> vector<4x64xf32>
    %c2_312 = arith.constant 2 : index
    %c0_313 = arith.constant 0 : index
    %c0_314 = arith.constant 0 : index
    %1065 = vector.load %arg57[%c2_312, %c0_313, %c0_314] : memref<4x64x256xf32, #tpu.memory_space<vmem>>, vector<1x64x256xf32>
    %1066 = vector.shape_cast %1065 : vector<1x64x256xf32> to vector<64x256xf32>
    %cst_315 = arith.constant dense<0.000000e+00> : vector<4x256xf32>
    %1067 = tpu.matmul %1064, %1066, %cst_315 {dimension_numbers = #tpu.dot_dimension_numbers<[1], [0], [0], [1], [0, 0, 1, 1], [], []>} : vector<4x64xf32>, vector<64x256xf32>, vector<4x256xf32> -> vector<4x256xf32>
    %1068 = arith.addf %1061, %1067 : vector<4x256xf32>
    %c3_316 = arith.constant 3 : index
    %c0_317 = arith.constant 0 : index
    %c0_318 = arith.constant 0 : index
    %1069 = vector.load %arg44[%c3_316, %c0_317, %c0_318] : memref<4x4x4xbf16, #tpu.memory_space<vmem>>, vector<1x4x4xbf16>
    %1070 = vector.shape_cast %1069 : vector<1x4x4xbf16> to vector<4x4xbf16>
    %cst_319 = arith.constant dense<0.000000e+00> : vector<4x64xf32>
    %1071 = tpu.matmul %1070, %1048, %cst_319 {dimension_numbers = #tpu.dot_dimension_numbers<[1], [0], [0], [1], [0, 0, 1, 1], [], []>} : vector<4x4xbf16>, vector<4x64xbf16>, vector<4x64xf32> -> vector<4x64xf32>
    %c3_320 = arith.constant 3 : index
    %c0_321 = arith.constant 0 : index
    %c0_322 = arith.constant 0 : index
    %1072 = vector.load %arg57[%c3_320, %c0_321, %c0_322] : memref<4x64x256xf32, #tpu.memory_space<vmem>>, vector<1x64x256xf32>
    %1073 = vector.shape_cast %1072 : vector<1x64x256xf32> to vector<64x256xf32>
    %cst_323 = arith.constant dense<0.000000e+00> : vector<4x256xf32>
    %1074 = tpu.matmul %1071, %1073, %cst_323 {dimension_numbers = #tpu.dot_dimension_numbers<[1], [0], [0], [1], [0, 0, 1, 1], [], []>} : vector<4x64xf32>, vector<64x256xf32>, vector<4x256xf32> -> vector<4x256xf32>
    %1075 = arith.addf %1068, %1074 : vector<4x256xf32>
    %c0_324 = arith.constant 0 : index
    %c0_325 = arith.constant 0 : index
    %1076 = vector.load %arg45[%c0_324, %c0_325] : memref<4x1xf32, #tpu.memory_space<vmem>>, vector<4x1xf32>
    %1077 = vector.broadcast %1076 : vector<4x1xf32> to vector<4x256xf32>
    %1078 = arith.addf %1075, %1077 : vector<4x256xf32>
    %1079 = tpu.concatenate %1078, %115 in 0 : vector<4x256xf32>, vector<4x256xf32> -> vector<8x256xf32>
    %cst_326 = arith.constant 0.000000e+00 : f32
    %1080 = vector.broadcast %cst_326 : f32 to vector<8x17xf32>
    %1081 = tpu.concatenate %1080, %1079, %1080 in 1 : vector<8x17xf32>, vector<8x256xf32>, vector<8x17xf32> -> vector<8x290xf32>
    %c0_327 = arith.constant 0 : index
    %c0_328 = arith.constant 0 : index
    %1082 = vector.load %arg48[%c0_327, %c0_328] : memref<3x256xf32, #tpu.memory_space<vmem>>, vector<3x256xf32>
    %1083 = vector.extract_strided_slice %1081 {offsets = [0, 0], sizes = [8, 256], strides = [1, 1]} : vector<8x290xf32> to vector<8x256xf32>
    %1084 = vector.extract_strided_slice %1082 {offsets = [0, 0], sizes = [1, 256], strides = [1, 1]} : vector<3x256xf32> to vector<1x256xf32>
    %1085 = vector.shape_cast %1084 : vector<1x256xf32> to vector<256xf32>
    %1086 = vector.shape_cast %1085 : vector<256xf32> to vector<1x256xf32>
    %1087 = vector.broadcast %1086 : vector<1x256xf32> to vector<8x256xf32>
    %1088 = arith.mulf %1083, %1087 : vector<8x256xf32>
    %1089 = vector.extract_strided_slice %1081 {offsets = [0, 1], sizes = [8, 256], strides = [1, 1]} : vector<8x290xf32> to vector<8x256xf32>
    %1090 = vector.extract_strided_slice %1081 {offsets = [0, 2], sizes = [8, 256], strides = [1, 1]} : vector<8x290xf32> to vector<8x256xf32>
    %1091 = vector.extract_strided_slice %1082 {offsets = [2, 0], sizes = [1, 256], strides = [1, 1]} : vector<3x256xf32> to vector<1x256xf32>
    %1092 = vector.shape_cast %1091 : vector<1x256xf32> to vector<256xf32>
    %1093 = vector.shape_cast %1092 : vector<256xf32> to vector<1x256xf32>
    %1094 = vector.broadcast %1093 : vector<1x256xf32> to vector<8x256xf32>
    %1095 = arith.mulf %1090, %1094 : vector<8x256xf32>
    %1096 = vector.extract_strided_slice %1081 {offsets = [0, 16], sizes = [8, 256], strides = [1, 1]} : vector<8x290xf32> to vector<8x256xf32>
    %1097 = vector.extract_strided_slice %1082 {offsets = [0, 0], sizes = [1, 256], strides = [1, 1]} : vector<3x256xf32> to vector<1x256xf32>
    %1098 = vector.shape_cast %1097 : vector<1x256xf32> to vector<256xf32>
    %1099 = vector.shape_cast %1098 : vector<256xf32> to vector<1x256xf32>
    %1100 = vector.broadcast %1099 : vector<1x256xf32> to vector<8x256xf32>
    %1101 = arith.mulf %1096, %1100 : vector<8x256xf32>
    %1102 = vector.extract_strided_slice %1081 {offsets = [0, 17], sizes = [8, 256], strides = [1, 1]} : vector<8x290xf32> to vector<8x256xf32>
    %1103 = vector.extract_strided_slice %1081 {offsets = [0, 18], sizes = [8, 256], strides = [1, 1]} : vector<8x290xf32> to vector<8x256xf32>
    %1104 = vector.extract_strided_slice %1082 {offsets = [2, 0], sizes = [1, 256], strides = [1, 1]} : vector<3x256xf32> to vector<1x256xf32>
    %1105 = vector.shape_cast %1104 : vector<1x256xf32> to vector<256xf32>
    %1106 = vector.shape_cast %1105 : vector<256xf32> to vector<1x256xf32>
    %1107 = vector.broadcast %1106 : vector<1x256xf32> to vector<8x256xf32>
    %1108 = arith.mulf %1103, %1107 : vector<8x256xf32>
    %1109 = vector.extract_strided_slice %1081 {offsets = [0, 32], sizes = [8, 256], strides = [1, 1]} : vector<8x290xf32> to vector<8x256xf32>
    %1110 = vector.extract_strided_slice %1082 {offsets = [0, 0], sizes = [1, 256], strides = [1, 1]} : vector<3x256xf32> to vector<1x256xf32>
    %1111 = vector.shape_cast %1110 : vector<1x256xf32> to vector<256xf32>
    %1112 = vector.shape_cast %1111 : vector<256xf32> to vector<1x256xf32>
    %1113 = vector.broadcast %1112 : vector<1x256xf32> to vector<8x256xf32>
    %1114 = arith.mulf %1109, %1113 : vector<8x256xf32>
    %1115 = vector.extract_strided_slice %1081 {offsets = [0, 33], sizes = [8, 256], strides = [1, 1]} : vector<8x290xf32> to vector<8x256xf32>
    %1116 = vector.extract_strided_slice %1081 {offsets = [0, 34], sizes = [8, 256], strides = [1, 1]} : vector<8x290xf32> to vector<8x256xf32>
    %1117 = vector.extract_strided_slice %1082 {offsets = [2, 0], sizes = [1, 256], strides = [1, 1]} : vector<3x256xf32> to vector<1x256xf32>
    %1118 = vector.shape_cast %1117 : vector<1x256xf32> to vector<256xf32>
    %1119 = vector.shape_cast %1118 : vector<256xf32> to vector<1x256xf32>
    %1120 = vector.broadcast %1119 : vector<1x256xf32> to vector<8x256xf32>
    %1121 = arith.mulf %1116, %1120 : vector<8x256xf32>
    %1122 = tpu.concatenate %1088, %1089, %1095, %1101, %1102, %1108, %1114, %1115, %1121 in 0 : vector<8x256xf32>, vector<8x256xf32>, vector<8x256xf32>, vector<8x256xf32>, vector<8x256xf32>, vector<8x256xf32>, vector<8x256xf32>, vector<8x256xf32>, vector<8x256xf32> -> vector<72x256xf32>
    %1123 = arith.truncf %1122 : vector<72x256xf32> to vector<72x256xbf16>
    %c0_329 = arith.constant 0 : index
    %c0_330 = arith.constant 0 : index
    %1124 = vector.load %arg34[%c0_329, %c0_330] : memref<4x72xbf16, #tpu.memory_space<vmem>>, vector<4x72xbf16>
    %cst_331 = arith.constant dense<0.000000e+00> : vector<4x256xf32>
    %1125 = tpu.matmul %1124, %1123, %cst_331 {dimension_numbers = #tpu.dot_dimension_numbers<[1], [0], [0], [1], [0, 0, 1, 1], [], []>} : vector<4x72xbf16>, vector<72x256xbf16>, vector<4x256xf32> -> vector<4x256xf32>
    %c0_332 = arith.constant 0 : index
    %c0_333 = arith.constant 0 : index
    %1126 = vector.load %arg35[%c0_332, %c0_333] : memref<4x1xf32, #tpu.memory_space<vmem>>, vector<4x1xf32>
    %1127 = vector.broadcast %1126 : vector<4x1xf32> to vector<4x256xf32>
    %1128 = arith.addf %1125, %1127 : vector<4x256xf32>
    %cst_334 = arith.constant 0.000000e+00 : f32
    %1129 = vector.broadcast %cst_334 : f32 to vector<4x256xf32>
    %1130 = arith.cmpf ogt, %1128, %1129 : vector<4x256xf32>
    %cst_335 = arith.constant 0.000000e+00 : f32
    %1131 = vector.broadcast %cst_335 : f32 to vector<4x256xf32>
    %1132 = arith.minimumf %1128, %1131 : vector<4x256xf32>
    %1133 = math.exp %1132 : vector<4x256xf32>
    %cst_336 = arith.constant 1.000000e+00 : f32
    %1134 = vector.broadcast %cst_336 : f32 to vector<4x256xf32>
    %1135 = arith.subf %1133, %1134 : vector<4x256xf32>
    %1136 = arith.select %1130, %1128, %1135 : vector<4x256xi1>, vector<4x256xf32>
    %cst_337 = arith.constant 0.000000e+00 : f32
    %1137 = vector.broadcast %cst_337 : f32 to vector<4x17xf32>
    %1138 = tpu.concatenate %1137, %1136, %1137 in 1 : vector<4x17xf32>, vector<4x256xf32>, vector<4x17xf32> -> vector<4x290xf32>
    %c0_338 = arith.constant 0 : index
    %c0_339 = arith.constant 0 : index
    %1139 = vector.load %arg48[%c0_338, %c0_339] : memref<3x256xf32, #tpu.memory_space<vmem>>, vector<3x256xf32>
    %1140 = vector.extract_strided_slice %1138 {offsets = [0, 0], sizes = [4, 256], strides = [1, 1]} : vector<4x290xf32> to vector<4x256xf32>
    %1141 = vector.extract_strided_slice %1139 {offsets = [0, 0], sizes = [1, 256], strides = [1, 1]} : vector<3x256xf32> to vector<1x256xf32>
    %1142 = vector.shape_cast %1141 : vector<1x256xf32> to vector<256xf32>
    %1143 = vector.shape_cast %1142 : vector<256xf32> to vector<1x256xf32>
    %1144 = vector.broadcast %1143 : vector<1x256xf32> to vector<4x256xf32>
    %1145 = arith.mulf %1140, %1144 : vector<4x256xf32>
    %1146 = vector.extract_strided_slice %1138 {offsets = [0, 1], sizes = [4, 256], strides = [1, 1]} : vector<4x290xf32> to vector<4x256xf32>
    %1147 = vector.extract_strided_slice %1138 {offsets = [0, 2], sizes = [4, 256], strides = [1, 1]} : vector<4x290xf32> to vector<4x256xf32>
    %1148 = vector.extract_strided_slice %1139 {offsets = [2, 0], sizes = [1, 256], strides = [1, 1]} : vector<3x256xf32> to vector<1x256xf32>
    %1149 = vector.shape_cast %1148 : vector<1x256xf32> to vector<256xf32>
    %1150 = vector.shape_cast %1149 : vector<256xf32> to vector<1x256xf32>
    %1151 = vector.broadcast %1150 : vector<1x256xf32> to vector<4x256xf32>
    %1152 = arith.mulf %1147, %1151 : vector<4x256xf32>
    %1153 = vector.extract_strided_slice %1138 {offsets = [0, 16], sizes = [4, 256], strides = [1, 1]} : vector<4x290xf32> to vector<4x256xf32>
    %1154 = vector.extract_strided_slice %1139 {offsets = [0, 0], sizes = [1, 256], strides = [1, 1]} : vector<3x256xf32> to vector<1x256xf32>
    %1155 = vector.shape_cast %1154 : vector<1x256xf32> to vector<256xf32>
    %1156 = vector.shape_cast %1155 : vector<256xf32> to vector<1x256xf32>
    %1157 = vector.broadcast %1156 : vector<1x256xf32> to vector<4x256xf32>
    %1158 = arith.mulf %1153, %1157 : vector<4x256xf32>
    %1159 = vector.extract_strided_slice %1138 {offsets = [0, 17], sizes = [4, 256], strides = [1, 1]} : vector<4x290xf32> to vector<4x256xf32>
    %1160 = vector.extract_strided_slice %1138 {offsets = [0, 18], sizes = [4, 256], strides = [1, 1]} : vector<4x290xf32> to vector<4x256xf32>
    %1161 = vector.extract_strided_slice %1139 {offsets = [2, 0], sizes = [1, 256], strides = [1, 1]} : vector<3x256xf32> to vector<1x256xf32>
    %1162 = vector.shape_cast %1161 : vector<1x256xf32> to vector<256xf32>
    %1163 = vector.shape_cast %1162 : vector<256xf32> to vector<1x256xf32>
    %1164 = vector.broadcast %1163 : vector<1x256xf32> to vector<4x256xf32>
    %1165 = arith.mulf %1160, %1164 : vector<4x256xf32>
    %1166 = vector.extract_strided_slice %1138 {offsets = [0, 32], sizes = [4, 256], strides = [1, 1]} : vector<4x290xf32> to vector<4x256xf32>
    %1167 = vector.extract_strided_slice %1139 {offsets = [0, 0], sizes = [1, 256], strides = [1, 1]} : vector<3x256xf32> to vector<1x256xf32>
    %1168 = vector.shape_cast %1167 : vector<1x256xf32> to vector<256xf32>
    %1169 = vector.shape_cast %1168 : vector<256xf32> to vector<1x256xf32>
    %1170 = vector.broadcast %1169 : vector<1x256xf32> to vector<4x256xf32>
    %1171 = arith.mulf %1166, %1170 : vector<4x256xf32>
    %1172 = vector.extract_strided_slice %1138 {offsets = [0, 33], sizes = [4, 256], strides = [1, 1]} : vector<4x290xf32> to vector<4x256xf32>
    %1173 = vector.extract_strided_slice %1138 {offsets = [0, 34], sizes = [4, 256], strides = [1, 1]} : vector<4x290xf32> to vector<4x256xf32>
    %1174 = vector.extract_strided_slice %1139 {offsets = [2, 0], sizes = [1, 256], strides = [1, 1]} : vector<3x256xf32> to vector<1x256xf32>
    %1175 = vector.shape_cast %1174 : vector<1x256xf32> to vector<256xf32>
    %1176 = vector.shape_cast %1175 : vector<256xf32> to vector<1x256xf32>
    %1177 = vector.broadcast %1176 : vector<1x256xf32> to vector<4x256xf32>
    %1178 = arith.mulf %1173, %1177 : vector<4x256xf32>
    %1179 = tpu.concatenate %1145, %1146, %1152, %1158, %1159, %1165, %1171, %1172, %1178 in 0 : vector<4x256xf32>, vector<4x256xf32>, vector<4x256xf32>, vector<4x256xf32>, vector<4x256xf32>, vector<4x256xf32>, vector<4x256xf32>, vector<4x256xf32>, vector<4x256xf32> -> vector<36x256xf32>
    %1180 = arith.truncf %1179 : vector<36x256xf32> to vector<36x256xbf16>
    %c0_340 = arith.constant 0 : index
    %c0_341 = arith.constant 0 : index
    %1181 = vector.load %arg36[%c0_340, %c0_341] : memref<4x36xbf16, #tpu.memory_space<vmem>>, vector<4x36xbf16>
    %cst_342 = arith.constant dense<0.000000e+00> : vector<4x256xf32>
    %1182 = tpu.matmul %1181, %1180, %cst_342 {dimension_numbers = #tpu.dot_dimension_numbers<[1], [0], [0], [1], [0, 0, 1, 1], [], []>} : vector<4x36xbf16>, vector<36x256xbf16>, vector<4x256xf32> -> vector<4x256xf32>
    %c0_343 = arith.constant 0 : index
    %c0_344 = arith.constant 0 : index
    %1183 = vector.load %arg37[%c0_343, %c0_344] : memref<4x1xf32, #tpu.memory_space<vmem>>, vector<4x1xf32>
    %1184 = vector.broadcast %1183 : vector<4x1xf32> to vector<4x256xf32>
    %1185 = arith.addf %1182, %1184 : vector<4x256xf32>
    %cst_345 = arith.constant 0.000000e+00 : f32
    %1186 = vector.broadcast %cst_345 : f32 to vector<4x256xf32>
    %1187 = arith.cmpf ogt, %1185, %1186 : vector<4x256xf32>
    %cst_346 = arith.constant 0.000000e+00 : f32
    %1188 = vector.broadcast %cst_346 : f32 to vector<4x256xf32>
    %1189 = arith.minimumf %1185, %1188 : vector<4x256xf32>
    %1190 = math.exp %1189 : vector<4x256xf32>
    %cst_347 = arith.constant 1.000000e+00 : f32
    %1191 = vector.broadcast %cst_347 : f32 to vector<4x256xf32>
    %1192 = arith.subf %1190, %1191 : vector<4x256xf32>
    %1193 = arith.select %1187, %1185, %1192 : vector<4x256xi1>, vector<4x256xf32>
    %c0_348 = arith.constant 0 : index
    %c0_349 = arith.constant 0 : index
    %1194 = vector.load %arg46[%c0_348, %c0_349] : memref<1x4xbf16, #tpu.memory_space<vmem>>, vector<1x4xbf16>
    %1195 = arith.truncf %1193 : vector<4x256xf32> to vector<4x256xbf16>
    %cst_350 = arith.constant dense<0.000000e+00> : vector<1x256xf32>
    %1196 = tpu.matmul %1194, %1195, %cst_350 {dimension_numbers = #tpu.dot_dimension_numbers<[1], [0], [0], [1], [0, 0, 1, 1], [], []>} : vector<1x4xbf16>, vector<4x256xbf16>, vector<1x256xf32> -> vector<1x256xf32>
    %c0_351 = arith.constant 0 : index
    %c0_352 = arith.constant 0 : index
    %1197 = vector.load %arg47[%c0_351, %c0_352] : memref<1x1xf32, #tpu.memory_space<vmem>>, vector<1x1xf32>
    %1198 = vector.broadcast %1197 : vector<1x1xf32> to vector<1x256xf32>
    %1199 = arith.addf %1196, %1198 : vector<1x256xf32>
    %c0_353 = arith.constant 0 : index
    %c0_354 = arith.constant 0 : index
    %c0_355 = arith.constant 0 : index
    %1200 = vector.load %arg61[%c0_353, %c0_354, %c0_355] : memref<1x1x256xf32, #tpu.memory_space<vmem>>, vector<1x1x256xf32>
    %1201 = vector.shape_cast %1200 : vector<1x1x256xf32> to vector<1x256xf32>
    %1202 = vector.shape_cast %1199 : vector<1x256xf32> to vector<1x1x256xf32>
    tpu.vector_store %arg61[%c0_353, %c0_354, %c0_355], %1202 {strides = array<i32>} : memref<1x1x256xf32, #tpu.memory_space<vmem>>, vector<1x1x256xf32>,
    return
  }
  func.func @transform_0(%arg0: i32) -> (i32, i32, i32) {
    %c0_i32 = arith.constant 0 : i32
    %c0_i32_0 = arith.constant 0 : i32
    %c0_i32_1 = arith.constant 0 : i32
    return %arg0, %c0_i32, %c0_i32_0 : i32, i32, i32
  }
  func.func @transform_1(%arg0: i32) -> (i32, i32) {
    %c0_i32 = arith.constant 0 : i32
    %c0_i32_0 = arith.constant 0 : i32
    %c0_i32_1 = arith.constant 0 : i32
    return %c0_i32, %c0_i32_0 : i32, i32
  }
  func.func @transform_2(%arg0: i32) -> (i32, i32) {
    %c0_i32 = arith.constant 0 : i32
    %c0_i32_0 = arith.constant 0 : i32
    %c0_i32_1 = arith.constant 0 : i32
    return %c0_i32, %c0_i32_0 : i32, i32
  }
  func.func @transform_3(%arg0: i32) -> (i32, i32) {
    %c0_i32 = arith.constant 0 : i32
    %c0_i32_0 = arith.constant 0 : i32
    %c0_i32_1 = arith.constant 0 : i32
    return %c0_i32, %c0_i32_0 : i32, i32
  }
  func.func @transform_4(%arg0: i32) -> (i32, i32) {
    %c0_i32 = arith.constant 0 : i32
    %c0_i32_0 = arith.constant 0 : i32
    %c0_i32_1 = arith.constant 0 : i32
    return %c0_i32, %c0_i32_0 : i32, i32
  }
  func.func @transform_5(%arg0: i32) -> (i32, i32) {
    %c0_i32 = arith.constant 0 : i32
    %c0_i32_0 = arith.constant 0 : i32
    %c0_i32_1 = arith.constant 0 : i32
    return %c0_i32, %c0_i32_0 : i32, i32
  }
  func.func @transform_6(%arg0: i32) -> (i32, i32) {
    %c0_i32 = arith.constant 0 : i32
    %c0_i32_0 = arith.constant 0 : i32
    %c0_i32_1 = arith.constant 0 : i32
    return %c0_i32, %c0_i32_0 : i32, i32
  }
  func.func @transform_7(%arg0: i32) -> (i32, i32) {
    %c0_i32 = arith.constant 0 : i32
    %c0_i32_0 = arith.constant 0 : i32
    %c0_i32_1 = arith.constant 0 : i32
    return %c0_i32, %c0_i32_0 : i32, i32
  }
  func.func @transform_8(%arg0: i32) -> (i32, i32) {
    %c0_i32 = arith.constant 0 : i32
    %c0_i32_0 = arith.constant 0 : i32
    %c0_i32_1 = arith.constant 0 : i32
    return %c0_i32, %c0_i32_0 : i32, i32
  }
  func.func @transform_9(%arg0: i32) -> (i32, i32) {
    %c0_i32 = arith.constant 0 : i32
    %c0_i32_0 = arith.constant 0 : i32
    %c0_i32_1 = arith.constant 0 : i32
    return %c0_i32, %c0_i32_0 : i32, i32
  }
  func.func @transform_10(%arg0: i32) -> (i32, i32) {
    %c0_i32 = arith.constant 0 : i32
    %c0_i32_0 = arith.constant 0 : i32
    %c0_i32_1 = arith.constant 0 : i32
    return %c0_i32, %c0_i32_0 : i32, i32
  }
  func.func @transform_11(%arg0: i32) -> (i32, i32) {
    %c0_i32 = arith.constant 0 : i32
    %c0_i32_0 = arith.constant 0 : i32
    %c0_i32_1 = arith.constant 0 : i32
    return %c0_i32, %c0_i32_0 : i32, i32
  }
  func.func @transform_12(%arg0: i32) -> (i32, i32) {
    %c0_i32 = arith.constant 0 : i32
    %c0_i32_0 = arith.constant 0 : i32
    %c0_i32_1 = arith.constant 0 : i32
    return %c0_i32, %c0_i32_0 : i32, i32
  }
  func.func @transform_13(%arg0: i32) -> (i32, i32) {
    %c0_i32 = arith.constant 0 : i32
    %c0_i32_0 = arith.constant 0 : i32
    %c0_i32_1 = arith.constant 0 : i32
    return %c0_i32, %c0_i32_0 : i32, i32
  }
  func.func @transform_14(%arg0: i32) -> (i32, i32) {
    %c0_i32 = arith.constant 0 : i32
    %c0_i32_0 = arith.constant 0 : i32
    %c0_i32_1 = arith.constant 0 : i32
    return %c0_i32, %c0_i32_0 : i32, i32
  }
  func.func @transform_15(%arg0: i32) -> (i32, i32) {
    %c0_i32 = arith.constant 0 : i32
    %c0_i32_0 = arith.constant 0 : i32
    %c0_i32_1 = arith.constant 0 : i32
    return %c0_i32, %c0_i32_0 : i32, i32
  }
  func.func @transform_16(%arg0: i32) -> (i32, i32) {
    %c0_i32 = arith.constant 0 : i32
    %c0_i32_0 = arith.constant 0 : i32
    %c0_i32_1 = arith.constant 0 : i32
    return %c0_i32, %c0_i32_0 : i32, i32
  }
  func.func @transform_17(%arg0: i32) -> (i32, i32) {
    %c0_i32 = arith.constant 0 : i32
    %c0_i32_0 = arith.constant 0 : i32
    %c0_i32_1 = arith.constant 0 : i32
    return %c0_i32, %c0_i32_0 : i32, i32
  }
  func.func @transform_18(%arg0: i32) -> (i32, i32) {
    %c0_i32 = arith.constant 0 : i32
    %c0_i32_0 = arith.constant 0 : i32
    %c0_i32_1 = arith.constant 0 : i32
    return %c0_i32, %c0_i32_0 : i32, i32
  }
  func.func @transform_19(%arg0: i32) -> (i32, i32) {
    %c0_i32 = arith.constant 0 : i32
    %c0_i32_0 = arith.constant 0 : i32
    %c0_i32_1 = arith.constant 0 : i32
    return %c0_i32, %c0_i32_0 : i32, i32
  }
  func.func @transform_20(%arg0: i32) -> (i32, i32) {
    %c0_i32 = arith.constant 0 : i32
    %c0_i32_0 = arith.constant 0 : i32
    %c0_i32_1 = arith.constant 0 : i32
    return %c0_i32, %c0_i32_0 : i32, i32
  }
  func.func @transform_21(%arg0: i32) -> (i32, i32) {
    %c0_i32 = arith.constant 0 : i32
    %c0_i32_0 = arith.constant 0 : i32
    %c0_i32_1 = arith.constant 0 : i32
    return %c0_i32, %c0_i32_0 : i32, i32
  }
  func.func @transform_22(%arg0: i32) -> (i32, i32) {
    %c0_i32 = arith.constant 0 : i32
    %c0_i32_0 = arith.constant 0 : i32
    %c0_i32_1 = arith.constant 0 : i32
    return %c0_i32, %c0_i32_0 : i32, i32
  }
  func.func @transform_23(%arg0: i32) -> (i32, i32) {
    %c0_i32 = arith.constant 0 : i32
    %c0_i32_0 = arith.constant 0 : i32
    %c0_i32_1 = arith.constant 0 : i32
    return %c0_i32, %c0_i32_0 : i32, i32
  }
  func.func @transform_24(%arg0: i32) -> (i32, i32) {
    %c0_i32 = arith.constant 0 : i32
    %c0_i32_0 = arith.constant 0 : i32
    %c0_i32_1 = arith.constant 0 : i32
    return %c0_i32, %c0_i32_0 : i32, i32
  }
  func.func @transform_25(%arg0: i32) -> (i32, i32) {
    %c0_i32 = arith.constant 0 : i32
    %c0_i32_0 = arith.constant 0 : i32
    %c0_i32_1 = arith.constant 0 : i32
    return %c0_i32, %c0_i32_0 : i32, i32
  }
  func.func @transform_26(%arg0: i32) -> (i32, i32) {
    %c0_i32 = arith.constant 0 : i32
    %c0_i32_0 = arith.constant 0 : i32
    %c0_i32_1 = arith.constant 0 : i32
    return %c0_i32, %c0_i32_0 : i32, i32
  }
  func.func @transform_27(%arg0: i32) -> (i32, i32) {
    %c0_i32 = arith.constant 0 : i32
    %c0_i32_0 = arith.constant 0 : i32
    %c0_i32_1 = arith.constant 0 : i32
    return %c0_i32, %c0_i32_0 : i32, i32
  }
  func.func @transform_28(%arg0: i32) -> (i32, i32) {
    %c0_i32 = arith.constant 0 : i32
    %c0_i32_0 = arith.constant 0 : i32
    %c0_i32_1 = arith.constant 0 : i32
    return %c0_i32, %c0_i32_0 : i32, i32
  }
  func.func @transform_29(%arg0: i32) -> (i32, i32) {
    %c0_i32 = arith.constant 0 : i32
    %c0_i32_0 = arith.constant 0 : i32
    %c0_i32_1 = arith.constant 0 : i32
    return %c0_i32, %c0_i32_0 : i32, i32
  }
  func.func @transform_30(%arg0: i32) -> (i32, i32) {
    %c0_i32 = arith.constant 0 : i32
    %c0_i32_0 = arith.constant 0 : i32
    %c0_i32_1 = arith.constant 0 : i32
    return %c0_i32, %c0_i32_0 : i32, i32
  }
  func.func @transform_31(%arg0: i32) -> (i32, i32) {
    %c0_i32 = arith.constant 0 : i32
    %c0_i32_0 = arith.constant 0 : i32
    %c0_i32_1 = arith.constant 0 : i32
    return %c0_i32, %c0_i32_0 : i32, i32
  }
  func.func @transform_32(%arg0: i32) -> (i32, i32) {
    %c0_i32 = arith.constant 0 : i32
    %c0_i32_0 = arith.constant 0 : i32
    %c0_i32_1 = arith.constant 0 : i32
    return %c0_i32, %c0_i32_0 : i32, i32
  }
  func.func @transform_33(%arg0: i32) -> (i32, i32) {
    %c0_i32 = arith.constant 0 : i32
    %c0_i32_0 = arith.constant 0 : i32
    %c0_i32_1 = arith.constant 0 : i32
    return %c0_i32, %c0_i32_0 : i32, i32
  }
  func.func @transform_34(%arg0: i32) -> (i32, i32) {
    %c0_i32 = arith.constant 0 : i32
    %c0_i32_0 = arith.constant 0 : i32
    %c0_i32_1 = arith.constant 0 : i32
    return %c0_i32, %c0_i32_0 : i32, i32
  }
  func.func @transform_35(%arg0: i32) -> (i32, i32) {
    %c0_i32 = arith.constant 0 : i32
    %c0_i32_0 = arith.constant 0 : i32
    %c0_i32_1 = arith.constant 0 : i32
    return %c0_i32, %c0_i32_0 : i32, i32
  }
  func.func @transform_36(%arg0: i32) -> (i32, i32) {
    %c0_i32 = arith.constant 0 : i32
    %c0_i32_0 = arith.constant 0 : i32
    %c0_i32_1 = arith.constant 0 : i32
    return %c0_i32, %c0_i32_0 : i32, i32
  }
  func.func @transform_37(%arg0: i32) -> (i32, i32, i32) {
    %c0_i32 = arith.constant 0 : i32
    %c0_i32_0 = arith.constant 0 : i32
    %c0_i32_1 = arith.constant 0 : i32
    %c0_i32_2 = arith.constant 0 : i32
    return %c0_i32, %c0_i32_0, %c0_i32_1 : i32, i32, i32
  }
  func.func @transform_38(%arg0: i32) -> (i32, i32) {
    %c0_i32 = arith.constant 0 : i32
    %c0_i32_0 = arith.constant 0 : i32
    %c0_i32_1 = arith.constant 0 : i32
    return %c0_i32, %c0_i32_0 : i32, i32
  }
  func.func @transform_39(%arg0: i32) -> (i32, i32, i32) {
    %c0_i32 = arith.constant 0 : i32
    %c0_i32_0 = arith.constant 0 : i32
    %c0_i32_1 = arith.constant 0 : i32
    %c0_i32_2 = arith.constant 0 : i32
    return %c0_i32, %c0_i32_0, %c0_i32_1 : i32, i32, i32
  }
  func.func @transform_40(%arg0: i32) -> (i32, i32) {
    %c0_i32 = arith.constant 0 : i32
    %c0_i32_0 = arith.constant 0 : i32
    %c0_i32_1 = arith.constant 0 : i32
    return %c0_i32, %c0_i32_0 : i32, i32
  }
  func.func @transform_41(%arg0: i32) -> (i32, i32, i32) {
    %c0_i32 = arith.constant 0 : i32
    %c0_i32_0 = arith.constant 0 : i32
    %c0_i32_1 = arith.constant 0 : i32
    %c0_i32_2 = arith.constant 0 : i32
    return %c0_i32, %c0_i32_0, %c0_i32_1 : i32, i32, i32
  }
  func.func @transform_42(%arg0: i32) -> (i32, i32) {
    %c0_i32 = arith.constant 0 : i32
    %c0_i32_0 = arith.constant 0 : i32
    %c0_i32_1 = arith.constant 0 : i32
    return %c0_i32, %c0_i32_0 : i32, i32
  }
  func.func @transform_43(%arg0: i32) -> (i32, i32, i32) {
    %c0_i32 = arith.constant 0 : i32
    %c0_i32_0 = arith.constant 0 : i32
    %c0_i32_1 = arith.constant 0 : i32
    %c0_i32_2 = arith.constant 0 : i32
    return %c0_i32, %c0_i32_0, %c0_i32_1 : i32, i32, i32
  }
  func.func @transform_44(%arg0: i32) -> (i32, i32) {
    %c0_i32 = arith.constant 0 : i32
    %c0_i32_0 = arith.constant 0 : i32
    %c0_i32_1 = arith.constant 0 : i32
    return %c0_i32, %c0_i32_0 : i32, i32
  }
  func.func @transform_45(%arg0: i32) -> (i32, i32) {
    %c0_i32 = arith.constant 0 : i32
    %c0_i32_0 = arith.constant 0 : i32
    %c0_i32_1 = arith.constant 0 : i32
    return %c0_i32, %c0_i32_0 : i32, i32
  }
  func.func @transform_46(%arg0: i32) -> (i32, i32) {
    %c0_i32 = arith.constant 0 : i32
    %c0_i32_0 = arith.constant 0 : i32
    %c0_i32_1 = arith.constant 0 : i32
    return %c0_i32, %c0_i32_0 : i32, i32
  }
  func.func @transform_47(%arg0: i32) -> (i32, i32) {
    %c0_i32 = arith.constant 0 : i32
    %c0_i32_0 = arith.constant 0 : i32
    %c0_i32_1 = arith.constant 0 : i32
    return %c0_i32, %c0_i32_0 : i32, i32
  }
  func.func @transform_48(%arg0: i32) -> (i32, i32) {
    %c0_i32 = arith.constant 0 : i32
    %c0_i32_0 = arith.constant 0 : i32
    %c0_i32_1 = arith.constant 0 : i32
    return %c0_i32, %c0_i32_0 : i32, i32
  }
  func.func @transform_49(%arg0: i32) -> (i32, i32) {
    %c0_i32 = arith.constant 0 : i32
    %c0_i32_0 = arith.constant 0 : i32
    %c0_i32_1 = arith.constant 0 : i32
    return %c0_i32, %c0_i32_0 : i32, i32
  }
  func.func @transform_50(%arg0: i32) -> (i32, i32) {
    %c0_i32 = arith.constant 0 : i32
    %c0_i32_0 = arith.constant 0 : i32
    %c0_i32_1 = arith.constant 0 : i32
    return %c0_i32, %c0_i32_0 : i32, i32
  }
  func.func @transform_51(%arg0: i32) -> (i32, i32) {
    %c0_i32 = arith.constant 0 : i32
    %c0_i32_0 = arith.constant 0 : i32
    %c0_i32_1 = arith.constant 0 : i32
    return %c0_i32, %c0_i32_0 : i32, i32
  }
  func.func @transform_52(%arg0: i32) -> (i32, i32) {
    %c0_i32 = arith.constant 0 : i32
    %c0_i32_0 = arith.constant 0 : i32
    %c0_i32_1 = arith.constant 0 : i32
    return %c0_i32, %c0_i32_0 : i32, i32
  }
  func.func @transform_53(%arg0: i32) -> (i32, i32) {
    %c0_i32 = arith.constant 0 : i32
    %c0_i32_0 = arith.constant 0 : i32
    %c0_i32_1 = arith.constant 0 : i32
    return %c0_i32, %c0_i32_0 : i32, i32
  }
  func.func @transform_54(%arg0: i32) -> (i32, i32) {
    %c0_i32 = arith.constant 0 : i32
    %c0_i32_0 = arith.constant 0 : i32
    %c0_i32_1 = arith.constant 0 : i32
    return %c0_i32, %c0_i32_0 : i32, i32
  }
  func.func @transform_55(%arg0: i32) -> (i32, i32) {
    %c0_i32 = arith.constant 0 : i32
    %c0_i32_0 = arith.constant 0 : i32
    %c0_i32_1 = arith.constant 0 : i32
    return %c0_i32, %c0_i32_0 : i32, i32
  }
  func.func @transform_56(%arg0: i32) -> (i32, i32, i32) {
    %c0_i32 = arith.constant 0 : i32
    %c0_i32_0 = arith.constant 0 : i32
    %c0_i32_1 = arith.constant 0 : i32
    %c0_i32_2 = arith.constant 0 : i32
    return %c0_i32, %c0_i32_0, %c0_i32_1 : i32, i32, i32
  }
  func.func @transform_57(%arg0: i32) -> (i32, i32, i32) {
    %c0_i32 = arith.constant 0 : i32
    %c0_i32_0 = arith.constant 0 : i32
    %c0_i32_1 = arith.constant 0 : i32
    %c0_i32_2 = arith.constant 0 : i32
    return %c0_i32, %c0_i32_0, %c0_i32_1 : i32, i32, i32
  }
  func.func @transform_58(%arg0: i32) -> (i32, i32, i32) {
    %c0_i32 = arith.constant 0 : i32
    %c0_i32_0 = arith.constant 0 : i32
    %c0_i32_1 = arith.constant 0 : i32
    %c0_i32_2 = arith.constant 0 : i32
    return %c0_i32, %c0_i32_0, %c0_i32_1 : i32, i32, i32
  }
  func.func @transform_59(%arg0: i32) -> (i32, i32, i32) {
    %c0_i32 = arith.constant 0 : i32
    %c0_i32_0 = arith.constant 0 : i32
    %c0_i32_1 = arith.constant 0 : i32
    %c0_i32_2 = arith.constant 0 : i32
    return %c0_i32, %c0_i32_0, %c0_i32_1 : i32, i32, i32
  }
  func.func @transform_60(%arg0: i32) -> (i32, i32, i32) {
    %c0_i32 = arith.constant 0 : i32
    %c0_i32_0 = arith.constant 0 : i32
    %c0_i32_1 = arith.constant 0 : i32
    return %arg0, %c0_i32, %c0_i32_0 : i32, i32, i32
  }
}

</mosaic_0001>

<bundles_post_ra>
// kernel: combined_model_forward.1
= control target key start
LH: loop header
LB: loop body
LE: loop exit
PB: predicated region body
PF: predicated region fallthrough
CT: control target
= control target key end

     0   :  { %s11034_s6 = smov 1   ;;  %s11035_s10 = smov 2   ;;  %s13146_s0 = inlined_call_operand.smem [shape: u32[61], index: -1, kind: input, shape index: {}] }
   0x1   :  { %s11157_s5 = sld [smem:[%s13146_s0]]   ;;  %s11036_s14 = smov 3  }
   0x2   :  { %s11162_s9 = sld [smem:[%s13146_s0 + %s11034_s6]]   ;;  %s11037_s18 = smov 4  }
   0x3   :  { %s11167_s13 = sld [smem:[%s13146_s0 + %s11035_s10]]   ;;  %s11038_s22 = smov 5  }
   0x4   :  { %s11172_s17 = sld [smem:[%s13146_s0 + %s11036_s14]]   ;;  %s11039_s26 = smov 6  }
   0x5   :  { %s11177_s21 = sld [smem:[%s13146_s0 + %s11037_s18]]   ;;  %s11040_s30 = smov 7  }
   0x6   :  { %s11182_s25 = sld [smem:[%s13146_s0 + %s11038_s22]]   ;;  %s11041_s4 = smov 8  }
   0x7   :  { %13282 = sst [smem:[#allocation34_spill]] %s11157_s5  ;;  %s11042_s10 = smov 9  }
   0x8   :  { %13283 = sst [smem:[#allocation35_spill]] %s11162_s9  ;;  %s11043_s15 = smov 10  }
   0x9   :  { %13284 = sst [smem:[#allocation36_spill]] %s11167_s13  ;;  %s11044_s20 = smov 11  }
   0xa   :  { %13285 = sst [smem:[#allocation37_spill]] %s11172_s17  ;;  %s11046_s1 = smov 13  }
   0xb   :  { %13286 = sst [smem:[#allocation38_spill]] %s11177_s21  ;;  %s11047_s7 = smov 14  }
   0xc   :  { %13287 = sst [smem:[#allocation39_spill]] %s11182_s25  ;;  %s11049_s22 = smov 16  }
   0xd   :  { %s11187_s29 = sld [smem:[%s13146_s0 + %s11039_s26]]   ;;  %s11045_s26 = smov 12  }
   0xe   :  { %s11192_s3 = sld [smem:[%s13146_s0 + %s11040_s30]]   ;;  %s11050_s28 = smov 17  }
   0xf   :  { %s11197_s8 = sld [smem:[%s13146_s0 + %s11041_s4]]   ;;  %s11080_s16 = smov 47  }
  0x10   :  { %s11202_s14 = sld [smem:[%s13146_s0 + %s11042_s10]]   ;;  %s11081_s23 = smov 48  }
  0x11   :  { %s11207_s19 = sld [smem:[%s13146_s0 + %s11043_s15]]   ;;  %s11048_s15 = smov 15  }
  0x12   :  { %s11212_s24 = sld [smem:[%s13146_s0 + %s11044_s20]]   ;;  %s11083_s10 = smov 50  }
  0x13   :  { %13288 = sst [smem:[#allocation40_spill]] %s11187_s29  ;;  %s11091_s13 = smov 58  }
  0x14   :  { %13289 = sst [smem:[#allocation41_spill]] %s11192_s3 }
  0x15   :  { %13290 = sst [smem:[#allocation42_spill]] %s11197_s8 }
  0x16   :  { %s11217_s30 = sld [smem:[%s13146_s0 + %s11045_s26]]  }
  0x17   :  { %13291 = sst [smem:[#allocation43_spill]] %s11207_s19 }
  0x18   :  { %13292 = sst [smem:[#allocation44_spill]] %s11212_s24 }
  0x19   :  { %s11222_s6 = sld [smem:[%s13146_s0 + %s11046_s1]]   ;;  %s11082_s1 = smov 49  }
  0x1a   :  { %s11227_s12 = sld [smem:[%s13146_s0 + %s11047_s7]]   ;;  %s11051_s7 = smov 18  }
  0x1b   :  { %s11232_s20 = sld [smem:[%s13146_s0 + %s11048_s15]]   ;;  %s11052_s15 = smov 19  }
  0x1c   :  { %13293 = sst [smem:[#allocation45_spill]] %s11217_s30 }
  0x1d   :  { %s11237_s27 = sld [smem:[%s13146_s0 + %s11049_s22]]   ;;  %s11053_s22 = smov 20  }
  0x1e   :  { %s11242_s4 = sld [smem:[%s13146_s0 + %s11050_s28]]   ;;  %s11054_s28 = smov 21  }
  0x1f   :  { %13294 = sst [smem:[#allocation46_spill]] %s11222_s6 }
  0x20   :  { %13295 = sst [smem:[#allocation47_spill]] %s11227_s12 }
  0x21   :  { %13296 = sst [smem:[#allocation48_spill]] %s11232_s20 }
  0x22   :  { %s11247_s6 = sld [smem:[%s13146_s0 + %s11051_s7]]   ;;  %s11055_s7 = smov 22  }
  0x23   :  { %13297 = sst [smem:[#allocation49_spill]] %s11237_s27 }
  0x24   :  { %13298 = sst [smem:[#allocation50_spill]] %s11242_s4 }
  0x25   :  { %s11252_s20 = sld [smem:[%s13146_s0 + %s11052_s15]]   ;;  %s11056_s15 = smov 23  }
  0x26   :  { %s11257_s27 = sld [smem:[%s13146_s0 + %s11053_s22]]   ;;  %s11057_s22 = smov 24  }
  0x27   :  { %s11262_s4 = sld [smem:[%s13146_s0 + %s11054_s28]]   ;;  %s11058_s28 = smov 25  }
  0x28   :  { %13299 = sst [smem:[#allocation51_spill]] %s11247_s6 }
  0x29   :  { %s11267_s6 = sld [smem:[%s13146_s0 + %s11055_s7]]   ;;  %s11059_s7 = smov 26  }
  0x2a   :  { %s11405_s29 = sld [smem:[%s13146_s0 + %s11083_s10]]   ;;  %s11087_s10 = smov 54  }
  0x2b   :  { %13300 = sst [smem:[#allocation52_spill]] %s11252_s20 }
  0x2c   :  { %13301 = sst [smem:[#allocation53_spill]] %s11257_s27 }
  0x2d   :  { %13302 = sst [smem:[#allocation54_spill]] %s11262_s4 }
  0x2e   :  { %s11272_s20 = sld [smem:[%s13146_s0 + %s11056_s15]]   ;;  %s11060_s15 = smov 27  }
  0x2f   :  { %13303 = sst [smem:[#allocation55_spill]] %s11267_s6 }
  0x30   :  { %s11277_s27 = sld [smem:[%s13146_s0 + %s11057_s22]]   ;;  %s11061_s22 = smov 28  }
  0x31   :  { %s11282_s4 = sld [smem:[%s13146_s0 + %s11058_s28]]   ;;  %s11062_s28 = smov 29  }
  0x32   :  { %s11287_s6 = sld [smem:[%s13146_s0 + %s11059_s7]]   ;;  %s11063_s7 = smov 30  }
  0x33   :  { %s11292_s12 = sld [smem:[%s13146_s0 + %s11060_s15]]   ;;  %s11064_s15 = smov 31  }
  0x34   :  { %s11312_s24 = sld [smem:[%s13146_s0 + %s11064_s15]]   ;;  %s11068_s15 = smov 35  }
  0x35   :  { %s11332_s19 = sld [smem:[%s13146_s0 + %s11068_s15]]   ;;  %s11072_s15 = smov 39  }
  0x36   :  { %13304 = sst [smem:[#allocation56_spill]] %s11277_s27 }
  0x37   :  { %13305 = sst [smem:[#allocation57_spill]] %s11282_s4 }
  0x38   :  { %13306 = sst [smem:[#allocation58_spill]] %s11287_s6 }
  0x39   :  { %13307 = sst [smem:[#allocation59_spill]] %s11292_s12 }
  0x3a   :  { %s11297_s27 = sld [smem:[%s13146_s0 + %s11061_s22]]   ;;  %s11065_s22 = smov 32  }
  0x3b   :  { %s11302_s4 = sld [smem:[%s13146_s0 + %s11062_s28]]   ;;  %s11066_s28 = smov 33  }
  0x3c   :  { %s11307_s6 = sld [smem:[%s13146_s0 + %s11063_s7]]   ;;  %s11067_s7 = smov 34  }
  0x3d   :  { %s11322_s30 = sld [smem:[%s13146_s0 + %s11066_s28]]   ;;  %s11070_s28 = smov 37  }
  0x3e   :  { %s11342_s8 = sld [smem:[%s13146_s0 + %s11070_s28]]   ;;  %s11074_s28 = smov 41  }
  0x3f   :  { %s11352_s25 = sld [smem:[%s13146_s0 + %s11072_s15]]   ;;  %s11076_s15 = smov 43  }
  0x40   :  { %13308 = sst [smem:[#allocation60_spill]] %s11297_s27 }
  0x41   :  { %13309 = sst [smem:[#allocation61_spill]] %s11302_s4 }
  0x42   :  { %13310 = sst [smem:[#allocation62_spill]] %s11307_s6 }
  0x43   :  { %s11317_s27 = sld [smem:[%s13146_s0 + %s11065_s22]]   ;;  %s11069_s22 = smov 36  }
  0x44   :  { %s11327_s6 = sld [smem:[%s13146_s0 + %s11067_s7]]   ;;  %s11071_s7 = smov 38  }
  0x45   :  { %13314 = sst [smem:[#allocation66_spill]] %s11342_s8 }
  0x46   :  { %13316 = sst [smem:[#allocation68_spill]] %s11352_s25 }
  0x47   :  { %s11362_s8 = sld [smem:[%s13146_s0 + %s11074_s28]]   ;;  %s11078_s28 = smov 45  }
  0x48   :  { %s11372_s25 = sld [smem:[%s13146_s0 + %s11076_s15]]   ;;  %s11088_s15 = smov 55  }
  0x49   :  { %13311 = sst [smem:[#allocation63_spill]] %s11317_s27 }
  0x4a   :  { %13312 = sst [smem:[#allocation64_spill]] %s11327_s6 }
  0x4b   :  { %s11337_s27 = sld [smem:[%s13146_s0 + %s11069_s22]]   ;;  %s11073_s22 = smov 40  }
  0x4c   :  { %s11347_s6 = sld [smem:[%s13146_s0 + %s11071_s7]]   ;;  %s11075_s7 = smov 42  }
  0x4d   :  { %13318 = sst [smem:[#allocation70_spill]] %s11362_s8 }
  0x4e   :  { %13320 = sst [smem:[#allocation72_spill]] %s11372_s25 }
  0x4f   :  { %s11382_s8 = sld [smem:[%s13146_s0 + %s11078_s28]]  }
  0x50   :  { %s11390_s25 = sld [smem:[%s13146_s0 + %s11080_s16]]   ;;  %s11084_s16 = smov 51  }
  0x51   :  { %13313 = sst [smem:[#allocation65_spill]] %s11337_s27 }
  0x52   :  { %13315 = sst [smem:[#allocation67_spill]] %s11347_s6 }
  0x53   :  { %s11357_s27 = sld [smem:[%s13146_s0 + %s11073_s22]]   ;;  %s11077_s22 = smov 44  }
  0x54   :  { %s11367_s6 = sld [smem:[%s13146_s0 + %s11075_s7]]   ;;  %s11079_s7 = smov 46  }
  0x55   :  { %13322 = sst [smem:[#allocation74_spill]] %s11382_s8 }
  0x56   :  { %s11400_s8 = sld [smem:[%s13146_s0 + %s11082_s1]]   ;;  %s11086_s1 = smov 53  }
  0x57   :  { %s11410_s17 = sld [smem:[%s13146_s0 + %s11084_s16]]  }
  0x58   :  { %s11425_s16 = sld [smem:[%s13146_s0 + %s11087_s10]]  }
  0x59   :  { %13317 = sst [smem:[#allocation69_spill]] %s11357_s27 }
  0x5a   :  { %13319 = sst [smem:[#allocation71_spill]] %s11367_s6 }
  0x5b   :  { %s11377_s27 = sld [smem:[%s13146_s0 + %s11077_s22]]  }
  0x5c   :  { %s8605_s6 = sld [smem:[%s13146_s0 + %s11079_s7]]  }
  0x5d   :  { %13323 = sst [smem:[#allocation75_spill]] %s11400_s8 }
  0x5e   :  { %13324 = sst [smem:[#allocation76_spill]] %s11410_s17  ;;  %s11092_s17 = smov 59  }
  0x5f   :  { %s11420_s7 = sld [smem:[%s13146_s0 + %s11086_s1]]   ;;  %s11090_s1 = smov 57  }
  0x60   :  { %13327 = sst [smem:[#allocation79_spill]] %s11425_s16 }
  0x61   :  { %13321 = sst [smem:[#allocation73_spill]] %s11377_s27 }
  0x62   :  { %s11395_s27 = sld [smem:[%s13146_s0 + %s11081_s23]]   ;;  %s11085_s23 = smov 52   ;;  %v126_v0 = vstv %s8605_s6 }
  0x63   :  { %s11415_s21 = sld [smem:[%s13146_s0 + %s11085_s23]]   ;;  %127 = vst [vmem:[#allocation2] sm:$0x1] %v126_v0  ;;  %s11089_s6 = smov 56  }
  0x64   :  { %s11430_s23 = sld [smem:[%s13146_s0 + %s11088_s15]]  }
  0x65   :  { %13326 = sst [smem:[#allocation78_spill]] %s11420_s7 }
  0x66   :  { %s11435_s28 = sld [smem:[%s13146_s0 + %s11089_s6]]   ;;  %s11093_s6 = smov 60  }
  0x67   :  { %s11445_s16 = sld [smem:[%s13146_s0 + %s11091_s13]]  }
  0x69   :  { %13325 = sst [smem:[#allocation77_spill]] %s11415_s21 }
  0x6a   :  { %13328 = sst [smem:[#allocation80_spill]] %s11430_s23 }
  0x6b   :  { %s11440_s21 = sld [smem:[%s13146_s0 + %s11090_s1]]  }
  0x6c   :  { %13329 = sst [smem:[#allocation81_spill]] %s11435_s28 }
  0x6d   :  { %s11450_s23 = sld [smem:[%s13146_s0 + %s11092_s17]]  }
  0x6e   :  { %s11455_s28 = sld [smem:[%s13146_s0 + %s11093_s6]]  }
  0x6f   :  { %128 = vsyncpa [#allocation4], 0 }
  0x70   :  { %129 = vsyncpa [#allocation6], 0 }
  0x71   :  { %130 = vsyncpa [#allocation9], 0 }
  0x72   :  { %131 = vsyncpa [#allocation12], 0 }
  0x73   :  { %132 = vsyncpa [#allocation15], 0 }
  0x74   :  { %133 = vsyncpa [#allocation18], 0 }
  0x75   :  { %134 = vsyncpa [#allocation21], 0 }
  0x76   :  { %135 = vsyncpa [#allocation24], 0  ;;  %s11457_s7 = smov 0  }
  0x77 LB: > { %s13330_s12 = sld [smem:[#allocation59_spill]]  ;;  %s13333_s4 = sld [smem:[#allocation61_spill]]  ;;  %s11032_s7 = sphi %s11457_s7, %s141_s7  }
  0x78   : > { %s13331_s9 = sld [smem:[#allocation35_spill]]  ;;  %s13334_s3 = sld [smem:[#allocation41_spill]] }
  0x79   : > { %s13332_s8 = sld [smem:[#allocation75_spill]]  ;;  %s11094_s0 = smov [#allocation5]  }
  0x7a   : > { %s1476_s1 = sshll.u32 %s11094_s0, 4  ;;  %s11463_s2 = sadd.s32 4294967295, %s11032_s7   ;;  %s11468_s1 = int_to_ptr.vmem [resolvable:$true] %s1476_s1 }
  0x7b   : > { %p8622_p0 = scmp.ge.s32.totalorder %s11032_s7, 1  ;;  %p1437_p1 = scmp.lt.s32.totalorder %s11032_s7, 3 }
  0x7c   : > { %p13173_p2 = scmp.eq.s32.totalorder %s11463_s2, 0  ;;  %s11095_s10 = smov [#allocation8]  }
  0x7d   : > { %p11470_p3 = pnand %p8622_p0, %p1437_p1  ;;  %s1541_s11 = sshll.u32 %s11095_s10, 4  ;;  %s11476_s11 = int_to_ptr.vmem [resolvable:$true] %s1541_s11 }
  0x7e   : > { %s11096_s15 = smov [#allocation11]   ;;  %s11097_s6 = smov [#allocation14]  }
  0x7f   : > { %s13335_s13 = scalar_select %p11470_p3, 1, 0 }
  0x80   : > { %p9568_p4 = pneg %p11470_p3  ;;  %s1578_s18 = sshll.u32 %s11096_s15, 4  ;;  %s11484_s18 = int_to_ptr.vmem [resolvable:$true] %s1578_s18 }
  0x81   : > { %s11486_s22 = sshll.u32 %s11097_s6, 4  ;;  %s10574_s26 = scalar_lea.hbm %s13334_s3, 64  ;;  %s1607_s22 = int_to_ptr.vmem [resolvable:$true] %s11486_s22 }
  0x82   : > { %p11480_p5 = pnand %p13173_p2, %p9568_p4  ;;  %p10575_p6 = scmp.ne.s32.totalorder %s13334_s3, %s10574_s26 }
  0x83   : > { %p10581_p10 = scmp.lt.u32.totalorder %s10574_s26, %s13334_s3 }
  0x84   : > { %p11492_p7 = pneg %p11480_p5 }
  0x86   : > { %p10577_p8 = pnand %p11492_p7, %p10575_p6 }
  0x88   : > { %p10578_p9 = pneg %p10577_p8 }
  0x8a   : > { %p10583_p11 = pnand %p10581_p10, %p10578_p9 }
  0x8c   : > { %10586 = shalt.err (!%p10583_p11)
}
  0x8d   : > { %s10587_s10 = scalar_lea.vmem %s11468_s1, 64  ;;  %p10595_p1 = scmp.lt.s32.totalorder %s11468_s1, %s11468_s1 }
  0x8e   : > { %p10588_p12 = scmp.ne.s32.totalorder %s11468_s1, %s10587_s10  ;;  %p10596_p4 = scmp.lt.s32.totalorder %s10587_s10, %s10587_s10 }
  0x90   : > { %p10590_p13 = pnand %p10588_p12, %p11492_p7  ;;  %p10597_p2 = por %p10596_p4, %p10595_p1 }
  0x92   : > { %p10591_p0 = pneg %p10590_p13 }
  0x94   : > { %p10598_p3 = pnand %p10597_p2, %p10591_p0 }
  0x96   : > { %10601 = shalt.err (!%p10598_p3)
}
  0x97   : > { %9574 = dma.hbm_to_vmem [thread:$0]  (!%p11480_p5), %s13334_s3, 64, %s11468_s1, [#allocation6]  }
  0x98   : > { %s10602_s15 = scalar_lea.hbm %s11272_s20, 256 }
  0x99   : > { %p10603_p6 = scmp.ne.s32.totalorder %s11272_s20, %s10602_s15  ;;  %p10609_p10 = scmp.lt.u32.totalorder %s10602_s15, %s11272_s20 }
  0x9b   : > { %p10605_p8 = pnand %p10603_p6, %p11492_p7 }
  0x9d   : > { %p10606_p9 = pneg %p10605_p8 }
  0x9f   : > { %p10611_p11 = pnand %p10609_p10, %p10606_p9 }
  0xa1   : > { %10614 = shalt.err (!%p10611_p11)
}
  0xa2   : > { %s10615_s6 = scalar_lea.vmem %s11476_s11, 256  ;;  %p10623_p13 = scmp.lt.s32.totalorder %s11476_s11, %s11476_s11 }
  0xa3   : > { %p10616_p2 = scmp.ne.s32.totalorder %s11476_s11, %s10615_s6  ;;  %p10624_p0 = scmp.lt.s32.totalorder %s10615_s6, %s10615_s6 }
  0xa5   : > { %p10618_p3 = pnand %p10616_p2, %p11492_p7  ;;  %p10625_p1 = por %p10624_p0, %p10623_p13 }
  0xa7   : > { %p10619_p12 = pneg %p10618_p3 }
  0xa9   : > { %p10626_p4 = pnand %p10625_p1, %p10619_p12 }
  0xab   : > { %10629 = shalt.err (!%p10626_p4)
}
  0xac   : > { %s11098_s1 = smov 128   ;;  %s11099_s26 = smov 8  }
  0xad   : > { %9580 = dma.hbm_to_vmem [thread:$0]  (!%p11480_p5), %s11272_s20, 256, %s11476_s11, [#allocation9], %s11098_s1, %s11098_s1, %s11099_s26  }
  0xae   : > { %s10630_s10 = scalar_lea.hbm %s13333_s4, 128 }
  0xaf   : > { %p10631_p6 = scmp.ne.s32.totalorder %s13333_s4, %s10630_s10  ;;  %p10637_p10 = scmp.lt.u32.totalorder %s10630_s10, %s13333_s4 }
  0xb1   : > { %p10633_p8 = pnand %p10631_p6, %p11492_p7 }
  0xb3   : > { %p10634_p9 = pneg %p10633_p8 }
  0xb5   : > { %p10639_p11 = pnand %p10637_p10, %p10634_p9 }
  0xb7   : > { %10642 = shalt.err (!%p10639_p11)
}
  0xb8   : > { %s10643_s15 = scalar_lea.vmem %s11484_s18, 128  ;;  %p10651_p13 = scmp.lt.s32.totalorder %s11484_s18, %s11484_s18 }
  0xb9   : > { %p10644_p2 = scmp.ne.s32.totalorder %s11484_s18, %s10643_s15  ;;  %p10652_p0 = scmp.lt.s32.totalorder %s10643_s15, %s10643_s15 }
  0xbb   : > { %p10646_p3 = pnand %p10644_p2, %p11492_p7  ;;  %p10653_p1 = por %p10652_p0, %p10651_p13 }
  0xbd   : > { %p10647_p12 = pneg %p10646_p3 }
  0xbf   : > { %p10654_p4 = pnand %p10653_p1, %p10647_p12 }
  0xc1   : > { %10657 = shalt.err (!%p10654_p4)
}
  0xc2   : > { %9586 = dma.hbm_to_vmem [thread:$0]  (!%p11480_p5), %s13333_s4, 128, %s11484_s18, [#allocation12]  }
  0xc3   : > { %s10658_s11 = scalar_lea.hbm %s11322_s30, 32 }
  0xc4   : > { %p10659_p6 = scmp.ne.s32.totalorder %s11322_s30, %s10658_s11  ;;  %p10665_p10 = scmp.lt.u32.totalorder %s10658_s11, %s11322_s30 }
  0xc6   : > { %p10661_p8 = pnand %p10659_p6, %p11492_p7 }
  0xc8   : > { %p10662_p9 = pneg %p10661_p8 }
  0xca   : > { %p10667_p11 = pnand %p10665_p10, %p10662_p9 }
  0xcc   : > { %10670 = shalt.err (!%p10667_p11)
}
  0xcd   : > { %s10671_s6 = scalar_lea.vmem %s1607_s22, 32  ;;  %p10679_p13 = scmp.lt.s32.totalorder %s1607_s22, %s1607_s22 }
  0xce   : > { %p10672_p2 = scmp.ne.s32.totalorder %s1607_s22, %s10671_s6  ;;  %p10680_p0 = scmp.lt.s32.totalorder %s10671_s6, %s10671_s6 }
  0xd0   : > { %p10674_p3 = pnand %p10672_p2, %p11492_p7  ;;  %p10681_p1 = por %p10680_p0, %p10679_p13 }
  0xd2   : > { %p10675_p12 = pneg %p10674_p3 }
  0xd4   : > { %p10682_p4 = pnand %p10681_p1, %p10675_p12 }
  0xd6   : > { %10685 = shalt.err (!%p10682_p4)
}
  0xd7   : > { %9592 = dma.hbm_to_vmem [thread:$0]  (!%p11480_p5), %s11322_s30, 32, %s1607_s22, [#allocation15]  }
  0xd8   : > { %s11100_s18 = smov [#allocation17]   ;;  %s11101_s26 = smov [#allocation20]  }
  0xd9   : > { %s1664_s1 = sshll.u32 %s11100_s18, 4  ;;  %s1686_s10 = sshll.u32 %s11101_s26, 4  ;;  %s1665_s1 = int_to_ptr.vmem [resolvable:$true] %s1664_s1  ;;  %s1687_s10 = int_to_ptr.vmem [resolvable:$true] %s1686_s10 }
  0xda   : > { %s10686_s15 = scalar_lea.hbm %s11390_s25, 128 }
  0xdb   : > { %p10687_p6 = scmp.ne.s32.totalorder %s11390_s25, %s10686_s15  ;;  %p10693_p10 = scmp.lt.u32.totalorder %s10686_s15, %s11390_s25 }
  0xdd   : > { %p10689_p8 = pnand %p10687_p6, %p11492_p7 }
  0xdf   : > { %p10690_p9 = pneg %p10689_p8 }
  0xe1   : > { %p10695_p11 = pnand %p10693_p10, %p10690_p9 }
  0xe3   : > { %10698 = shalt.err (!%p10695_p11)
}
  0xe4   : > { %s10699_s11 = scalar_lea.vmem %s1665_s1, 128  ;;  %p10707_p13 = scmp.lt.s32.totalorder %s1665_s1, %s1665_s1 }
  0xe5   : > { %p10700_p2 = scmp.ne.s32.totalorder %s1665_s1, %s10699_s11  ;;  %p10708_p0 = scmp.lt.s32.totalorder %s10699_s11, %s10699_s11 }
  0xe7   : > { %p10702_p3 = pnand %p10700_p2, %p11492_p7  ;;  %p10709_p1 = por %p10708_p0, %p10707_p13 }
  0xe9   : > { %p10703_p12 = pneg %p10702_p3 }
  0xeb   : > { %p10710_p4 = pnand %p10709_p1, %p10703_p12 }
  0xed   : > { %10713 = shalt.err (!%p10710_p4)
}
  0xee   : > { %9598 = dma.hbm_to_vmem [thread:$0]  (!%p11480_p5), %s11390_s25, 128, %s1665_s1, [#allocation18]  }
  0xef   : > { %s10714_s22 = scalar_lea.hbm %s13332_s8, 64 }
  0xf0   : > { %p10715_p6 = scmp.ne.s32.totalorder %s13332_s8, %s10714_s22  ;;  %p10721_p10 = scmp.lt.u32.totalorder %s10714_s22, %s13332_s8 }
  0xf2   : > { %p10717_p8 = pnand %p10715_p6, %p11492_p7 }
  0xf4   : > { %p10718_p9 = pneg %p10717_p8 }
  0xf6   : > { %p10723_p11 = pnand %p10721_p10, %p10718_p9 }
  0xf8   : > { %10726 = shalt.err (!%p10723_p11)
}
  0xf9   : > { %s10727_s6 = scalar_lea.vmem %s1687_s10, 64  ;;  %p10735_p13 = scmp.lt.s32.totalorder %s1687_s10, %s1687_s10 }
  0xfa   : > { %p10728_p2 = scmp.ne.s32.totalorder %s1687_s10, %s10727_s6  ;;  %p10736_p0 = scmp.lt.s32.totalorder %s10727_s6, %s10727_s6 }
  0xfc   : > { %p10730_p3 = pnand %p10728_p2, %p11492_p7  ;;  %p10737_p1 = por %p10736_p0, %p10735_p13 }
  0xfe   : > { %p10731_p12 = pneg %p10730_p3 }
 0x100   : > { %p10738_p4 = pnand %p10737_p1, %p10731_p12 }
 0x102   : > { %10741 = shalt.err (!%p10738_p4)
}
 0x103   : > { %9604 = dma.hbm_to_vmem [thread:$0]  (!%p11480_p5), %s13332_s8, 64, %s1687_s10, [#allocation21]  }
 0x104   : > { %s11102_s18 = smov [#allocation23]   ;;  %s11103_s26 = smov [#allocation3]  }
 0x105   : > { %s1728_s1 = sshll.u32 %s11102_s18, 4  ;;  %s1450_s15 = sshll.u32 %s11103_s26, 4  ;;  %s1729_s1 = int_to_ptr.vmem [resolvable:$true] %s1728_s1  ;;  %s1451_s15 = int_to_ptr.vmem [resolvable:$true] %s1450_s15 }
 0x106   : > { %s10742_s11 = scalar_lea.hbm %s11445_s16, 256 }
 0x107   : > { %p10743_p6 = scmp.ne.s32.totalorder %s11445_s16, %s10742_s11  ;;  %p10749_p10 = scmp.lt.u32.totalorder %s10742_s11, %s11445_s16 }
 0x109   : > { %p10745_p8 = pnand %p10743_p6, %p11492_p7 }
 0x10b   : > { %p10746_p9 = pneg %p10745_p8 }
 0x10d   : > { %p10751_p11 = pnand %p10749_p10, %p10746_p9 }
 0x10f   : > { %10754 = shalt.err (!%p10751_p11)
}
 0x110   : > { %s10755_s22 = scalar_lea.vmem %s1729_s1, 256  ;;  %p10763_p13 = scmp.lt.s32.totalorder %s1729_s1, %s1729_s1 }
 0x111   : > { %p10756_p2 = scmp.ne.s32.totalorder %s1729_s1, %s10755_s22  ;;  %p10764_p0 = scmp.lt.s32.totalorder %s10755_s22, %s10755_s22 }
 0x113   : > { %p10758_p3 = pnand %p10756_p2, %p11492_p7  ;;  %p10765_p1 = por %p10764_p0, %p10763_p13 }
 0x115   : > { %p10759_p12 = pneg %p10758_p3 }
 0x117   : > { %p10766_p4 = pnand %p10765_p1, %p10759_p12 }
 0x119   : > { %10769 = shalt.err (!%p10766_p4)
}
 0x11a   : > { %s13175_s10 = smov 64   ;;  %s11105_s6 = smov 4  }
 0x11b   : > { %9610 = dma.hbm_to_vmem [thread:$0]  (!%p11480_p5), %s11445_s16, 256, %s1729_s1, [#allocation24], %s13175_s10, %s13175_s10, %s11105_s6  }
 0x11c   : > { %s10770_s18 = scalar_lea.hbm %s13331_s9, 32 }
 0x11d   : > { %p10771_p6 = scmp.ne.s32.totalorder %s13331_s9, %s10770_s18  ;;  %p10777_p10 = scmp.lt.u32.totalorder %s10770_s18, %s13331_s9 }
 0x11f   : > { %p10773_p8 = pnand %p10771_p6, %p11492_p7 }
 0x121   : > { %p10774_p9 = pneg %p10773_p8 }
 0x123   : > { %p10779_p11 = pnand %p10777_p10, %p10774_p9 }
 0x125   : > { %10782 = shalt.err (!%p10779_p11)
}
 0x126   : > { %s10783_s26 = scalar_lea.vmem %s1451_s15, 32  ;;  %p10791_p13 = scmp.lt.s32.totalorder %s1451_s15, %s1451_s15 }
 0x127   : > { %p10784_p2 = scmp.ne.s32.totalorder %s1451_s15, %s10783_s26  ;;  %p10792_p0 = scmp.lt.s32.totalorder %s10783_s26, %s10783_s26 }
 0x129   : > { %p10786_p3 = pnand %p10784_p2, %p11492_p7  ;;  %p10793_p1 = por %p10792_p0, %p10791_p13 }
 0x12b   : > { %p10787_p12 = pneg %p10786_p3 }
 0x12d   : > { %p10794_p4 = pnand %p10793_p1, %p10787_p12 }
 0x12f   : > { %10797 = shalt.err (!%p10794_p4)
}
 0x130   : > { %9571 = dma.hbm_to_vmem [thread:$0]  (!%p11480_p5), %s13331_s9, 32, %s1451_s15, [#allocation4]  }
 0x131   : > { %s11106_s1 = smov [#allocation7]   ;;  %s11107_s22 = smov [#allocation10]  }
 0x132   : > { %s1489_s11 = sshll.u32 %s11106_s1, 4  ;;  %s1564_s18 = sshll.u32 %s11107_s22, 4  ;;  %s1490_s11 = int_to_ptr.vmem [resolvable:$true] %s1489_s11  ;;  %s1565_s18 = int_to_ptr.vmem [resolvable:$true] %s1564_s18 }
 0x133   : > { %s10798_s10 = scalar_lea.hbm %s11202_s14, 128 }
 0x134   : > { %p10799_p6 = scmp.ne.s32.totalorder %s11202_s14, %s10798_s10  ;;  %p10805_p10 = scmp.lt.u32.totalorder %s10798_s10, %s11202_s14 }
 0x136   : > { %p10801_p8 = pnand %p10799_p6, %p11492_p7 }
 0x138   : > { %p10802_p9 = pneg %p10801_p8 }
 0x13a   : > { %p10807_p11 = pnand %p10805_p10, %p10802_p9 }
 0x13c   : > { %10810 = shalt.err (!%p10807_p11)
}
 0x13d   : > { %s10811_s26 = scalar_lea.vmem %s1490_s11, 128  ;;  %p10819_p13 = scmp.lt.s32.totalorder %s1490_s11, %s1490_s11 }
 0x13e   : > { %p10812_p2 = scmp.ne.s32.totalorder %s1490_s11, %s10811_s26  ;;  %p10820_p0 = scmp.lt.s32.totalorder %s10811_s26, %s10811_s26 }
 0x140   : > { %p10814_p3 = pnand %p10812_p2, %p11492_p7  ;;  %p10821_p1 = por %p10820_p0, %p10819_p13 }
 0x142   : > { %p10815_p12 = pneg %p10814_p3 }
 0x144   : > { %p10822_p4 = pnand %p10821_p1, %p10815_p12 }
 0x146   : > { %10825 = shalt.err (!%p10822_p4)
}
 0x147   : > { %s13338_s15 = smov 64   ;;  %s10826_s10 = scalar_lea.hbm %s13330_s12, 128 }
 0x148   : > { %9577 = dma.hbm_to_vmem [thread:$0]  (!%p11480_p5), %s11202_s14, 128, %s1490_s11, [#allocation6], %s13338_s15, %s13338_s15, %s11105_s6  }
 0x149   : > { %p10827_p6 = scmp.ne.s32.totalorder %s13330_s12, %s10826_s10  ;;  %p10833_p10 = scmp.lt.u32.totalorder %s10826_s10, %s13330_s12 }
 0x14b   : > { %p10829_p8 = pnand %p10827_p6, %p11492_p7 }
 0x14d   : > { %p10830_p9 = pneg %p10829_p8 }
 0x14f   : > { %p10835_p11 = pnand %p10833_p10, %p10830_p9 }
 0x151   : > { %10838 = shalt.err (!%p10835_p11)
}
 0x152   : > { %s10839_s1 = scalar_lea.vmem %s1565_s18, 128  ;;  %p10847_p13 = scmp.lt.s32.totalorder %s1565_s18, %s1565_s18 }
 0x153   : > { %p10840_p2 = scmp.ne.s32.totalorder %s1565_s18, %s10839_s1  ;;  %p10848_p0 = scmp.lt.s32.totalorder %s10839_s1, %s10839_s1 }
 0x155   : > { %p10842_p3 = pnand %p10840_p2, %p11492_p7  ;;  %p10849_p1 = por %p10848_p0, %p10847_p13 }
 0x157   : > { %p10843_p12 = pneg %p10842_p3 }
 0x159   : > { %p10850_p4 = pnand %p10849_p1, %p10843_p12 }
 0x15b   : > { %10853 = shalt.err (!%p10850_p4)
}
 0x15c   : > { %9583 = dma.hbm_to_vmem [thread:$0]  (!%p11480_p5), %s13330_s12, 128, %s1565_s18, [#allocation9]  }
 0x15d   : > { %s11108_s6 = smov [#allocation13]   ;;  %s11109_s22 = smov [#allocation16]  }
 0x15e   : > { %s1592_s11 = sshll.u32 %s11108_s6, 4  ;;  %s1620_s26 = sshll.u32 %s11109_s22, 4  ;;  %s1593_s11 = int_to_ptr.vmem [resolvable:$true] %s1592_s11  ;;  %s1621_s26 = int_to_ptr.vmem [resolvable:$true] %s1620_s26 }
 0x15f   : > { %s10854_s15 = scalar_lea.hbm %s11312_s24, 32 }
 0x160   : > { %p10855_p6 = scmp.ne.s32.totalorder %s11312_s24, %s10854_s15  ;;  %p10861_p10 = scmp.lt.u32.totalorder %s10854_s15, %s11312_s24 }
 0x162   : > { %p10857_p8 = pnand %p10855_p6, %p11492_p7 }
 0x164   : > { %p10858_p9 = pneg %p10857_p8 }
 0x166   : > { %p10863_p11 = pnand %p10861_p10, %p10858_p9 }
 0x168   : > { %10866 = shalt.err (!%p10863_p11)
}
 0x169   : > { %s10867_s10 = scalar_lea.vmem %s1593_s11, 32  ;;  %p10875_p13 = scmp.lt.s32.totalorder %s1593_s11, %s1593_s11 }
 0x16a   : > { %p10868_p2 = scmp.ne.s32.totalorder %s1593_s11, %s10867_s10  ;;  %p10876_p0 = scmp.lt.s32.totalorder %s10867_s10, %s10867_s10 }
 0x16c   : > { %p10870_p3 = pnand %p10868_p2, %p11492_p7  ;;  %p10877_p1 = por %p10876_p0, %p10875_p13 }
 0x16e   : > { %p10871_p12 = pneg %p10870_p3 }
 0x170   : > { %p10878_p4 = pnand %p10877_p1, %p10871_p12 }
 0x172   : > { %10881 = shalt.err (!%p10878_p4)
}
 0x173   : > { %9589 = dma.hbm_to_vmem [thread:$0]  (!%p11480_p5), %s11312_s24, 32, %s1593_s11, [#allocation12]  }
 0x174   : > { %s10882_s18 = scalar_lea.hbm %s11332_s19, 32 }
 0x175   : > { %p10883_p6 = scmp.ne.s32.totalorder %s11332_s19, %s10882_s18  ;;  %p10889_p10 = scmp.lt.u32.totalorder %s10882_s18, %s11332_s19 }
 0x177   : > { %p10885_p8 = pnand %p10883_p6, %p11492_p7 }
 0x179   : > { %p10886_p9 = pneg %p10885_p8 }
 0x17b   : > { %p10891_p11 = pnand %p10889_p10, %p10886_p9 }
 0x17d   : > { %10894 = shalt.err (!%p10891_p11)
}
 0x17e   : > { %s10895_s1 = scalar_lea.vmem %s1621_s26, 32  ;;  %p10903_p13 = scmp.lt.s32.totalorder %s1621_s26, %s1621_s26 }
 0x17f   : > { %p10896_p2 = scmp.ne.s32.totalorder %s1621_s26, %s10895_s1  ;;  %p10904_p0 = scmp.lt.s32.totalorder %s10895_s1, %s10895_s1 }
 0x181   : > { %p10898_p3 = pnand %p10896_p2, %p11492_p7  ;;  %p10905_p1 = por %p10904_p0, %p10903_p13 }
 0x183   : > { %p10899_p12 = pneg %p10898_p3 }
 0x185   : > { %p10906_p4 = pnand %p10905_p1, %p10899_p12 }
 0x187   : > { %10909 = shalt.err (!%p10906_p4)
}
 0x188   : > { %9595 = dma.hbm_to_vmem [thread:$0]  (!%p11480_p5), %s11332_s19, 32, %s1621_s26, [#allocation15]  }
 0x189   : > { %s11110_s6 = smov [#allocation19]   ;;  %s11111_s22 = smov [#allocation22]  }
 0x18a   : > { %s1675_s11 = sshll.u32 %s11110_s6, 4  ;;  %s1697_s15 = sshll.u32 %s11111_s22, 4  ;;  %s1676_s11 = int_to_ptr.vmem [resolvable:$true] %s1675_s11  ;;  %s1698_s15 = int_to_ptr.vmem [resolvable:$true] %s1697_s15 }
 0x18b   : > { %s10910_s10 = scalar_lea.hbm %s11395_s27, 64 }
 0x18c   : > { %p10911_p6 = scmp.ne.s32.totalorder %s11395_s27, %s10910_s10  ;;  %p10917_p10 = scmp.lt.u32.totalorder %s10910_s10, %s11395_s27 }
 0x18e   : > { %p10913_p8 = pnand %p10911_p6, %p11492_p7 }
 0x190   : > { %p10914_p9 = pneg %p10913_p8 }
 0x192   : > { %p10919_p11 = pnand %p10917_p10, %p10914_p9 }
 0x194   : > { %10922 = shalt.err (!%p10919_p11)
}
 0x195   : > { %s10923_s18 = scalar_lea.vmem %s1676_s11, 64  ;;  %p10931_p13 = scmp.lt.s32.totalorder %s1676_s11, %s1676_s11 }
 0x196   : > { %p10924_p2 = scmp.ne.s32.totalorder %s1676_s11, %s10923_s18  ;;  %p10932_p0 = scmp.lt.s32.totalorder %s10923_s18, %s10923_s18 }
 0x198   : > { %p10926_p3 = pnand %p10924_p2, %p11492_p7  ;;  %p10933_p1 = por %p10932_p0, %p10931_p13 }
 0x19a   : > { %p10927_p12 = pneg %p10926_p3 }
 0x19c   : > { %p10934_p4 = pnand %p10933_p1, %p10927_p12 }
 0x19e   : > { %10937 = shalt.err (!%p10934_p4)
}
 0x19f   : > { %9601 = dma.hbm_to_vmem [thread:$0]  (!%p11480_p5), %s11395_s27, 64, %s1676_s11, [#allocation18]  }
 0x1a0   : > { %s10938_s26 = scalar_lea.hbm %s11405_s29, 64 }
 0x1a1   : > { %p10939_p6 = scmp.ne.s32.totalorder %s11405_s29, %s10938_s26  ;;  %p10945_p10 = scmp.lt.u32.totalorder %s10938_s26, %s11405_s29 }
 0x1a3   : > { %p10941_p8 = pnand %p10939_p6, %p11492_p7 }
 0x1a5   : > { %p10942_p9 = pneg %p10941_p8 }
 0x1a7   : > { %p10947_p11 = pnand %p10945_p10, %p10942_p9 }
 0x1a9   : > { %10950 = shalt.err (!%p10947_p11)
}
 0x1aa   : > { %s10951_s1 = scalar_lea.vmem %s1698_s15, 64  ;;  %p10959_p13 = scmp.lt.s32.totalorder %s1698_s15, %s1698_s15 }
 0x1ab   : > { %p10952_p2 = scmp.ne.s32.totalorder %s1698_s15, %s10951_s1  ;;  %p10960_p0 = scmp.lt.s32.totalorder %s10951_s1, %s10951_s1 }
 0x1ad   : > { %p10954_p3 = pnand %p10952_p2, %p11492_p7  ;;  %p10961_p1 = por %p10960_p0, %p10959_p13 }
 0x1af   : > { %p10955_p12 = pneg %p10954_p3 }
 0x1b1   : > { %p10962_p4 = pnand %p10961_p1, %p10955_p12 }
 0x1b3   : > { %10965 = shalt.err (!%p10962_p4)
}
 0x1b4   : > { %9607 = dma.hbm_to_vmem [thread:$0]  (!%p11480_p5), %s11405_s29, 64, %s1698_s15, [#allocation21]  }
 0x1b5   : > { %s11112_s6 = smov [#allocation25]   ;;  %s10966_s22 = scalar_lea.hbm %s11450_s23, 64 }
 0x1b6   : > { %s1741_s11 = sshll.u32 %s11112_s6, 4  ;;  %p10967_p6 = scmp.ne.s32.totalorder %s11450_s23, %s10966_s22  ;;  %s1742_s11 = int_to_ptr.vmem [resolvable:$true] %s1741_s11 }
 0x1b7   : > { %p10973_p10 = scmp.lt.u32.totalorder %s10966_s22, %s11450_s23 }
 0x1b8   : > { %p10969_p8 = pnand %p10967_p6, %p11492_p7 }
 0x1ba   : > { %p10970_p9 = pneg %p10969_p8 }
 0x1bc   : > { %p10975_p11 = pnand %p10973_p10, %p10970_p9 }
 0x1be   : > { %10978 = shalt.err (!%p10975_p11)
}
 0x1bf   : > { %s10979_s10 = scalar_lea.vmem %s1742_s11, 64  ;;  %p10987_p13 = scmp.lt.s32.totalorder %s1742_s11, %s1742_s11 }
 0x1c0   : > { %p10980_p2 = scmp.ne.s32.totalorder %s1742_s11, %s10979_s10  ;;  %p10988_p0 = scmp.lt.s32.totalorder %s10979_s10, %s10979_s10 }
 0x1c2   : > { %p10982_p3 = pnand %p10980_p2, %p11492_p7  ;;  %p10989_p1 = por %p10988_p0, %p10987_p13 }
 0x1c4   : > { %p10983_p12 = pneg %p10982_p3 }
 0x1c6   : > { %p10990_p4 = pnand %p10989_p1, %p10983_p12 }
 0x1c8   : > { %10993 = shalt.err (!%p10990_p4)
}
 0x1c9   : > { %s11113_s15 = smov 16   ;;  %s11114_s18 = smov 1  }
 0x1ca   : > { %9613 = dma.hbm_to_vmem [thread:$0]  (!%p11480_p5), %s11450_s23, 64, %s1742_s11, [#allocation24], %s11113_s15, %s11113_s15, %s11114_s18  }
 0x1cb   : > { %p13339_p6 = scmp.ne.s32.totalorder %s13335_s13, 0 }
 0x1cd   : > { %1765 = sbr.rel (%p13339_p6) target bundleno = 13600 (0x3520), region = 260 }
 0x1d4   : > { %p13340_p8 = scmp.eq.s32.totalorder %s11463_s2, 0 }
 0x1d6   : > { %10999 = dma.done.wait (%p13340_p8), [#allocation4], 32   ;;  %p13341_p7 = pmov %p13340_p8 }
 0x1d8   : > { %11001 = vsyncadd (%p13341_p7), [#allocation4], 4294967264  ;;  %p13342_p9 = pmov %p13341_p7 }
 0x1d9   : > { %p13343_p10 = pmov %p13341_p7 }
 0x1da   : > { %11003 = dma.done.wait (%p13342_p9), [#allocation6], 192  }
 0x1db   : > { %11005 = vsyncadd (%p13343_p10), [#allocation6], 4294967104  ;;  %p13344_p11 = pmov %p13341_p7 }
 0x1dc   : > { %p13345_p5 = pmov %p13341_p7 }
 0x1dd   : > { %11007 = dma.done.wait (%p13344_p11), [#allocation9], 384  }
 0x1de   : > { %11009 = vsyncadd (%p13345_p5), [#allocation9], 4294966912  ;;  %p13346_p2 = pmov %p13345_p5 }
 0x1e0   : > { %11011 = dma.done.wait (%p13346_p2), [#allocation12], 160   ;;  %p13347_p3 = pmov %p13346_p2 }
 0x1e1   : > { %p13348_p12 = pmov %p13346_p2 }
 0x1e2   : > { %11013 = vsyncadd (%p13347_p3), [#allocation12], 4294967136 }
 0x1e3   : > { %11015 = dma.done.wait (%p13348_p12), [#allocation15], 64   ;;  %p13349_p13 = pmov %p13346_p2 }
 0x1e4   : > { %p13350_p0 = pmov %p13346_p2 }
 0x1e5   : > { %11017 = vsyncadd (%p13349_p13), [#allocation15], 4294967232 }
 0x1e6   : > { %11019 = dma.done.wait (%p13350_p0), [#allocation18], 192   ;;  %p13351_p1 = pmov %p13350_p0 }
 0x1e7   : > { %p13352_p4 = pmov %p13350_p0 }
 0x1e8   : > { %11021 = vsyncadd (%p13351_p1), [#allocation18], 4294967104 }
 0x1e9   : > { %11023 = dma.done.wait (%p13352_p4), [#allocation21], 128   ;;  %p13353_p6 = pmov %p13350_p0 }
 0x1ea   : > { %p13354_p8 = pmov %p13350_p0 }
 0x1eb   : > { %11025 = vsyncadd (%p13353_p6), [#allocation21], 4294967168 }
 0x1ec   : > { %11027 = dma.done.wait (%p13354_p8), [#allocation24], 320   ;;  %p13355_p7 = pmov %p13350_p0 }
 0x1ed   : > { %s13356_s5 = sld [smem:[#allocation34_spill]]  ;;  %p1958_p9 = scmp.lt.s32.totalorder %s11463_s2, 1  ;;  %v13237_v1 = vlaneseq  ;;  %v1982_v7 = vld [vmem:[#allocation17] sm:$0x77]  ;;  %vm13246_vm0 = vcmask 138240   ;;  %vm2028_vm1 = vcmask 15360  }
 0x1ee   : > { %11029 = vsyncadd (%p13355_p7), [#allocation24], 4294966976  ;;  %s13186_s0 = smov 17   ;;  %s13176_s26 = smov 16   ;;  %vm2042_vm2 = vcmask 130048   ;;  %vm2054_vm3 = vcmask 146432  }
 0x1ef   : > { %s13496_s2 = smov (!%p1958_p9, %s11463_s2), 1  ;;  %v11705_v2 = vshrl.u32 %v13237_v1, 7  ;;  %s13177_s1 = smov 2   ;;  %vm13179_vm4 = vcmask 261120   ;;  %vm2078_vm5 = vcmask 277504   ;;  %vm13199_vm6 = vcmask 777216  }
 0x1f0   : > { %s8878_s13 = sshll.u32 %s13496_s2, 3  ;;  %s11118_s6 = smov 18   ;;  %vm13216_vm7 = vcmask 908288   ;;  %vm2200_vm8 = vcmask 1043456   ;;  %vm13239_vm9 = vcmask 1039360   ;;  %vm13217_vm10 = vcmask 1031168  }
 0x1f1   : > { %13357 = vst [vmem:[#allocation82_spill] sm:$0xff] %v11705_v2  ;;  %v11709_v3 = vsub.s32 0, %v11705_v2  ;;  %v1990_v4 = vsub.s32 4, %v11705_v2  ;;  %v11713_v5 = vsub.s32 2, %v11705_v2  ;;  %v2010_v8 = vsub.s32 6, %v11705_v2  ;;  %s11119_s11 = smov 32  }
 0x1f2   : > { %s11120_s22 = smov 34   ;;  %s13212_s10 = smov 127   ;;  %vm13195_vm11 = vcmask 785408   ;;  %vm13207_vm12 = vcmask 900096   ;;  %vm13238_vm13 = vcmask 916480   ;;  %vm13190_vm14 = vcmask 769024  }
 0x1f3   : > { %13358 = vst [vmem:[#allocation83_spill] sm:$0xff] %v11709_v3  ;;  %s1962_s17 = scalar_lea.vmem %s13356_s5, %s8878_s13  ;;  %v1987_v10 = vrot.slane %v1982_v7, %v11709_v3  ;;  %v1991_v11 = vrot.slane %v1982_v7, %v1990_v4  ;;  %v2007_v12 = vrot.slane %v1982_v7, %v11713_v5  ;;  %v2011_v16 = vrot.slane %v1982_v7, %v2010_v8  ;;  %s13202_s15 = smov 111  }
 0x1f4   : > { %v1968_v6 = vld [vmem:[%s1962_s17] sm:$0xff]  ;;  %s13184_s18 = smov 95   ;;  %s13227_s13 = smov 126   ;;  %v13252_v7 = vmov 0   ;;  %vm13271_vm15 = vcmask 1041408  }
 0x1f5   : > { %1971 = vrot.lane.b32.xlu0 %v1968_v6, %s13186_s0  ;;  %v1970_v9 = vcombine.high %v1968_v6, %v1968_v6  ;;  %v11721_v13 = vrot.slane %v1987_v10, %v11709_v3  ;;  %v11727_v14 = vrot.slane %v1991_v11, %v11709_v3  ;;  %v2017_v15 = vrot.slane %v2007_v12, %v11713_v5  ;;  %s13193_s17 = smov 112   ;;  %s13386_s3 = smov 123  }
 0x1f6   : > { %v2021_v17 = vrot.slane %v2011_v16, %v11713_v5  ;;  %2265 = vmatprep.mubr.bf16.mxu0 %v13252_v7  ;;  %9807 = vset.pattern.permute.xlu0 %v13252_v7  ;;  %s13387_s4 = sld [smem:[#allocation44_spill]]  ;;  %s13389_s5 = smov 120  }
 0x1f7   : > { %13359 = vst [vmem:[#allocation84_spill] sm:$0xff] %v11721_v13  ;;  %2038 = vrot.lane.b32.xlu1 %v11721_v13, %s13176_s26  ;;  %13360 = vst [vmem:[#allocation85_spill] sm:$0xff] %v11727_v14  ;;  %2483 = vmatprep.mubr.bf16.mxu1 %v13252_v7  ;;  %s13392_s8 = smov 6   ;;  %s13395_s9 = sld [smem:[#allocation46_spill]] }
 0x1f8   : > { %9863 = vset.pattern.permute.xlu1 %v13252_v7  ;;  %s13399_s12 = sld [smem:[#allocation48_spill]] }
 0x1f9   : > { %1973 = vrot.lane.b32.xlu0 %v1970_v9, %s13186_s0 }
 0x1fb   : > { %2040 = vrot.lane.b32.xlu1 %v11727_v14, %s13176_s26  ;;  %s13366_s26 = sld [smem:[#allocation36_spill]] }
 0x1fd   : > { %2024 = vrot.lane.b32.xlu0 %v2017_v15, %s13177_s1 }
 0x1ff   : > { %2026 = vrot.lane.b32.xlu1 %v2021_v17, %s13177_s1  ;;  %s13180_s1 = smov 94  }
 0x201   : > { %2050 = vrot.lane.b32.xlu0 %v2017_v15, %s11118_s6  ;;  %v2216_v10 = vld [vmem:[%s13366_s26] sm:$0xf]  ;;  %s13367_s26 = sld [smem:[#allocation38_spill]] }
 0x203   : > { %2052 = vrot.lane.b32.xlu1 %v2021_v17, %s11118_s6 }
 0x205   : > { %2062 = vrot.lane.b32.xlu0 %v11721_v13, %s11119_s11 }
 0x207   : > { %2064 = vrot.lane.b32.xlu1 %v11727_v14, %s11119_s11  ;;  %s13200_s11 = smov 110  }
 0x209   : > { %2074 = vrot.lane.b32.xlu0 %v2017_v15, %s11120_s22 }
 0x20b   : > { %2076 = vrot.lane.b32.xlu1 %v2021_v17, %s11120_s22  ;;  %s13182_s22 = smov 96  }
 0x267   : > { %v1972_v18 = vpop.permute.xlu0 %1971 }
 0x268   : > { %v11740_v19 = vsel %vm13246_vm0, 0.0, %v1972_v18 }
 0x269   : > { %v2088_v20 = vrot.slane %v11740_v19, 4  ;;  %v11743_v21 = vpop.permute.xlu1 %2038 }
 0x26a   : > { %v2047_v39 = vmul.f32 %v11743_v21, %v11740_v19 }
 0x26b   : > { %v1974_v22 = vpop.permute.xlu0 %1973  ;;  %2091 = vrot.lane.b32.xlu1 %v2088_v20, %s13212_s10 }
 0x26c   : > { %v11749_v23 = vsel %vm13246_vm0, %v1972_v18, %v1974_v22  ;;  %v11752_v24 = vsel %vm13246_vm0, %v1974_v22, 0.0  ;;  %v2119_v46 = vrot.slane %v2047_v39, 4 }
 0x26d   : > { %v9767_v25 = vpack.i.bf16 %v11752_v24, %v11749_v23  ;;  %v2089_v26 = vrot.slane %v11749_v23, 4  ;;  %v2090_v27 = vrot.slane %v11752_v24, 4  ;;  %v11758_v28 = vpop.permute.xlu1 %2040 }
 0x26e   : > { %v11788_v40 = vsel %vm2042_vm2, %v11743_v21, %v11758_v28  ;;  %v2049_v43 = vmul.f32 %v11758_v28, %v11752_v24 }
 0x26f   : > { %9768 = vrot.lane.b32.xlu0 %v9767_v25, %s13202_s15  ;;  %v11761_v29 = vpop.permute.xlu0 %2024  ;;  %v9777_v30 = vpack.i.bf16 %v2090_v27, %v2089_v26  ;;  %v2048_v42 = vmul.f32 %v11788_v40, %v11749_v23  ;;  %v2003_v27 = vmul.f32 %v11727_v14, %v11749_v23 }
 0x270   : > { %v2033_v35 = vmul.f32 %v11761_v29, %v11740_v19  ;;  %v2121_v54 = vrot.slane %v2049_v43, 4 }
 0x271   : > { %9778 = vrot.lane.b32.xlu1 %v9777_v30, %s13184_s18  ;;  %v11764_v31 = vpop.permute.xlu1 %2026  ;;  %v2120_v53 = vrot.slane %v2048_v42, 4 }
 0x272   : > { %v11770_v32 = vsel %vm2028_vm1, %v11761_v29, %v11764_v31  ;;  %v2035_v33 = vmul.f32 %v11764_v31, %v11752_v24 }
 0x273   : > { %9773 = vrot.lane.b32.xlu0 %v9777_v30, %s13212_s10  ;;  %v11774_v34 = vpop.permute.xlu0 %2050  ;;  %v2034_v36 = vmul.f32 %v11770_v32, %v11749_v23  ;;  %v9792_v60 = vpack.i.bf16 %v2121_v54, %v2120_v53  ;;  %v2002_v30 = vmul.f32 %v11721_v13, %v11740_v19 }
 0x274   : > { %v2059_v47 = vmul.f32 %v11774_v34, %v11740_v19 }
 0x275   : > { %v11780_v37 = vpop.permute.xlu1 %2052  ;;  %v9782_v38 = vpack.i.bf16 %v2035_v33, %v2034_v36 }
 0x276   : > { %v11792_v41 = vsel %vm2054_vm3, %v11774_v34, %v11780_v37  ;;  %v2061_v49 = vmul.f32 %v11780_v37, %v11752_v24  ;;  %v2147_v55 = vrot.slane %v2059_v47, 4  ;;  %vm13198_vm3 = vcmask 293888  }
 0x277   : > { %2105 = vrot.lane.b32.xlu0 %v2033_v35, %s13227_s13  ;;  %9783 = vrot.lane.b32.xlu1 %v9782_v38, %s13227_s13  ;;  %v11799_v44 = vpop.permute.xlu0 %2062  ;;  %v2060_v48 = vmul.f32 %v11792_v41, %v11749_v23 }
 0x278   : > { %v2149_v58 = vrot.slane %v2061_v49, 4  ;;  %v2071_v4 = vmul.f32 %v11799_v44, %v11740_v19 }
 0x279   : > { %v11801_v45 = vpop.permute.xlu1 %2064  ;;  %v2148_v57 = vrot.slane %v2060_v48, 4 }
 0x27a   : > { %13361 = vst [vmem:[#allocation86_spill] sm:$0xff] %v11801_v45  ;;  %v11812_v50 = vsel %vm13179_vm4, %v11799_v44, %v11801_v45  ;;  %v2073_v51 = vmul.f32 %v11801_v45, %v11752_v24 }
 0x27b   : > { %13362 = vst [vmem:[#allocation87_spill] sm:$0xff] %v11812_v50  ;;  %2122 = vrot.lane.b32.xlu1 %v2119_v46, %s13193_s17  ;;  %v2072_v52 = vmul.f32 %v11812_v50, %v11749_v23  ;;  %v9797_v59 = vpack.i.bf16 %v2149_v58, %v2148_v57  ;;  %v11825_v62 = vpop.permute.xlu0 %2074 }
 0x27c   : > { %13364 = vst [vmem:[#allocation89_spill] sm:$0xff] %v11825_v62  ;;  %v2083_v8 = vmul.f32 %v11825_v62, %v11740_v19 }
 0x27d   : > { %v9787_v56 = vpack.i.bf16 %v2073_v51, %v2072_v52  ;;  %v11821_v61 = vpop.permute.xlu1 %2076 }
 0x27e   : > { %13363 = vst [vmem:[#allocation88_spill] sm:$0xff] %v11821_v61  ;;  %v11829_v63 = vsel %vm2078_vm5, %v11825_v62, %v11821_v61  ;;  %v2085_v0 = vmul.f32 %v11821_v61, %v11752_v24 }
 0x27f   : > { %2150 = vrot.lane.b32.xlu1 %v2147_v55, %s13200_s11  ;;  %9788 = vrot.lane.b32.xlu0 %v9787_v56, %s13182_s22  ;;  %13365 = vst [vmem:[#allocation90_spill] sm:$0xff] %v11829_v63  ;;  %v2084_v6 = vmul.f32 %v11829_v63, %v11749_v23 }
 0x281   : > { %v9802_v9 = vpack.i.bf16 %v2084_v6, %v2083_v8 }
 0x283   : > { %9798 = vrot.lane.b32.xlu1 %v9797_v59, %s13200_s11  ;;  %9793 = vrot.lane.b32.xlu0 %v9792_v60, %s13193_s17 }
 0x287   : > { %2175 = vrot.lane.b32.xlu1 %v2088_v20, %s13184_s18  ;;  %2133 = vrot.lane.b32.xlu0 %v11740_v19, %s13202_s15 }
 0x28b   : > { %2193 = vrot.lane.b32.xlu1 %v2085_v0, %s13180_s1  ;;  %2164 = vrot.lane.b32.xlu0 %v2071_v4, %s13182_s22 }
 0x28f   : > { %9803 = vrot.lane.b32.xlu0 %v9802_v9, %s13180_s1 }
 0x293   : > { %2219 = vperm.xlu0 %9807, %v2216_v10  }
 0x2dd   : > { %v2092_v11 = vpop.permute.xlu1 %2091 }
 0x2e1   : > { %v9769_v12 = vpop.permute.xlu0 %9768 }
 0x2e2   : > { %v9771_v33 = vunpack.i.h.bf16 %v9769_v12  ;;  %v9770_v35 = vunpack.i.l.bf16 %v9769_v12 }
 0x2e3   : > { %v9779_v15 = vpop.permute.xlu1 %9778 }
 0x2e4   : > { %v9781_v46 = vunpack.i.h.bf16 %v9779_v15  ;;  %v9780_v47 = vunpack.i.l.bf16 %v9779_v15  ;;  %v2141_v57 = vsel %vm13216_vm7, %v9770_v35, %v9771_v33 }
 0x2e5   : > { %v9774_v16 = vpop.permute.xlu0 %9773 }
 0x2e6   : > { %v9776_v22 = vunpack.i.h.bf16 %v9774_v16  ;;  %v9775_v24 = vunpack.i.l.bf16 %v9774_v16  ;;  %v2183_v15 = vsel %vm13199_vm6, %v9780_v47, %v9781_v46 }
 0x2e8   : > { %v2099_v43 = vsel %vm13239_vm9, %v9775_v24, %v9776_v22  ;;  %v2098_v23 = vsel %vm13239_vm9, %v2092_v11, %v9775_v24 }
 0x2e9   : > { %v9784_v17 = vpop.permute.xlu1 %9783  ;;  %v2106_v18 = vpop.permute.xlu0 %2105  ;;  %v2202_v55 = vsel %vm2200_vm8, %v2003_v27, %v2099_v43  ;;  %v2201_v8 = vsel %vm2200_vm8, %v2002_v30, %v2098_v23 }
 0x2ea   : > { %v9786_v36 = vunpack.i.h.bf16 %v9784_v17  ;;  %v9785_v38 = vunpack.i.l.bf16 %v9784_v17 }
 0x2ec   : > { %v2113_v54 = vsel %vm13217_vm10, %v9785_v38, %v9786_v36  ;;  %v2112_v56 = vsel %vm13217_vm10, %v2106_v18, %v9785_v38 }
 0x2ed   : > { %v2123_v20 = vpop.permute.xlu1 %2122 }
 0x2f1   : > { %v2151_v25 = vpop.permute.xlu1 %2150  ;;  %v9789_v26 = vpop.permute.xlu0 %9788 }
 0x2f2   : > { %v9791_v39 = vunpack.i.h.bf16 %v9789_v26  ;;  %v9790_v42 = vunpack.i.l.bf16 %v9789_v26 }
 0x2f4   : > { %v2172_v0 = vsel %vm13195_vm11, %v9790_v42, %v9791_v39 }
 0x2f5   : > { %v9799_v48 = vpop.permute.xlu1 %9798  ;;  %v9794_v49 = vpop.permute.xlu0 %9793  ;;  %v2208_v17 = vsel %vm2200_vm8, %v2172_v0, %v2183_v15 }
 0x2f6   : > { %v9801_v51 = vunpack.i.h.bf16 %v9799_v48  ;;  %v9800_v52 = vunpack.i.l.bf16 %v9799_v48  ;;  %v9796_v53 = vunpack.i.h.bf16 %v9794_v49  ;;  %v9795_v19 = vunpack.i.l.bf16 %v9794_v49  ;;  %v2215_v49 = vld [vmem:[#allocation3] sm:$0x3] }
 0x2f8   : > { %v2130_v58 = vsel %vm13238_vm13, %v9795_v19, %v9796_v53  ;;  %v2129_v59 = vsel %vm13238_vm13, %v2123_v20, %v9795_v19  ;;  %v2158_v60 = vsel %vm13207_vm12, %v9800_v52, %v9801_v51  ;;  %v2157_v26 = vsel %vm13207_vm12, %v2151_v25, %v9800_v52 }
 0x2f9   : > { %v2134_v4 = vpop.permute.xlu0 %2133  ;;  %v2204_v6 = vsel %vm2200_vm8, %v2113_v54, %v2130_v58  ;;  %v2203_v9 = vsel %vm2200_vm8, %v2112_v56, %v2129_v59  ;;  %v2206_v10 = vsel %vm2200_vm8, %v2141_v57, %v2158_v60  ;;  %v2176_v16 = vpop.permute.xlu1 %2175 }
 0x2fa   : > { %v2210_v11 = vpack.c.bf16 %v2204_v6, %v2202_v55  ;;  %v2209_v12 = vpack.c.bf16 %v2203_v9, %v2201_v8  ;;  %v2140_v18 = vsel %vm13216_vm7, %v2134_v4, %v9770_v35  ;;  %v2212_v20 = vpack.c.bf16 %v2208_v17, %v2206_v10 }
 0x2fb   : > { %v2182_v24 = vsel %vm13199_vm6, %v2176_v16, %v9780_v47  ;;  %v2205_v30 = vsel %vm2200_vm8, %v2140_v18, %v2157_v26 }
 0x2fc   : > { %2233 = vmatprep.subr.bf16.mxu0 %v2210_v11 }
 0x2fd   : > { %v2165_v22 = vpop.permute.xlu0 %2164  ;;  %2234 = vmatpush1.bf16.msra.mxu0 %v2209_v12  ;;  %v2194_v43 = vpop.permute.xlu1 %2193 }
 0x2fe   : > { %v2171_v27 = vsel %vm13195_vm11, %v2165_v22, %v9790_v42  ;;  %2235 = vmatprep.subr.bf16.mxu0 %v2212_v20 }
 0x2ff   : > { %v2207_v33 = vsel %vm2200_vm8, %v2171_v27, %v2182_v24 }
 0x300   : > { %v2211_v36 = vpack.c.bf16 %v2207_v33, %v2205_v30 }
 0x301   : > { %v9804_v38 = vpop.permute.xlu0 %9803 }
 0x302   : > { %v9806_v39 = vunpack.i.h.bf16 %v9804_v38  ;;  %v9805_v35 = vunpack.i.l.bf16 %v9804_v38  ;;  %2236 = vmatpush1.bf16.msra.mxu0 %v2211_v36 }
 0x304   : > { %v2197_v46 = vsel %vm13190_vm14, %v9806_v39, %v2194_v43  ;;  %v2196_v47 = vsel %vm13190_vm14, %v9805_v35, %v9806_v39 }
 0x305   : > { %v2214_v25 = vpack.c.bf16 %v2197_v46, %v2197_v46  ;;  %v2213_v48 = vpack.c.bf16 %v2196_v47, %v2196_v47 }
 0x307   : > { %8658 = vmatprep.subr.msk.bf16.mxu0 %vm13271_vm15, %v2214_v25  ;;  %v2228_v42 = vsel %vm13271_vm15, %v2213_v48, 0 }
 0x308   : > { %2238 = vmatpush1.bf16.msra.mxu0 %v2228_v42 }
 0x30b   : > { %8659 = vmatmul.mubr.msk.bf16.vlgmr.msra.gmra.mrb[0].mxu0 %vm13198_vm3, %v2215_v49 }
 0x312   : > { %v2220_v23 = vpop.permute.xlu0 %2219 }
 0x3de   : > { %v2267_v51 = vpop.f32.mrb[0].mxu0 }
 0x3df   : > { %v2268_v52 = vadd.f32 %v2267_v51, %v2220_v23  ;;  %v2269_v53 = vpop.f32.mrb[1].mxu0 }
 0x3e0   : > { %v2270_v19 = vadd.f32 %v2269_v53, %v2220_v23  ;;  %v2271_v54 = vpop.f32.mrb[2].mxu0 }
 0x3e1   : > { %v2276_v55 = vmin.f32 %v2268_v52, 0.0  ;;  %v2272_v56 = vpop.f32.mrb[3].mxu0  ;;  %vm2274_vm5 = vcmp.gt.f32.partialorder %v2268_v52, 0.0 }
 0x3e2   : > { %v2277_v57 = vmin.f32 %v2270_v19, 0.0  ;;  %vm2275_vm4 = vcmp.gt.f32.partialorder %v2270_v19, 0.0 }
 0x3e3   : > { %v2278_v58 = vmul.f32 1.442695, %v2276_v55 }
 0x3e4   : > { %v2280_v59 = vmul.f32 1.442695, %v2277_v57 }
 0x3e5   : > { %10508 = vpow2.f32 %v2278_v58 }
 0x3e6   : > { %10510 = vpow2.f32 %v2280_v59 }
 0x3ef   : > { %v10509_v60 = vpop.eup %10508 }
 0x3f0   : > { %v10511_v0 = vpop.eup %10510  ;;  %v8660_v4 = vadd.f32 -1.0, %v10509_v60  ;;  %v2436_v60 = vld [vmem:[%s13367_s26] sm:$0xf]  ;;  %s13368_s26 = sld [smem:[#allocation37_spill]] }
 0x3f1   : > { %v8661_v8 = vadd.f32 -1.0, %v10511_v0 }
 0x3f2   : > { %v2284_v6 = vsel %vm2274_vm5, %v2268_v52, %v8660_v4 }
 0x3f3   : > { %2288 = vrot.lane.b32.xlu1 %v2284_v6, %s13186_s0  ;;  %v2285_v9 = vsel %vm2275_vm4, %v2270_v19, %v8661_v8 }
 0x3f7   : > { %2290 = vrot.lane.b32.xlu1 %v2285_v9, %s13186_s0  ;;  %s13370_s0 = smov 2  }
 0x465   : > { %v2289_v10 = vpop.permute.xlu1 %2288 }
 0x466   : > { %v11886_v11 = vsel %vm13246_vm0, 0.0, %v2289_v10 }
 0x467   : > { %v2317_v12 = vrot.slane %v11886_v11, 4  ;;  %v2300_v30 = vmul.f32 %v11886_v11, %v11761_v29  ;;  %v2303_v36 = vmul.f32 %v11886_v11, %v11743_v21  ;;  %v2306_v47 = vmul.f32 %v11886_v11, %v11774_v34 }
 0x468   : > { %v2309_v55 = vmul.f32 %v11886_v11, %v11799_v44  ;;  %v2312_v58 = vmul.f32 %v11886_v11, %v11825_v62 }
 0x469   : > { %2320 = vrot.lane.b32.xlu1 %v2317_v12, %s13212_s10  ;;  %v2291_v15 = vpop.permute.xlu1 %2290  ;;  %v2346_v46 = vrot.slane %v2303_v36, 4  ;;  %v2372_v51 = vrot.slane %v2306_v47, 4 }
 0x46a   : > { %v2292_v16 = vsel %vm13246_vm0, %v2289_v10, %v2291_v15  ;;  %v2297_v17 = vsel %vm13246_vm0, %v2291_v15, 0.0 }
 0x46b   : > { %v9808_v18 = vpack.i.bf16 %v2297_v17, %v2292_v16  ;;  %v2301_v20 = vmul.f32 %v2292_v16, %v11770_v32  ;;  %v2302_v22 = vmul.f32 %v2297_v17, %v11764_v31  ;;  %v2318_v26 = vrot.slane %v2292_v16, 4 }
 0x46c   : > { %v2319_v27 = vrot.slane %v2297_v17, 4  ;;  %v2310_v38 = vmul.f32 %v2292_v16, %v11812_v50  ;;  %v2311_v39 = vmul.f32 %v2297_v17, %v11801_v45  ;;  %v2304_v35 = vmul.f32 %v2292_v16, %v11788_v40 }
 0x46d   : > { %9809 = vrot.lane.b32.xlu0 %v9808_v18, %s13202_s15  ;;  %v9818_v24 = vpack.i.bf16 %v2302_v22, %v2301_v20  ;;  %v2305_v43 = vmul.f32 %v2297_v17, %v11758_v28  ;;  %v2307_v25 = vmul.f32 %v2292_v16, %v11792_v41  ;;  %v2308_v48 = vmul.f32 %v2297_v17, %v11780_v37 }
 0x46e   : > { %v9828_v33 = vpack.i.bf16 %v2319_v27, %v2318_v26  ;;  %v9823_v42 = vpack.i.bf16 %v2311_v39, %v2310_v38  ;;  %v2347_v49 = vrot.slane %v2304_v35, 4  ;;  %v2313_v56 = vmul.f32 %v2292_v16, %v11829_v63 }
 0x46f   : > { %9819 = vrot.lane.b32.xlu1 %v9818_v24, %s13227_s13  ;;  %v2348_v23 = vrot.slane %v2305_v43, 4  ;;  %v2373_v52 = vrot.slane %v2307_v25, 4  ;;  %v2374_v53 = vrot.slane %v2308_v48, 4  ;;  %v2314_v57 = vmul.f32 %v2297_v17, %v11821_v61 }
 0x470   : > { %v9843_v59 = vpack.i.bf16 %v2313_v56, %v2312_v58  ;;  %v2299_v26 = vmul.f32 %v2292_v16, %v11727_v14 }
 0x471   : > { %2333 = vrot.lane.b32.xlu0 %v2300_v30, %s13227_s13  ;;  %v9833_v19 = vpack.i.bf16 %v2348_v23, %v2347_v49  ;;  %v9838_v54 = vpack.i.bf16 %v2374_v53, %v2373_v52  ;;  %v2298_v30 = vmul.f32 %v11886_v11, %v11721_v13 }
 0x473   : > { %9829 = vrot.lane.b32.xlu1 %v9828_v33, %s13184_s18 }
 0x475   : > { %9814 = vrot.lane.b32.xlu0 %v9828_v33, %s13212_s10 }
 0x477   : > { %2349 = vrot.lane.b32.xlu1 %v2346_v46, %s13193_s17 }
 0x479   : > { %9824 = vrot.lane.b32.xlu0 %v9823_v42, %s13182_s22 }
 0x47b   : > { %2375 = vrot.lane.b32.xlu1 %v2372_v51, %s13200_s11 }
 0x47d   : > { %9834 = vrot.lane.b32.xlu0 %v9833_v19, %s13193_s17 }
 0x47f   : > { %9839 = vrot.lane.b32.xlu1 %v9838_v54, %s13200_s11 }
 0x481   : > { %2359 = vrot.lane.b32.xlu0 %v11886_v11, %s13202_s15 }
 0x483   : > { %2398 = vrot.lane.b32.xlu1 %v2317_v12, %s13184_s18  ;;  %s13196_s18 = smov 9  }
 0x485   : > { %2388 = vrot.lane.b32.xlu0 %v2309_v55, %s13182_s22  ;;  %s13189_s22 = smov 10  }
 0x487   : > { %2415 = vrot.lane.b32.xlu1 %v2314_v57, %s13180_s1 }
 0x489   : > { %9844 = vrot.lane.b32.xlu0 %v9843_v59, %s13180_s1  ;;  %s13369_s1 = sld [smem:[#allocation77_spill]] }
 0x48d   : > { %2439 = vperm.xlu0 %9807, %v2436_v60  }
 0x4db   : > { %v2321_v0 = vpop.permute.xlu1 %2320 }
 0x4df   : > { %v9810_v4 = vpop.permute.xlu0 %9809 }
 0x4e0   : > { %v9812_v33 = vunpack.i.h.bf16 %v9810_v4  ;;  %v9811_v36 = vunpack.i.l.bf16 %v9810_v4 }
 0x4e1   : > { %v9820_v6 = vpop.permute.xlu1 %9819 }
 0x4e2   : > { %v9821_v20 = vunpack.i.l.bf16 %v9820_v6  ;;  %v9822_v22 = vunpack.i.h.bf16 %v9820_v6 }
 0x4e3   : > { %v2334_v8 = vpop.permute.xlu0 %2333 }
 0x4e4   : > { %v2339_v43 = vsel %vm13217_vm10, %v2334_v8, %v9821_v20  ;;  %v2340_v16 = vsel %vm13217_vm10, %v9821_v20, %v9822_v22 }
 0x4e5   : > { %v9830_v9 = vpop.permute.xlu1 %9829 }
 0x4e6   : > { %v9832_v48 = vunpack.i.h.bf16 %v9830_v9  ;;  %v9831_v42 = vunpack.i.l.bf16 %v9830_v9 }
 0x4e7   : > { %v9815_v10 = vpop.permute.xlu0 %9814 }
 0x4e8   : > { %v9817_v15 = vunpack.i.h.bf16 %v9815_v10  ;;  %v9816_v18 = vunpack.i.l.bf16 %v9815_v10  ;;  %v2405_v6 = vsel %vm13199_vm6, %v9831_v42, %v9832_v48  ;;  %v2559_v48 = vld [vmem:[%s13369_s1 + $0x80] sm:$0xff] }
 0x4e9   : > { %v2350_v12 = vpop.permute.xlu1 %2349 }
 0x4ea   : > { %v2327_v27 = vsel %vm13239_vm9, %v9816_v18, %v9817_v15  ;;  %v2326_v25 = vsel %vm13239_vm9, %v2321_v0, %v9816_v18  ;;  %v2366_v0 = vsel %vm13216_vm7, %v9811_v36, %v9812_v33 }
 0x4eb   : > { %v9825_v17 = vpop.permute.xlu0 %9824  ;;  %v2422_v23 = vsel %vm2200_vm8, %v2299_v26, %v2327_v27  ;;  %v2421_v55 = vsel %vm2200_vm8, %v2298_v30, %v2326_v25  ;;  %v13250_v25 = vmov 0.0  }
 0x4ec   : > { %v9827_v38 = vunpack.i.h.bf16 %v9825_v17  ;;  %v9826_v39 = vunpack.i.l.bf16 %v9825_v17 }
 0x4ed   : > { %v2376_v24 = vpop.permute.xlu1 %2375 }
 0x4ee   : > { %v2395_v57 = vsel %vm13195_vm11, %v9826_v39, %v9827_v38 }
 0x4ef   : > { %v9835_v35 = vpop.permute.xlu0 %9834 }
 0x4f0   : > { %v9837_v46 = vunpack.i.h.bf16 %v9835_v35  ;;  %v9836_v47 = vunpack.i.l.bf16 %v9835_v35 }
 0x4f1   : > { %v9840_v49 = vpop.permute.xlu1 %9839 }
 0x4f2   : > { %v9842_v51 = vunpack.i.h.bf16 %v9840_v49  ;;  %v9841_v11 = vunpack.i.l.bf16 %v9840_v49  ;;  %v2356_v52 = vsel %vm13238_vm13, %v9836_v47, %v9837_v46  ;;  %v2355_v53 = vsel %vm13238_vm13, %v2350_v12, %v9836_v47  ;;  %v2435_v47 = vld [vmem:[%s13368_s26] sm:$0x3]  ;;  %s13188_s26 = smov 8  }
 0x4f3   : > { %v2360_v19 = vpop.permute.xlu0 %2359  ;;  %v2424_v54 = vsel %vm2200_vm8, %v2340_v16, %v2356_v52  ;;  %v2423_v56 = vsel %vm2200_vm8, %v2339_v43, %v2355_v53  ;;  %v2428_v12 = vsel %vm2200_vm8, %v2395_v57, %v2405_v6  ;;  %v2543_v49 = vld [vmem:[%s13369_s1] sm:$0xff] }
 0x4f4   : > { %v2430_v58 = vpack.c.bf16 %v2424_v54, %v2422_v23  ;;  %v2429_v59 = vpack.c.bf16 %v2423_v56, %v2421_v55  ;;  %v2382_v4 = vsel %vm13207_vm12, %v9841_v11, %v9842_v51  ;;  %v2365_v8 = vsel %vm13216_vm7, %v2360_v19, %v9811_v36  ;;  %v2544_v23 = vld [vmem:[%s13369_s1 + $0x8] sm:$0xff]  ;;  %v2561_v51 = vld [vmem:[%s13369_s1 + $0x90] sm:$0xff]  ;;  %v2546_v54 = vld [vmem:[%s13369_s1 + $0x18] sm:$0xff] }
 0x4f5   : > { %v2399_v60 = vpop.permute.xlu1 %2398  ;;  %v2381_v9 = vsel %vm13207_vm12, %v2376_v24, %v9841_v11  ;;  %v2426_v10 = vsel %vm2200_vm8, %v2366_v0, %v2382_v4  ;;  %v2562_v11 = vld [vmem:[%s13369_s1 + $0x98] sm:$0xff]  ;;  %v9368_v52 = vpack.c.bf16 %v2544_v23, %v2543_v49  ;;  %v2545_v19 = vld [vmem:[%s13369_s1 + $0x10] sm:$0xff]  ;;  %v2563_v55 = vld [vmem:[%s13369_s1 + $0xa0] sm:$0xff]  ;;  %vm2993_vm12 = vcmask 171008  }
 0x4f6   : > { %2451 = vmatprep.subr.bf16.mxu1 %v2430_v58  ;;  %v2432_v18 = vpack.c.bf16 %v2428_v12, %v2426_v10  ;;  %v2404_v17 = vsel %vm13199_vm6, %v2399_v60, %v9831_v42  ;;  %v2425_v22 = vsel %vm2200_vm8, %v2365_v8, %v2381_v9  ;;  %v2560_v42 = vld [vmem:[%s13369_s1 + $0x88] sm:$0xff]  ;;  %v9370_v53 = vpack.c.bf16 %v2562_v11, %v2561_v51  ;;  %v2565_v0 = vld [vmem:[%s13369_s1 + $0xb0] sm:$0xff]  ;;  %v2566_v4 = vld [vmem:[%s13369_s1 + $0xb8] sm:$0xff] }
 0x4f7   : > { %v2389_v15 = vpop.permute.xlu0 %2388  ;;  %2452 = vmatpush1.bf16.msra.mxu1 %v2429_v59  ;;  %v9366_v16 = vpack.c.bf16 %v2560_v42, %v2559_v48  ;;  %v2564_v56 = vld [vmem:[%s13369_s1 + $0xa8] sm:$0xff]  ;;  %v9372_v57 = vpack.c.bf16 %v2546_v54, %v2545_v19  ;;  %v2547_v59 = vld [vmem:[%s13369_s1 + $0x20] sm:$0xff]  ;;  %v9378_v8 = vpack.c.bf16 %v2566_v4, %v2565_v0  ;;  %v2549_v9 = vld [vmem:[%s13369_s1 + $0x30] sm:$0xff] }
 0x4f8   : > { %v2394_v20 = vsel %vm13195_vm11, %v2389_v15, %v9826_v39  ;;  %2453 = vmatprep.subr.bf16.mxu1 %v2432_v18  ;;  %v9374_v58 = vpack.c.bf16 %v2564_v56, %v2563_v55  ;;  %v2548_v60 = vld [vmem:[%s13369_s1 + $0x28] sm:$0xff]  ;;  %v2550_v10 = vld [vmem:[%s13369_s1 + $0x38] sm:$0xff]  ;;  %v2569_v48 = vld [vmem:[%s13369_s1 + $0xd0] sm:$0xff] }
 0x4f9   : > { %v2427_v26 = vsel %vm2200_vm8, %v2394_v20, %v2404_v17  ;;  %v2416_v36 = vpop.permute.xlu1 %2415  ;;  %9367 = vmatprep.subr.bf16.mxu0 %v9366_v16  ;;  %v9376_v6 = vpack.c.bf16 %v2548_v60, %v2547_v59  ;;  %v9380_v12 = vpack.c.bf16 %v2550_v10, %v2549_v9  ;;  %v2570_v42 = vld [vmem:[%s13369_s1 + $0xd8] sm:$0xff]  ;;  %v2553_v49 = vld [vmem:[%s13369_s1 + $0x50] sm:$0xff]  ;;  %v2571_v19 = vld [vmem:[%s13369_s1 + $0xe0] sm:$0xff] }
 0x4fa   : > { %v2431_v27 = vpack.c.bf16 %v2427_v26, %v2425_v22  ;;  %9369 = vmatpush3.bf16.msra.mxu0 %v9368_v52  ;;  %v9386_v16 = vpack.c.bf16 %v2570_v42, %v2569_v48  ;;  %v2554_v23 = vld [vmem:[%s13369_s1 + $0x58] sm:$0xff]  ;;  %v2572_v54 = vld [vmem:[%s13369_s1 + $0xe8] sm:$0xff]  ;;  %v2555_v55 = vld [vmem:[%s13369_s1 + $0x60] sm:$0xff] }
 0x4fb   : > { %v9845_v24 = vpop.permute.xlu0 %9844  ;;  %9371 = vmatprep.subr.bf16.mxu0 %v9370_v53  ;;  %v9388_v51 = vpack.c.bf16 %v2554_v23, %v2553_v49  ;;  %v2573_v4 = vld [vmem:[%s13369_s1 + $0xf0] sm:$0xff] }
 0x4fc   : > { %v9847_v30 = vunpack.i.h.bf16 %v9845_v24  ;;  %v9846_v33 = vunpack.i.l.bf16 %v9845_v24  ;;  %2454 = vmatpush1.bf16.msra.mxu1 %v2431_v27 }
 0x4fe   : > { %v2418_v38 = vsel %vm13190_vm14, %v9847_v30, %v2416_v36  ;;  %v2417_v39 = vsel %vm13190_vm14, %v9846_v33, %v9847_v30  ;;  %9373 = vmatpush3.bf16.msra.mxu0 %v9372_v57  ;;  %v9390_v57 = vpack.c.bf16 %v2572_v54, %v2571_v19  ;;  %vm11136_vm14 = vmmov 0  }
 0x4ff   : > { %v2434_v35 = vpack.c.bf16 %v2418_v38, %v2418_v38  ;;  %v2433_v43 = vpack.c.bf16 %v2417_v39, %v2417_v39  ;;  %9375 = vmatprep.subr.bf16.mxu0 %v9374_v58  ;;  %v2567_v38 = vld [vmem:[%s13369_s1 + $0xc0] sm:$0xff]  ;;  %v2568_v39 = vld [vmem:[%s13369_s1 + $0xc8] sm:$0xff] }
 0x500   : > { %v2556_v58 = vld [vmem:[%s13369_s1 + $0x68] sm:$0xff] }
 0x501   : > { %8662 = vmatprep.subr.msk.bf16.mxu1 %vm13271_vm15, %v2434_v35  ;;  %v2446_v46 = vsel %vm13271_vm15, %v2433_v43, 0  ;;  %v2551_v35 = vld [vmem:[%s13369_s1 + $0x40] sm:$0xff]  ;;  %v9382_v43 = vpack.c.bf16 %v2568_v39, %v2567_v38  ;;  %v9392_v60 = vpack.c.bf16 %v2556_v58, %v2555_v55 }
 0x502   : > { %2456 = vmatpush1.bf16.msra.mxu1 %v2446_v46  ;;  %9377 = vmatpush3.bf16.msra.mxu0 %v9376_v6  ;;  %v2552_v46 = vld [vmem:[%s13369_s1 + $0x48] sm:$0xff]  ;;  %v2574_v6 = vld [vmem:[%s13369_s1 + $0xf8] sm:$0xff] }
 0x503   : > { %9095 = vmatprep.subr.bf16.mxu1 %v13250_v25  ;;  %9379 = vmatprep.subr.bf16.mxu0 %v9378_v8  ;;  %v2557_v8 = vld [vmem:[%s13369_s1 + $0x70] sm:$0xff]  ;;  %v9394_v10 = vpack.c.bf16 %v2574_v6, %v2573_v4 }
 0x505   : > { %8663 = vmatmul.mubr.msk.bf16.vlgmr.msra.gmra.mrb[0].mxu1 %vm13198_vm3, %v2435_v47  ;;  %v9384_v47 = vpack.c.bf16 %v2552_v46, %v2551_v35 }
 0x506   : > { %9381 = vmatpush3.bf16.msra.mxu0 %v9380_v12  ;;  %v2558_v12 = vld [vmem:[%s13369_s1 + $0x78] sm:$0xff]  ;;  %9101 = vmatprep.mubr.msk.bf16.mxu1 %vm11136_vm14, %v13250_v25  ;;  %s13385_s1 = smov 124  }
 0x507   : > { %9383 = vmatprep.subr.bf16.mxu0 %v9382_v43 }
 0x50a   : > { %9385 = vmatpush3.bf16.msra.mxu0 %v9384_v47 }
 0x50b   : > { %9387 = vmatprep.subr.bf16.mxu0 %v9386_v16 }
 0x50c   : > { %v2440_v15 = vpop.permute.xlu0 %2439 }
 0x50e   : > { %9389 = vmatpush3.bf16.msra.mxu0 %v9388_v51 }
 0x50f   : > { %9391 = vmatprep.subr.bf16.mxu0 %v9390_v57 }
 0x512   : > { %9393 = vmatpush3.bf16.msra.mxu0 %v9392_v60 }
 0x513   : > { %9395 = vmatprep.subr.bf16.mxu0 %v9394_v10 }
 0x5d8   : > { %v2485_v18 = vpop.f32.mrb[0].mxu1 }
 0x5d9   : > { %v2486_v17 = vadd.f32 %v2485_v18, %v2440_v15  ;;  %v2487_v20 = vpop.f32.mrb[1].mxu1  ;;  %v2653_v18 = vld [vmem:[#allocation19] sm:$0x7] }
 0x5da   : > { %v2488_v22 = vadd.f32 %v2487_v20, %v2440_v15  ;;  %v2489_v26 = vpop.f32.mrb[2].mxu1  ;;  %v9396_v15 = vpack.c.bf16 %v2558_v12, %v2557_v8  ;;  %v2662_v54 = vrot.slane %v2653_v18, %v11713_v5 }
 0x5db   : > { %v2494_v27 = vmin.f32 %v2486_v17, 0.0  ;;  %v2490_v24 = vpop.f32.mrb[3].mxu1  ;;  %vm2492_vm4 = vcmp.gt.f32.partialorder %v2486_v17, 0.0 }
 0x5dc   : > { %v2495_v30 = vmin.f32 %v2488_v22, 0.0  ;;  %vm2493_vm5 = vcmp.gt.f32.partialorder %v2488_v22, 0.0  ;;  %9397 = vmatpush3.bf16.msra.mxu0 %v9396_v15 }
 0x5dd   : > { %v2496_v33 = vmul.f32 1.442695, %v2494_v27 }
 0x5de   : > { %v2498_v36 = vmul.f32 1.442695, %v2495_v30 }
 0x5df   : > { %10512 = vpow2.f32 %v2496_v33 }
 0x5e0   : > { %10514 = vpow2.f32 %v2498_v36 }
 0x5e9   : > { %v10513_v11 = vpop.eup %10512 }
 0x5ea   : > { %v10515_v52 = vpop.eup %10514  ;;  %v8664_v53 = vadd.f32 -1.0, %v10513_v11 }
 0x5eb   : > { %v8665_v56 = vadd.f32 -1.0, %v10515_v52 }
 0x5ec   : > { %v11989_v59 = vsel %vm2492_vm4, %v2486_v17, %v8664_v53  ;;  %v12008_v17 = vrot.slane %v2653_v18, %v11709_v3  ;;  %vm2649_vm4 = vcmask 72704  }
 0x5ed   : > { %v11991_v0 = vsel %vm2493_vm5, %v2488_v22, %v8665_v56  ;;  %2507 = vrot.lane.b32.xlu0 %v11989_v59, %s13212_s10  ;;  %vm2651_vm5 = vcmask 596992  }
 0x5ee   : > { %v9848_v9 = vpack.i.bf16 %v13250_v25, %v11991_v0 }
 0x5f0   : > { %9849 = vrot.lane.b32.xlu1 %v9848_v9, %s13212_s10 }
 0x5f1   : > { %2519 = vrot.lane.b32.xlu0 %v11989_v59, %s13193_s17 }
 0x5f4   : > { %9854 = vrot.lane.b32.xlu1 %v9848_v9, %s13193_s17 }
 0x5f5   : > { %2531 = vrot.lane.b32.xlu0 %v11989_v59, %s13202_s15 }
 0x5f8   : > { %9859 = vrot.lane.b32.xlu1 %v9848_v9, %s13202_s15 }
 0x5f9   : > { %2669 = vrot.lane.b32.xlu0 %v12008_v17, %s13188_s26  ;;  %s13371_s26 = smov 16  }
 0x5fd   : > { %2673 = vrot.lane.b32.xlu0 %v2662_v54, %s13189_s22  ;;  %s13218_s22 = smov 120  }
 0x601   : > { %2681 = vrot.lane.b32.xlu0 %v2662_v54, %s11118_s6  ;;  %s13191_s6 = smov 119  }
 0x65f   : > { %v2508_v20 = vpop.permute.xlu0 %2507 }
 0x662   : > { %v9850_v22 = vpop.permute.xlu1 %9849 }
 0x663   : > { %v9852_v26 = vunpack.i.h.bf16 %v9850_v22  ;;  %v9851_v27 = vunpack.i.l.bf16 %v9850_v22  ;;  %v2520_v24 = vpop.permute.xlu0 %2519 }
 0x665   : > { %v2513_v33 = vsel %vm13239_vm9, %v2508_v20, %v9851_v27  ;;  %v2514_v36 = vsel %vm13239_vm9, %v9851_v27, %v9852_v26 }
 0x666   : > { %v9855_v30 = vpop.permute.xlu1 %9854  ;;  %v2517_v46 = vmax.f32 %v11989_v59, %v2513_v33  ;;  %v2518_v48 = vmax.f32 %v11991_v0, %v2514_v36 }
 0x667   : > { %v9857_v38 = vunpack.i.h.bf16 %v9855_v30  ;;  %v9856_v39 = vunpack.i.l.bf16 %v9855_v30  ;;  %v2532_v23 = vpop.permute.xlu0 %2531 }
 0x669   : > { %v2525_v35 = vsel %vm13238_vm13, %v2520_v24, %v9856_v39  ;;  %v2526_v43 = vsel %vm13238_vm13, %v9856_v39, %v9857_v38 }
 0x66a   : > { %v9860_v47 = vpop.permute.xlu1 %9859  ;;  %v2529_v16 = vmax.f32 %v2517_v46, %v2525_v35  ;;  %v2530_v51 = vmax.f32 %v2518_v48, %v2526_v43 }
 0x66b   : > { %v9862_v42 = vunpack.i.h.bf16 %v9860_v47  ;;  %v9861_v49 = vunpack.i.l.bf16 %v9860_v47  ;;  %v12028_v58 = vpop.permute.xlu0 %2669 }
 0x66d   : > { %v2537_v11 = vsel %vm13216_vm7, %v2532_v23, %v9861_v49  ;;  %v2538_v52 = vsel %vm13216_vm7, %v9861_v49, %v9862_v42 }
 0x66e   : > { %v2542_v53 = vmax.f32 %v2530_v51, %v2538_v52  ;;  %v2541_v19 = vmax.f32 %v2529_v16, %v2537_v11 }
 0x66f   : > { %v12034_v10 = vpop.permute.xlu0 %2673 }
 0x670   : > { %2639 = vmatprep.mubr.f32.mxu0 %v2542_v53 }
 0x671   : > { %2640 = vmatmul.mubr.f32.vlgmr.msra.gmra.mrb[4].mxu0 %v2541_v19 }
 0x672   : > { %9135 = vmatprep.mubr.msk.f32.mxu0 %vm11136_vm14, %v13250_v25 }
 0x673   : > { %v12046_v27 = vpop.permute.xlu0 %2681 }
 0x744   : > { %v8911_v55 = vpop.f32.mrb[4].mxu0 }
 0x745   : > { %v8912_v56 = vpop.f32.mrb[5].mxu0 }
 0x746   : > { %v8913_v57 = vadd.f32 %v8912_v56, %v8911_v55 }
 0x748   : > { %2646 = vrot.lane.b32.xlu1 %v8913_v57, %s13196_s18 }
 0x74c   : > { %2664 = vrot.lane.b32.xlu1 %v2662_v54, %s13370_s0 }
 0x750   : > { %2677 = vrot.lane.b32.xlu1 %v12008_v17, %s13371_s26  ;;  %s13372_s26 = sld [smem:[#allocation40_spill]] }
 0x756   : > { %v2726_v33 = vld [vmem:[%s13372_s26] sm:$0xff]  ;;  %s13375_s26 = smov 119  }
 0x7ba   : > { %v2647_v60 = vpop.permute.xlu1 %2646 }
 0x7bb   : > { %v2650_v4 = vsel %vm2649_vm4, 0.0, %v2647_v60 }
 0x7bc   : > { %v2652_v6 = vsel %vm2651_vm5, %v2650_v4, 0.0 }
 0x7bd   : > { %2699 = vrot.lane.b32.xlu0 %v2652_v6, %s13191_s6  ;;  %v2686_v8 = vrot.slane %v2652_v6, 4  ;;  %v2672_v9 = vmul.f32 %v12028_v58, %v2652_v6  ;;  %v2676_v20 = vmul.f32 %v12034_v10, %v2652_v6  ;;  %s13204_s6 = smov 118   ;;  %v2684_v30 = vmul.f32 %v12046_v27, %v2652_v6 }
 0x7be   : > { %v12036_v12 = vpop.permute.xlu1 %2664  ;;  %v2658_v35 = vmul.f32 %v12008_v17, %v2652_v6 }
 0x7bf   : > { %2687 = vrot.lane.b32.xlu1 %v2686_v8, %s13212_s10  ;;  %v2667_v15 = vmul.f32 %v12036_v12, %v2652_v6  ;;  %v2695_v18 = vrot.slane %v2672_v9, 4  ;;  %v2703_v24 = vrot.slane %v2676_v20, 4 }
 0x7c1   : > { %2691 = vrot.lane.b32.xlu0 %v2667_v15, %s13227_s13 }
 0x7c2   : > { %v12042_v22 = vpop.permute.xlu1 %2677 }
 0x7c3   : > { %2696 = vrot.lane.b32.xlu1 %v2695_v18, %s13218_s22  ;;  %v2680_v26 = vmul.f32 %v12042_v22, %v2652_v6 }
 0x7c5   : > { %2708 = vrot.lane.b32.xlu0 %v2680_v26, %s13193_s17  ;;  %s13373_s17 = sld [smem:[#allocation39_spill]] }
 0x7c7   : > { %2704 = vrot.lane.b32.xlu1 %v2703_v24, %s13204_s6 }
 0x7c9   : > { %2715 = vrot.lane.b32.xlu0 %v2684_v30, %s13200_s11 }
 0x7cb   : > { %2711 = vrot.lane.b32.xlu1 %v2686_v8, %s13202_s15  ;;  %v2725_v54 = vld [vmem:[%s13373_s17] sm:$0xf]  ;;  %s13374_s17 = sld [smem:[#allocation42_spill]] }
 0x7cf   : > { %2729 = vperm.xlu1 %9863, %v2726_v33  }
 0x82f   : > { %v2700_v36 = vpop.permute.xlu0 %2699 }
 0x831   : > { %v2688_v38 = vpop.permute.xlu1 %2687 }
 0x832   : > { %v2718_v46 = vsel %vm2200_vm8, %v2658_v35, %v2688_v38 }
 0x833   : > { %v2692_v39 = vpop.permute.xlu0 %2691 }
 0x835   : > { %v2697_v43 = vpop.permute.xlu1 %2696 }
 0x836   : > { %v2719_v47 = vsel %vm2200_vm8, %v2692_v39, %v2697_v43  ;;  %v2832_v43 = vld [vmem:[%s13374_s17] sm:$0xff]  ;;  %s13377_s17 = sld [smem:[#allocation78_spill]] }
 0x837   : > { %v2722_v48 = vpack.c.bf16 %v2719_v47, %v2718_v46  ;;  %v2709_v42 = vpop.permute.xlu0 %2708 }
 0x839   : > { %v2705_v49 = vpop.permute.xlu1 %2704  ;;  %9096 = vmatpush3.bf16.msra.mxu1 %v2722_v48 }
 0x83a   : > { %9097 = vmatprep.subr.bf16.mxu1 %v13250_v25  ;;  %v2720_v51 = vsel %vm2200_vm8, %v2700_v36, %v2705_v49 }
 0x83b   : > { %v2716_v16 = vpop.permute.xlu0 %2715 }
 0x83c   : > { %v2724_v53 = vpack.c.bf16 %v2716_v16, %v2716_v16 }
 0x83d   : > { %v2712_v23 = vpop.permute.xlu1 %2711 }
 0x83e   : > { %v2721_v11 = vsel %vm2200_vm8, %v2709_v42, %v2712_v23  ;;  %v2736_v19 = vsel %vm13271_vm15, %v2724_v53, 0 }
 0x83f   : > { %v2723_v52 = vpack.c.bf16 %v2721_v11, %v2720_v51 }
 0x841   : > { %9098 = vmatpush3.bf16.msra.mxu1 %v2723_v52 }
 0x842   : > { %9099 = vmatprep.subr.bf16.mxu1 %v13250_v25 }
 0x845   : > { %9100 = vmatpush3.bf16.msra.mxu1 %v2736_v19 }
 0x846   : > { %9105 = vmatprep.subr.bf16.mxu1 %v13250_v25 }
 0x848   : > { %9102 = vmatmul.mubr.msk.bf16.vlgmr.msra.gmra.mrb[4].mxu1 %vm13198_vm3, %v2725_v54  ;;  %vm13270_vm3 = vcmask 523264  }
 0x849   : > { %9115 = vmatprep.mubr.msk.bf16.mxu1 %vm11136_vm14, %v13250_v25 }
 0x84e   : > { %v2730_v55 = vpop.permute.xlu1 %2729 }
 0x91b   : > { %v2772_v56 = vpop.f32.mrb[4].mxu1 }
 0x91c   : > { %v2773_v57 = vadd.f32 %v2772_v56, %v2730_v55  ;;  %v9103_v60 = vpop.f32.mrb[5].mxu1 }
 0x91d   : > { %v2775_v4 = vpop.f32.mrb[6].mxu1  ;;  %v2906_v60 = vld [vmem:[%s13377_s17] sm:$0xff] }
 0x91e   : > { %v2779_v6 = vmin.f32 %v2773_v57, 0.0  ;;  %v9104_v8 = vpop.f32.mrb[7].mxu1  ;;  %vm2778_vm11 = vcmp.gt.f32.partialorder %v2773_v57, 0.0  ;;  %v2907_v4 = vld [vmem:[%s13377_s17 + $0x8] sm:$0xff] }
 0x91f   : > { %v13248_v8 = vmov 0.0|0.0  }
 0x920   : > { %v2780_v9 = vmul.f32 1.442695, %v2779_v6  ;;  %v2908_v6 = vld [vmem:[%s13377_s17 + $0x10] sm:$0xff]  ;;  %9398 = vmatprep.subr.bf16.mxu0 %v13248_v8 }
 0x922   : > { %10516 = vpow2.f32 %v2780_v9  ;;  %v9399_v9 = vpack.c.bf16 %v2907_v4, %v2906_v60 }
 0x924   : > { %9400 = vmatpush3.bf16.msra.mxu0 %v9399_v9 }
 0x925   : > { %9401 = vmatprep.subr.bf16.mxu0 %v13248_v8 }
 0x92c   : > { %v10517_v15 = vpop.eup %10516 }
 0x92d   : > { %v8667_v18 = vadd.f32 -1.0, %v10517_v15  ;;  %v2909_v15 = vld [vmem:[%s13377_s17 + $0x18] sm:$0xff] }
 0x92f   : > { %v2783_v20 = vsel %vm2778_vm11, %v2773_v57, %v8667_v18  ;;  %v2831_v57 = vld [vmem:[#allocation5] sm:$0xf]  ;;  %vm2838_vm11 = vcmask 588800   ;;  %v9402_v18 = vpack.c.bf16 %v2909_v15, %v2908_v6 }
 0x930   : > { %2785 = vrot.lane.b32.xlu0 %v2783_v20, %s13196_s18  ;;  %s13376_s18 = smov 112   ;;  %v2910_v20 = vld [vmem:[%s13377_s17 + $0x20] sm:$0xff] }
 0x931   : > { %9403 = vmatpush3.bf16.msra.mxu0 %v9402_v18 }
 0x932   : > { %9404 = vmatprep.subr.bf16.mxu0 %v13248_v8 }
 0x9a2   : > { %v2786_v26 = vpop.permute.xlu0 %2785 }
 0x9a3   : > { %v2788_v24 = vsel %vm2649_vm4, 0.0, %v2786_v26  ;;  %v2911_v26 = vld [vmem:[%s13377_s17 + $0x28] sm:$0xff] }
 0x9a4   : > { %v2789_v30 = vsel %vm2651_vm5, %v2788_v24, 0.0  ;;  %v9405_v24 = vpack.c.bf16 %v2911_v26, %v2910_v20 }
 0x9a5   : > { %2797 = vrot.lane.b32.xlu1 %v2789_v30, %s13212_s10  ;;  %v2791_v33 = vmul.f32 %v2789_v30, %v12036_v12  ;;  %v2792_v36 = vmul.f32 %v2789_v30, %v12028_v58  ;;  %v2793_v38 = vmul.f32 %v2789_v30, %v12034_v10  ;;  %v2794_v39 = vmul.f32 %v2789_v30, %v12042_v22 }
 0x9a6   : > { %v2795_v35 = vmul.f32 %v2789_v30, %v12046_v27  ;;  %v2790_v46 = vmul.f32 %v2789_v30, %v12008_v17  ;;  %9406 = vmatpush3.bf16.msra.mxu0 %v9405_v24 }
 0x9a7   : > { %2801 = vrot.lane.b32.xlu0 %v2791_v33, %s13227_s13  ;;  %9407 = vmatprep.subr.bf16.mxu0 %v13248_v8 }
 0x9a9   : > { %2805 = vrot.lane.b32.xlu1 %v2792_v36, %s13218_s22 }
 0x9ab   : > { %2808 = vrot.lane.b32.xlu0 %v2789_v30, %s13375_s26 }
 0x9ad   : > { %2812 = vrot.lane.b32.xlu1 %v2793_v38, %s13204_s6  ;;  %s13210_s6 = smov 5  }
 0x9af   : > { %2816 = vrot.lane.b32.xlu0 %v2794_v39, %s13376_s18 }
 0x9b1   : > { %2819 = vrot.lane.b32.xlu1 %v2789_v30, %s13202_s15  ;;  %s13378_s15 = smov 10  }
 0x9b3   : > { %2823 = vrot.lane.b32.xlu0 %v2795_v35, %s13200_s11  ;;  %s13206_s11 = smov 6  }
 0x9b5   : > { %2835 = vperm.xlu1 %9863, %v2832_v43  }
 0xa17   : > { %v2798_v47 = vpop.permute.xlu1 %2797 }
 0xa18   : > { %v2826_v48 = vpack.c.bf16 %v2798_v47, %v2790_v46  ;;  %v2912_v47 = vld [vmem:[%s13377_s17 + $0x30] sm:$0xff] }
 0xa19   : > { %v2802_v42 = vpop.permute.xlu0 %2801 }
 0xa1a   : > { %9106 = vmatpush3.bf16.msra.mxu1 %v2826_v48  ;;  %v2913_v48 = vld [vmem:[%s13377_s17 + $0x38] sm:$0xff] }
 0xa1b   : > { %v2806_v49 = vpop.permute.xlu1 %2805  ;;  %9107 = vmatprep.subr.bf16.mxu1 %v13250_v25 }
 0xa1c   : > { %v2827_v16 = vpack.c.bf16 %v2806_v49, %v2802_v42  ;;  %v9408_v42 = vpack.c.bf16 %v2913_v48, %v2912_v47 }
 0xa1d   : > { %v2809_v23 = vpop.permute.xlu0 %2808 }
 0xa1e   : > { %9108 = vmatpush3.bf16.msra.mxu1 %v2827_v16  ;;  %9409 = vmatpush3.bf16.msra.mxu0 %v9408_v42 }
 0xa1f   : > { %v2813_v51 = vpop.permute.xlu1 %2812  ;;  %9109 = vmatprep.subr.bf16.mxu1 %v13250_v25  ;;  %3259 = vmatprep.subr.bf16.mxu0 %v13252_v7 }
 0xa20   : > { %v2828_v11 = vpack.c.bf16 %v2813_v51, %v2809_v23 }
 0xa21   : > { %v2817_v52 = vpop.permute.xlu0 %2816 }
 0xa22   : > { %9110 = vmatpush3.bf16.msra.mxu1 %v2828_v11  ;;  %v2995_v11 = vld [vmem:[#allocation20] sm:$0x7] }
 0xa23   : > { %v2820_v53 = vpop.permute.xlu1 %2819  ;;  %9111 = vmatprep.subr.bf16.mxu1 %v13250_v25  ;;  %v12125_v4 = vrot.slane %v2995_v11, %v11709_v3 }
 0xa24   : > { %v2829_v19 = vpack.c.bf16 %v2820_v53, %v2817_v52  ;;  %v3004_v52 = vrot.slane %v2995_v11, %v11713_v5 }
 0xa25   : > { %v2824_v54 = vpop.permute.xlu0 %2823 }
 0xa26   : > { %v2830_v55 = vpack.c.bf16 %v2824_v54, %v2824_v54  ;;  %9112 = vmatpush3.bf16.msra.mxu1 %v2829_v19 }
 0xa27   : > { %9113 = vmatprep.subr.bf16.mxu1 %v13250_v25 }
 0xa28   : > { %v2843_v56 = vsel %vm2200_vm8, %v2830_v55, 0 }
 0xa2a   : > { %9114 = vmatpush3.bf16.msra.mxu1 %v2843_v56 }
 0xa2b   : > { %9138 = vmatprep.subr.bf16.mxu1 %v13250_v25 }
 0xa2d   : > { %9116 = vmatmul.mubr.msk.bf16.vlgmr.msra.gmra.mrb[8].mxu1 %vm2838_vm11, %v2831_v57 }
 0xa2e   : > { %9148 = vmatprep.mubr.msk.bf16.mxu1 %vm11136_vm14, %v13250_v25 }
 0xa34   : > { %v2836_v30 = vpop.permute.xlu1 %2835 }
 0xb00   : > { %v2879_v33 = vpop.f32.mrb[8].mxu1 }
 0xb01   : > { %v2880_v36 = vadd.f32 %v2879_v33, %v2836_v30  ;;  %v9117_v38 = vpop.f32.mrb[9].mxu1 }
 0xb02   : > { %v2882_v39 = vpop.f32.mrb[10].mxu1 }
 0xb03   : > { %v2886_v35 = vmin.f32 %v2880_v36, 0.0  ;;  %v9118_v43 = vpop.f32.mrb[11].mxu1  ;;  %vm2885_vm6 = vcmp.gt.f32.partialorder %v2880_v36, 0.0 }
 0xb05   : > { %v2887_v46 = vmul.f32 1.442695, %v2886_v35 }
 0xb07   : > { %10518 = vpow2.f32 %v2887_v46 }
 0xb11   : > { %v10519_v49 = vpop.eup %10518 }
 0xb12   : > { %v8669_v16 = vadd.f32 -1.0, %v10519_v49 }
 0xb14   : > { %v12111_v23 = vsel %vm2885_vm6, %v2880_v36, %v8669_v16  ;;  %vm2991_vm6 = vcmask 39936  }
 0xb15   : > { %v2892_v51 = vsel %vm13270_vm3, %v12111_v23, 0.0 }
 0xb16   : > { %2898 = vrot.lane.b32.xlu1 %v2892_v51, %s13218_s22  ;;  %2894 = vrot.lane.b32.xlu0 %v2892_v51, %s13212_s10 }
 0xb1a   : > { %2902 = vrot.lane.b32.xlu0 %v2892_v51, %s13375_s26 }
 0xb1e   : > { %3006 = vrot.lane.b32.xlu0 %v3004_v52, %s13370_s0 }
 0xb22   : > { %3015 = vrot.lane.b32.xlu0 %v3004_v52, %s13206_s11  ;;  %s13208_s11 = smov 4  }
 0xb26   : > { %3023 = vrot.lane.b32.xlu0 %v3004_v52, %s13378_s15  ;;  %s13379_s15 = smov 8  }
 0xb88   : > { %v2895_v53 = vpop.permute.xlu0 %2894  ;;  %v2899_v54 = vpop.permute.xlu1 %2898 }
 0xb89   : > { %v2897_v19 = vmax.f32 %v12111_v23, %v2895_v53 }
 0xb8b   : > { %v2901_v55 = vmax.f32 %v2897_v19, %v2899_v54 }
 0xb8c   : > { %v2903_v56 = vpop.permute.xlu0 %2902 }
 0xb8d   : > { %v2905_v57 = vmax.f32 %v2901_v55, %v2903_v56 }
 0xb8f   : > { %9136 = vmatmul.mubr.msk.f32.vlgmr.msra.gmra.mrb[6].mxu0 %vm13270_vm3, %v2905_v57 }
 0xb90   : > { %v12132_v9 = vpop.permute.xlu0 %3006 }
 0xb94   : > { %v12142_v33 = vpop.permute.xlu0 %3015 }
 0xb98   : > { %v12151_v35 = vpop.permute.xlu0 %3023 }
 0xc62   : > { %v2983_v60 = vpop.f32.mrb[6].mxu0 }
 0xc63   : > { %2988 = vrot.lane.b32.xlu1 %v2983_v60, %s13210_s6  ;;  %v9137_v6 = vpop.f32.mrb[7].mxu0  ;;  %s13222_s6 = smov 123  }
 0xc67   : > { %3011 = vrot.lane.b32.xlu1 %v12125_v4, %s13208_s11  ;;  %s13380_s11 = sld [smem:[#allocation43_spill]] }
 0xc6b   : > { %3019 = vrot.lane.b32.xlu1 %v12125_v4, %s13379_s15  ;;  %s13214_s15 = smov 124  }
 0xc6d   : > { %v3064_v46 = vld [vmem:[%s13380_s11] sm:$0xff]  ;;  %v3065_v47 = vld [vmem:[%s13380_s11 + $0x8] sm:$0xff]  ;;  %s13240_s11 = smov 125  }
 0xcd5   : > { %v2989_v15 = vpop.permute.xlu1 %2988 }
 0xcd6   : > { %v2992_v18 = vsel %vm2991_vm6, 0.0, %v2989_v15  ;;  %v10465_v15 = vld [vmem:[#allocation7] sm:$0xff]  }
 0xcd7   : > { %v2994_v20 = vsel %vm2993_vm12, %v2992_v18, 0.0 }
 0xcd8   : > { %3028 = vrot.lane.b32.xlu1 %v2994_v20, %s13212_s10  ;;  %v3009_v26 = vmul.f32 %v12132_v9, %v2994_v20  ;;  %v3018_v38 = vmul.f32 %v12142_v33, %v2994_v20  ;;  %s13220_s10 = smov 122   ;;  %v3026_v43 = vmul.f32 %v12151_v35, %v2994_v20  ;;  %v3000_v48 = vmul.f32 %v12125_v4, %v2994_v20 }
 0xcd9   : > { %v12138_v24 = vpop.permute.xlu1 %3011 }
 0xcda   : > { %3032 = vrot.lane.b32.xlu0 %v3009_v26, %s13227_s13  ;;  %v3014_v30 = vmul.f32 %v12138_v24, %v2994_v20 }
 0xcdc   : > { %3036 = vrot.lane.b32.xlu1 %v3014_v30, %s13214_s15  ;;  %s13381_s15 = smov 118  }
 0xcdd   : > { %v12145_v36 = vpop.permute.xlu1 %3019 }
 0xcde   : > { %3039 = vrot.lane.b32.xlu0 %v2994_v20, %s13222_s6  ;;  %v3022_v39 = vmul.f32 %v12145_v36, %v2994_v20  ;;  %s13384_s6 = sld [smem:[#allocation45_spill]] }
 0xce0   : > { %3043 = vrot.lane.b32.xlu1 %v3018_v38, %s13220_s10  ;;  %s13383_s10 = smov 127  }
 0xce2   : > { %3047 = vrot.lane.b32.xlu0 %v3022_v39, %s13218_s22  ;;  %s13382_s22 = smov 5  }
 0xce4   : > { %3050 = vrot.lane.b32.xlu1 %v2994_v20, %s13375_s26 }
 0xce6   : > { %3054 = vrot.lane.b32.xlu0 %v3026_v43, %s13381_s15 }
 0xce8   : > { %3068 = vperm.xlu1 %9863, %v3064_v46  }
 0xcea   : > { %3073 = vperm.xlu0 %9807, %v3065_v47  }
 0xd4a   : > { %v3029_v42 = vpop.permute.xlu1 %3028 }
 0xd4b   : > { %v3057_v49 = vpack.c.bf16 %v3029_v42, %v3000_v48 }
 0xd4c   : > { %v3033_v16 = vpop.permute.xlu0 %3032 }
 0xd4d   : > { %9139 = vmatpush3.bf16.msra.mxu1 %v3057_v49 }
 0xd4e   : > { %v3037_v51 = vpop.permute.xlu1 %3036  ;;  %9140 = vmatprep.subr.bf16.mxu1 %v13250_v25 }
 0xd4f   : > { %v3058_v11 = vpack.c.bf16 %v3037_v51, %v3033_v16 }
 0xd50   : > { %v3040_v52 = vpop.permute.xlu0 %3039 }
 0xd51   : > { %9141 = vmatpush3.bf16.msra.mxu1 %v3058_v11 }
 0xd52   : > { %v3044_v53 = vpop.permute.xlu1 %3043  ;;  %9142 = vmatprep.subr.bf16.mxu1 %v13250_v25 }
 0xd53   : > { %v3059_v19 = vpack.c.bf16 %v3044_v53, %v3040_v52 }
 0xd54   : > { %v3048_v54 = vpop.permute.xlu0 %3047 }
 0xd55   : > { %9143 = vmatpush3.bf16.msra.mxu1 %v3059_v19 }
 0xd56   : > { %v3051_v55 = vpop.permute.xlu1 %3050  ;;  %9144 = vmatprep.subr.bf16.mxu1 %v13250_v25 }
 0xd57   : > { %v3060_v56 = vpack.c.bf16 %v3051_v55, %v3048_v54 }
 0xd58   : > { %v3055_v57 = vpop.permute.xlu0 %3054 }
 0xd59   : > { %v3061_v60 = vpack.c.bf16 %v3055_v57, %v3055_v57  ;;  %9145 = vmatpush3.bf16.msra.mxu1 %v3060_v56 }
 0xd5a   : > { %9146 = vmatprep.subr.bf16.mxu1 %v13250_v25 }
 0xd5b   : > { %v3085_v6 = vsel %vm2200_vm8, %v3061_v60, 0 }
 0xd5d   : > { %9147 = vmatpush3.bf16.msra.mxu1 %v3085_v6 }
 0xd60   : > { %9149 = vmatmul.mubr.msk.bf16.vlgmr.msra.gmra.mrb[12].mxu1 %vm2838_vm11, %v10465_v15 }
 0xd67   : > { %v3069_v18 = vpop.permute.xlu1 %3068 }
 0xd69   : > { %v3074_v38 = vpop.permute.xlu0 %3073 }
 0xe33   : > { %v3121_v20 = vpop.f32.mrb[12].mxu1 }
 0xe34   : > { %v3122_v26 = vadd.f32 %v3121_v20, %v3069_v18  ;;  %v9150_v30 = vpop.f32.mrb[13].mxu1 }
 0xe35   : > { %v3124_v39 = vpop.f32.mrb[14].mxu1 }
 0xe36   : > { %v3130_v43 = vmin.f32 %v3122_v26, 0.0  ;;  %v3125_v46 = vadd.f32 %v3124_v39, %v3074_v38  ;;  %v9151_v47 = vpop.f32.mrb[15].mxu1  ;;  %vm3128_vm7 = vcmp.gt.f32.partialorder %v3122_v26, 0.0 }
 0xe38   : > { %v3132_v48 = vmul.f32 1.442695, %v3130_v43  ;;  %v3131_v42 = vmin.f32 %v3125_v46, 0.0  ;;  %vm3129_vm10 = vcmp.gt.f32.partialorder %v3125_v46, 0.0 }
 0xe3a   : > { %10520 = vpow2.f32 %v3132_v48  ;;  %v3134_v49 = vmul.f32 1.442695, %v3131_v42 }
 0xe3c   : > { %10522 = vpow2.f32 %v3134_v49 }
 0xe44   : > { %v10521_v16 = vpop.eup %10520 }
 0xe45   : > { %v8673_v51 = vadd.f32 -1.0, %v10521_v16 }
 0xe46   : > { %v10523_v11 = vpop.eup %10522 }
 0xe47   : > { %v3138_v52 = vsel %vm3128_vm7, %v3122_v26, %v8673_v51  ;;  %v8674_v53 = vadd.f32 -1.0, %v10523_v11 }
 0xe48   : > { %3142 = vrot.lane.b32.xlu1 %v3138_v52, %s13382_s22 }
 0xe49   : > { %v3139_v19 = vsel %vm3129_vm10, %v3125_v46, %v8674_v53 }
 0xe4a   : > { %3144 = vrot.lane.b32.xlu0 %v3139_v19, %s13382_s22 }
 0xeba   : > { %v3143_v54 = vpop.permute.xlu1 %3142 }
 0xebb   : > { %v3148_v55 = vsel %vm2991_vm6, 0.0, %v3143_v54  ;;  %v3235_v54 = vld [vmem:[%s13384_s6] sm:$0xff] }
 0xebc   : > { %v3150_v56 = vsel %vm2993_vm12, %v3148_v55, 0.0  ;;  %v3145_v57 = vpop.permute.xlu0 %3144  ;;  %v3236_v55 = vld [vmem:[%s13384_s6 + $0x8] sm:$0xff]  ;;  %s13390_s6 = sld [smem:[#allocation79_spill]] }
 0xebd   : > { %v3149_v60 = vsel %vm2991_vm6, 0.0, %v3145_v57  ;;  %v3154_v15 = vmul.f32 %v3150_v56, %v12132_v9  ;;  %v3152_v18 = vmul.f32 %v3150_v56, %v12125_v4  ;;  %v3156_v46 = vmul.f32 %v3150_v56, %v12138_v24  ;;  %v10466_v57 = vld [vmem:[%s13387_s4 + $0x4] ss:$8 sps:$4 sm:$0xff]  }
 0xebe   : > { %v3151_v6 = vsel %vm2993_vm12, %v3149_v60, 0.0  ;;  %v3158_v42 = vmul.f32 %v3150_v56, %v12142_v33  ;;  %v3160_v51 = vmul.f32 %v3150_v56, %v12145_v36  ;;  %v3162_v53 = vmul.f32 %v3150_v56, %v12151_v35  ;;  %8677 = vmatprep.mubr.msk.bf16.mxu0 %vm2042_vm2, %v10466_v57 }
 0xebf   : > { %v9864_v20 = vpack.i.bf16 %v3151_v6, %v3150_v56  ;;  %v3155_v26 = vmul.f32 %v3151_v6, %v12132_v9  ;;  %v3153_v30 = vmul.f32 %v3151_v6, %v12125_v4  ;;  %v3157_v38 = vmul.f32 %v3151_v6, %v12138_v24 }
 0xec0   : > { %v3159_v48 = vmul.f32 %v3151_v6, %v12142_v33  ;;  %v3161_v49 = vmul.f32 %v3151_v6, %v12145_v36  ;;  %v3163_v52 = vmul.f32 %v3151_v6, %v12151_v35 }
 0xec1   : > { %9865 = vrot.lane.b32.xlu1 %v9864_v20, %s13383_s10  ;;  %v9869_v39 = vpack.i.bf16 %v3155_v26, %v3154_v15  ;;  %v3224_v43 = vpack.c.bf16 %v3153_v30, %v3152_v18  ;;  %v9874_v47 = vpack.i.bf16 %v3157_v38, %v3156_v46 }
 0xec2   : > { %v9884_v16 = vpack.i.bf16 %v3159_v48, %v3158_v42  ;;  %v9889_v11 = vpack.i.bf16 %v3161_v49, %v3160_v51  ;;  %v9899_v19 = vpack.i.bf16 %v3163_v52, %v3162_v53 }
 0xec3   : > { %9870 = vrot.lane.b32.xlu0 %v9869_v39, %s13227_s13  ;;  %3260 = vmatpush1.bf16.msra.mxu0 %v3224_v43  ;;  %s13388_s13 = smov 122  }
 0xec4   : > { %3261 = vmatprep.subr.bf16.mxu0 %v13252_v7 }
 0xec5   : > { %9875 = vrot.lane.b32.xlu1 %v9874_v47, %s13385_s1 }
 0xec7   : > { %9880 = vrot.lane.b32.xlu0 %v9864_v20, %s13386_s3 }
 0xec9   : > { %9885 = vrot.lane.b32.xlu1 %v9884_v16, %s13388_s13 }
 0xecb   : > { %9890 = vrot.lane.b32.xlu0 %v9889_v11, %s13389_s5 }
 0xecd   : > { %9895 = vrot.lane.b32.xlu1 %v9864_v20, %s13375_s26 }
 0xecf   : > { %9900 = vrot.lane.b32.xlu0 %v9899_v19, %s13381_s15 }
 0xed1   : > { %3239 = vperm.xlu1 %9863, %v3235_v54  }
 0xed3   : > { %3244 = vperm.xlu0 %9807, %v3236_v55  }
 0xf33   : > { %v9866_v60 = vpop.permute.xlu1 %9865 }
 0xf34   : > { %v9868_v15 = vunpack.i.h.bf16 %v9866_v60  ;;  %v9867_v18 = vunpack.i.l.bf16 %v9866_v60 }
 0xf35   : > { %v9871_v6 = vpop.permute.xlu0 %9870 }
 0xf36   : > { %v3225_v26 = vpack.c.bf16 %v9868_v15, %v9867_v18  ;;  %v9873_v30 = vunpack.i.h.bf16 %v9871_v6  ;;  %v9872_v38 = vunpack.i.l.bf16 %v9871_v6 }
 0xf37   : > { %v9876_v56 = vpop.permute.xlu1 %9875 }
 0xf38   : > { %3262 = vmatpush1.bf16.msra.mxu0 %v3225_v26  ;;  %v3226_v20 = vpack.c.bf16 %v9873_v30, %v9872_v38  ;;  %v9878_v39 = vunpack.i.h.bf16 %v9876_v56  ;;  %v9877_v43 = vunpack.i.l.bf16 %v9876_v56  ;;  %v10468_v56 = vld [vmem:[%s13387_s4] ss:$8 sps:$4 sm:$0xff]   ;;  %s13233_s4 = smov 3  }
 0xf39   : > { %3263 = vmatprep.subr.bf16.mxu0 %v13252_v7  ;;  %v9881_v46 = vpop.permute.xlu0 %9880 }
 0xf3a   : > { %v3227_v47 = vpack.c.bf16 %v9878_v39, %v9877_v43  ;;  %v9883_v48 = vunpack.i.h.bf16 %v9881_v46  ;;  %v9882_v42 = vunpack.i.l.bf16 %v9881_v46 }
 0xf3b   : > { %v9886_v49 = vpop.permute.xlu1 %9885 }
 0xf3c   : > { %3264 = vmatpush1.bf16.msra.mxu0 %v3226_v20  ;;  %v3228_v16 = vpack.c.bf16 %v9883_v48, %v9882_v42  ;;  %v9888_v51 = vunpack.i.h.bf16 %v9886_v49  ;;  %v9887_v11 = vunpack.i.l.bf16 %v9886_v49 }
 0xf3d   : > { %3265 = vmatprep.subr.bf16.mxu0 %v13252_v7  ;;  %v9891_v52 = vpop.permute.xlu0 %9890 }
 0xf3e   : > { %v3229_v53 = vpack.c.bf16 %v9888_v51, %v9887_v11  ;;  %v9893_v19 = vunpack.i.h.bf16 %v9891_v52  ;;  %v9892_v54 = vunpack.i.l.bf16 %v9891_v52 }
 0xf3f   : > { %v9896_v55 = vpop.permute.xlu1 %9895 }
 0xf40   : > { %3266 = vmatpush1.bf16.msra.mxu0 %v3227_v47  ;;  %v3230_v57 = vpack.c.bf16 %v9893_v19, %v9892_v54  ;;  %v9898_v60 = vunpack.i.h.bf16 %v9896_v55  ;;  %v9897_v15 = vunpack.i.l.bf16 %v9896_v55  ;;  %v3340_v19 = vld [vmem:[%s13390_s6] sm:$0xff]  ;;  %v3341_v54 = vld [vmem:[%s13390_s6 + $0x8] sm:$0xff]  ;;  %s13391_s6 = smov 4  }
 0xf41   : > { %3267 = vmatprep.subr.bf16.mxu0 %v13252_v7  ;;  %v9901_v18 = vpop.permute.xlu0 %9900 }
 0xf42   : > { %v3231_v6 = vpack.c.bf16 %v9898_v60, %v9897_v15  ;;  %v9903_v26 = vunpack.i.h.bf16 %v9901_v18  ;;  %v9902_v30 = vunpack.i.l.bf16 %v9901_v18 }
 0xf44   : > { %3268 = vmatpush1.bf16.msra.mxu0 %v3228_v16  ;;  %v3232_v38 = vpack.c.bf16 %v9903_v26, %v9902_v30 }
 0xf45   : > { %3269 = vmatprep.subr.bf16.mxu0 %v13252_v7 }
 0xf48   : > { %3270 = vmatpush1.bf16.msra.mxu0 %v3229_v53 }
 0xf49   : > { %3271 = vmatprep.subr.bf16.mxu0 %v13252_v7 }
 0xf4c   : > { %3272 = vmatpush1.bf16.msra.mxu0 %v3230_v57  ;;  %v9410_v57 = vpack.c.bf16 %v3341_v54, %v3340_v19 }
 0xf4d   : > { %3273 = vmatprep.subr.bf16.mxu0 %v13252_v7 }
 0xf4e   : > { %9411 = vmatprep.subr.bf16.mxu1 %v9410_v57 }
 0xf4f   : > { %9413 = vmatpush3.bf16.msra.mxu1 %v9410_v57 }
 0xf50   : > { %3274 = vmatpush1.bf16.msra.mxu0 %v3231_v6  ;;  %v3240_v20 = vpop.permute.xlu1 %3239  ;;  %3570 = vmatprep.subr.bf16.mxu1 %v13252_v7 }
 0xf51   : > { %3275 = vmatprep.subr.bf16.mxu0 %v13252_v7 }
 0xf52   : > { %v3245_v47 = vpop.permute.xlu0 %3244 }
 0xf54   : > { %3276 = vmatpush1.bf16.msra.mxu0 %v3232_v38 }
 0xf55   : > { %3742 = vmatprep.subr.bf16.mxu0 %v13252_v7 }
 0xf57   : > { %3292 = vmatmul.mubr.bf16.vlgmr.msra.gmra.mrb[8].mxu0 %v10468_v56 }
0x102a   : > { %v3293_v39 = vpop.f32.mrb[8].mxu0 }
0x102b   : > { %v3294_v43 = vadd.f32 %v3293_v39, %v3240_v20  ;;  %v3295_v46 = vpop.f32.mrb[9].mxu0 }
0x102c   : > { %v3296_v48 = vpop.f32.mrb[10].mxu0 }
0x102d   : > { %v3302_v42 = vmin.f32 %v3294_v43, 0.0  ;;  %v3297_v49 = vadd.f32 %v3296_v48, %v3245_v47  ;;  %v3298_v16 = vpop.f32.mrb[11].mxu0  ;;  %vm3300_vm7 = vcmp.gt.f32.partialorder %v3294_v43, 0.0 }
0x102f   : > { %v3304_v51 = vmul.f32 1.442695, %v3302_v42  ;;  %v3303_v11 = vmin.f32 %v3297_v49, 0.0  ;;  %vm3301_vm10 = vcmp.gt.f32.partialorder %v3297_v49, 0.0 }
0x1031   : > { %10524 = vpow2.f32 %v3304_v51  ;;  %v3306_v52 = vmul.f32 1.442695, %v3303_v11  ;;  %v3437_v11 = vld [vmem:[#allocation22] sm:$0x7] }
0x1032   : > { %v12229_v19 = vrot.slane %v3437_v11, %v11709_v3  ;;  %v3447_v54 = vrot.slane %v3437_v11, %v11713_v5 }
0x1033   : > { %10526 = vpow2.f32 %v3306_v52 }
0x103b   : > { %v10525_v53 = vpop.eup %10524 }
0x103c   : > { %v8678_v55 = vadd.f32 -1.0, %v10525_v53 }
0x103d   : > { %v10527_v60 = vpop.eup %10526 }
0x103e   : > { %v12208_v15 = vsel %vm3300_vm7, %v3294_v43, %v8678_v55  ;;  %v8679_v18 = vadd.f32 -1.0, %v10527_v60  ;;  %vm3431_vm7 = vcmask 23552  }
0x103f   : > { %v3312_v6 = vsel %vm2042_vm2, %v12208_v15, 0.0 }
0x1040   : > { %v12212_v26 = vsel %vm3301_vm10, %v3297_v49, %v8679_v18  ;;  %3316 = vrot.lane.b32.xlu1 %v3312_v6, %s13383_s10  ;;  %vm3434_vm10 = vcmask 56320  }
0x1041   : > { %v3313_v30 = vsel %vm2042_vm2, %v12212_v26, 0.0 }
0x1042   : > { %3318 = vrot.lane.b32.xlu0 %v3313_v30, %s13383_s10 }
0x1044   : > { %3324 = vrot.lane.b32.xlu1 %v3312_v6, %s13385_s1 }
0x1046   : > { %3326 = vrot.lane.b32.xlu0 %v3313_v30, %s13385_s1 }
0x1048   : > { %3332 = vrot.lane.b32.xlu1 %v3312_v6, %s13386_s3 }
0x104a   : > { %3334 = vrot.lane.b32.xlu0 %v3313_v30, %s13386_s3 }
0x10b2   : > { %v3317_v38 = vpop.permute.xlu1 %3316 }
0x10b3   : > { %v3322_v39 = vmax.f32 %v12208_v15, %v3317_v38 }
0x10b4   : > { %v3319_v56 = vpop.permute.xlu0 %3318 }
0x10b5   : > { %v3323_v46 = vmax.f32 %v12212_v26, %v3319_v56 }
0x10b6   : > { %v3325_v20 = vpop.permute.xlu1 %3324 }
0x10b7   : > { %v3330_v47 = vmax.f32 %v3322_v39, %v3325_v20 }
0x10b8   : > { %v3327_v43 = vpop.permute.xlu0 %3326 }
0x10b9   : > { %v3331_v42 = vmax.f32 %v3323_v46, %v3327_v43 }
0x10ba   : > { %v3333_v48 = vpop.permute.xlu1 %3332 }
0x10bb   : > { %v3338_v49 = vmax.f32 %v3330_v47, %v3333_v48 }
0x10bc   : > { %v3335_v16 = vpop.permute.xlu0 %3334 }
0x10bd   : > { %v3339_v51 = vmax.f32 %v3331_v42, %v3335_v16  ;;  %9156 = vmatprep.mubr.msk.f32.mxu1 %vm2042_vm2, %v3338_v49 }
0x10bf   : > { %9157 = vmatmul.mubr.msk.f32.vlgmr.msra.gmra.mrb[16].mxu1 %vm2042_vm2, %v3339_v51 }
0x1192   : > { %v9158_v52 = vpop.f32.mrb[16].mxu1 }
0x1193   : > { %3427 = vrot.lane.b32.xlu0 %v9158_v52, %s13233_s4  ;;  %v3414_v53 = vpop.f32.mrb[17].mxu1 }
0x1194   : > { %3425 = vrot.lane.b32.xlu1 %v3414_v53, %s13233_s4  ;;  %s13394_s4 = sld [smem:[#allocation47_spill]] }
0x1197   : > { %3455 = vrot.lane.b32.xlu0 %v12229_v19, %s13370_s0 }
0x1198   : > { %3449 = vrot.lane.b32.xlu1 %v3447_v54, %s13370_s0 }
0x119b   : > { %3465 = vrot.lane.b32.xlu0 %v12229_v19, %s13391_s6 }
0x119c   : > { %3460 = vrot.lane.b32.xlu1 %v3447_v54, %s13391_s6 }
0x11a0   : > { %3470 = vrot.lane.b32.xlu1 %v3447_v54, %s13392_s8  ;;  %s13393_s8 = smov 126  }
0x1205   : > { %v3428_v55 = vpop.permute.xlu0 %3427 }
0x1206   : > { %v3433_v57 = vsel %vm3431_vm7, 0.0, %v3428_v55  ;;  %v3426_v60 = vpop.permute.xlu1 %3425 }
0x1207   : > { %v3436_v18 = vsel %vm3434_vm10, %v3433_v57, 0.0  ;;  %v3432_v6 = vsel %vm3431_vm7, 0.0, %v3426_v60 }
0x1208   : > { %v3435_v30 = vsel %vm3434_vm10, %v3432_v6, 0.0  ;;  %v3443_v38 = vmul.f32 %v12229_v19, %v3436_v18 }
0x1209   : > { %v12245_v56 = vpop.permute.xlu0 %3455  ;;  %v9904_v20 = vpack.i.bf16 %v3436_v18, %v3435_v30  ;;  %v3442_v39 = vmul.f32 %v12229_v19, %v3435_v30 }
0x120a   : > { %v12248_v43 = vpop.permute.xlu1 %3449  ;;  %v3458_v46 = vmul.f32 %v12245_v56, %v3435_v30  ;;  %v3459_v47 = vmul.f32 %v12245_v56, %v3436_v18 }
0x120b   : > { %9905 = vrot.lane.b32.xlu0 %v9904_v20, %s13383_s10  ;;  %v3535_v48 = vpack.c.bf16 %v3443_v38, %v3442_v39  ;;  %v3452_v42 = vmul.f32 %v12248_v43, %v3435_v30  ;;  %v3453_v49 = vmul.f32 %v12248_v43, %v3436_v18 }
0x120c   : > { %v9914_v16 = vpack.i.bf16 %v3459_v47, %v3458_v46  ;;  %v3546_v47 = vld [vmem:[%s13394_s4] sm:$0xff] }
0x120d   : > { %3571 = vmatpush1.bf16.msra.mxu1 %v3535_v48  ;;  %v9909_v51 = vpack.i.bf16 %v3453_v49, %v3452_v42  ;;  %v12255_v11 = vpop.permute.xlu0 %3465  ;;  %v3547_v42 = vld [vmem:[%s13394_s4 + $0x8] sm:$0xff]  ;;  %s13397_s4 = sld [smem:[#allocation49_spill]] }
0x120e   : > { %v12257_v52 = vpop.permute.xlu1 %3460  ;;  %3572 = vmatprep.subr.bf16.mxu1 %v13252_v7  ;;  %v3468_v57 = vmul.f32 %v12255_v11, %v3435_v30  ;;  %v3469_v60 = vmul.f32 %v12255_v11, %v3436_v18  ;;  %v10469_v49 = vld [vmem:[%s13395_s9 + $0x4] ss:$8 sps:$4 sm:$0xff]  }
0x120f   : > { %9915 = vrot.lane.b32.xlu0 %v9914_v16, %s13393_s8  ;;  %9910 = vrot.lane.b32.xlu1 %v9909_v51, %s13393_s8  ;;  %v3463_v53 = vmul.f32 %v12257_v52, %v3435_v30  ;;  %v3464_v54 = vmul.f32 %v12257_v52, %v3436_v18 }
0x1210   : > { %v9929_v38 = vpack.i.bf16 %v3469_v60, %v3468_v57  ;;  %8684 = vmatprep.mubr.msk.bf16.mxu1 %vm2042_vm2, %v10469_v49 }
0x1211   : > { %v9924_v55 = vpack.i.bf16 %v3464_v54, %v3463_v53 }
0x1212   : > { %v12266_v6 = vpop.permute.xlu1 %3470 }
0x1213   : > { %9920 = vrot.lane.b32.xlu1 %v9904_v20, %s13240_s11  ;;  %9925 = vrot.lane.b32.xlu0 %v9924_v55, %s13385_s1  ;;  %v3473_v39 = vmul.f32 %v12266_v6, %v3435_v30  ;;  %v3474_v46 = vmul.f32 %v12266_v6, %v3436_v18  ;;  %s13396_s11 = smov 3  }
0x1215   : > { %v9939_v48 = vpack.i.bf16 %v3474_v46, %v3473_v39 }
0x1217   : > { %9930 = vrot.lane.b32.xlu1 %v9929_v38, %s13385_s1  ;;  %9935 = vrot.lane.b32.xlu0 %v9904_v20, %s13386_s3 }
0x121b   : > { %3550 = vperm.xlu0 %9807, %v3546_v47   ;;  %9940 = vrot.lane.b32.xlu1 %v9939_v48, %s13388_s13 }
0x121f   : > { %3555 = vperm.xlu1 %9863, %v3547_v42  }
0x127d   : > { %v9906_v16 = vpop.permute.xlu0 %9905 }
0x127e   : > { %v9908_v51 = vunpack.i.h.bf16 %v9906_v16  ;;  %v9907_v53 = vunpack.i.l.bf16 %v9906_v16 }
0x1280   : > { %v3536_v30 = vpack.c.bf16 %v9908_v51, %v9907_v53 }
0x1281   : > { %v9916_v54 = vpop.permute.xlu0 %9915  ;;  %v9911_v18 = vpop.permute.xlu1 %9910 }
0x1282   : > { %v9913_v55 = vunpack.i.h.bf16 %v9911_v18  ;;  %v9912_v57 = vunpack.i.l.bf16 %v9911_v18  ;;  %3573 = vmatpush1.bf16.msra.mxu1 %v3536_v30  ;;  %v9918_v20 = vunpack.i.h.bf16 %v9916_v54  ;;  %v9917_v60 = vunpack.i.l.bf16 %v9916_v54 }
0x1283   : > { %3574 = vmatprep.subr.bf16.mxu1 %v13252_v7 }
0x1284   : > { %v3537_v38 = vpack.c.bf16 %v9913_v55, %v9912_v57  ;;  %v3538_v46 = vpack.c.bf16 %v9918_v20, %v9917_v60 }
0x1285   : > { %v9921_v39 = vpop.permute.xlu1 %9920  ;;  %v9926_v42 = vpop.permute.xlu0 %9925 }
0x1286   : > { %3575 = vmatpush1.bf16.msra.mxu1 %v3537_v38  ;;  %v9923_v47 = vunpack.i.h.bf16 %v9921_v39  ;;  %v9922_v48 = vunpack.i.l.bf16 %v9921_v39  ;;  %v9928_v49 = vunpack.i.h.bf16 %v9926_v42  ;;  %v9927_v16 = vunpack.i.l.bf16 %v9926_v42  ;;  %v10471_v42 = vld [vmem:[%s13395_s9] ss:$8 sps:$4 sm:$0xff]   ;;  %s13398_s9 = smov 125  }
0x1287   : > { %3576 = vmatprep.subr.bf16.mxu1 %v13252_v7 }
0x1288   : > { %v3539_v51 = vpack.c.bf16 %v9923_v47, %v9922_v48  ;;  %v3540_v30 = vpack.c.bf16 %v9928_v49, %v9927_v16 }
0x1289   : > { %v9931_v53 = vpop.permute.xlu1 %9930  ;;  %v9936_v55 = vpop.permute.xlu0 %9935 }
0x128a   : > { %3577 = vmatpush1.bf16.msra.mxu1 %v3538_v46  ;;  %v9933_v54 = vunpack.i.h.bf16 %v9931_v53  ;;  %v9932_v18 = vunpack.i.l.bf16 %v9931_v53  ;;  %v9938_v57 = vunpack.i.h.bf16 %v9936_v55  ;;  %v9937_v20 = vunpack.i.l.bf16 %v9936_v55 }
0x128b   : > { %3578 = vmatprep.subr.bf16.mxu1 %v13252_v7 }
0x128c   : > { %v3541_v60 = vpack.c.bf16 %v9933_v54, %v9932_v18  ;;  %v3542_v39 = vpack.c.bf16 %v9938_v57, %v9937_v20 }
0x128d   : > { %v9941_v38 = vpop.permute.xlu1 %9940 }
0x128e   : > { %3579 = vmatpush1.bf16.msra.mxu1 %v3539_v51  ;;  %v9943_v46 = vunpack.i.h.bf16 %v9941_v38  ;;  %v9942_v47 = vunpack.i.l.bf16 %v9941_v38 }
0x128f   : > { %3580 = vmatprep.subr.bf16.mxu1 %v13252_v7 }
0x1290   : > { %v3543_v48 = vpack.c.bf16 %v9943_v46, %v9942_v47 }
0x1292   : > { %3581 = vmatpush1.bf16.msra.mxu1 %v3540_v30 }
0x1293   : > { %3582 = vmatprep.subr.bf16.mxu1 %v13252_v7 }
0x1296   : > { %3583 = vmatpush1.bf16.msra.mxu1 %v3541_v60 }
0x1297   : > { %3584 = vmatprep.subr.bf16.mxu1 %v13252_v7 }
0x129a   : > { %3585 = vmatpush1.bf16.msra.mxu1 %v3542_v39  ;;  %v3551_v49 = vpop.permute.xlu0 %3550 }
0x129b   : > { %3586 = vmatprep.subr.bf16.mxu1 %v13252_v7 }
0x129e   : > { %3587 = vmatpush1.bf16.msra.mxu1 %v3543_v48  ;;  %v3556_v30 = vpop.permute.xlu1 %3555 }
0x12a1   : > { %3603 = vmatmul.mubr.bf16.vlgmr.msra.gmra.mrb[20].mxu1 %v10471_v42 }
0x1374   : > { %v3604_v16 = vpop.f32.mrb[20].mxu1 }
0x1375   : > { %v3605_v51 = vadd.f32 %v3604_v16, %v3551_v49  ;;  %v3606_v53 = vpop.f32.mrb[21].mxu1 }
0x1376   : > { %v3607_v54 = vpop.f32.mrb[22].mxu1 }
0x1377   : > { %v3613_v18 = vmin.f32 %v3605_v51, 0.0  ;;  %v3608_v55 = vadd.f32 %v3607_v54, %v3556_v30  ;;  %v3609_v60 = vpop.f32.mrb[23].mxu1  ;;  %vm3611_vm13 = vcmp.gt.f32.partialorder %v3605_v51, 0.0 }
0x1379   : > { %v3615_v1 = vmul.f32 1.442695, %v3613_v18  ;;  %v3614_v57 = vmin.f32 %v3608_v55, 0.0  ;;  %vm3612_vm9 = vcmp.gt.f32.partialorder %v3608_v55, 0.0 }
0x137b   : > { %10528 = vpow2.f32 %v3615_v1  ;;  %v3617_v20 = vmul.f32 1.442695, %v3614_v57 }
0x137d   : > { %10530 = vpow2.f32 %v3617_v20 }
0x1385   : > { %v10529_v38 = vpop.eup %10528 }
0x1386   : > { %v8685_v39 = vadd.f32 -1.0, %v10529_v38 }
0x1387   : > { %v10531_v46 = vpop.eup %10530 }
0x1388   : > { %v3621_v47 = vsel %vm3611_vm13, %v3605_v51, %v8685_v39  ;;  %v8686_v48 = vadd.f32 -1.0, %v10531_v46 }
0x1389   : > { %3625 = vrot.lane.b32.xlu0 %v3621_v47, %s13396_s11 }
0x138a   : > { %v3622_v42 = vsel %vm3612_vm9, %v3608_v55, %v8686_v48  ;;  %vm3795_vm9 = vcmask 31744  }
0x138b   : > { %3627 = vrot.lane.b32.xlu1 %v3622_v42, %s13396_s11 }
0x13fb   : > { %v3626_v49 = vpop.permute.xlu0 %3625 }
0x13fc   : > { %v3631_v16 = vsel %vm3431_vm7, 0.0, %v3626_v49 }
0x13fd   : > { %v3633_v53 = vsel %vm3434_vm10, %v3631_v16, 0.0  ;;  %v3628_v1 = vpop.permute.xlu1 %3627 }
0x13fe   : > { %v3632_v30 = vsel %vm3431_vm7, 0.0, %v3628_v1  ;;  %v3637_v18 = vmul.f32 %v3633_v53, %v12248_v43  ;;  %v3635_v51 = vmul.f32 %v3633_v53, %v12229_v19  ;;  %v3639_v46 = vmul.f32 %v3633_v53, %v12245_v56 }
0x13ff   : > { %v3634_v54 = vsel %vm3434_vm10, %v3632_v30, 0.0  ;;  %v3641_v42 = vmul.f32 %v3633_v53, %v12257_v52  ;;  %v3643_v1 = vmul.f32 %v3633_v53, %v12255_v11 }
0x1400   : > { %v9944_v60 = vpack.i.bf16 %v3634_v54, %v3633_v53  ;;  %v3638_v57 = vmul.f32 %v3634_v54, %v12248_v43  ;;  %v3636_v55 = vmul.f32 %v3634_v54, %v12229_v19  ;;  %v3640_v20 = vmul.f32 %v3634_v54, %v12245_v56 }
0x1401   : > { %v3642_v48 = vmul.f32 %v3634_v54, %v12257_v52  ;;  %v3644_v49 = vmul.f32 %v3634_v54, %v12255_v11 }
0x1402   : > { %9945 = vrot.lane.b32.xlu0 %v9944_v60, %s13383_s10  ;;  %v9949_v38 = vpack.i.bf16 %v3638_v57, %v3637_v18  ;;  %v3707_v39 = vpack.c.bf16 %v3636_v55, %v3635_v51  ;;  %v9954_v47 = vpack.i.bf16 %v3640_v20, %v3639_v46  ;;  %v3646_v18 = vmul.f32 %v3634_v54, %v12266_v6  ;;  %v3718_v55 = vld [vmem:[%s13397_s4] sm:$0xff]  ;;  %v3719_v20 = vld [vmem:[%s13397_s4 + $0x8] sm:$0xff]  ;;  %s13400_s4 = sld [smem:[#allocation80_spill]] }
0x1403   : > { %v9964_v16 = vpack.i.bf16 %v3642_v48, %v3641_v42  ;;  %v9969_v30 = vpack.i.bf16 %v3644_v49, %v3643_v1  ;;  %v3645_v51 = vmul.f32 %v3633_v53, %v12266_v6 }
0x1404   : > { %9950 = vrot.lane.b32.xlu1 %v9949_v38, %s13393_s8  ;;  %3743 = vmatpush1.bf16.msra.mxu0 %v3707_v39  ;;  %v10472_v38 = vld [vmem:[%s13399_s12 + $0x4] ss:$8 sps:$4 sm:$0xff]  }
0x1405   : > { %3744 = vmatprep.subr.bf16.mxu0 %v13252_v7  ;;  %v9979_v57 = vpack.i.bf16 %v3646_v18, %v3645_v51  ;;  %8689 = vmatprep.mubr.msk.bf16.mxu0 %vm2042_vm2, %v10472_v38 }
0x1406   : > { %9955 = vrot.lane.b32.xlu0 %v9954_v47, %s13393_s8 }
0x1408   : > { %9960 = vrot.lane.b32.xlu1 %v9944_v60, %s13398_s9 }
0x140a   : > { %9965 = vrot.lane.b32.xlu0 %v9964_v16, %s13385_s1 }
0x140c   : > { %9970 = vrot.lane.b32.xlu1 %v9969_v30, %s13385_s1 }
0x140e   : > { %9975 = vrot.lane.b32.xlu0 %v9944_v60, %s13386_s3 }
0x1410   : > { %9980 = vrot.lane.b32.xlu1 %v9979_v57, %s13388_s13 }
0x1412   : > { %3722 = vperm.xlu0 %9807, %v3718_v55  }
0x1414   : > { %3727 = vperm.xlu1 %9863, %v3719_v20  }
0x1474   : > { %v9946_v39 = vpop.permute.xlu0 %9945 }
0x1475   : > { %v9948_v46 = vunpack.i.h.bf16 %v9946_v39  ;;  %v9947_v47 = vunpack.i.l.bf16 %v9946_v39 }
0x1476   : > { %v9951_v54 = vpop.permute.xlu1 %9950 }
0x1477   : > { %v3708_v48 = vpack.c.bf16 %v9948_v46, %v9947_v47  ;;  %v9953_v42 = vunpack.i.h.bf16 %v9951_v54  ;;  %v9952_v49 = vunpack.i.l.bf16 %v9951_v54 }
0x1478   : > { %v9956_v53 = vpop.permute.xlu0 %9955 }
0x1479   : > { %3745 = vmatpush1.bf16.msra.mxu0 %v3708_v48  ;;  %v3709_v60 = vpack.c.bf16 %v9953_v42, %v9952_v49  ;;  %v9958_v16 = vunpack.i.h.bf16 %v9956_v53  ;;  %v9957_v1 = vunpack.i.l.bf16 %v9956_v53 }
0x147a   : > { %3746 = vmatprep.subr.bf16.mxu0 %v13252_v7  ;;  %v9961_v30 = vpop.permute.xlu1 %9960 }
0x147b   : > { %v3710_v18 = vpack.c.bf16 %v9958_v16, %v9957_v1  ;;  %v9963_v51 = vunpack.i.h.bf16 %v9961_v30  ;;  %v9962_v57 = vunpack.i.l.bf16 %v9961_v30 }
0x147c   : > { %v9966_v55 = vpop.permute.xlu0 %9965 }
0x147d   : > { %3747 = vmatpush1.bf16.msra.mxu0 %v3709_v60  ;;  %v3711_v20 = vpack.c.bf16 %v9963_v51, %v9962_v57  ;;  %v9968_v38 = vunpack.i.h.bf16 %v9966_v55  ;;  %v9967_v39 = vunpack.i.l.bf16 %v9966_v55  ;;  %v10474_v57 = vld [vmem:[%s13399_s12] ss:$8 sps:$4 sm:$0xff]   ;;  %s11147_s12 = smov 1  }
0x147e   : > { %3748 = vmatprep.subr.bf16.mxu0 %v13252_v7  ;;  %v9971_v46 = vpop.permute.xlu1 %9970 }
0x147f   : > { %v3712_v47 = vpack.c.bf16 %v9968_v38, %v9967_v39  ;;  %v9973_v54 = vunpack.i.h.bf16 %v9971_v46  ;;  %v9972_v48 = vunpack.i.l.bf16 %v9971_v46 }
0x1480   : > { %v9976_v42 = vpop.permute.xlu0 %9975 }
0x1481   : > { %3749 = vmatpush1.bf16.msra.mxu0 %v3710_v18  ;;  %v3713_v49 = vpack.c.bf16 %v9973_v54, %v9972_v48  ;;  %v9978_v53 = vunpack.i.h.bf16 %v9976_v42  ;;  %v9977_v60 = vunpack.i.l.bf16 %v9976_v42 }
0x1482   : > { %3750 = vmatprep.subr.bf16.mxu0 %v13252_v7  ;;  %v9981_v16 = vpop.permute.xlu1 %9980 }
0x1483   : > { %v3714_v1 = vpack.c.bf16 %v9978_v53, %v9977_v60  ;;  %v9983_v30 = vunpack.i.h.bf16 %v9981_v16  ;;  %v9982_v18 = vunpack.i.l.bf16 %v9981_v16 }
0x1485   : > { %3751 = vmatpush1.bf16.msra.mxu0 %v3711_v20  ;;  %v3715_v51 = vpack.c.bf16 %v9983_v30, %v9982_v18 }
0x1486   : > { %3752 = vmatprep.subr.bf16.mxu0 %v13252_v7 }
0x1489   : > { %3753 = vmatpush1.bf16.msra.mxu0 %v3712_v47 }
0x148a   : > { %3754 = vmatprep.subr.bf16.mxu0 %v13252_v7 }
0x148d   : > { %3755 = vmatpush1.bf16.msra.mxu0 %v3713_v49 }
0x148e   : > { %3756 = vmatprep.subr.bf16.mxu0 %v13252_v7 }
0x1491   : > { %3757 = vmatpush1.bf16.msra.mxu0 %v3714_v1  ;;  %v3723_v55 = vpop.permute.xlu0 %3722  ;;  %v3824_v1 = vld [vmem:[%s13400_s4] sm:$0xf]  ;;  %s13401_s4 = sld [smem:[#allocation76_spill]] }
0x1492   : > { %3758 = vmatprep.subr.bf16.mxu0 %v13252_v7  ;;  %9159 = vmatprep.subr.msk.mxu1 %vm2200_vm8, %v3824_v1 }
0x1493   : > { %v3728_v46 = vpop.permute.xlu1 %3727  ;;  %9160 = vmatpush3.msk.msra.mxu1 %vm2200_vm8, %v3824_v1 }
0x1494   : > { %4060 = vmatprep.subr.bf16.mxu1 %v13252_v7 }
0x1495   : > { %3759 = vmatpush1.bf16.msra.mxu0 %v3715_v51 }
0x1498   : > { %3775 = vmatmul.mubr.bf16.vlgmr.msra.gmra.mrb[12].mxu0 %v10474_v57 }
0x156b   : > { %v3776_v20 = vpop.f32.mrb[12].mxu0 }
0x156c   : > { %v3777_v38 = vadd.f32 %v3776_v20, %v3723_v55  ;;  %v3778_v39 = vpop.f32.mrb[13].mxu0 }
0x156d   : > { %v3779_v47 = vpop.f32.mrb[14].mxu0 }
0x156e   : > { %v3785_v54 = vmin.f32 %v3777_v38, 0.0  ;;  %v3780_v48 = vadd.f32 %v3779_v47, %v3728_v46  ;;  %v3781_v42 = vpop.f32.mrb[15].mxu0  ;;  %vm3783_vm13 = vcmp.gt.f32.partialorder %v3777_v38, 0.0 }
0x1570   : > { %v3787_v49 = vmul.f32 1.442695, %v3785_v54  ;;  %v3786_v53 = vmin.f32 %v3780_v48, 0.0  ;;  %vm3784_vm0 = vcmp.gt.f32.partialorder %v3780_v48, 0.0 }
0x1572   : > { %10532 = vpow2.f32 %v3787_v49  ;;  %v3789_v60 = vmul.f32 1.442695, %v3786_v53 }
0x1574   : > { %10534 = vpow2.f32 %v3789_v60 }
0x157c   : > { %v10533_v16 = vpop.eup %10532 }
0x157d   : > { %v8690_v30 = vadd.f32 -1.0, %v10533_v16 }
0x157e   : > { %v10535_v18 = vpop.eup %10534 }
0x157f   : > { %v12329_v51 = vsel %vm3783_vm13, %v3777_v38, %v8690_v30  ;;  %v8691_v57 = vadd.f32 -1.0, %v10535_v18  ;;  %v3921_v18 = vld [vmem:[%s13401_s4] sm:$0x7]  ;;  %s13407_s4 = sld [smem:[#allocation67_spill]] }
0x1580   : > { %v3796_v55 = vsel %vm3795_vm9, %v12329_v51, 0.0 }
0x1581   : > { %v12334_v20 = vsel %vm3784_vm0, %v3780_v48, %v8691_v57  ;;  %3800 = vrot.lane.b32.xlu0 %v3796_v55, %s13383_s10 }
0x1582   : > { %v3797_v39 = vsel %vm3795_vm9, %v12334_v20, 0.0 }
0x1583   : > { %3802 = vrot.lane.b32.xlu1 %v3797_v39, %s13383_s10 }
0x1585   : > { %3808 = vrot.lane.b32.xlu0 %v3796_v55, %s13393_s8 }
0x1587   : > { %3810 = vrot.lane.b32.xlu1 %v3797_v39, %s13393_s8 }
0x1589   : > { %3816 = vrot.lane.b32.xlu0 %v3796_v55, %s13398_s9 }
0x158b   : > { %3818 = vrot.lane.b32.xlu1 %v3797_v39, %s13398_s9  ;;  %v12351_v39 = vrot.slane %v3921_v18, %v11709_v3 }
0x15f3   : > { %v3801_v38 = vpop.permute.xlu0 %3800 }
0x15f4   : > { %v3806_v54 = vmax.f32 %v12329_v51, %v3801_v38  ;;  %v3931_v38 = vrot.slane %v3921_v18, %v11713_v5 }
0x15f5   : > { %v3803_v46 = vpop.permute.xlu1 %3802 }
0x15f6   : > { %v3807_v42 = vmax.f32 %v12334_v20, %v3803_v46 }
0x15f7   : > { %v3809_v47 = vpop.permute.xlu0 %3808 }
0x15f8   : > { %v3814_v49 = vmax.f32 %v3806_v54, %v3809_v47 }
0x15f9   : > { %v3811_v48 = vpop.permute.xlu1 %3810 }
0x15fa   : > { %v3815_v60 = vmax.f32 %v3807_v42, %v3811_v48 }
0x15fb   : > { %v3817_v53 = vpop.permute.xlu0 %3816 }
0x15fc   : > { %v3822_v16 = vmax.f32 %v3814_v49, %v3817_v53 }
0x15fd   : > { %v3819_v1 = vpop.permute.xlu1 %3818 }
0x15fe   : > { %v3823_v30 = vmax.f32 %v3815_v60, %v3819_v1  ;;  %9161 = vmatprep.mubr.msk.f32.mxu1 %vm3795_vm9, %v3822_v16 }
0x1600   : > { %9162 = vmatmul.mubr.msk.f32.vlgmr.msra.gmra.mrb[18].mxu1 %vm3795_vm9, %v3823_v30 }
0x16d3   : > { %v9163_v57 = vpop.f32.mrb[18].mxu1 }
0x16d4   : > { %3913 = vrot.lane.b32.xlu1 %v9163_v57, %s13370_s0  ;;  %v3900_v55 = vpop.f32.mrb[19].mxu1 }
0x16d5   : > { %3911 = vrot.lane.b32.xlu0 %v3900_v55, %s13370_s0 }
0x16d8   : > { %3939 = vrot.lane.b32.xlu1 %v12351_v39, %s11147_s12  ;;  %s13402_s12 = sld [smem:[#allocation50_spill]] }
0x16d9   : > { %3933 = vrot.lane.b32.xlu0 %v3931_v38, %s13370_s0 }
0x16dc   : > { %3949 = vrot.lane.b32.xlu1 %v12351_v39, %s13370_s0 }
0x16dd   : > { %3944 = vrot.lane.b32.xlu0 %v3931_v38, %s13396_s11 }
0x16e1   : > { %3954 = vrot.lane.b32.xlu0 %v3931_v38, %s13391_s6  ;;  %s13404_s6 = sld [smem:[#allocation51_spill]] }
0x1746   : > { %v3914_v46 = vpop.permute.xlu1 %3913 }
0x1747   : > { %v3918_v47 = vsel %vm2028_vm1, 0.0, %v3914_v46  ;;  %v3912_v54 = vpop.permute.xlu0 %3911 }
0x1748   : > { %v3920_v48 = vsel %vm3431_vm7, %v3918_v47, 0.0  ;;  %v3917_v5 = vsel %vm2028_vm1, 0.0, %v3912_v54 }
0x1749   : > { %v3919_v42 = vsel %vm3431_vm7, %v3917_v5, 0.0  ;;  %v3927_v49 = vmul.f32 %v12351_v39, %v3920_v48 }
0x174a   : > { %v12366_v53 = vpop.permute.xlu1 %3939  ;;  %v9984_v60 = vpack.i.bf16 %v3920_v48, %v3919_v42  ;;  %v3926_v16 = vmul.f32 %v12351_v39, %v3919_v42 }
0x174b   : > { %v12369_v1 = vpop.permute.xlu0 %3933  ;;  %v3942_v30 = vmul.f32 %v12366_v53, %v3919_v42  ;;  %v3943_v18 = vmul.f32 %v12366_v53, %v3920_v48 }
0x174c   : > { %9985 = vrot.lane.b32.xlu1 %v9984_v60, %s13383_s10  ;;  %v4019_v57 = vpack.c.bf16 %v3927_v49, %v3926_v16  ;;  %v3936_v55 = vmul.f32 %v12369_v1, %v3919_v42  ;;  %v3937_v38 = vmul.f32 %v12369_v1, %v3920_v48 }
0x174d   : > { %v9994_v46 = vpack.i.bf16 %v3943_v18, %v3942_v30 }
0x174e   : > { %4061 = vmatpush1.bf16.msra.mxu1 %v4019_v57  ;;  %v9989_v47 = vpack.i.bf16 %v3937_v38, %v3936_v55  ;;  %v12376_v54 = vpop.permute.xlu1 %3949 }
0x174f   : > { %v12378_v5 = vpop.permute.xlu0 %3944  ;;  %4062 = vmatprep.subr.bf16.mxu1 %v13252_v7  ;;  %v3952_v30 = vmul.f32 %v12376_v54, %v3919_v42  ;;  %v3953_v18 = vmul.f32 %v12376_v54, %v3920_v48 }
0x1750   : > { %9995 = vrot.lane.b32.xlu1 %v9994_v46, %s13383_s10  ;;  %9990 = vrot.lane.b32.xlu0 %v9989_v47, %s13393_s8  ;;  %v3947_v49 = vmul.f32 %v12378_v5, %v3919_v42  ;;  %v3948_v16 = vmul.f32 %v12378_v5, %v3920_v48 }
0x1751   : > { %v10009_v55 = vpack.i.bf16 %v3953_v18, %v3952_v30 }
0x1752   : > { %v10004_v8 = vpack.i.bf16 %v3948_v16, %v3947_v49  ;;  %v10475_v49 = vld [vmem:[%s13402_s12 + $0x4] ss:$8 sps:$4 sm:$0xff]  }
0x1753   : > { %v12387_v57 = vpop.permute.xlu0 %3954  ;;  %8699 = vmatprep.mubr.msk.bf16.mxu1 %vm2042_vm2, %v10475_v49 }
0x1754   : > { %10000 = vrot.lane.b32.xlu0 %v9984_v60, %s13393_s8  ;;  %10005 = vrot.lane.b32.xlu1 %v10004_v8, %s13398_s9  ;;  %v3957_v38 = vmul.f32 %v12387_v57, %v3919_v42  ;;  %v3958_v46 = vmul.f32 %v12387_v57, %v3920_v48  ;;  %v13403_v48 = vmov 0  }
0x1756   : > { %v10019_v47 = vpack.i.bf16 %v3958_v46, %v3957_v38 }
0x1758   : > { %10010 = vrot.lane.b32.xlu0 %v10009_v55, %s13393_s8  ;;  %10015 = vrot.lane.b32.xlu1 %v9984_v60, %s13398_s9 }
0x175c   : > { %10020 = vrot.lane.b32.xlu0 %v10019_v47, %s13385_s1 }
0x17be   : > { %v9986_v16 = vpop.permute.xlu1 %9985 }
0x17bf   : > { %v9988_v25 = vunpack.i.h.bf16 %v9986_v16  ;;  %v9987_v7 = vunpack.i.l.bf16 %v9986_v16 }
0x17c1   : > { %v4020_v2 = vpack.c.bf16 %v9988_v25, %v9987_v7 }
0x17c2   : > { %v9996_v8 = vpop.permute.xlu1 %9995  ;;  %v9991_v30 = vpop.permute.xlu0 %9990 }
0x17c3   : > { %v9993_v18 = vunpack.i.h.bf16 %v9991_v30  ;;  %v9992_v42 = vunpack.i.l.bf16 %v9991_v30  ;;  %4063 = vmatpush1.bf16.msra.mxu1 %v4020_v2  ;;  %v9998_v55 = vunpack.i.h.bf16 %v9996_v8  ;;  %v9997_v3 = vunpack.i.l.bf16 %v9996_v8 }
0x17c4   : > { %4064 = vmatprep.subr.bf16.mxu1 %v13403_v48 }
0x17c5   : > { %v4021_v60 = vpack.c.bf16 %v9993_v18, %v9992_v42  ;;  %v4022_v46 = vpack.c.bf16 %v9998_v55, %v9997_v3 }
0x17c6   : > { %v10001_v38 = vpop.permute.xlu0 %10000  ;;  %v10006_v14 = vpop.permute.xlu1 %10005 }
0x17c7   : > { %4065 = vmatpush1.bf16.msra.mxu1 %v4021_v60  ;;  %v10003_v47 = vunpack.i.h.bf16 %v10001_v38  ;;  %v10002_v49 = vunpack.i.l.bf16 %v10001_v38  ;;  %v10008_v7 = vunpack.i.h.bf16 %v10006_v14  ;;  %v10007_v25 = vunpack.i.l.bf16 %v10006_v14 }
0x17c8   : > { %4066 = vmatprep.subr.bf16.mxu1 %v13403_v48 }
0x17c9   : > { %v4023_v16 = vpack.c.bf16 %v10003_v47, %v10002_v49  ;;  %v4024_v8 = vpack.c.bf16 %v10008_v7, %v10007_v25  ;;  %v10477_v7 = vld [vmem:[%s13402_s12] ss:$8 sps:$4 sm:$0xff]   ;;  %v10478_v25 = vld [vmem:[%s13402_s12 + $0x14] ss:$8 sps:$4 sm:$0xff]  }
0x17ca   : > { %v10011_v2 = vpop.permute.xlu0 %10010  ;;  %v10016_v42 = vpop.permute.xlu1 %10015 }
0x17cb   : > { %4067 = vmatpush1.bf16.msra.mxu1 %v4022_v46  ;;  %v10013_v30 = vunpack.i.h.bf16 %v10011_v2  ;;  %v10012_v18 = vunpack.i.l.bf16 %v10011_v2  ;;  %v10018_v3 = vunpack.i.h.bf16 %v10016_v42  ;;  %v10017_v55 = vunpack.i.l.bf16 %v10016_v42  ;;  %v10480_v2 = vld [vmem:[%s13402_s12 + $0x10] ss:$8 sps:$4 sm:$0xff]  }
0x17cc   : > { %4068 = vmatprep.subr.bf16.mxu1 %v13403_v48 }
0x17cd   : > { %v4025_v60 = vpack.c.bf16 %v10013_v30, %v10012_v18  ;;  %v4026_v14 = vpack.c.bf16 %v10018_v3, %v10017_v55  ;;  %v4033_v18 = vld [vmem:[%s13404_s6 + $0x8] sm:$0xff] }
0x17ce   : > { %v10021_v38 = vpop.permute.xlu0 %10020 }
0x17cf   : > { %4069 = vmatpush1.bf16.msra.mxu1 %v4023_v16  ;;  %v10023_v46 = vunpack.i.h.bf16 %v10021_v38  ;;  %v10022_v47 = vunpack.i.l.bf16 %v10021_v38  ;;  %v13405_v16 = vmov 0.0  }
0x17d0   : > { %4070 = vmatprep.subr.bf16.mxu1 %v13403_v48 }
0x17d1   : > { %v4027_v49 = vpack.c.bf16 %v10023_v46, %v10022_v47 }
0x17d3   : > { %4071 = vmatpush1.bf16.msra.mxu1 %v4024_v8  ;;  %v4032_v8 = vld [vmem:[%s13404_s6] sm:$0xff] }
0x17d4   : > { %4072 = vmatprep.subr.bf16.mxu1 %v13403_v48 }
0x17d7   : > { %4073 = vmatpush1.bf16.msra.mxu1 %v4025_v60 }
0x17d8   : > { %4074 = vmatprep.subr.bf16.mxu1 %v13403_v48 }
0x17db   : > { %4075 = vmatpush1.bf16.msra.mxu1 %v4026_v14 }
0x17dc   : > { %4076 = vmatprep.subr.bf16.mxu1 %v13403_v48 }
0x17df   : > { %4077 = vmatpush1.bf16.msra.mxu1 %v4027_v49  ;;  %v4034_v49 = vld [vmem:[%s13404_s6 + $0x10] sm:$0xff] }
0x17e0   : > { %9164 = vmatprep.subr.bf16.mxu1 %v13405_v16 }
0x17e2   : > { %4093 = vmatmul.mubr.bf16.vlgmr.msra.gmra.mrb[24].mxu1 %v10477_v7 }
0x17e3   : > { %8700 = vmatprep.mubr.msk.bf16.mxu1 %vm2042_vm2, %v10478_v25 }
0x17ea   : > { %4101 = vmatmul.mubr.bf16.gmra.mrb[28].mxu1 %v10480_v2  ;;  %v4035_v2 = vld [vmem:[%s13404_s6 + $0x18] sm:$0xff] }
0x17eb   : > { %9168 = vmatprep.mubr.msk.bf16.mxu1 %vm11136_vm14, %v13405_v16 }
0x18b5   : > { %v4094_v30 = vpop.f32.mrb[24].mxu1 }
0x18b6   : > { %v4095_v42 = vadd.f32 %v4094_v30, %v4032_v8  ;;  %v4096_v3 = vpop.f32.mrb[25].mxu1 }
0x18b7   : > { %v4097_v55 = vpop.f32.mrb[26].mxu1 }
0x18b8   : > { %v4113_v60 = vmin.f32 %v4095_v42, 0.0  ;;  %v4098_v38 = vadd.f32 %v4097_v55, %v4033_v18  ;;  %v4099_v14 = vpop.f32.mrb[27].mxu1  ;;  %vm4109_vm0 = vcmp.gt.f32.partialorder %v4095_v42, 0.0 }
0x18ba   : > { %v4117_v46 = vmul.f32 1.442695, %v4113_v60  ;;  %v4114_v47 = vmin.f32 %v4098_v38, 0.0  ;;  %vm4110_vm13 = vcmp.gt.f32.partialorder %v4098_v38, 0.0 }
0x18bc   : > { %10536 = vpow2.f32 %v4117_v46  ;;  %v4119_v7 = vmul.f32 1.442695, %v4114_v47 }
0x18bd   : > { %v4102_v25 = vpop.f32.mrb[28].mxu1 }
0x18be   : > { %10538 = vpow2.f32 %v4119_v7  ;;  %v4103_v13 = vadd.f32 %v4102_v25, %v4034_v49  ;;  %v4104_v61 = vpop.f32.mrb[29].mxu1 }
0x18bf   : > { %v4105_v63 = vpop.f32.mrb[30].mxu1 }
0x18c0   : > { %v4115_v62 = vmin.f32 %v4103_v13, 0.0  ;;  %v4106_v45 = vadd.f32 %v4105_v63, %v4035_v2  ;;  %v4107_v50 = vpop.f32.mrb[31].mxu1  ;;  %vm4111_vm3 = vcmp.gt.f32.partialorder %v4103_v13, 0.0 }
0x18c2   : > { %v4121_v8 = vmul.f32 1.442695, %v4115_v62  ;;  %v4116_v30 = vmin.f32 %v4106_v45, 0.0  ;;  %vm4112_vm15 = vcmp.gt.f32.partialorder %v4106_v45, 0.0 }
0x18c4   : > { %10540 = vpow2.f32 %v4121_v8  ;;  %v4123_v3 = vmul.f32 1.442695, %v4116_v30 }
0x18c6   : > { %v10537_v18 = vpop.eup %10536  ;;  %10542 = vpow2.f32 %v4123_v3 }
0x18c7   : > { %v8701_v55 = vadd.f32 -1.0, %v10537_v18 }
0x18c8   : > { %v10539_v60 = vpop.eup %10538 }
0x18c9   : > { %v4129_v14 = vsel %vm4109_vm0, %v4095_v42, %v8701_v55  ;;  %v8702_v46 = vadd.f32 -1.0, %v10539_v60  ;;  %vm4551_vm0 = vcmask 1040384  }
0x18ca   : > { %4137 = vrot.lane.b32.xlu1 %v4129_v14, %s13370_s0 }
0x18cb   : > { %v4130_v47 = vsel %vm4110_vm13, %v4098_v38, %v8702_v46  ;;  %vm4544_vm13 = vcmask 7168  }
0x18cc   : > { %4139 = vrot.lane.b32.xlu0 %v4130_v47, %s13370_s0 }
0x18ce   : > { %v10541_v61 = vpop.eup %10540 }
0x18cf   : > { %v8703_v63 = vadd.f32 -1.0, %v10541_v61 }
0x18d0   : > { %v10543_v50 = vpop.eup %10542 }
0x18d1   : > { %v4131_v62 = vsel %vm4111_vm3, %v4103_v13, %v8703_v63  ;;  %v8704_v49 = vadd.f32 -1.0, %v10543_v50 }
0x18d2   : > { %4141 = vrot.lane.b32.xlu1 %v4131_v62, %s13370_s0 }
0x18d3   : > { %v4132_v7 = vsel %vm4112_vm15, %v4106_v45, %v8704_v49 }
0x18d4   : > { %4143 = vrot.lane.b32.xlu0 %v4132_v7, %s13370_s0  ;;  %s13406_s0 = sld [smem:[#allocation52_spill]] }
0x193c   : > { %v4138_v42 = vpop.permute.xlu1 %4137 }
0x193d   : > { %v4149_v25 = vsel %vm2028_vm1, 0.0, %v4138_v42 }
0x193e   : > { %v4140_v2 = vpop.permute.xlu0 %4139  ;;  %v4153_v8 = vsel %vm3431_vm7, %v4149_v25, 0.0 }
0x193f   : > { %v4150_v38 = vsel %vm2028_vm1, 0.0, %v4140_v2  ;;  %v4169_v18 = vmul.f32 %v4153_v8, %v12378_v5  ;;  %v12428_v45 = vmul.f32 %v4153_v8, %v12351_v39 }
0x1940   : > { %v4154_v30 = vsel %vm3431_vm7, %v4150_v38, 0.0 }
0x1941   : > { %v10024_v3 = vpack.i.bf16 %v4154_v30, %v4153_v8  ;;  %v4170_v13 = vmul.f32 %v4154_v30, %v12378_v5  ;;  %v12431_v55 = vmul.f32 %v4154_v30, %v12351_v39  ;;  %v4174_v2 = vmul.f32 %v4154_v30, %v12376_v54 }
0x1943   : > { %10025 = vrot.lane.b32.xlu1 %v10024_v3, %s13393_s8  ;;  %v10034_v46 = vpack.i.bf16 %v4170_v13, %v4169_v18  ;;  %v4301_v47 = vpack.c.bf16 %v12431_v55, %v12428_v45  ;;  %v4173_v18 = vmul.f32 %v4153_v8, %v12376_v54 }
0x1944   : > { %v4142_v60 = vpop.permute.xlu1 %4141 }
0x1945   : > { %v4151_v14 = vsel %vm2028_vm1, 0.0, %v4142_v60 }
0x1946   : > { %v4155_v61 = vsel %vm3431_vm7, %v4151_v14, 0.0  ;;  %v4144_v63 = vpop.permute.xlu0 %4143 }
0x1947   : > { %v4152_v50 = vsel %vm2028_vm1, 0.0, %v4144_v63  ;;  %10035 = vrot.lane.b32.xlu1 %v10034_v46, %s13398_s9  ;;  %v4171_v7 = vmul.f32 %v4155_v61, %v12378_v5  ;;  %v12445_v38 = vmul.f32 %v4155_v61, %v12351_v39  ;;  %v4175_v60 = vmul.f32 %v4155_v61, %v12376_v54 }
0x1948   : > { %v4156_v62 = vsel %vm3431_vm7, %v4152_v50, 0.0  ;;  %v4161_v46 = vmul.f32 %v4153_v8, %v12369_v1  ;;  %vm13409_vm1 = vcmask 261120  }
0x1949   : > { %v10029_v49 = vpack.i.bf16 %v4156_v62, %v4155_v61  ;;  %v4172_v42 = vmul.f32 %v4156_v62, %v12378_v5  ;;  %v12448_v13 = vmul.f32 %v4156_v62, %v12351_v39  ;;  %v10054_v5 = vpack.i.bf16 %v4174_v2, %v4173_v18 }
0x194a   : > { %v4176_v55 = vmul.f32 %v4156_v62, %v12376_v54  ;;  %v4162_v39 = vmul.f32 %v4154_v30, %v12369_v1  ;;  %v4164_v50 = vmul.f32 %v4156_v62, %v12369_v1  ;;  %v4178_v2 = vmul.f32 %v4154_v30, %v12387_v57 }
0x194b   : > { %10030 = vrot.lane.b32.xlu0 %v10029_v49, %s13393_s8  ;;  %v10049_v25 = vpack.i.bf16 %v4172_v42, %v4171_v7  ;;  %v4302_v45 = vpack.c.bf16 %v12448_v13, %v12445_v38  ;;  %v4163_v7 = vmul.f32 %v4155_v61, %v12369_v1  ;;  %v4166_v42 = vmul.f32 %v4154_v30, %v12366_v53  ;;  %v10483_v38 = vld [vmem:[%s13406_s0 + $0x4] ss:$12 sps:$4 sm:$0xff]  }
0x194c   : > { %v10064_v14 = vpack.i.bf16 %v4176_v55, %v4175_v60  ;;  %v10059_v63 = vpack.i.bf16 %v4162_v39, %v4161_v46  ;;  %v4177_v18 = vmul.f32 %v4153_v8, %v12387_v57  ;;  %v4168_v1 = vmul.f32 %v4156_v62, %v12366_v53  ;;  %4375 = vmatprep.mubr.bf16.mxu0 %v10483_v38  ;;  %v4994_v60 = vld [vmem:[%s13407_s4] sm:$0xff]  ;;  %v4995_v39 = vld [vmem:[%s13407_s4 + $0x8] sm:$0xff]  ;;  %s13408_s4 = sld [smem:[#allocation53_spill]] }
0x194d   : > { %10050 = vrot.lane.b32.xlu1 %v10049_v25, %s13398_s9  ;;  %v10074_v54 = vpack.i.bf16 %v4164_v50, %v4163_v7  ;;  %v4165_v25 = vmul.f32 %v4153_v8, %v12366_v53  ;;  %v4180_v30 = vmul.f32 %v4156_v62, %v12387_v57 }
0x194f   : > { %10040 = vrot.lane.b32.xlu0 %v10024_v3, %s13383_s10  ;;  %v10079_v13 = vpack.i.bf16 %v4166_v42, %v4165_v25 }
0x1951   : > { %10055 = vrot.lane.b32.xlu1 %v10054_v5, %s13393_s8  ;;  %v4167_v5 = vmul.f32 %v4155_v61, %v12366_v53 }
0x1953   : > { %10045 = vrot.lane.b32.xlu0 %v10029_v49, %s13383_s10  ;;  %v10089_v55 = vpack.i.bf16 %v4168_v1, %v4167_v5 }
0x1955   : > { %10065 = vrot.lane.b32.xlu1 %v10064_v14, %s13393_s8 }
0x1957   : > { %10060 = vrot.lane.b32.xlu0 %v10059_v63, %s13393_s8 }
0x1959   : > { %10070 = vrot.lane.b32.xlu1 %v10024_v3, %s13398_s9  ;;  %v10094_v3 = vpack.i.bf16 %v4178_v2, %v4177_v18 }
0x195b   : > { %10075 = vrot.lane.b32.xlu0 %v10074_v54, %s13393_s8 }
0x195d   : > { %10085 = vrot.lane.b32.xlu1 %v10029_v49, %s13398_s9  ;;  %v4179_v49 = vmul.f32 %v4155_v61, %v12387_v57 }
0x195f   : > { %10080 = vrot.lane.b32.xlu0 %v10079_v13, %s13383_s10  ;;  %v10099_v8 = vpack.i.bf16 %v4180_v30, %v4179_v49 }
0x1961   : > { %10095 = vrot.lane.b32.xlu1 %v10094_v3, %s13385_s1 }
0x1963   : > { %10090 = vrot.lane.b32.xlu0 %v10089_v55, %s13383_s10 }
0x1965   : > { %4998 = vperm.xlu1 %9863, %v4994_v60  }
0x1967   : > { %10100 = vrot.lane.b32.xlu0 %v10099_v8, %s13385_s1 }
0x196b   : > { %5003 = vperm.xlu0 %9807, %v4995_v39  }
0x19b5   : > { %v10026_v14 = vpop.permute.xlu1 %10025 }
0x19b6   : > { %v10028_v46 = vunpack.i.h.bf16 %v10026_v14  ;;  %v10027_v63 = vunpack.i.l.bf16 %v10026_v14 }
0x19b8   : > { %v4309_v53 = vpack.c.bf16 %v10028_v46, %v10027_v63 }
0x19b9   : > { %v10036_v50 = vpop.permute.xlu1 %10035 }
0x19ba   : > { %8946 = vmatprep.subr.bf16.mxu0 %v4309_v53  ;;  %v10038_v7 = vunpack.i.h.bf16 %v10036_v50  ;;  %v10037_v62 = vunpack.i.l.bf16 %v10036_v50 }
0x19bb   : > { %8947 = vmatpush3.bf16.msra.mxu0 %v4301_v47 }
0x19bc   : > { %v4311_v38 = vpack.c.bf16 %v10038_v7, %v10037_v62 }
0x19bd   : > { %v10031_v54 = vpop.permute.xlu0 %10030 }
0x19be   : > { %v10033_v42 = vunpack.i.h.bf16 %v10031_v54  ;;  %v10032_v25 = vunpack.i.l.bf16 %v10031_v54 }
0x19bf   : > { %v10051_v2 = vpop.permute.xlu1 %10050 }
0x19c0   : > { %v4310_v57 = vpack.c.bf16 %v10033_v42, %v10032_v25  ;;  %v10053_v13 = vunpack.i.h.bf16 %v10051_v2  ;;  %v10052_v18 = vunpack.i.l.bf16 %v10051_v2 }
0x19c1   : > { %v10041_v61 = vpop.permute.xlu0 %10040 }
0x19c2   : > { %v10043_v1 = vunpack.i.h.bf16 %v10041_v61  ;;  %v10042_v3 = vunpack.i.l.bf16 %v10041_v61  ;;  %8948 = vmatprep.subr.bf16.mxu0 %v4310_v57  ;;  %v4312_v39 = vpack.c.bf16 %v10053_v13, %v10052_v18 }
0x19c3   : > { %v10056_v5 = vpop.permute.xlu1 %10055  ;;  %8949 = vmatpush3.bf16.msra.mxu0 %v4302_v45 }
0x19c4   : > { %v4303_v55 = vpack.c.bf16 %v10043_v1, %v10042_v3  ;;  %8950 = vmatprep.subr.bf16.mxu0 %v4311_v38  ;;  %v10058_v30 = vunpack.i.h.bf16 %v10056_v5  ;;  %v10057_v47 = vunpack.i.l.bf16 %v10056_v5 }
0x19c5   : > { %v10046_v60 = vpop.permute.xlu0 %10045 }
0x19c6   : > { %v10048_v49 = vunpack.i.h.bf16 %v10046_v60  ;;  %v10047_v8 = vunpack.i.l.bf16 %v10046_v60  ;;  %v4313_v53 = vpack.c.bf16 %v10058_v30, %v10057_v47 }
0x19c7   : > { %v10066_v14 = vpop.permute.xlu1 %10065  ;;  %8951 = vmatpush3.bf16.msra.mxu0 %v4303_v55 }
0x19c8   : > { %v4304_v46 = vpack.c.bf16 %v10048_v49, %v10047_v8  ;;  %8952 = vmatprep.subr.bf16.mxu0 %v4312_v39  ;;  %v10068_v50 = vunpack.i.h.bf16 %v10066_v14  ;;  %v10067_v7 = vunpack.i.l.bf16 %v10066_v14 }
0x19c9   : > { %v10061_v63 = vpop.permute.xlu0 %10060 }
0x19ca   : > { %v10063_v62 = vunpack.i.h.bf16 %v10061_v63  ;;  %v10062_v54 = vunpack.i.l.bf16 %v10061_v63  ;;  %v4314_v13 = vpack.c.bf16 %v10068_v50, %v10067_v7 }
0x19cb   : > { %v10071_v42 = vpop.permute.xlu1 %10070  ;;  %8953 = vmatpush3.bf16.msra.mxu0 %v4304_v46 }
0x19cc   : > { %v4305_v45 = vpack.c.bf16 %v10063_v62, %v10062_v54  ;;  %8954 = vmatprep.subr.bf16.mxu0 %v4313_v53  ;;  %v10073_v25 = vunpack.i.h.bf16 %v10071_v42  ;;  %v10072_v2 = vunpack.i.l.bf16 %v10071_v42 }
0x19cd   : > { %v10076_v57 = vpop.permute.xlu0 %10075 }
0x19ce   : > { %v10078_v61 = vunpack.i.h.bf16 %v10076_v57  ;;  %v10077_v38 = vunpack.i.l.bf16 %v10076_v57  ;;  %v4315_v5 = vpack.c.bf16 %v10073_v25, %v10072_v2  ;;  %v10481_v25 = vld [vmem:[%s13406_s0] ss:$12 sps:$4 sm:$0xff]   ;;  %v10484_v57 = vld [vmem:[%s13406_s0 + $0x8] ss:$12 sps:$4 sm:$0xff]   ;;  %s13410_s0 = sld [smem:[#allocation66_spill]] }
0x19cf   : > { %v10086_v18 = vpop.permute.xlu1 %10085  ;;  %8955 = vmatpush3.bf16.msra.mxu0 %v4305_v45 }
0x19d0   : > { %v4306_v1 = vpack.c.bf16 %v10078_v61, %v10077_v38  ;;  %8956 = vmatprep.subr.bf16.mxu0 %v4314_v13  ;;  %v10088_v55 = vunpack.i.h.bf16 %v10086_v18  ;;  %v10087_v30 = vunpack.i.l.bf16 %v10086_v18  ;;  %v4323_v13 = vld [vmem:[%s13408_s4] sm:$0xff] }
0x19d1   : > { %v10081_v3 = vpop.permute.xlu0 %10080 }
0x19d2   : > { %v10083_v47 = vunpack.i.h.bf16 %v10081_v3  ;;  %v10082_v60 = vunpack.i.l.bf16 %v10081_v3  ;;  %v4316_v7 = vpack.c.bf16 %v10088_v55, %v10087_v30  ;;  %v4324_v55 = vld [vmem:[%s13408_s4 + $0x8] sm:$0xff]  ;;  %s13412_s4 = sld [smem:[#allocation55_spill]] }
0x19d3   : > { %v10096_v49 = vpop.permute.xlu1 %10095  ;;  %8957 = vmatpush3.bf16.msra.mxu0 %v4306_v1 }
0x19d4   : > { %v4307_v8 = vpack.c.bf16 %v10083_v47, %v10082_v60  ;;  %v10098_v39 = vunpack.i.h.bf16 %v10096_v49  ;;  %v10097_v14 = vunpack.i.l.bf16 %v10096_v49  ;;  %8958 = vmatprep.subr.bf16.mxu0 %v4315_v5 }
0x19d5   : > { %v10091_v46 = vpop.permute.xlu0 %10090 }
0x19d6   : > { %v4317_v63 = vpack.c.bf16 %v10098_v39, %v10097_v14  ;;  %v10093_v53 = vunpack.i.h.bf16 %v10091_v46  ;;  %v10092_v50 = vunpack.i.l.bf16 %v10091_v46 }
0x19d7   : > { %8959 = vmatpush3.bf16.msra.mxu0 %v4307_v8 }
0x19d8   : > { %v4308_v62 = vpack.c.bf16 %v10093_v53, %v10092_v50  ;;  %8960 = vmatprep.subr.bf16.mxu0 %v4316_v7  ;;  %9165 = vmatpush3.bf16.msra.mxu1 %v4317_v63 }
0x19d9   : > { %v10101_v54 = vpop.permute.xlu0 %10100  ;;  %9166 = vmatprep.subr.bf16.mxu1 %v13405_v16 }
0x19da   : > { %v10103_v42 = vunpack.i.h.bf16 %v10101_v54  ;;  %v10102_v45 = vunpack.i.l.bf16 %v10101_v54 }
0x19db   : > { %8961 = vmatpush3.bf16.msra.mxu0 %v4308_v62 }
0x19dc   : > { %v4318_v2 = vpack.c.bf16 %v10103_v42, %v10102_v45  ;;  %9172 = vmatprep.subr.bf16.mxu0 %v13405_v16 }
0x19de   : > { %4376 = vmatmul.mubr.bf16.vlgmr.msra.gmra.mrb[16].mxu0 %v10481_v25  ;;  %9167 = vmatpush3.bf16.msra.mxu1 %v4318_v2 }
0x19df   : > { %9178 = vmatprep.subr.bf16.mxu1 %v13405_v16  ;;  %9174 = vmatprep.mubr.msk.bf16.mxu0 %vm11136_vm14, %v13405_v16 }
0x19e1   : > { %9169 = vmatmul.mubr.msk.bf16.vlgmr.msra.gmra.mrb[32].mxu1 %vm13409_vm1, %v10484_v57 }
0x19e2   : > { %9180 = vmatprep.mubr.msk.bf16.mxu1 %vm11136_vm14, %v13405_v16 }
0x1ab1   : > { %v8962_v61 = vpop.f32.mrb[16].mxu0 }
0x1ab2   : > { %v8963_v38 = vpop.f32.mrb[17].mxu0 }
0x1ab3   : > { %v8964_v18 = vadd.f32 %v8963_v38, %v8962_v61  ;;  %v8965_v1 = vpop.f32.mrb[18].mxu0  ;;  %v4543_v61 = vld [vmem:[#allocation25 + $0x1] sm:$0x1]  ;;  %v10485_v38 = vld [vmem:[%s13410_s0 + $0x8] sm:$0xff]  }
0x1ab4   : > { %v8966_v3 = vpop.f32.mrb[19].mxu0  ;;  %v4418_v5 = vpop.f32.mrb[32].mxu1 }
0x1ab5   : > { %v8967_v30 = vadd.f32 %v8966_v3, %v8965_v1  ;;  %v4378_v47 = vadd.f32 %v8964_v18, %v4323_v13  ;;  %v9170_v60 = vpop.f32.mrb[33].mxu1  ;;  %v10486_v13 = vld [vmem:[%s13410_s0] sm:$0xff]   ;;  %v10487_v18 = vld [vmem:[%s13410_s0 + $0x10] sm:$0xff]   ;;  %v4489_v1 = vld [vmem:[#allocation25] sm:$0x1] }
0x1ab6   : > { %v4421_v49 = vpop.f32.mrb[34].mxu1 }
0x1ab7   : > { %v4419_v8 = vadd.f32 %v4418_v5, %v4378_v47  ;;  %v4381_v39 = vadd.f32 %v8967_v30, %v4324_v55  ;;  %v9171_v14 = vpop.f32.mrb[35].mxu1 }
0x1ab9   : > { %v4427_v46 = vmin.f32 %v4419_v8, 0.0  ;;  %v4422_v63 = vadd.f32 %v4421_v49, %v4381_v39  ;;  %vm4425_vm15 = vcmp.gt.f32.partialorder %v4419_v8, 0.0  ;;  %v4767_v49 = vld [vmem:[#allocation25 + $0x2] sm:$0x1] }
0x1abb   : > { %v4429_v53 = vmul.f32 1.442695, %v4427_v46  ;;  %v4428_v50 = vmin.f32 %v4422_v63, 0.0  ;;  %vm4426_vm3 = vcmp.gt.f32.partialorder %v4422_v63, 0.0 }
0x1abd   : > { %10544 = vpow2.f32 %v4429_v53  ;;  %v4431_v7 = vmul.f32 1.442695, %v4428_v50  ;;  %v4907_v50 = vld [vmem:[#allocation25 + $0x3] sm:$0x1] }
0x1abf   : > { %10546 = vpow2.f32 %v4431_v7  ;;  %v10488_v7 = vld [vmem:[%s13410_s0 + $0x18] sm:$0xff]   ;;  %s13411_s0 = sld [smem:[#allocation54_spill]] }
0x1ac7   : > { %v10545_v62 = vpop.eup %10544 }
0x1ac8   : > { %v8709_v54 = vadd.f32 -1.0, %v10545_v62 }
0x1ac9   : > { %v10547_v42 = vpop.eup %10546 }
0x1aca   : > { %v8710_v45 = vadd.f32 -1.0, %v10547_v42  ;;  %v4435_v25 = vsel %vm4425_vm15, %v4419_v8, %v8709_v54 }
0x1acc   : > { %v4436_v2 = vsel %vm4426_vm3, %v4422_v63, %v8710_v45 }
0x1acd   : > { %v4437_v57 = vpack.c.bf16 %v4436_v2, %v4435_v25  ;;  %v5004_v25 = vpop.permute.xlu0 %5003 }
0x1acf   : > { %9173 = vmatpush3.bf16.msra.mxu0 %v4437_v57  ;;  %9179 = vmatpush3.bf16.msra.mxu1 %v4437_v57 }
0x1ad0   : > { %9194 = vmatprep.subr.bf16.mxu1 %v13405_v16  ;;  %9184 = vmatprep.subr.msk.mxu0 %vm4551_vm0, %v4543_v61 }
0x1ad2   : > { %9181 = vmatmul.mubr.msk.bf16.vlgmr.msra.gmra.mrb[36].mxu1 %vm2042_vm2, %v10485_v38  ;;  %9175 = vmatmul.mubr.msk.bf16.vlgmr.msra.gmra.mrb[20].mxu0 %vm2042_vm2, %v10486_v13 }
0x1ad3   : > { %9195 = vmatpush3.bf16.msra.mxu1 %v4437_v57  ;;  %9196 = vmatprep.mubr.msk.bf16.mxu1 %vm11136_vm14, %v13405_v16 }
0x1ad4   : > { %9185 = vmatpush3.msk.msra.mxu0 %vm4551_vm0, %v4543_v61 }
0x1ad5   : > { %9189 = vmatprep.subr.msk.mxu0 %vm4551_vm0, %v4489_v1 }
0x1ada   : > { %9197 = vmatmul.mubr.msk.bf16.vlgmr.msra.gmra.mrb[40].mxu1 %vm2042_vm2, %v10487_v18 }
0x1ba5   : > { %v4535_v3 = vpop.f32.mrb[36].mxu1  ;;  %v4482_v5 = vpop.f32.mrb[20].mxu0 }
0x1ba6   : > { %v9182_v55 = vpop.f32.mrb[37].mxu1  ;;  %9186 = vmatprep.mubr.msk.f32.mxu0 %vm4544_vm13, %v4535_v3  ;;  %v9176_v30 = vpop.f32.mrb[21].mxu0 }
0x1ba7   : > { %v4538_v47 = vpop.f32.mrb[38].mxu1  ;;  %v4485_v60 = vpop.f32.mrb[22].mxu0 }
0x1ba8   : > { %v9183_v8 = vpop.f32.mrb[39].mxu1  ;;  %9187 = vmatmul.mubr.msk.f32.vlgmr.msra.gmra.mrb[24].mxu0 %vm4544_vm13, %v4538_v47  ;;  %v9177_v39 = vpop.f32.mrb[23].mxu0 }
0x1ba9   : > { %9190 = vmatpush3.msk.msra.mxu0 %vm4551_vm0, %v4489_v1  ;;  %9191 = vmatprep.mubr.msk.f32.mxu0 %vm4544_vm13, %v4482_v5 }
0x1baa   : > { %9200 = vmatprep.subr.msk.mxu0 %vm4551_vm0, %v4767_v49 }
0x1bad   : > { %v4759_v14 = vpop.f32.mrb[40].mxu1 }
0x1bae   : > { %v9198_v46 = vpop.f32.mrb[41].mxu1 }
0x1baf   : > { %v4762_v63 = vpop.f32.mrb[42].mxu1 }
0x1bb0   : > { %9192 = vmatmul.mubr.msk.f32.vlgmr.msra.gmra.mrb[24].mxu0 %vm4544_vm13, %v4485_v60  ;;  %v9199_v53 = vpop.f32.mrb[43].mxu1 }
0x1bb1   : > { %9201 = vmatpush3.msk.msra.mxu0 %vm4551_vm0, %v4767_v49  ;;  %9202 = vmatprep.mubr.msk.f32.mxu0 %vm4544_vm13, %v4759_v14 }
0x1bb2   : > { %9205 = vmatprep.subr.bf16.mxu0 %v13405_v16 }
0x1bb8   : > { %9203 = vmatmul.mubr.msk.f32.vlgmr.msra.gmra.mrb[24].mxu0 %vm4544_vm13, %v4762_v63 }
0x1bb9   : > { %9206 = vmatpush3.bf16.msra.mxu0 %v4437_v57  ;;  %9207 = vmatprep.mubr.msk.bf16.mxu0 %vm11136_vm14, %v13405_v16  ;;  %v4999_v57 = vpop.permute.xlu1 %4998 }
0x1bba   : > { %9211 = vmatprep.subr.msk.mxu0 %vm4551_vm0, %v4907_v50 }
0x1bbc   : > { %9208 = vmatmul.mubr.msk.bf16.vlgmr.msra.gmra.mrb[28].mxu0 %vm2042_vm2, %v10488_v7 }
0x1bbd   : > { %9212 = vmatpush3.msk.msra.mxu0 %vm4551_vm0, %v4907_v50  ;;  %vm13418_vm0 = vmmov %vm13409_vm1 }
0x1bbe   : > { %9216 = vmatprep.subr.bf16.mxu0 %v13405_v16 }
0x1c8f   : > { %v4899_v62 = vpop.f32.mrb[28].mxu0 }
0x1c90   : > { %v9209_v54 = vpop.f32.mrb[29].mxu0  ;;  %9213 = vmatprep.mubr.msk.f32.mxu0 %vm4544_vm13, %v4899_v62 }
0x1c91   : > { %v4902_v42 = vpop.f32.mrb[30].mxu0 }
0x1c92   : > { %v9210_v45 = vpop.f32.mrb[31].mxu0  ;;  %9214 = vmatmul.mubr.msk.f32.vlgmr.msra.gmra.mrb[24].mxu0 %vm4544_vm13, %v4902_v42 }
0x1c93   : > { %9220 = vmatprep.mubr.msk.bf16.mxu0 %vm11136_vm14, %v13405_v16 }
0x1d65   : > { %v9215_v2 = vpop.f32.mrb[24].mxu0 }
0x1d66   : > { %v5007_v61 = vadd.f32 %v9215_v2, %v5004_v25  ;;  %v4983_v38 = vpop.f32.mrb[25].mxu0 }
0x1d67   : > { %v5006_v13 = vadd.f32 %v4999_v57, %v4983_v38 }
0x1d68   : > { %5014 = vrot.lane.b32.xlu0 %v5007_v61, %s13396_s11 }
0x1d69   : > { %5012 = vrot.lane.b32.xlu1 %v5006_v13, %s13396_s11 }
0x1d6c   : > { %5018 = vrot.lane.b32.xlu0 %v12334_v20, %s13396_s11 }
0x1d6d   : > { %5016 = vrot.lane.b32.xlu1 %v12329_v51, %s13396_s11 }
0x1dda   : > { %v5015_v18 = vpop.permute.xlu0 %5014 }
0x1ddb   : > { %v5025_v1 = vsel %vm3431_vm7, 0.0, %v5015_v18  ;;  %v5013_v3 = vpop.permute.xlu1 %5012 }
0x1ddc   : > { %v5029_v5 = vsel %vm3434_vm10, %v5025_v1, 0.0  ;;  %v5024_v55 = vsel %vm3431_vm7, 0.0, %v5013_v3 }
0x1ddd   : > { %v5028_v30 = vsel %vm3434_vm10, %v5024_v55, 0.0  ;;  %v5045_v8 = vmul.f32 %v5029_v5, %v12257_v52  ;;  %v5049_v62 = vmul.f32 %v5029_v5, %v12255_v11  ;;  %v5033_v25 = vmul.f32 %v5029_v5, %v12229_v19 }
0x1dde   : > { %v5019_v47 = vpop.permute.xlu0 %5018  ;;  %v10104_v60 = vpack.i.bf16 %v5029_v5, %v5028_v30  ;;  %v5044_v49 = vmul.f32 %v5028_v30, %v12257_v52  ;;  %v5048_v42 = vmul.f32 %v5028_v30, %v12255_v11  ;;  %v5032_v45 = vmul.f32 %v5028_v30, %v12229_v19 }
0x1ddf   : > { %v5027_v20 = vsel %vm3431_vm7, 0.0, %v5019_v47  ;;  %v5017_v39 = vpop.permute.xlu1 %5016  ;;  %v5036_v61 = vmul.f32 %v5028_v30, %v12248_v43  ;;  %v5037_v38 = vmul.f32 %v5029_v5, %v12248_v43 }
0x1de0   : > { %v5031_v51 = vsel %vm3434_vm10, %v5027_v20, 0.0  ;;  %v5026_v14 = vsel %vm3431_vm7, 0.0, %v5017_v39  ;;  %10105 = vrot.lane.b32.xlu1 %v10104_v60, %s13398_s9  ;;  %v10119_v63 = vpack.i.bf16 %v5045_v8, %v5044_v49  ;;  %v5176_v13 = vpack.c.bf16 %v5033_v25, %v5032_v45 }
0x1de1   : > { %v5030_v46 = vsel %vm3434_vm10, %v5026_v14, 0.0  ;;  %v5047_v7 = vmul.f32 %v5031_v51, %v12257_v52  ;;  %v12557_v57 = vmul.f32 %v5031_v51, %v12229_v19  ;;  %v10134_v1 = vpack.i.bf16 %v5049_v62, %v5048_v42 }
0x1de2   : > { %v10109_v53 = vpack.i.bf16 %v5031_v51, %v5030_v46  ;;  %v5046_v50 = vmul.f32 %v5030_v46, %v12257_v52  ;;  %v12554_v2 = vmul.f32 %v5030_v46, %v12229_v19  ;;  %v5050_v3 = vmul.f32 %v5030_v46, %v12255_v11 }
0x1de3   : > { %v5051_v55 = vmul.f32 %v5031_v51, %v12255_v11  ;;  %v10144_v47 = vpack.i.bf16 %v5037_v38, %v5036_v61  ;;  %v5038_v8 = vmul.f32 %v5030_v46, %v12248_v43  ;;  %v5039_v20 = vmul.f32 %v5031_v51, %v12248_v43  ;;  %v5199_v61 = vld [vmem:[%s13412_s4 + $0x8] sm:$0xff] }
0x1de4   : > { %10120 = vrot.lane.b32.xlu1 %v10119_v63, %s13385_s1  ;;  %10110 = vrot.lane.b32.xlu0 %v10109_v53, %s13398_s9  ;;  %v10124_v54 = vpack.i.bf16 %v5047_v7, %v5046_v50  ;;  %v5177_v18 = vpack.c.bf16 %v12557_v57, %v12554_v2  ;;  %v5040_v14 = vmul.f32 %v5028_v30, %v12245_v56  ;;  %v10491_v7 = vld [vmem:[%s13411_s0 + $0x4] ss:$12 sps:$4 sm:$0xff]  }
0x1de5   : > { %v10139_v49 = vpack.i.bf16 %v5051_v55, %v5050_v3  ;;  %v10149_v39 = vpack.i.bf16 %v5039_v20, %v5038_v8  ;;  %v5041_v63 = vmul.f32 %v5029_v5, %v12245_v56  ;;  %v5052_v50 = vmul.f32 %v5028_v30, %v12266_v6  ;;  %5260 = vmatprep.mubr.bf16.mxu1 %v10491_v7 }
0x1de6   : > { %v5042_v42 = vmul.f32 %v5030_v46, %v12245_v56  ;;  %v5043_v45 = vmul.f32 %v5031_v51, %v12245_v56  ;;  %v5054_v2 = vmul.f32 %v5030_v46, %v12266_v6  ;;  %v5055_v30 = vmul.f32 %v5031_v51, %v12266_v6 }
0x1de7   : > { %v10164_v62 = vpack.i.bf16 %v5041_v63, %v5040_v14 }
0x1de8   : > { %10115 = vrot.lane.b32.xlu0 %v10104_v60, %s13383_s10  ;;  %10125 = vrot.lane.b32.xlu1 %v10124_v54, %s13385_s1  ;;  %v5053_v54 = vmul.f32 %v5029_v5, %v12266_v6  ;;  %v10169_v25 = vpack.i.bf16 %v5043_v45, %v5042_v42  ;;  %v5198_v5 = vld [vmem:[%s13412_s4] sm:$0xff]  ;;  %v10179_v57 = vpack.i.bf16 %v5055_v30, %v5054_v2  ;;  %s13417_s4 = sld [smem:[#allocation58_spill]] }
0x1dec   : > { %10130 = vrot.lane.b32.xlu0 %v10109_v53, %s13383_s10  ;;  %10135 = vrot.lane.b32.xlu1 %v10134_v1, %s13385_s1 }
0x1df0   : > { %10145 = vrot.lane.b32.xlu0 %v10144_v47, %s13393_s8  ;;  %10140 = vrot.lane.b32.xlu1 %v10139_v49, %s13385_s1 }
0x1df4   : > { %10155 = vrot.lane.b32.xlu1 %v10104_v60, %s13386_s3  ;;  %10150 = vrot.lane.b32.xlu0 %v10149_v39, %s13393_s8  ;;  %v10174_v60 = vpack.i.bf16 %v5053_v54, %v5052_v50 }
0x1df8   : > { %10160 = vrot.lane.b32.xlu1 %v10109_v53, %s13386_s3  ;;  %10165 = vrot.lane.b32.xlu0 %v10164_v62, %s13393_s8 }
0x1dfc   : > { %10175 = vrot.lane.b32.xlu1 %v10174_v60, %s13388_s13  ;;  %10170 = vrot.lane.b32.xlu0 %v10169_v25, %s13393_s8 }
0x1e00   : > { %5202 = vperm.xlu1 %9863, %v5198_v5   ;;  %10180 = vrot.lane.b32.xlu0 %v10179_v57, %s13388_s13 }
0x1e04   : > { %5207 = vperm.xlu0 %9807, %v5199_v61  }
0x1e52   : > { %v10106_v53 = vpop.permute.xlu1 %10105 }
0x1e53   : > { %v10108_v38 = vunpack.i.h.bf16 %v10106_v53  ;;  %v10107_v1 = vunpack.i.l.bf16 %v10106_v53 }
0x1e55   : > { %v5184_v3 = vpack.c.bf16 %v10108_v38, %v10107_v1 }
0x1e56   : > { %v10111_v55 = vpop.permute.xlu0 %10110  ;;  %v10121_v47 = vpop.permute.xlu1 %10120 }
0x1e57   : > { %v10113_v46 = vunpack.i.h.bf16 %v10111_v55  ;;  %v10112_v49 = vunpack.i.l.bf16 %v10111_v55  ;;  %v10123_v51 = vunpack.i.h.bf16 %v10121_v47  ;;  %v10122_v8 = vunpack.i.l.bf16 %v10121_v47  ;;  %8991 = vmatprep.subr.bf16.mxu1 %v5184_v3 }
0x1e58   : > { %8992 = vmatpush3.bf16.msra.mxu1 %v5176_v13 }
0x1e59   : > { %v5185_v20 = vpack.c.bf16 %v10113_v46, %v10112_v49  ;;  %v5186_v63 = vpack.c.bf16 %v10123_v51, %v10122_v8 }
0x1e5a   : > { %v10116_v39 = vpop.permute.xlu0 %10115  ;;  %v10126_v14 = vpop.permute.xlu1 %10125 }
0x1e5b   : > { %v10118_v50 = vunpack.i.h.bf16 %v10116_v39  ;;  %v10117_v7 = vunpack.i.l.bf16 %v10116_v39  ;;  %v10128_v62 = vunpack.i.h.bf16 %v10126_v14  ;;  %v10127_v54 = vunpack.i.l.bf16 %v10126_v14  ;;  %8993 = vmatprep.subr.bf16.mxu1 %v5185_v20 }
0x1e5c   : > { %8994 = vmatpush3.bf16.msra.mxu1 %v5177_v18 }
0x1e5d   : > { %v5178_v42 = vpack.c.bf16 %v10118_v50, %v10117_v7  ;;  %8995 = vmatprep.subr.bf16.mxu1 %v5186_v63  ;;  %v5187_v25 = vpack.c.bf16 %v10128_v62, %v10127_v54 }
0x1e5e   : > { %v10131_v45 = vpop.permute.xlu0 %10130  ;;  %v10136_v60 = vpop.permute.xlu1 %10135 }
0x1e5f   : > { %v10133_v2 = vunpack.i.h.bf16 %v10131_v45  ;;  %v10132_v30 = vunpack.i.l.bf16 %v10131_v45  ;;  %v10138_v5 = vunpack.i.h.bf16 %v10136_v60  ;;  %v10137_v57 = vunpack.i.l.bf16 %v10136_v60 }
0x1e60   : > { %8996 = vmatpush3.bf16.msra.mxu1 %v5178_v42 }
0x1e61   : > { %v5179_v13 = vpack.c.bf16 %v10133_v2, %v10132_v30  ;;  %8997 = vmatprep.subr.bf16.mxu1 %v5187_v25  ;;  %v5188_v38 = vpack.c.bf16 %v10138_v5, %v10137_v57 }
0x1e62   : > { %v10146_v61 = vpop.permute.xlu0 %10145  ;;  %v10141_v53 = vpop.permute.xlu1 %10140 }
0x1e63   : > { %v10148_v1 = vunpack.i.h.bf16 %v10146_v61  ;;  %v10147_v3 = vunpack.i.l.bf16 %v10146_v61  ;;  %v10143_v55 = vunpack.i.h.bf16 %v10141_v53  ;;  %v10142_v47 = vunpack.i.l.bf16 %v10141_v53 }
0x1e64   : > { %8998 = vmatpush3.bf16.msra.mxu1 %v5179_v13 }
0x1e65   : > { %v5180_v18 = vpack.c.bf16 %v10148_v1, %v10147_v3  ;;  %8999 = vmatprep.subr.bf16.mxu1 %v5188_v38  ;;  %v5189_v51 = vpack.c.bf16 %v10143_v55, %v10142_v47 }
0x1e66   : > { %v10151_v46 = vpop.permute.xlu0 %10150  ;;  %v10156_v49 = vpop.permute.xlu1 %10155 }
0x1e67   : > { %v10153_v8 = vunpack.i.h.bf16 %v10151_v46  ;;  %v10152_v20 = vunpack.i.l.bf16 %v10151_v46  ;;  %v10158_v39 = vunpack.i.h.bf16 %v10156_v49  ;;  %v10157_v14 = vunpack.i.l.bf16 %v10156_v49  ;;  %v10492_v49 = vld [vmem:[%s13411_s0 + $0x8] ss:$12 sps:$4 sm:$0xff]  }
0x1e68   : > { %9000 = vmatpush3.bf16.msra.mxu1 %v5180_v18  ;;  %v10489_v18 = vld [vmem:[%s13411_s0] ss:$12 sps:$4 sm:$0xff]   ;;  %s13414_s0 = sld [smem:[#allocation69_spill]] }
0x1e69   : > { %v5181_v63 = vpack.c.bf16 %v10153_v8, %v10152_v20  ;;  %9001 = vmatprep.subr.bf16.mxu1 %v5189_v51  ;;  %v5190_v62 = vpack.c.bf16 %v10158_v39, %v10157_v14 }
0x1e6a   : > { %v10166_v50 = vpop.permute.xlu0 %10165  ;;  %v10161_v7 = vpop.permute.xlu1 %10160 }
0x1e6b   : > { %v10168_v54 = vunpack.i.h.bf16 %v10166_v50  ;;  %v10167_v42 = vunpack.i.l.bf16 %v10166_v50  ;;  %v10163_v45 = vunpack.i.h.bf16 %v10161_v7  ;;  %v10162_v60 = vunpack.i.l.bf16 %v10161_v7 }
0x1e6c   : > { %9002 = vmatpush3.bf16.msra.mxu1 %v5181_v63 }
0x1e6d   : > { %v5182_v25 = vpack.c.bf16 %v10168_v54, %v10167_v42  ;;  %9003 = vmatprep.subr.bf16.mxu1 %v5190_v62  ;;  %v5191_v5 = vpack.c.bf16 %v10163_v45, %v10162_v60 }
0x1e6e   : > { %v10171_v2 = vpop.permute.xlu0 %10170  ;;  %v10176_v30 = vpop.permute.xlu1 %10175 }
0x1e6f   : > { %v10173_v57 = vunpack.i.h.bf16 %v10171_v2  ;;  %v10172_v13 = vunpack.i.l.bf16 %v10171_v2  ;;  %v10178_v61 = vunpack.i.h.bf16 %v10176_v30  ;;  %v10177_v53 = vunpack.i.l.bf16 %v10176_v30 }
0x1e70   : > { %9004 = vmatpush3.bf16.msra.mxu1 %v5182_v25 }
0x1e71   : > { %v5183_v38 = vpack.c.bf16 %v10173_v57, %v10172_v13  ;;  %v5192_v1 = vpack.c.bf16 %v10178_v61, %v10177_v53  ;;  %9005 = vmatprep.subr.bf16.mxu1 %v5191_v5 }
0x1e72   : > { %v10181_v3 = vpop.permute.xlu0 %10180 }
0x1e73   : > { %v10183_v55 = vunpack.i.h.bf16 %v10181_v3  ;;  %v10182_v47 = vunpack.i.l.bf16 %v10181_v3  ;;  %9217 = vmatpush3.bf16.msra.mxu0 %v5192_v1 }
0x1e74   : > { %9006 = vmatpush3.bf16.msra.mxu1 %v5183_v38  ;;  %9218 = vmatprep.subr.bf16.mxu0 %v13405_v16 }
0x1e75   : > { %v5193_v46 = vpack.c.bf16 %v10183_v55, %v10182_v47  ;;  %9224 = vmatprep.subr.bf16.mxu1 %v13405_v16 }
0x1e77   : > { %5261 = vmatmul.mubr.bf16.vlgmr.msra.gmra.mrb[44].mxu1 %v10489_v18  ;;  %9219 = vmatpush3.bf16.msra.mxu0 %v5193_v46 }
0x1e78   : > { %5441 = vmatprep.subr.bf16.mxu0 %v13403_v48  ;;  %9226 = vmatprep.mubr.msk.bf16.mxu1 %vm11136_vm14, %v13405_v16 }
0x1e7a   : > { %9221 = vmatmul.mubr.msk.bf16.vlgmr.msra.gmra.mrb[32].mxu0 %vm13409_vm1, %v10492_v49 }
0x1e7f   : > { %v5203_v20 = vpop.permute.xlu1 %5202 }
0x1e83   : > { %v5208_v42 = vpop.permute.xlu0 %5207 }
0x1f4a   : > { %v9007_v51 = vpop.f32.mrb[44].mxu1 }
0x1f4b   : > { %v9008_v8 = vpop.f32.mrb[45].mxu1 }
0x1f4c   : > { %v9009_v39 = vadd.f32 %v9008_v8, %v9007_v51  ;;  %v9010_v14 = vpop.f32.mrb[46].mxu1 }
0x1f4d   : > { %v9011_v63 = vpop.f32.mrb[47].mxu1  ;;  %v5303_v50 = vpop.f32.mrb[32].mxu0 }
0x1f4e   : > { %v9012_v7 = vadd.f32 %v9011_v63, %v9010_v14  ;;  %v5263_v62 = vadd.f32 %v9009_v39, %v5203_v20  ;;  %v9222_v54 = vpop.f32.mrb[33].mxu0 }
0x1f4f   : > { %v5306_v45 = vpop.f32.mrb[34].mxu0 }
0x1f50   : > { %v5304_v60 = vadd.f32 %v5303_v50, %v5263_v62  ;;  %v5266_v25 = vadd.f32 %v9012_v7, %v5208_v42  ;;  %v9223_v2 = vpop.f32.mrb[35].mxu0 }
0x1f52   : > { %v5312_v30 = vmin.f32 %v5304_v60, 0.0  ;;  %v5307_v5 = vadd.f32 %v5306_v45, %v5266_v25  ;;  %vm5310_vm15 = vcmp.gt.f32.partialorder %v5304_v60, 0.0 }
0x1f54   : > { %v5314_v57 = vmul.f32 1.442695, %v5312_v30  ;;  %v5313_v13 = vmin.f32 %v5307_v5, 0.0  ;;  %vm5311_vm3 = vcmp.gt.f32.partialorder %v5307_v5, 0.0 }
0x1f56   : > { %10548 = vpow2.f32 %v5314_v57  ;;  %v5316_v61 = vmul.f32 1.442695, %v5313_v13 }
0x1f58   : > { %10550 = vpow2.f32 %v5316_v61 }
0x1f60   : > { %v10549_v53 = vpop.eup %10548 }
0x1f61   : > { %v8741_v38 = vadd.f32 -1.0, %v10549_v53  ;;  %v6049_v53 = vld [vmem:[%s13414_s0] sm:$0xff] }
0x1f62   : > { %v10551_v1 = vpop.eup %10550 }
0x1f63   : > { %v5320_v3 = vsel %vm5310_vm15, %v5304_v60, %v8741_v38  ;;  %v8742_v55 = vadd.f32 -1.0, %v10551_v1  ;;  %v10493_v38 = vld [vmem:[#allocation8 + $0x4] ss:$8 sps:$4 sm:$0xff]  }
0x1f64   : > { %5324 = vrot.lane.b32.xlu1 %v5320_v3, %s13396_s11  ;;  %8745 = vmatprep.mubr.msk.bf16.mxu0 %vm2042_vm2, %v10493_v38 }
0x1f65   : > { %v5321_v47 = vsel %vm5311_vm3, %v5307_v5, %v8742_v55 }
0x1f66   : > { %5326 = vrot.lane.b32.xlu0 %v5321_v47, %s13396_s11  ;;  %s13413_s11 = sld [smem:[#allocation56_spill]] }
0x1f6c   : > { %v5417_v13 = vld [vmem:[%s13413_s11] sm:$0xff]  ;;  %v5418_v61 = vld [vmem:[%s13413_s11 + $0x8] sm:$0xff] }
0x1fd6   : > { %v5325_v18 = vpop.permute.xlu1 %5324 }
0x1fd7   : > { %v5330_v46 = vsel %vm3431_vm7, 0.0, %v5325_v18 }
0x1fd8   : > { %v5332_v49 = vsel %vm3434_vm10, %v5330_v46, 0.0  ;;  %v5327_v51 = vpop.permute.xlu0 %5326 }
0x1fd9   : > { %v5331_v8 = vsel %vm3431_vm7, 0.0, %v5327_v51  ;;  %v5336_v39 = vmul.f32 %v5332_v49, %v12248_v43  ;;  %v5334_v14 = vmul.f32 %v5332_v49, %v12229_v19  ;;  %v5338_v45 = vmul.f32 %v5332_v49, %v12245_v56 }
0x1fda   : > { %v5333_v20 = vsel %vm3434_vm10, %v5331_v8, 0.0  ;;  %v5342_v2 = vmul.f32 %v5332_v49, %v12255_v11  ;;  %v5344_v57 = vmul.f32 %v5332_v49, %v12266_v6 }
0x1fdb   : > { %v10184_v63 = vpack.i.bf16 %v5333_v20, %v5332_v49  ;;  %v5337_v50 = vmul.f32 %v5333_v20, %v12248_v43  ;;  %v5335_v7 = vmul.f32 %v5333_v20, %v12229_v19  ;;  %v5339_v62 = vmul.f32 %v5333_v20, %v12245_v56 }
0x1fdc   : > { %v5341_v25 = vmul.f32 %v5333_v20, %v12257_v52  ;;  %v5340_v19 = vmul.f32 %v5332_v49, %v12257_v52  ;;  %v5343_v43 = vmul.f32 %v5333_v20, %v12255_v11  ;;  %v5345_v5 = vmul.f32 %v5333_v20, %v12266_v6  ;;  %v6050_v11 = vld [vmem:[%s13414_s0 + $0x8] sm:$0xff]  ;;  %s13416_s0 = sld [smem:[#allocation57_spill]] }
0x1fdd   : > { %10185 = vrot.lane.b32.xlu1 %v10184_v63, %s13383_s10  ;;  %v10189_v54 = vpack.i.bf16 %v5337_v50, %v5336_v39  ;;  %v5406_v42 = vpack.c.bf16 %v5335_v7, %v5334_v14  ;;  %v10194_v60 = vpack.i.bf16 %v5339_v62, %v5338_v45 }
0x1fde   : > { %v10204_v56 = vpack.i.bf16 %v5341_v25, %v5340_v19  ;;  %v10209_v30 = vpack.i.bf16 %v5343_v43, %v5342_v2  ;;  %v10219_v52 = vpack.i.bf16 %v5345_v5, %v5344_v57 }
0x1fdf   : > { %10190 = vrot.lane.b32.xlu0 %v10189_v54, %s13393_s8  ;;  %5442 = vmatpush1.bf16.msra.mxu0 %v5406_v42 }
0x1fe0   : > { %5443 = vmatprep.subr.bf16.mxu0 %v13403_v48 }
0x1fe1   : > { %10195 = vrot.lane.b32.xlu1 %v10194_v60, %s13393_s8 }
0x1fe3   : > { %10200 = vrot.lane.b32.xlu0 %v10184_v63, %s13398_s9  ;;  %s13415_s9 = sld [smem:[#allocation68_spill]] }
0x1fe5   : > { %10205 = vrot.lane.b32.xlu1 %v10204_v56, %s13385_s1 }
0x1fe7   : > { %10210 = vrot.lane.b32.xlu0 %v10209_v30, %s13385_s1 }
0x1fe9   : > { %10215 = vrot.lane.b32.xlu1 %v10184_v63, %s13386_s3 }
0x1feb   : > { %10220 = vrot.lane.b32.xlu0 %v10219_v52, %s13388_s13 }
0x1fed   : > { %5421 = vperm.xlu1 %9863, %v5417_v13  }
0x1fef   : > { %5426 = vperm.xlu0 %9807, %v5418_v61  }
0x1ff1   : > { %6053 = vperm.xlu1 %9863, %v6049_v53   ;;  %v10495_v53 = vld [vmem:[#allocation8] ss:$8 sps:$4 sm:$0xff]  }
0x1ff3   : > { %6058 = vperm.xlu0 %9807, %v6050_v11  }
0x204f   : > { %v10186_v1 = vpop.permute.xlu1 %10185 }
0x2050   : > { %v10188_v3 = vunpack.i.h.bf16 %v10186_v1  ;;  %v10187_v55 = vunpack.i.l.bf16 %v10186_v1 }
0x2051   : > { %v10191_v6 = vpop.permute.xlu0 %10190 }
0x2052   : > { %v5407_v47 = vpack.c.bf16 %v10188_v3, %v10187_v55  ;;  %v10193_v18 = vunpack.i.h.bf16 %v10191_v6  ;;  %v10192_v46 = vunpack.i.l.bf16 %v10191_v6 }
0x2053   : > { %v10196_v49 = vpop.permute.xlu1 %10195 }
0x2054   : > { %5444 = vmatpush1.bf16.msra.mxu0 %v5407_v47  ;;  %v5408_v51 = vpack.c.bf16 %v10193_v18, %v10192_v46  ;;  %v10198_v8 = vunpack.i.h.bf16 %v10196_v49  ;;  %v10197_v20 = vunpack.i.l.bf16 %v10196_v49 }
0x2055   : > { %5445 = vmatprep.subr.bf16.mxu0 %v13403_v48  ;;  %v10201_v39 = vpop.permute.xlu0 %10200 }
0x2056   : > { %v5409_v14 = vpack.c.bf16 %v10198_v8, %v10197_v20  ;;  %v10203_v63 = vunpack.i.h.bf16 %v10201_v39  ;;  %v10202_v50 = vunpack.i.l.bf16 %v10201_v39 }
0x2057   : > { %v10206_v7 = vpop.permute.xlu1 %10205 }
0x2058   : > { %5446 = vmatpush1.bf16.msra.mxu0 %v5408_v51  ;;  %v5410_v62 = vpack.c.bf16 %v10203_v63, %v10202_v50  ;;  %v10208_v54 = vunpack.i.h.bf16 %v10206_v7  ;;  %v10207_v42 = vunpack.i.l.bf16 %v10206_v7 }
0x2059   : > { %5447 = vmatprep.subr.bf16.mxu0 %v13403_v48  ;;  %v10211_v45 = vpop.permute.xlu0 %10210 }
0x205a   : > { %v5411_v60 = vpack.c.bf16 %v10208_v54, %v10207_v42  ;;  %v10213_v25 = vunpack.i.h.bf16 %v10211_v45  ;;  %v10212_v19 = vunpack.i.l.bf16 %v10211_v45  ;;  %v10496_v54 = vld [vmem:[%s13415_s9] sm:$0xff]   ;;  %v10497_v42 = vld [vmem:[%s13415_s9 + $0x8] sm:$0xff]  }
0x205b   : > { %v10216_v43 = vpop.permute.xlu1 %10215  ;;  %v5600_v45 = vld [vmem:[#allocation23 + $0x4] sm:$0xf] }
0x205c   : > { %5448 = vmatpush1.bf16.msra.mxu0 %v5409_v14  ;;  %v5412_v56 = vpack.c.bf16 %v10213_v25, %v10212_v19  ;;  %v10218_v2 = vunpack.i.h.bf16 %v10216_v43  ;;  %v10217_v30 = vunpack.i.l.bf16 %v10216_v43  ;;  %v10499_v25 = vld [vmem:[%s13415_s9 + $0x18] sm:$0xff]  }
0x205d   : > { %5449 = vmatprep.subr.bf16.mxu0 %v13403_v48  ;;  %v10221_v5 = vpop.permute.xlu0 %10220 }
0x205e   : > { %v5413_v57 = vpack.c.bf16 %v10218_v2, %v10217_v30  ;;  %v10223_v52 = vunpack.i.h.bf16 %v10221_v5  ;;  %v10222_v13 = vunpack.i.l.bf16 %v10221_v5 }
0x2060   : > { %5450 = vmatpush1.bf16.msra.mxu0 %v5410_v62  ;;  %v5414_v61 = vpack.c.bf16 %v10223_v52, %v10222_v13  ;;  %v5822_v13 = vld [vmem:[#allocation23 + $0x8] sm:$0xf] }
0x2061   : > { %5451 = vmatprep.subr.bf16.mxu0 %v13403_v48 }
0x2064   : > { %5452 = vmatpush1.bf16.msra.mxu0 %v5411_v60  ;;  %v5546_v60 = vld [vmem:[#allocation23] sm:$0xf] }
0x2065   : > { %5453 = vmatprep.subr.bf16.mxu0 %v13403_v48 }
0x2068   : > { %5454 = vmatpush1.bf16.msra.mxu0 %v5412_v56 }
0x2069   : > { %5455 = vmatprep.subr.bf16.mxu0 %v13403_v48 }
0x206c   : > { %5456 = vmatpush1.bf16.msra.mxu0 %v5413_v57  ;;  %v5422_v11 = vpop.permute.xlu1 %5421 }
0x206d   : > { %5457 = vmatprep.subr.bf16.mxu0 %v13403_v48 }
0x206e   : > { %v5427_v55 = vpop.permute.xlu0 %5426 }
0x2070   : > { %5458 = vmatpush1.bf16.msra.mxu0 %v5414_v61  ;;  %v10498_v61 = vld [vmem:[%s13415_s9 + $0x10] sm:$0xff]  }
0x2071   : > { %9257 = vmatprep.subr.bf16.mxu0 %v13405_v16 }
0x2073   : > { %5474 = vmatmul.mubr.bf16.vlgmr.msra.gmra.mrb[36].mxu0 %v10495_v53 }
0x2074   : > { %9259 = vmatprep.mubr.msk.bf16.mxu0 %vm11136_vm14, %v13405_v16 }
0x2146   : > { %v5475_v38 = vpop.f32.mrb[36].mxu0 }
0x2147   : > { %v5476_v1 = vadd.f32 %v5475_v38, %v5422_v11  ;;  %v5477_v3 = vpop.f32.mrb[37].mxu0  ;;  %v5962_v11 = vld [vmem:[#allocation23 + $0xc] sm:$0xf] }
0x2148   : > { %v5478_v6 = vpop.f32.mrb[38].mxu0 }
0x2149   : > { %v5484_v47 = vmin.f32 %v5476_v1, 0.0  ;;  %v5479_v18 = vadd.f32 %v5478_v6, %v5427_v55  ;;  %v5480_v46 = vpop.f32.mrb[39].mxu0  ;;  %vm5482_vm7 = vcmp.gt.f32.partialorder %v5476_v1, 0.0 }
0x214a   : > { %v6059_v46 = vpop.permute.xlu0 %6058 }
0x214b   : > { %v5486_v49 = vmul.f32 1.442695, %v5484_v47  ;;  %v5485_v51 = vmin.f32 %v5479_v18, 0.0  ;;  %vm5483_vm10 = vcmp.gt.f32.partialorder %v5479_v18, 0.0 }
0x214d   : > { %10552 = vpow2.f32 %v5486_v49  ;;  %v5488_v8 = vmul.f32 1.442695, %v5485_v51  ;;  %v6054_v51 = vpop.permute.xlu1 %6053 }
0x214f   : > { %10554 = vpow2.f32 %v5488_v8 }
0x2157   : > { %v10553_v20 = vpop.eup %10552 }
0x2158   : > { %v8746_v39 = vadd.f32 -1.0, %v10553_v20 }
0x2159   : > { %v10555_v14 = vpop.eup %10554 }
0x215a   : > { %v8747_v63 = vadd.f32 -1.0, %v10555_v14  ;;  %v5492_v50 = vsel %vm5482_vm7, %v5476_v1, %v8746_v39 }
0x215c   : > { %v5493_v7 = vsel %vm5483_vm10, %v5479_v18, %v8747_v63  ;;  %vm13437_vm10 = vcmask 138240  }
0x215d   : > { %v5494_v62 = vpack.c.bf16 %v5493_v7, %v5492_v50 }
0x215f   : > { %9225 = vmatpush3.bf16.msra.mxu1 %v5494_v62  ;;  %9258 = vmatpush3.bf16.msra.mxu0 %v5494_v62 }
0x2160   : > { %9230 = vmatprep.subr.bf16.mxu1 %v13405_v16 }
0x2162   : > { %9227 = vmatmul.mubr.msk.bf16.vlgmr.msra.gmra.mrb[48].mxu1 %vm2042_vm2, %v10496_v54  ;;  %9260 = vmatmul.mubr.msk.bf16.vlgmr.msra.gmra.mrb[40].mxu0 %vm2042_vm2, %v10499_v25 }
0x2163   : > { %9231 = vmatpush3.bf16.msra.mxu1 %v5494_v62  ;;  %9232 = vmatprep.mubr.msk.bf16.mxu1 %vm11136_vm14, %v13405_v16 }
0x2164   : > { %9236 = vmatprep.subr.msk.mxu1 %vm2200_vm8, %v5600_v45 }
0x216a   : > { %9233 = vmatmul.mubr.msk.bf16.vlgmr.msra.gmra.mrb[52].mxu1 %vm2042_vm2, %v10497_v42 }
0x216b   : > { %9237 = vmatpush3.msk.msra.mxu1 %vm2200_vm8, %v5600_v45 }
0x216c   : > { %9241 = vmatprep.subr.msk.mxu1 %vm2200_vm8, %v5546_v60 }
0x2235   : > { %v5539_v19 = vpop.f32.mrb[48].mxu1  ;;  %v5954_v53 = vpop.f32.mrb[40].mxu0 }
0x2236   : > { %v9228_v43 = vpop.f32.mrb[49].mxu1  ;;  %v9261_v38 = vpop.f32.mrb[41].mxu0 }
0x2237   : > { %v5542_v56 = vpop.f32.mrb[50].mxu1  ;;  %v5957_v1 = vpop.f32.mrb[42].mxu0 }
0x2238   : > { %v9229_v2 = vpop.f32.mrb[51].mxu1  ;;  %v9262_v3 = vpop.f32.mrb[43].mxu0 }
0x223d   : > { %v5592_v30 = vpop.f32.mrb[52].mxu1 }
0x223e   : > { %v9234_v5 = vpop.f32.mrb[53].mxu1  ;;  %9238 = vmatprep.mubr.msk.f32.mxu1 %vm3795_vm9, %v5592_v30 }
0x223f   : > { %v5595_v57 = vpop.f32.mrb[54].mxu1 }
0x2240   : > { %v9235_v52 = vpop.f32.mrb[55].mxu1  ;;  %9239 = vmatmul.mubr.msk.f32.vlgmr.msra.gmra.mrb[56].mxu1 %vm3795_vm9, %v5595_v57 }
0x2241   : > { %9243 = vmatprep.mubr.msk.f32.mxu1 %vm3795_vm9, %v5539_v19  ;;  %9242 = vmatpush3.msk.msra.mxu1 %vm2200_vm8, %v5546_v60 }
0x2242   : > { %9246 = vmatprep.subr.bf16.mxu1 %v13405_v16 }
0x2248   : > { %9244 = vmatmul.mubr.msk.f32.vlgmr.msra.gmra.mrb[56].mxu1 %vm3795_vm9, %v5542_v56 }
0x2249   : > { %9247 = vmatpush3.bf16.msra.mxu1 %v5494_v62  ;;  %9248 = vmatprep.mubr.msk.bf16.mxu1 %vm11136_vm14, %v13405_v16 }
0x224a   : > { %9252 = vmatprep.subr.msk.mxu1 %vm2200_vm8, %v5822_v13 }
0x224c   : > { %9249 = vmatmul.mubr.msk.bf16.vlgmr.msra.gmra.mrb[60].mxu1 %vm2042_vm2, %v10498_v61 }
0x224d   : > { %9253 = vmatpush3.msk.msra.mxu1 %vm2200_vm8, %v5822_v13 }
0x224e   : > { %9263 = vmatprep.subr.msk.mxu1 %vm2200_vm8, %v5962_v11 }
0x231f   : > { %v5814_v55 = vpop.f32.mrb[60].mxu1 }
0x2320   : > { %v9250_v6 = vpop.f32.mrb[61].mxu1  ;;  %9254 = vmatprep.mubr.msk.f32.mxu1 %vm3795_vm9, %v5814_v55 }
0x2321   : > { %v5817_v47 = vpop.f32.mrb[62].mxu1 }
0x2322   : > { %v9251_v18 = vpop.f32.mrb[63].mxu1  ;;  %9255 = vmatmul.mubr.msk.f32.vlgmr.msra.gmra.mrb[56].mxu1 %vm3795_vm9, %v5817_v47 }
0x2323   : > { %9264 = vmatpush3.msk.msra.mxu1 %vm2200_vm8, %v5962_v11  ;;  %9265 = vmatprep.mubr.msk.f32.mxu1 %vm3795_vm9, %v5954_v53 }
0x2324   : > { %9268 = vmatprep.subr.bf16.mxu1 %v13405_v16 }
0x232a   : > { %9266 = vmatmul.mubr.msk.f32.vlgmr.msra.gmra.mrb[56].mxu1 %vm3795_vm9, %v5957_v1 }
0x232b   : > { %9272 = vmatprep.mubr.msk.bf16.mxu1 %vm11136_vm14, %v13405_v16 }
0x23fd   : > { %v9267_v49 = vpop.f32.mrb[56].mxu1 }
0x23fe   : > { %v6062_v8 = vadd.f32 %v9267_v49, %v6059_v46  ;;  %v6038_v20 = vpop.f32.mrb[57].mxu1 }
0x23ff   : > { %v6061_v39 = vadd.f32 %v6054_v51, %v6038_v20 }
0x2400   : > { %6069 = vrot.lane.b32.xlu0 %v6062_v8, %s13382_s22 }
0x2401   : > { %6067 = vrot.lane.b32.xlu1 %v6061_v39, %s13382_s22 }
0x2404   : > { %6073 = vrot.lane.b32.xlu0 %v12212_v26, %s13382_s22 }
0x2405   : > { %6071 = vrot.lane.b32.xlu1 %v12208_v15, %s13382_s22 }
0x2472   : > { %v6070_v14 = vpop.permute.xlu0 %6069 }
0x2473   : > { %v6080_v63 = vsel %vm2991_vm6, 0.0, %v6070_v14  ;;  %v6068_v50 = vpop.permute.xlu1 %6067 }
0x2474   : > { %v6084_v7 = vsel %vm2993_vm12, %v6080_v63, 0.0  ;;  %v6079_v62 = vsel %vm2991_vm6, 0.0, %v6068_v50 }
0x2475   : > { %v6083_v54 = vsel %vm2993_vm12, %v6079_v62, 0.0  ;;  %v6100_v25 = vmul.f32 %v6084_v7, %v12142_v33  ;;  %v6104_v52 = vmul.f32 %v6084_v7, %v12145_v36  ;;  %v6088_v11 = vmul.f32 %v6084_v7, %v12125_v4 }
0x2476   : > { %v6074_v42 = vpop.permute.xlu0 %6073  ;;  %v10224_v45 = vpack.i.bf16 %v6084_v7, %v6083_v54  ;;  %v6099_v60 = vmul.f32 %v6083_v54, %v12142_v33  ;;  %v6103_v61 = vmul.f32 %v6083_v54, %v12145_v36  ;;  %v6087_v53 = vmul.f32 %v6083_v54, %v12125_v4 }
0x2477   : > { %v6082_v26 = vsel %vm2991_vm6, 0.0, %v6074_v42  ;;  %v6072_v19 = vpop.permute.xlu1 %6071  ;;  %v6091_v3 = vmul.f32 %v6083_v54, %v12132_v9  ;;  %v6092_v55 = vmul.f32 %v6084_v7, %v12132_v9  ;;  %v6095_v63 = vmul.f32 %v6083_v54, %v12138_v24  ;;  %v10502_v42 = vld [vmem:[%s13416_s0 + $0x4] ss:$12 sps:$4 sm:$0xff]  }
0x2478   : > { %v6086_v15 = vsel %vm2993_vm12, %v6082_v26, 0.0  ;;  %v6081_v43 = vsel %vm2991_vm6, 0.0, %v6072_v19  ;;  %10225 = vrot.lane.b32.xlu1 %v10224_v45, %s13386_s3  ;;  %v10239_v2 = vpack.i.bf16 %v6100_v25, %v6099_v60  ;;  %v6231_v6 = vpack.c.bf16 %v6088_v11, %v6087_v53  ;;  %6315 = vmatprep.mubr.bf16.mxu0 %v10502_v42 }
0x2479   : > { %v6085_v56 = vsel %vm2993_vm12, %v6081_v43, 0.0  ;;  %v6102_v57 = vmul.f32 %v6086_v15, %v12142_v33  ;;  %v12703_v1 = vmul.f32 %v6086_v15, %v12125_v4  ;;  %v10254_v18 = vpack.i.bf16 %v6104_v52, %v6103_v61 }
0x247a   : > { %v10229_v30 = vpack.i.bf16 %v6086_v15, %v6085_v56  ;;  %v6101_v5 = vmul.f32 %v6085_v56, %v12142_v33  ;;  %v12700_v38 = vmul.f32 %v6085_v56, %v12125_v4  ;;  %v6105_v46 = vmul.f32 %v6085_v56, %v12145_v36 }
0x247b   : > { %v6106_v49 = vmul.f32 %v6086_v15, %v12145_v36  ;;  %v10264_v51 = vpack.i.bf16 %v6092_v55, %v6091_v3  ;;  %v6093_v20 = vmul.f32 %v6085_v56, %v12132_v9  ;;  %v6094_v39 = vmul.f32 %v6086_v15, %v12132_v9 }
0x247c   : > { %10240 = vrot.lane.b32.xlu1 %v10239_v2, %s13388_s13  ;;  %10230 = vrot.lane.b32.xlu0 %v10229_v30, %s13386_s3  ;;  %v10244_v13 = vpack.i.bf16 %v6102_v57, %v6101_v5  ;;  %v6232_v47 = vpack.c.bf16 %v12703_v1, %v12700_v38  ;;  %v6096_v50 = vmul.f32 %v6084_v7, %v12138_v24  ;;  %v6254_v57 = vld [vmem:[%s13417_s4 + $0x8] sm:$0xff] }
0x247d   : > { %v10259_v8 = vpack.i.bf16 %v6106_v49, %v6105_v46  ;;  %v10269_v14 = vpack.i.bf16 %v6094_v39, %v6093_v20  ;;  %v6107_v62 = vmul.f32 %v6083_v54, %v12151_v35  ;;  %v6108_v25 = vmul.f32 %v6084_v7, %v12151_v35  ;;  %v6253_v7 = vld [vmem:[%s13417_s4] sm:$0xff]  ;;  %s13448_s4 = smov 94  }
0x247e   : > { %v10284_v60 = vpack.i.bf16 %v6096_v50, %v6095_v63  ;;  %v6097_v26 = vmul.f32 %v6085_v56, %v12138_v24  ;;  %v6098_v19 = vmul.f32 %v6086_v15, %v12138_v24  ;;  %v6109_v2 = vmul.f32 %v6085_v56, %v12151_v35 }
0x247f   : > { %v6110_v54 = vmul.f32 %v6086_v15, %v12151_v35 }
0x2480   : > { %10235 = vrot.lane.b32.xlu0 %v10224_v45, %s13383_s10  ;;  %10245 = vrot.lane.b32.xlu1 %v10244_v13, %s13388_s13  ;;  %v10289_v43 = vpack.i.bf16 %v6098_v19, %v6097_v26 }
0x2481   : > { %v10299_v5 = vpack.i.bf16 %v6110_v54, %v6109_v2 }
0x2484   : > { %10250 = vrot.lane.b32.xlu0 %v10229_v30, %s13383_s10  ;;  %10255 = vrot.lane.b32.xlu1 %v10254_v18, %s13389_s5 }
0x2488   : > { %10265 = vrot.lane.b32.xlu0 %v10264_v51, %s13393_s8  ;;  %10260 = vrot.lane.b32.xlu1 %v10259_v8, %s13389_s5 }
0x248c   : > { %10275 = vrot.lane.b32.xlu1 %v10224_v45, %s13375_s26  ;;  %10270 = vrot.lane.b32.xlu0 %v10269_v14, %s13393_s8  ;;  %v10294_v45 = vpack.i.bf16 %v6108_v25, %v6107_v62 }
0x2490   : > { %10280 = vrot.lane.b32.xlu1 %v10229_v30, %s13375_s26  ;;  %10285 = vrot.lane.b32.xlu0 %v10284_v60, %s13385_s1 }
0x2494   : > { %10295 = vrot.lane.b32.xlu1 %v10294_v45, %s13381_s15  ;;  %10290 = vrot.lane.b32.xlu0 %v10289_v43, %s13385_s1 }
0x2498   : > { %6257 = vperm.xlu1 %9863, %v6253_v7   ;;  %10300 = vrot.lane.b32.xlu0 %v10299_v5, %s13381_s15 }
0x249c   : > { %6262 = vperm.xlu0 %9807, %v6254_v57  }
0x24ea   : > { %v10226_v30 = vpop.permute.xlu1 %10225 }
0x24eb   : > { %v10228_v52 = vunpack.i.h.bf16 %v10226_v30  ;;  %v10227_v13 = vunpack.i.l.bf16 %v10226_v30 }
0x24ed   : > { %v6239_v61 = vpack.c.bf16 %v10228_v52, %v10227_v13 }
0x24ee   : > { %v10231_v53 = vpop.permute.xlu0 %10230  ;;  %v10241_v11 = vpop.permute.xlu1 %10240 }
0x24ef   : > { %v10233_v56 = vunpack.i.h.bf16 %v10231_v53  ;;  %v10232_v38 = vunpack.i.l.bf16 %v10231_v53  ;;  %v10243_v15 = vunpack.i.h.bf16 %v10241_v11  ;;  %v10242_v1 = vunpack.i.l.bf16 %v10241_v11  ;;  %9036 = vmatprep.subr.bf16.mxu0 %v6239_v61 }
0x24f0   : > { %9037 = vmatpush3.bf16.msra.mxu0 %v6231_v6 }
0x24f1   : > { %v6240_v3 = vpack.c.bf16 %v10233_v56, %v10232_v38  ;;  %v6241_v55 = vpack.c.bf16 %v10243_v15, %v10242_v1 }
0x24f2   : > { %v10236_v18 = vpop.permute.xlu0 %10235  ;;  %v10246_v46 = vpop.permute.xlu1 %10245 }
0x24f3   : > { %v10238_v49 = vunpack.i.h.bf16 %v10236_v18  ;;  %v10237_v51 = vunpack.i.l.bf16 %v10236_v18  ;;  %v10248_v8 = vunpack.i.h.bf16 %v10246_v46  ;;  %v10247_v20 = vunpack.i.l.bf16 %v10246_v46  ;;  %9038 = vmatprep.subr.bf16.mxu0 %v6240_v3 }
0x24f4   : > { %9039 = vmatpush3.bf16.msra.mxu0 %v6232_v47 }
0x24f5   : > { %v6233_v39 = vpack.c.bf16 %v10238_v49, %v10237_v51  ;;  %9040 = vmatprep.subr.bf16.mxu0 %v6241_v55  ;;  %v6242_v14 = vpack.c.bf16 %v10248_v8, %v10247_v20 }
0x24f6   : > { %v10251_v63 = vpop.permute.xlu0 %10250  ;;  %v10256_v50 = vpop.permute.xlu1 %10255 }
0x24f7   : > { %v10253_v62 = vunpack.i.h.bf16 %v10251_v63  ;;  %v10252_v42 = vunpack.i.l.bf16 %v10251_v63  ;;  %v10258_v60 = vunpack.i.h.bf16 %v10256_v50  ;;  %v10257_v25 = vunpack.i.l.bf16 %v10256_v50 }
0x24f8   : > { %9041 = vmatpush3.bf16.msra.mxu0 %v6233_v39 }
0x24f9   : > { %v6234_v6 = vpack.c.bf16 %v10253_v62, %v10252_v42  ;;  %9042 = vmatprep.subr.bf16.mxu0 %v6242_v14  ;;  %v6243_v26 = vpack.c.bf16 %v10258_v60, %v10257_v25 }
0x24fa   : > { %v10266_v19 = vpop.permute.xlu0 %10265  ;;  %v10261_v45 = vpop.permute.xlu1 %10260 }
0x24fb   : > { %v10268_v43 = vunpack.i.h.bf16 %v10266_v19  ;;  %v10267_v2 = vunpack.i.l.bf16 %v10266_v19  ;;  %v10263_v54 = vunpack.i.h.bf16 %v10261_v45  ;;  %v10262_v7 = vunpack.i.l.bf16 %v10261_v45  ;;  %v10503_v19 = vld [vmem:[%s13416_s0 + $0x8] ss:$12 sps:$4 sm:$0xff]  }
0x24fc   : > { %9043 = vmatpush3.bf16.msra.mxu0 %v6234_v6  ;;  %v10500_v6 = vld [vmem:[%s13416_s0] ss:$12 sps:$4 sm:$0xff]   ;;  %s13420_s0 = sld [smem:[#allocation71_spill]] }
0x24fd   : > { %v6235_v47 = vpack.c.bf16 %v10268_v43, %v10267_v2  ;;  %9044 = vmatprep.subr.bf16.mxu0 %v6243_v26  ;;  %v6244_v5 = vpack.c.bf16 %v10263_v54, %v10262_v7 }
0x24fe   : > { %v10271_v57 = vpop.permute.xlu0 %10270  ;;  %v10276_v30 = vpop.permute.xlu1 %10275 }
0x24ff   : > { %v10273_v52 = vunpack.i.h.bf16 %v10271_v57  ;;  %v10272_v13 = vunpack.i.l.bf16 %v10271_v57  ;;  %v10278_v61 = vunpack.i.h.bf16 %v10276_v30  ;;  %v10277_v53 = vunpack.i.l.bf16 %v10276_v30 }
0x2500   : > { %9045 = vmatpush3.bf16.msra.mxu0 %v6235_v47 }
0x2501   : > { %v6236_v11 = vpack.c.bf16 %v10273_v52, %v10272_v13  ;;  %9046 = vmatprep.subr.bf16.mxu0 %v6244_v5  ;;  %v6245_v56 = vpack.c.bf16 %v10278_v61, %v10277_v53 }
0x2502   : > { %v10286_v38 = vpop.permute.xlu0 %10285  ;;  %v10281_v15 = vpop.permute.xlu1 %10280 }
0x2503   : > { %v10288_v1 = vunpack.i.h.bf16 %v10286_v38  ;;  %v10287_v3 = vunpack.i.l.bf16 %v10286_v38  ;;  %v10283_v55 = vunpack.i.h.bf16 %v10281_v15  ;;  %v10282_v18 = vunpack.i.l.bf16 %v10281_v15 }
0x2504   : > { %9047 = vmatpush3.bf16.msra.mxu0 %v6236_v11 }
0x2505   : > { %v6237_v46 = vpack.c.bf16 %v10288_v1, %v10287_v3  ;;  %9048 = vmatprep.subr.bf16.mxu0 %v6245_v56  ;;  %v6246_v49 = vpack.c.bf16 %v10283_v55, %v10282_v18 }
0x2506   : > { %v10291_v51 = vpop.permute.xlu0 %10290  ;;  %v10296_v8 = vpop.permute.xlu1 %10295 }
0x2507   : > { %v10293_v20 = vunpack.i.h.bf16 %v10291_v51  ;;  %v10292_v39 = vunpack.i.l.bf16 %v10291_v51  ;;  %v10298_v14 = vunpack.i.h.bf16 %v10296_v8  ;;  %v10297_v63 = vunpack.i.l.bf16 %v10296_v8 }
0x2508   : > { %9049 = vmatpush3.bf16.msra.mxu0 %v6237_v46 }
0x2509   : > { %v6238_v50 = vpack.c.bf16 %v10293_v20, %v10292_v39  ;;  %v6247_v62 = vpack.c.bf16 %v10298_v14, %v10297_v63  ;;  %9050 = vmatprep.subr.bf16.mxu0 %v6246_v49 }
0x250a   : > { %v10301_v42 = vpop.permute.xlu0 %10300 }
0x250b   : > { %v10303_v60 = vunpack.i.h.bf16 %v10301_v42  ;;  %v10302_v25 = vunpack.i.l.bf16 %v10301_v42  ;;  %9269 = vmatpush3.bf16.msra.mxu1 %v6247_v62 }
0x250c   : > { %9051 = vmatpush3.bf16.msra.mxu0 %v6238_v50  ;;  %9270 = vmatprep.subr.bf16.mxu1 %v13405_v16 }
0x250d   : > { %v6248_v26 = vpack.c.bf16 %v10303_v60, %v10302_v25  ;;  %9276 = vmatprep.subr.bf16.mxu0 %v13405_v16 }
0x250f   : > { %6316 = vmatmul.mubr.bf16.vlgmr.msra.gmra.mrb[44].mxu0 %v10500_v6  ;;  %9271 = vmatpush3.bf16.msra.mxu1 %v6248_v26 }
0x2510   : > { %6486 = vmatprep.subr.bf16.mxu1 %v13403_v48  ;;  %9278 = vmatprep.mubr.msk.bf16.mxu0 %vm11136_vm14, %v13405_v16 }
0x2512   : > { %9273 = vmatmul.mubr.msk.bf16.vlgmr.msra.gmra.mrb[64].mxu1 %vm13418_vm0, %v10503_v19  ;;  %vm13438_vm0 = vmmov %vm13437_vm10 }
0x2517   : > { %v6258_v2 = vpop.permute.xlu1 %6257 }
0x251b   : > { %v6263_v13 = vpop.permute.xlu0 %6262 }
0x25e2   : > { %v9052_v45 = vpop.f32.mrb[44].mxu0 }
0x25e3   : > { %v9053_v43 = vpop.f32.mrb[45].mxu0 }
0x25e4   : > { %v9054_v54 = vadd.f32 %v9053_v43, %v9052_v45  ;;  %v9055_v7 = vpop.f32.mrb[46].mxu0 }
0x25e5   : > { %v9056_v47 = vpop.f32.mrb[47].mxu0  ;;  %v6358_v5 = vpop.f32.mrb[64].mxu1 }
0x25e6   : > { %v9057_v57 = vadd.f32 %v9056_v47, %v9055_v7  ;;  %v6318_v30 = vadd.f32 %v9054_v54, %v6258_v2  ;;  %v9274_v52 = vpop.f32.mrb[65].mxu1 }
0x25e7   : > { %v6361_v61 = vpop.f32.mrb[66].mxu1 }
0x25e8   : > { %v6359_v53 = vadd.f32 %v6358_v5, %v6318_v30  ;;  %v6321_v11 = vadd.f32 %v9057_v57, %v6263_v13  ;;  %v9275_v56 = vpop.f32.mrb[67].mxu1 }
0x25ea   : > { %v6367_v38 = vmin.f32 %v6359_v53, 0.0  ;;  %v6362_v15 = vadd.f32 %v6361_v61, %v6321_v11  ;;  %vm6365_vm13 = vcmp.gt.f32.partialorder %v6359_v53, 0.0  ;;  %v7021_v61 = vld [vmem:[%s13420_s0] sm:$0xff]  ;;  %s13425_s0 = smov 111  }
0x25ec   : > { %v6369_v1 = vmul.f32 1.442695, %v6367_v38  ;;  %v6368_v3 = vmin.f32 %v6362_v15, 0.0  ;;  %vm6366_vm1 = vcmp.gt.f32.partialorder %v6362_v15, 0.0 }
0x25ee   : > { %10556 = vpow2.f32 %v6369_v1  ;;  %v6371_v55 = vmul.f32 1.442695, %v6368_v3 }
0x25f0   : > { %10558 = vpow2.f32 %v6371_v55 }
0x25f8   : > { %v10557_v18 = vpop.eup %10556 }
0x25f9   : > { %v8778_v46 = vadd.f32 -1.0, %v10557_v18 }
0x25fa   : > { %v10559_v49 = vpop.eup %10558 }
0x25fb   : > { %v6375_v51 = vsel %vm6365_vm13, %v6359_v53, %v8778_v46  ;;  %v8779_v8 = vadd.f32 -1.0, %v10559_v49  ;;  %v6470_v53 = vld [vmem:[#allocation10] sm:$0xff]  ;;  %vm13439_vm13 = vmmov %vm13438_vm0 }
0x25fc   : > { %6379 = vrot.lane.b32.xlu1 %v6375_v51, %s13382_s22 }
0x25fd   : > { %v6376_v20 = vsel %vm6366_vm1, %v6362_v15, %v8779_v8  ;;  %vm13451_vm1 = vcmask 1039360  }
0x25fe   : > { %6381 = vrot.lane.b32.xlu0 %v6376_v20, %s13382_s22  ;;  %s13419_s22 = sld [smem:[#allocation60_spill]] }
0x266e   : > { %v6380_v39 = vpop.permute.xlu1 %6379 }
0x266f   : > { %v6385_v14 = vsel %vm2991_vm6, 0.0, %v6380_v39 }
0x2670   : > { %v6387_v63 = vsel %vm2993_vm12, %v6385_v14, 0.0  ;;  %v6382_v50 = vpop.permute.xlu0 %6381 }
0x2671   : > { %v6386_v62 = vsel %vm2991_vm6, 0.0, %v6382_v50  ;;  %v6391_v60 = vmul.f32 %v6387_v63, %v12132_v9  ;;  %v6389_v25 = vmul.f32 %v6387_v63, %v12125_v4  ;;  %v6393_v54 = vmul.f32 %v6387_v63, %v12138_v24 }
0x2672   : > { %v6388_v42 = vsel %vm2993_vm12, %v6386_v62, 0.0  ;;  %v6399_v52 = vmul.f32 %v6387_v63, %v12151_v35  ;;  %vm6534_vm6 = vcmask 64512  }
0x2673   : > { %v10304_v6 = vpack.i.bf16 %v6388_v42, %v6387_v63  ;;  %v6392_v26 = vmul.f32 %v6388_v42, %v12132_v9  ;;  %v6390_v19 = vmul.f32 %v6388_v42, %v12125_v4  ;;  %v6394_v45 = vmul.f32 %v6388_v42, %v12138_v24 }
0x2674   : > { %v6396_v47 = vmul.f32 %v6388_v42, %v12142_v33  ;;  %v6395_v4 = vmul.f32 %v6387_v63, %v12142_v33  ;;  %v6398_v9 = vmul.f32 %v6388_v42, %v12145_v36  ;;  %v6397_v24 = vmul.f32 %v6387_v63, %v12145_v36  ;;  %v6471_v33 = vld [vmem:[%s13419_s22] sm:$0xff]  ;;  %s13426_s22 = smov 110  }
0x2675   : > { %10305 = vrot.lane.b32.xlu1 %v10304_v6, %s13383_s10  ;;  %v10309_v43 = vpack.i.bf16 %v6392_v26, %v6391_v60  ;;  %v6461_v2 = vpack.c.bf16 %v6390_v19, %v6389_v25  ;;  %v10314_v7 = vpack.i.bf16 %v6394_v45, %v6393_v54  ;;  %v6400_v30 = vmul.f32 %v6388_v42, %v12151_v35 }
0x2676   : > { %v10324_v5 = vpack.i.bf16 %v6396_v47, %v6395_v4  ;;  %v10329_v57 = vpack.i.bf16 %v6398_v9, %v6397_v24  ;;  %v8781_v36 = vcombine.high %v6470_v53, %v6470_v53  ;;  %v8780_v4 = vcombine.low %v6470_v53, %v6470_v53 }
0x2677   : > { %10310 = vrot.lane.b32.xlu0 %v10309_v43, %s13393_s8  ;;  %6487 = vmatpush1.bf16.msra.mxu1 %v6461_v2  ;;  %v10339_v13 = vpack.i.bf16 %v6400_v30, %v6399_v52 }
0x2678   : > { %6488 = vmatprep.subr.bf16.mxu1 %v13403_v48  ;;  %8782 = vmatprep.mubr.msk.bf16.mxu1 %vm2042_vm2, %v8781_v36 }
0x2679   : > { %10315 = vrot.lane.b32.xlu1 %v10314_v7, %s13385_s1  ;;  %s13422_s1 = sld [smem:[#allocation70_spill]] }
0x267b   : > { %10320 = vrot.lane.b32.xlu0 %v10304_v6, %s13386_s3  ;;  %s13421_s3 = smov 9  }
0x267d   : > { %10325 = vrot.lane.b32.xlu1 %v10324_v5, %s13388_s13  ;;  %s13424_s13 = sld [smem:[#allocation62_spill]] }
0x267f   : > { %10330 = vrot.lane.b32.xlu0 %v10329_v57, %s13389_s5 }
0x2681   : > { %10335 = vrot.lane.b32.xlu1 %v10304_v6, %s13375_s26 }
0x2683   : > { %10340 = vrot.lane.b32.xlu0 %v10339_v13, %s13381_s15 }
0x2685   : > { %6474 = vperm.xlu1 %9863, %v6471_v33  }
0x2687   : > { %7024 = vperm.xlu0 %9807, %v7021_v61  }
0x268b   : > { %7032 = vrot.lane.b32.xlu0 %v12111_v23, %s13421_s3 }
0x26e7   : > { %v10306_v11 = vpop.permute.xlu1 %10305 }
0x26e8   : > { %v10308_v56 = vunpack.i.h.bf16 %v10306_v11  ;;  %v10307_v38 = vunpack.i.l.bf16 %v10306_v11 }
0x26e9   : > { %v10311_v35 = vpop.permute.xlu0 %10310 }
0x26ea   : > { %v6462_v15 = vpack.c.bf16 %v10308_v56, %v10307_v38  ;;  %v10313_v1 = vunpack.i.h.bf16 %v10311_v35  ;;  %v10312_v3 = vunpack.i.l.bf16 %v10311_v35  ;;  %v6533_v38 = vld [vmem:[%s13422_s1] sm:$0xf]  ;;  %v8791_v35 = vld [vmem:[%s13422_s1 + $0x8] sm:$0xf] }
0x26eb   : > { %v10316_v55 = vpop.permute.xlu1 %10315 }
0x26ec   : > { %6489 = vmatpush1.bf16.msra.mxu1 %v6462_v15  ;;  %v6463_v18 = vpack.c.bf16 %v10313_v1, %v10312_v3  ;;  %v10318_v46 = vunpack.i.h.bf16 %v10316_v55  ;;  %v10317_v49 = vunpack.i.l.bf16 %v10316_v55  ;;  %v13423_v15 = vmov 0.0|0.0   ;;  %v8785_v1 = vld [vmem:[%s13422_s1 + $0x4] sm:$0xf]  ;;  %v8787_v3 = vld [vmem:[%s11440_s21 + $0x10] sm:$0xff]  ;;  %v8788_v55 = vld [vmem:[%s11440_s21 + $0x18] sm:$0xff] }
0x26ed   : > { %6490 = vmatprep.subr.bf16.mxu1 %v13403_v48  ;;  %v10321_v51 = vpop.permute.xlu0 %10320 }
0x26ee   : > { %v6464_v23 = vpack.c.bf16 %v10318_v46, %v10317_v49  ;;  %v10323_v8 = vunpack.i.h.bf16 %v10321_v51  ;;  %v10322_v20 = vunpack.i.l.bf16 %v10321_v51 }
0x26ef   : > { %v10326_v39 = vpop.permute.xlu1 %10325 }
0x26f0   : > { %6491 = vmatpush1.bf16.msra.mxu1 %v6463_v18  ;;  %v6465_v14 = vpack.c.bf16 %v10323_v8, %v10322_v20  ;;  %v10328_v63 = vunpack.i.h.bf16 %v10326_v39  ;;  %v10327_v50 = vunpack.i.l.bf16 %v10326_v39  ;;  %v9415_v18 = vpack.c.bf16 %v8788_v55, %v8787_v3 }
0x26f1   : > { %6492 = vmatprep.subr.bf16.mxu1 %v13403_v48  ;;  %v10331_v62 = vpop.permute.xlu0 %10330 }
0x26f2   : > { %v6466_v42 = vpack.c.bf16 %v10328_v63, %v10327_v50  ;;  %v10333_v60 = vunpack.i.h.bf16 %v10331_v62  ;;  %v10332_v25 = vunpack.i.l.bf16 %v10331_v62  ;;  %v6582_v63 = vld [vmem:[%s11440_s21 + $0x8] sm:$0xff] }
0x26f3   : > { %v10336_v6 = vpop.permute.xlu1 %10335 }
0x26f4   : > { %6493 = vmatpush1.bf16.msra.mxu1 %v6464_v23  ;;  %v6467_v26 = vpack.c.bf16 %v10333_v60, %v10332_v25  ;;  %v10338_v19 = vunpack.i.h.bf16 %v10336_v6  ;;  %v10337_v45 = vunpack.i.l.bf16 %v10336_v6  ;;  %v8794_v60 = vld [vmem:[%s11440_s21 + $0x28] sm:$0xff] }
0x26f5   : > { %6494 = vmatprep.subr.bf16.mxu1 %v13403_v48  ;;  %v10341_v43 = vpop.permute.xlu0 %10340 }
0x26f6   : > { %v6468_v2 = vpack.c.bf16 %v10338_v19, %v10337_v45  ;;  %v10343_v54 = vunpack.i.h.bf16 %v10341_v43  ;;  %v10342_v7 = vunpack.i.l.bf16 %v10341_v43  ;;  %v8796_v43 = vld [vmem:[%s13422_s1 + $0xc] sm:$0xf]  ;;  %s13428_s1 = sld [smem:[#allocation73_spill]] }
0x26f8   : > { %6495 = vmatpush1.bf16.msra.mxu1 %v6465_v14  ;;  %v6469_v47 = vpack.c.bf16 %v10343_v54, %v10342_v7  ;;  %v6581_v14 = vld [vmem:[%s11440_s21] sm:$0xff]  ;;  %v8799_v54 = vld [vmem:[%s11440_s21 + $0x38] sm:$0xff] }
0x26f9   : > { %6496 = vmatprep.subr.bf16.mxu1 %v13403_v48  ;;  %v9418_v62 = vpack.c.bf16 %v6582_v63, %v6581_v14 }
0x26fc   : > { %6497 = vmatpush1.bf16.msra.mxu1 %v6466_v42  ;;  %v8793_v42 = vld [vmem:[%s11440_s21 + $0x20] sm:$0xff] }
0x26fd   : > { %6498 = vmatprep.subr.bf16.mxu1 %v13403_v48  ;;  %v9421_v19 = vpack.c.bf16 %v8794_v60, %v8793_v42 }
0x2700   : > { %6499 = vmatpush1.bf16.msra.mxu1 %v6467_v26 }
0x2701   : > { %6500 = vmatprep.subr.bf16.mxu1 %v13403_v48 }
0x2704   : > { %6501 = vmatpush1.bf16.msra.mxu1 %v6468_v2  ;;  %v6475_v9 = vpop.permute.xlu1 %6474  ;;  %v8798_v2 = vld [vmem:[%s11440_s21 + $0x30] sm:$0xff] }
0x2705   : > { %6502 = vmatprep.subr.bf16.mxu1 %v13403_v48  ;;  %v9424_v7 = vpack.c.bf16 %v8799_v54, %v8798_v2  ;;  %v7122_v54 = vld [vmem:[%s13424_s13] sm:$0xff]  ;;  %s13427_s13 = sld [smem:[#allocation63_spill]] }
0x2708   : > { %6503 = vmatpush1.bf16.msra.mxu1 %v6469_v47 }
0x2709   : > { %9302 = vmatprep.subr.bf16.mxu1 %v13405_v16 }
0x270b   : > { %6519 = vmatmul.mubr.bf16.vlgmr.msra.gmra.mrb[68].mxu1 %v8780_v4 }
0x270c   : > { %9304 = vmatprep.mubr.msk.bf16.mxu1 %vm11136_vm14, %v13405_v16 }
0x27de   : > { %v6520_v5 = vpop.f32.mrb[68].mxu1 }
0x27df   : > { %v6521_v24 = vadd.f32 %v6520_v5, %v6475_v9  ;;  %v6522_v57 = vpop.f32.mrb[69].mxu1 }
0x27e0   : > { %v6523_v30 = vpop.f32.mrb[70].mxu1 }
0x27e1   : > { %v6527_v52 = vmin.f32 %v6521_v24, 0.0  ;;  %v6524_v13 = vpop.f32.mrb[71].mxu1  ;;  %vm6526_vm12 = vcmp.gt.f32.partialorder %v6521_v24, 0.0 }
0x27e3   : > { %v6528_v33 = vmul.f32 1.442695, %v6527_v52 }
0x27e5   : > { %10560 = vpow2.f32 %v6528_v33 }
0x27ef   : > { %v10561_v61 = vpop.eup %10560 }
0x27f0   : > { %v8783_v53 = vadd.f32 -1.0, %v10561_v61 }
0x27f2   : > { %v6531_v36 = vsel %vm6526_vm12, %v6521_v24, %v8783_v53  ;;  %vm13452_vm12 = vmmov %vm13451_vm1 }
0x27f3   : > { %v6532_v11 = vpack.c.bf16 %v6531_v36, %v6531_v36 }
0x27f5   : > { %v6539_v56 = vsel %vm2200_vm8, %v6532_v11, 0 }
0x27f6   : > { %9277 = vmatpush3.bf16.msra.mxu0 %v6539_v56  ;;  %9303 = vmatpush3.bf16.msra.mxu1 %v6539_v56 }
0x27f7   : > { %9282 = vmatprep.subr.bf16.mxu0 %v13405_v16  ;;  %9423 = vmatprep.subr.bf16.mxu1 %v13423_v15 }
0x27f9   : > { %9279 = vmatmul.mubr.msk.bf16.vlgmr.msra.gmra.mrb[48].mxu0 %vm6534_vm6, %v6533_v38  ;;  %9305 = vmatmul.mubr.msk.bf16.vlgmr.msra.gmra.mrb[72].mxu1 %vm6534_vm6, %v8791_v35  ;;  %v7025_v38 = vpop.permute.xlu0 %7024 }
0x27fa   : > { %9283 = vmatpush3.bf16.msra.mxu0 %v6539_v56  ;;  %9284 = vmatprep.mubr.msk.bf16.mxu0 %vm11136_vm14, %v13405_v16 }
0x27fb   : > { %9414 = vmatprep.subr.bf16.mxu0 %v13423_v15  ;;  %9325 = vmatprep.mubr.msk.f32.mxu1 %vm11136_vm14, %v13405_v16 }
0x27fc   : > { %9425 = vmatpush3.bf16.msra.mxu1 %v9424_v7  ;;  %v7121_v7 = vld [vmem:[#allocation11] sm:$0xff] }
0x27fd   : > { %9328 = vmatprep.subr.bf16.mxu1 %v13405_v16 }
0x2801   : > { %9285 = vmatmul.mubr.msk.bf16.vlgmr.msra.gmra.mrb[52].mxu0 %vm6534_vm6, %v8785_v1 }
0x2802   : > { %9292 = vmatprep.mubr.msk.f32.mxu0 %vm11136_vm14, %v13405_v16  ;;  %9416 = vmatpush3.bf16.msra.mxu0 %v9415_v18 }
0x2803   : > { %9417 = vmatprep.subr.bf16.mxu0 %v13423_v15 }
0x28cc   : > { %v6575_v46 = vpop.f32.mrb[48].mxu0  ;;  %v6816_v49 = vpop.f32.mrb[72].mxu1 }
0x28cd   : > { %v9280_v51 = vpop.f32.mrb[49].mxu0  ;;  %v9306_v23 = vpop.f32.mrb[73].mxu1 }
0x28ce   : > { %v6578_v8 = vpop.f32.mrb[50].mxu0  ;;  %v6819_v20 = vpop.f32.mrb[74].mxu1 }
0x28cf   : > { %v9281_v39 = vpop.f32.mrb[51].mxu0  ;;  %v9307_v50 = vpop.f32.mrb[75].mxu1 }
0x28d4   : > { %v6622_v25 = vpop.f32.mrb[52].mxu0 }
0x28d5   : > { %v9286_v6 = vpop.f32.mrb[53].mxu0  ;;  %9293 = vmatmul.mubr.msk.f32.vlgmr.msra.gmra.mrb[26].mxu0 %vm2042_vm2, %v6622_v25 }
0x28d6   : > { %9419 = vmatpush3.bf16.msra.mxu0 %v9418_v62  ;;  %v6625_v26 = vpop.f32.mrb[54].mxu0  ;;  %9299 = vmatprep.mubr.msk.f32.mxu0 %vm11136_vm14, %v13405_v16 }
0x28d7   : > { %v9287_v45 = vpop.f32.mrb[55].mxu0  ;;  %9420 = vmatprep.subr.bf16.mxu0 %v13423_v15  ;;  %v7033_v15 = vpop.permute.xlu0 %7032 }
0x28d8   : > { %v7037_v1 = vsel %vm2649_vm4, 0.0, %v7033_v15 }
0x28d9   : > { %9300 = vmatmul.mubr.msk.f32.vlgmr.msra.gmra.mrb[56].mxu0 %vm2042_vm2, %v6575_v46  ;;  %v7039_v3 = vsel %vm2651_vm5, %v7037_v1, 0.0 }
0x28da   : > { %9422 = vmatpush3.bf16.msra.mxu0 %v9421_v19  ;;  %9312 = vmatprep.mubr.msk.f32.mxu0 %vm11136_vm14, %v13405_v16  ;;  %v7041_v51 = vmul.f32 %v7039_v3, %v12008_v17  ;;  %v7045_v50 = vmul.f32 %v7039_v3, %v12028_v58  ;;  %v7047_v60 = vmul.f32 %v7039_v3, %v12034_v10 }
0x28db   : > { %9315 = vmatprep.subr.bf16.mxu0 %v13405_v16  ;;  %v7049_v26 = vmul.f32 %v7039_v3, %v12042_v22 }
0x28dd   : > { %9313 = vmatmul.mubr.msk.f32.vlgmr.msra.gmra.mrb[58].mxu0 %vm2042_vm2, %v6816_v49  ;;  %v7043_v49 = vmul.f32 %v7039_v3, %v12036_v12 }
0x28de   : > { %9316 = vmatpush3.bf16.msra.mxu0 %v6539_v56  ;;  %9317 = vmatprep.mubr.msk.bf16.mxu0 %vm11136_vm14, %v13405_v16 }
0x28df   : > { %7137 = vmatprep.subr.bf16.mxu0 %v13403_v48 }
0x28e1   : > { %9318 = vmatmul.mubr.msk.bf16.vlgmr.msra.gmra.mrb[60].mxu0 %vm6534_vm6, %v8796_v43  ;;  %v7051_v43 = vmul.f32 %v7039_v3, %v12046_v27  ;;  %vm13453_vm6 = vcmask 916480  }
0x29a8   : > { %v6700_v47 = vpop.f32.mrb[26].mxu0 }
0x29a9   : > { %v9294_v4 = vpop.f32.mrb[27].mxu0 }
0x29ac   : > { %v6773_v9 = vpop.f32.mrb[56].mxu0 }
0x29ad   : > { %v6774_v5 = vadd.f32 %v6773_v9, %v6700_v47  ;;  %v9301_v24 = vpop.f32.mrb[57].mxu0  ;;  %v8802_v47 = vcombine.high %v7121_v7, %v7121_v7 }
0x29af   : > { %8803 = vmatprep.mubr.msk.bf16.mxu0 %vm2042_vm2, %v8802_v47 }
0x29b0   : > { %v6894_v57 = vpop.f32.mrb[58].mxu0 }
0x29b1   : > { %v6898_v30 = vadd.f32 %v6894_v57, %v6774_v5  ;;  %v9314_v52 = vpop.f32.mrb[59].mxu0 }
0x29b4   : > { %v6938_v13 = vpop.f32.mrb[60].mxu0 }
0x29b5   : > { %v9319_v33 = vpop.f32.mrb[61].mxu0  ;;  %9326 = vmatmul.mubr.msk.f32.vlgmr.msra.gmra.mrb[58].mxu1 %vm2042_vm2, %v6938_v13 }
0x29b6   : > { %v6941_v61 = vpop.f32.mrb[62].mxu0  ;;  %9338 = vmatprep.mubr.msk.bf16.mxu1 %vm11136_vm14, %v13405_v16 }
0x29b7   : > { %v9320_v53 = vpop.f32.mrb[63].mxu0 }
0x2a88   : > { %v7016_v36 = vpop.f32.mrb[58].mxu1 }
0x2a89   : > { %v7020_v11 = vadd.f32 %v7016_v36, %v6898_v30  ;;  %v9327_v56 = vpop.f32.mrb[59].mxu1 }
0x2a8b   : > { %v7027_v35 = vadd.f32 %v7025_v38, %v7020_v11 }
0x2a8d   : > { %7030 = vrot.lane.b32.xlu1 %v7027_v35, %s13421_s3 }
0x2aff   : > { %v7031_v55 = vpop.permute.xlu1 %7030 }
0x2b00   : > { %v7036_v18 = vsel %vm2649_vm4, 0.0, %v7031_v55 }
0x2b01   : > { %v7038_v46 = vsel %vm2651_vm5, %v7036_v18, 0.0 }
0x2b02   : > { %v10344_v23 = vpack.i.bf16 %v7039_v3, %v7038_v46  ;;  %v7042_v8 = vmul.f32 %v7038_v46, %v12036_v12  ;;  %v7040_v20 = vmul.f32 %v7038_v46, %v12008_v17  ;;  %v7044_v39 = vmul.f32 %v7038_v46, %v12028_v58 }
0x2b03   : > { %v7046_v42 = vmul.f32 %v7038_v46, %v12034_v10  ;;  %v7048_v25 = vmul.f32 %v7038_v46, %v12042_v22  ;;  %v7050_v45 = vmul.f32 %v7038_v46, %v12046_v27 }
0x2b04   : > { %10345 = vrot.lane.b32.xlu1 %v10344_v23, %s13383_s10  ;;  %v10349_v14 = vpack.i.bf16 %v7043_v49, %v7042_v8  ;;  %v7112_v63 = vpack.c.bf16 %v7041_v51, %v7040_v20  ;;  %v10354_v62 = vpack.i.bf16 %v7045_v50, %v7044_v39 }
0x2b05   : > { %v10364_v6 = vpack.i.bf16 %v7047_v60, %v7046_v42  ;;  %v10369_v19 = vpack.i.bf16 %v7049_v26, %v7048_v25  ;;  %v10379_v2 = vpack.i.bf16 %v7051_v43, %v7050_v45  ;;  %v8801_v42 = vcombine.low %v7121_v7, %v7121_v7 }
0x2b06   : > { %10350 = vrot.lane.b32.xlu0 %v10349_v14, %s13393_s8  ;;  %7138 = vmatpush1.bf16.msra.mxu0 %v7112_v63 }
0x2b07   : > { %7139 = vmatprep.subr.bf16.mxu0 %v13403_v48 }
0x2b08   : > { %10355 = vrot.lane.b32.xlu1 %v10354_v62, %s13389_s5 }
0x2b0a   : > { %10360 = vrot.lane.b32.xlu0 %v10344_v23, %s13375_s26 }
0x2b0c   : > { %10365 = vrot.lane.b32.xlu1 %v10364_v6, %s13381_s15 }
0x2b0e   : > { %10370 = vrot.lane.b32.xlu0 %v10369_v19, %s13376_s18 }
0x2b10   : > { %10375 = vrot.lane.b32.xlu1 %v10344_v23, %s13425_s0 }
0x2b12   : > { %10380 = vrot.lane.b32.xlu0 %v10379_v2, %s13426_s22 }
0x2b14   : > { %7125 = vperm.xlu1 %9863, %v7122_v54  }
0x2b76   : > { %v10346_v4 = vpop.permute.xlu1 %10345 }
0x2b77   : > { %v10348_v9 = vunpack.i.h.bf16 %v10346_v4  ;;  %v10347_v5 = vunpack.i.l.bf16 %v10346_v4 }
0x2b78   : > { %v10351_v24 = vpop.permute.xlu0 %10350 }
0x2b79   : > { %v7113_v57 = vpack.c.bf16 %v10348_v9, %v10347_v5  ;;  %v10353_v30 = vunpack.i.h.bf16 %v10351_v24  ;;  %v10352_v52 = vunpack.i.l.bf16 %v10351_v24 }
0x2b7a   : > { %v10356_v13 = vpop.permute.xlu1 %10355 }
0x2b7b   : > { %7140 = vmatpush1.bf16.msra.mxu0 %v7113_v57  ;;  %v7114_v33 = vpack.c.bf16 %v10353_v30, %v10352_v52  ;;  %v10358_v61 = vunpack.i.h.bf16 %v10356_v13  ;;  %v10357_v53 = vunpack.i.l.bf16 %v10356_v13  ;;  %v7231_v13 = vld [vmem:[%s13427_s13] sm:$0xf]  ;;  %s13444_s13 = smov 96  }
0x2b7c   : > { %7141 = vmatprep.subr.bf16.mxu0 %v13403_v48  ;;  %v10361_v36 = vpop.permute.xlu0 %10360 }
0x2b7d   : > { %v7115_v11 = vpack.c.bf16 %v10358_v61, %v10357_v53  ;;  %v10363_v56 = vunpack.i.h.bf16 %v10361_v36  ;;  %v10362_v38 = vunpack.i.l.bf16 %v10361_v36 }
0x2b7e   : > { %v10366_v35 = vpop.permute.xlu1 %10365 }
0x2b7f   : > { %7142 = vmatpush1.bf16.msra.mxu0 %v7114_v33  ;;  %v7116_v15 = vpack.c.bf16 %v10363_v56, %v10362_v38  ;;  %v10368_v1 = vunpack.i.h.bf16 %v10366_v35  ;;  %v10367_v3 = vunpack.i.l.bf16 %v10366_v35 }
0x2b80   : > { %7143 = vmatprep.subr.bf16.mxu0 %v13403_v48  ;;  %v10371_v55 = vpop.permute.xlu0 %10370 }
0x2b81   : > { %v7117_v18 = vpack.c.bf16 %v10368_v1, %v10367_v3  ;;  %v10373_v46 = vunpack.i.h.bf16 %v10371_v55  ;;  %v10372_v49 = vunpack.i.l.bf16 %v10371_v55  ;;  %v7230_v55 = vld [vmem:[#allocation13] sm:$0x3] }
0x2b82   : > { %v10376_v51 = vpop.permute.xlu1 %10375 }
0x2b83   : > { %7144 = vmatpush1.bf16.msra.mxu0 %v7115_v11  ;;  %v7118_v23 = vpack.c.bf16 %v10373_v46, %v10372_v49  ;;  %v10378_v8 = vunpack.i.h.bf16 %v10376_v51  ;;  %v10377_v20 = vunpack.i.l.bf16 %v10376_v51 }
0x2b84   : > { %7145 = vmatprep.subr.bf16.mxu0 %v13403_v48  ;;  %v10381_v39 = vpop.permute.xlu0 %10380 }
0x2b85   : > { %v7119_v14 = vpack.c.bf16 %v10378_v8, %v10377_v20  ;;  %v10383_v63 = vunpack.i.h.bf16 %v10381_v39  ;;  %v10382_v50 = vunpack.i.l.bf16 %v10381_v39 }
0x2b87   : > { %7146 = vmatpush1.bf16.msra.mxu0 %v7116_v15  ;;  %v7120_v62 = vpack.c.bf16 %v10383_v63, %v10382_v50 }
0x2b88   : > { %7147 = vmatprep.subr.bf16.mxu0 %v13403_v48 }
0x2b8b   : > { %7148 = vmatpush1.bf16.msra.mxu0 %v7117_v18 }
0x2b8c   : > { %7149 = vmatprep.subr.bf16.mxu0 %v13403_v48 }
0x2b8f   : > { %7150 = vmatpush1.bf16.msra.mxu0 %v7118_v23 }
0x2b90   : > { %7151 = vmatprep.subr.bf16.mxu0 %v13403_v48 }
0x2b93   : > { %7152 = vmatpush1.bf16.msra.mxu0 %v7119_v14  ;;  %v7126_v60 = vpop.permute.xlu1 %7125 }
0x2b94   : > { %7153 = vmatprep.subr.bf16.mxu0 %v13403_v48 }
0x2b97   : > { %7154 = vmatpush1.bf16.msra.mxu0 %v7120_v62 }
0x2b9a   : > { %7170 = vmatmul.mubr.bf16.vlgmr.msra.gmra.mrb[64].mxu0 %v8801_v42 }
0x2b9b   : > { %7482 = vmatprep.mubr.f32.mxu0 %v13405_v16 }
0x2c6d   : > { %v7171_v25 = vpop.f32.mrb[64].mxu0 }
0x2c6e   : > { %v7172_v6 = vadd.f32 %v7171_v25, %v7126_v60  ;;  %v7173_v26 = vpop.f32.mrb[65].mxu0 }
0x2c6f   : > { %v7174_v19 = vpop.f32.mrb[66].mxu0 }
0x2c70   : > { %v7178_v45 = vmin.f32 %v7172_v6, 0.0  ;;  %v7175_v43 = vpop.f32.mrb[67].mxu0  ;;  %vm7177_vm2 = vcmp.gt.f32.partialorder %v7172_v6, 0.0 }
0x2c72   : > { %v7179_v2 = vmul.f32 1.442695, %v7178_v45 }
0x2c74   : > { %10562 = vpow2.f32 %v7179_v2 }
0x2c7e   : > { %v10563_v54 = vpop.eup %10562 }
0x2c7f   : > { %v8804_v47 = vadd.f32 -1.0, %v10563_v54 }
0x2c81   : > { %v7182_v4 = vsel %vm7177_vm2, %v7172_v6, %v8804_v47  ;;  %vm13454_vm2 = vcmask 1031168  }
0x2c82   : > { %7184 = vrot.lane.b32.xlu0 %v7182_v4, %s13421_s3  ;;  %s13440_s3 = smov 95  }
0x2cf4   : > { %v7185_v7 = vpop.permute.xlu0 %7184 }
0x2cf5   : > { %v7187_v9 = vsel %vm2649_vm4, 0.0, %v7185_v7 }
0x2cf6   : > { %v7188_v5 = vsel %vm2651_vm5, %v7187_v9, 0.0  ;;  %vm13431_vm5 = vcmask 1041408  }
0x2cf7   : > { %7196 = vrot.lane.b32.xlu1 %v7188_v5, %s13383_s10  ;;  %v7190_v24 = vmul.f32 %v7188_v5, %v12036_v12  ;;  %v7191_v57 = vmul.f32 %v7188_v5, %v12028_v58  ;;  %v7192_v30 = vmul.f32 %v7188_v5, %v12034_v10  ;;  %v7193_v52 = vmul.f32 %v7188_v5, %v12042_v22  ;;  %v7839_v58 = vld [vmem:[%s13428_s1] sm:$0xf]  ;;  %s13441_s1 = sld [smem:[#allocation64_spill]] }
0x2cf8   : > { %v7194_v12 = vmul.f32 %v7188_v5, %v12046_v27  ;;  %v7189_v33 = vmul.f32 %v7188_v5, %v12008_v17 }
0x2cf9   : > { %7200 = vrot.lane.b32.xlu0 %v7190_v24, %s13393_s8 }
0x2cfb   : > { %7204 = vrot.lane.b32.xlu1 %v7191_v57, %s13389_s5  ;;  %s13429_s5 = sld [smem:[#allocation81_spill]] }
0x2cfd   : > { %7207 = vrot.lane.b32.xlu0 %v7188_v5, %s13375_s26  ;;  %s13430_s26 = sld [smem:[#allocation72_spill]] }
0x2cff   : > { %7211 = vrot.lane.b32.xlu1 %v7192_v30, %s13381_s15  ;;  %s13436_s15 = smov 17  }
0x2d01   : > { %7215 = vrot.lane.b32.xlu0 %v7193_v52, %s13376_s18  ;;  %v8811_v18 = vld [vmem:[%s13429_s5 + $0x88] sm:$0xff]  ;;  %v8813_v46 = vld [vmem:[%s13429_s5 + $0x98] sm:$0xff]  ;;  %v8810_v49 = vld [vmem:[%s13429_s5 + $0x80] sm:$0xff] }
0x2d02   : > { %v9426_v51 = vpack.c.bf16 %v8813_v46, %v8811_v18  ;;  %v8812_v23 = vld [vmem:[%s13429_s5 + $0x90] sm:$0xff]  ;;  %v8815_v8 = vld [vmem:[%s13429_s5 + $0xa8] sm:$0xff]  ;;  %v8817_v20 = vld [vmem:[%s13429_s5 + $0xb8] sm:$0xff] }
0x2d03   : > { %7218 = vrot.lane.b32.xlu1 %v7188_v5, %s13425_s0  ;;  %v9428_v39 = vpack.c.bf16 %v8812_v23, %v8810_v49  ;;  %v9430_v14 = vpack.c.bf16 %v8817_v20, %v8815_v8  ;;  %v8814_v63 = vld [vmem:[%s13429_s5 + $0xa0] sm:$0xff]  ;;  %v8816_v50 = vld [vmem:[%s13429_s5 + $0xb0] sm:$0xff]  ;;  %v8819_v30 = vld [vmem:[%s13429_s5 + $0xc8] sm:$0xff] }
0x2d04   : > { %9427 = vmatprep.subr.bf16.mxu0 %v9426_v51  ;;  %v9432_v62 = vpack.c.bf16 %v8816_v50, %v8814_v63  ;;  %v7290_v9 = vld [vmem:[%s13430_s26] sm:$0x3]  ;;  %v8808_v5 = vld [vmem:[%s13430_s26 + $0x2] sm:$0x3]  ;;  %v8828_v24 = vld [vmem:[%s13430_s26 + $0x4] sm:$0x3] }
0x2d05   : > { %7222 = vrot.lane.b32.xlu0 %v7194_v12, %s13426_s22  ;;  %9429 = vmatpush1.bf16.msra.mxu0 %v9428_v39  ;;  %v8847_v57 = vld [vmem:[%s13430_s26 + $0x6] sm:$0x3]  ;;  %v8821_v52 = vld [vmem:[%s13429_s5 + $0xd8] sm:$0xff]  ;;  %v7342_v18 = vld [vmem:[%s13429_s5 + $0x28] sm:$0xff] }
0x2d06   : > { %9431 = vmatprep.subr.bf16.mxu0 %v9430_v14  ;;  %v9434_v12 = vpack.c.bf16 %v8821_v52, %v8819_v30  ;;  %v7344_v46 = vld [vmem:[%s13429_s5 + $0x38] sm:$0xff]  ;;  %v7341_v23 = vld [vmem:[%s13429_s5 + $0x20] sm:$0xff]  ;;  %v7343_v8 = vld [vmem:[%s13429_s5 + $0x30] sm:$0xff] }
0x2d07   : > { %7234 = vperm.xlu1 %9863, %v7231_v13   ;;  %v8818_v13 = vld [vmem:[%s13429_s5 + $0xc0] sm:$0xff]  ;;  %v9446_v51 = vpack.c.bf16 %v7344_v46, %v7342_v18  ;;  %v7346_v39 = vld [vmem:[%s13429_s5 + $0x48] sm:$0xff]  ;;  %v7348_v14 = vld [vmem:[%s13429_s5 + $0x58] sm:$0xff] }
0x2d08   : > { %v8830_v30 = vld [vmem:[%s13429_s5 + $0x100] sm:$0xff]  ;;  %v8832_v52 = vld [vmem:[%s13429_s5 + $0x110] sm:$0xff] }
0x2d09   : > { %7842 = vperm.xlu0 %9807, %v7839_v58   ;;  %9433 = vmatpush1.bf16.msra.mxu0 %v9432_v62  ;;  %v8820_v58 = vld [vmem:[%s13429_s5 + $0xd0] sm:$0xff]  ;;  %v9448_v62 = vpack.c.bf16 %v7343_v8, %v7341_v23  ;;  %v8850_v23 = vld [vmem:[%s13429_s5 + $0x188] sm:$0xff]  ;;  %v8852_v8 = vld [vmem:[%s13429_s5 + $0x198] sm:$0xff] }
0x2d0a   : > { %9435 = vmatprep.subr.bf16.mxu0 %v9434_v12 }
0x2d69   : > { %v7197_v61 = vpop.permute.xlu1 %7196 }
0x2d6a   : > { %v7225_v10 = vpack.c.bf16 %v7197_v61, %v7189_v33  ;;  %v9436_v33 = vpack.c.bf16 %v8820_v58, %v8818_v13  ;;  %v8823_v61 = vld [vmem:[%s13429_s5 + $0xe8] sm:$0xff]  ;;  %v8837_v58 = vld [vmem:[%s13429_s5 + $0x138] sm:$0xff] }
0x2d6b   : > { %v7201_v53 = vpop.permute.xlu0 %7200  ;;  %v8835_v13 = vld [vmem:[%s13429_s5 + $0x128] sm:$0xff] }
0x2d6c   : > { %9329 = vmatpush3.bf16.msra.mxu1 %v7225_v10  ;;  %v8825_v10 = vld [vmem:[%s13429_s5 + $0xf8] sm:$0xff]  ;;  %9437 = vmatpush1.bf16.msra.mxu0 %v9436_v33  ;;  %v9460_v33 = vpack.c.bf16 %v8832_v52, %v8830_v30 }
0x2d6d   : > { %v7205_v36 = vpop.permute.xlu1 %7204  ;;  %9330 = vmatprep.subr.bf16.mxu1 %v13405_v16 }
0x2d6e   : > { %v7226_v22 = vpack.c.bf16 %v7205_v36, %v7201_v53  ;;  %v8822_v53 = vld [vmem:[%s13429_s5 + $0xe0] sm:$0xff]  ;;  %v9438_v36 = vpack.c.bf16 %v8825_v10, %v8823_v61  ;;  %v9462_v61 = vpack.c.bf16 %v8837_v58, %v8835_v13  ;;  %v7847_v13 = vrot.slane %v11989_v59, 4 }
0x2d6f   : > { %v7208_v11 = vpop.permute.xlu0 %7207  ;;  %v8834_v10 = vld [vmem:[%s13429_s5 + $0x120] sm:$0xff] }
0x2d70   : > { %9331 = vmatpush3.bf16.msra.mxu1 %v7226_v22  ;;  %v8824_v22 = vld [vmem:[%s13429_s5 + $0xf0] sm:$0xff]  ;;  %9439 = vmatprep.subr.bf16.mxu0 %v9438_v36  ;;  %v8839_v36 = vld [vmem:[%s13429_s5 + $0x148] sm:$0xff] }
0x2d71   : > { %v7212_v56 = vpop.permute.xlu1 %7211  ;;  %9332 = vmatprep.subr.bf16.mxu1 %v13405_v16 }
0x2d72   : > { %v7227_v27 = vpack.c.bf16 %v7212_v56, %v7208_v11  ;;  %v9440_v11 = vpack.c.bf16 %v8824_v22, %v8822_v53  ;;  %v7338_v56 = vld [vmem:[%s13429_s5 + $0x8] sm:$0xff]  ;;  %v8836_v53 = vld [vmem:[%s13429_s5 + $0x130] sm:$0xff]  ;;  %v8841_v22 = vld [vmem:[%s13429_s5 + $0x158] sm:$0xff] }
0x2d73   : > { %v7216_v38 = vpop.permute.xlu0 %7215 }
0x2d74   : > { %9333 = vmatpush3.bf16.msra.mxu1 %v7227_v27  ;;  %9441 = vmatpush1.bf16.msra.mxu0 %v9440_v11  ;;  %v7340_v27 = vld [vmem:[%s13429_s5 + $0x18] sm:$0xff] }
0x2d75   : > { %v7219_v17 = vpop.permute.xlu1 %7218  ;;  %9334 = vmatprep.subr.bf16.mxu1 %v13405_v16 }
0x2d76   : > { %v7228_v35 = vpack.c.bf16 %v7219_v17, %v7216_v38  ;;  %v9442_v38 = vpack.c.bf16 %v7340_v27, %v7338_v56  ;;  %v9464_v27 = vpack.c.bf16 %v8836_v53, %v8834_v10 }
0x2d77   : > { %v7223_v15 = vpop.permute.xlu0 %7222 }
0x2d78   : > { %v7229_v1 = vpack.c.bf16 %v7223_v15, %v7223_v15  ;;  %9335 = vmatpush3.bf16.msra.mxu1 %v7228_v35  ;;  %9443 = vmatprep.subr.bf16.mxu0 %v9442_v38 }
0x2d79   : > { %9336 = vmatprep.subr.bf16.mxu1 %v13405_v16 }
0x2d7a   : > { %v7241_v3 = vsel %vm2200_vm8, %v7229_v1, 0 }
0x2d7c   : > { %9337 = vmatpush3.bf16.msra.mxu1 %v7241_v3  ;;  %v7337_v3 = vld [vmem:[%s13429_s5] sm:$0xff] }
0x2d7d   : > { %9342 = vmatprep.subr.bf16.mxu1 %v13405_v16 }
0x2d7f   : > { %9339 = vmatmul.mubr.msk.bf16.vlgmr.msra.gmra.mrb[76].mxu1 %vm2838_vm11, %v7230_v55  ;;  %v7339_v55 = vld [vmem:[%s13429_s5 + $0x10] sm:$0xff] }
0x2d80   : > { %9344 = vmatprep.mubr.msk.bf16.mxu1 %vm11136_vm14, %v13405_v16  ;;  %v9444_v49 = vpack.c.bf16 %v7339_v55, %v7337_v3  ;;  %v8843_v55 = vld [vmem:[%s13429_s5 + $0x168] sm:$0xff] }
0x2d86   : > { %v7235_v42 = vpop.permute.xlu1 %7234 }
0x2e52   : > { %v7277_v60 = vpop.f32.mrb[76].mxu1 }
0x2e53   : > { %v7278_v25 = vadd.f32 %v7277_v60, %v7235_v42  ;;  %v9340_v6 = vpop.f32.mrb[77].mxu1  ;;  %v9450_v60 = vpack.c.bf16 %v7348_v14, %v7346_v39  ;;  %v9474_v39 = vpack.c.bf16 %v8852_v8, %v8850_v23  ;;  %v8849_v14 = vld [vmem:[%s13429_s5 + $0x180] sm:$0xff] }
0x2e54   : > { %v7280_v26 = vpop.f32.mrb[78].mxu1  ;;  %v7347_v6 = vld [vmem:[%s13429_s5 + $0x50] sm:$0xff]  ;;  %v13442_v23 = vld [vmem:[#allocation87_spill] sm:$0xff] }
0x2e55   : > { %v7284_v19 = vmin.f32 %v7278_v25, 0.0  ;;  %v9341_v45 = vpop.f32.mrb[79].mxu1  ;;  %vm7283_vm4 = vcmp.gt.f32.partialorder %v7278_v25, 0.0  ;;  %v7350_v26 = vld [vmem:[%s13429_s5 + $0x68] sm:$0xff] }
0x2e57   : > { %v7285_v43 = vmul.f32 1.442695, %v7284_v19  ;;  %v7352_v19 = vld [vmem:[%s13429_s5 + $0x78] sm:$0xff] }
0x2e59   : > { %10564 = vpow2.f32 %v7285_v43  ;;  %v9454_v43 = vpack.c.bf16 %v7352_v19, %v7350_v26  ;;  %v8858_v26 = vld [vmem:[%s13429_s5 + $0x1c8] sm:$0xff]  ;;  %v8860_v19 = vld [vmem:[%s13429_s5 + $0x1d8] sm:$0xff] }
0x2e63   : > { %v10565_v2 = vpop.eup %10564 }
0x2e64   : > { %v8806_v54 = vadd.f32 -1.0, %v10565_v2  ;;  %v7349_v2 = vld [vmem:[%s13429_s5 + $0x60] sm:$0xff] }
0x2e66   : > { %v7288_v47 = vsel %vm7283_vm4, %v7278_v25, %v8806_v54  ;;  %v7345_v25 = vld [vmem:[%s13429_s5 + $0x40] sm:$0xff]  ;;  %v7351_v54 = vld [vmem:[%s13429_s5 + $0x70] sm:$0xff]  ;;  %vm13455_vm4 = vmmov %vm13454_vm2 }
0x2e67   : > { %v7289_v4 = vpack.c.bf16 %v7288_v47, %v7288_v47  ;;  %v9452_v45 = vpack.c.bf16 %v7347_v6, %v7345_v25  ;;  %v8831_v47 = vld [vmem:[%s13429_s5 + $0x108] sm:$0xff]  ;;  %v8853_v25 = vld [vmem:[%s13429_s5 + $0x1a0] sm:$0xff]  ;;  %v8855_v6 = vld [vmem:[%s13429_s5 + $0x1b0] sm:$0xff] }
0x2e69   : > { %v7295_v7 = vsel %vm13431_vm5, %v7289_v4, 0  ;;  %v8833_v4 = vld [vmem:[%s13429_s5 + $0x118] sm:$0xff]  ;;  %vm13456_vm5 = vmmov %vm13453_vm6 }
0x2e6a   : > { %9343 = vmatpush3.bf16.msra.mxu1 %v7295_v7 }
0x2e6b   : > { %9348 = vmatprep.subr.bf16.mxu1 %v13405_v16 }
0x2e6d   : > { %9345 = vmatmul.mubr.msk.bf16.vlgmr.msra.gmra.mrb[80].mxu1 %vm3795_vm9, %v7290_v9 }
0x2e6e   : > { %9349 = vmatpush3.bf16.msra.mxu1 %v7295_v7  ;;  %9350 = vmatprep.mubr.msk.bf16.mxu1 %vm11136_vm14, %v13405_v16 }
0x2e6f   : > { %9354 = vmatprep.subr.bf16.mxu1 %v13405_v16 }
0x2e75   : > { %9351 = vmatmul.mubr.msk.bf16.vlgmr.msra.gmra.mrb[84].mxu1 %vm3795_vm9, %v8808_v5  ;;  %v9456_v5 = vpack.c.bf16 %v7351_v54, %v7349_v2  ;;  %v8857_v2 = vld [vmem:[%s13429_s5 + $0x1c0] sm:$0xff]  ;;  %v8859_v54 = vld [vmem:[%s13429_s5 + $0x1d0] sm:$0xff] }
0x2e76   : > { %9355 = vmatpush3.bf16.msra.mxu1 %v7295_v7  ;;  %9356 = vmatprep.mubr.msk.bf16.mxu1 %vm11136_vm14, %v13405_v16 }
0x2e77   : > { %9360 = vmatprep.subr.bf16.mxu1 %v13405_v16 }
0x2e7d   : > { %9357 = vmatmul.mubr.msk.bf16.vlgmr.msra.gmra.mrb[88].mxu1 %vm3795_vm9, %v8828_v24 }
0x2e7e   : > { %9361 = vmatpush3.bf16.msra.mxu1 %v7295_v7  ;;  %9362 = vmatprep.mubr.msk.bf16.mxu1 %vm11136_vm14, %v13405_v16  ;;  %vm13432_vm14 = vcmask 523264  }
0x2e7f   : > { %vm13433_vm15 = vmmov %vm13432_vm14 }
0x2e80   : > { %vm13434_vm3 = vmmov %vm13432_vm14 }
0x2e81   : > { %vm13435_vm7 = vmmov %vm13434_vm3 }
0x2e85   : > { %9363 = vmatmul.mubr.msk.bf16.vlgmr.msra.gmra.mrb[92].mxu1 %vm3795_vm9, %v8847_v57  ;;  %v9458_v57 = vpack.c.bf16 %v8833_v4, %v8831_v47  ;;  %v8862_v47 = vld [vmem:[%s13429_s5 + $0x1e8] sm:$0xff]  ;;  %v8864_v4 = vld [vmem:[%s13429_s5 + $0x1f8] sm:$0xff] }
0x2e86   : > { %8037 = vmatprep.mubr.bf16.mxu1 %v13403_v48 }
0x2f40   : > { %v7331_v17 = vpop.f32.mrb[80].mxu1 }
0x2f41   : > { %v9346_v35 = vpop.f32.mrb[81].mxu1 }
0x2f42   : > { %v7334_v15 = vpop.f32.mrb[82].mxu1  ;;  %v9466_v35 = vpack.c.bf16 %v8841_v22, %v8839_v36 }
0x2f43   : > { %v9347_v1 = vpop.f32.mrb[83].mxu1  ;;  %v8838_v15 = vld [vmem:[%s13429_s5 + $0x140] sm:$0xff] }
0x2f44   : > { %v8840_v1 = vld [vmem:[%s13429_s5 + $0x150] sm:$0xff] }
0x2f45   : > { %v9468_v18 = vpack.c.bf16 %v8840_v1, %v8838_v15 }
0x2f48   : > { %v7392_v20 = vpop.f32.mrb[84].mxu1 }
0x2f49   : > { %v9352_v63 = vpop.f32.mrb[85].mxu1  ;;  %8826 = vmatmul.mubr.msk.f32.vlgmr.msra.gmra.mrb[68].mxu0 %vm13432_vm14, %v7392_v20  ;;  %vm13457_vm14 = vcmask 908288  }
0x2f4a   : > { %9445 = vmatpush1.bf16.msra.mxu0 %v9444_v49  ;;  %v7395_v50 = vpop.f32.mrb[86].mxu1  ;;  %7556 = vmatprep.mubr.f32.mxu0 %v13405_v16  ;;  %v8842_v49 = vld [vmem:[%s13429_s5 + $0x160] sm:$0xff]  ;;  %v8851_v63 = vld [vmem:[%s13429_s5 + $0x190] sm:$0xff] }
0x2f4b   : > { %v9353_v42 = vpop.f32.mrb[87].mxu1  ;;  %9447 = vmatprep.subr.bf16.mxu0 %v9446_v51  ;;  %v8844_v51 = vld [vmem:[%s13429_s5 + $0x170] sm:$0xff]  ;;  %v8854_v50 = vld [vmem:[%s13429_s5 + $0x1a8] sm:$0xff] }
0x2f4c   : > { %v9472_v20 = vpack.c.bf16 %v8844_v51, %v8842_v49  ;;  %v9476_v42 = vpack.c.bf16 %v8851_v63, %v8849_v14  ;;  %v13445_v63 = vld [vmem:[#allocation89_spill] sm:$0xff] }
0x2f4e   : > { %9449 = vmatpush1.bf16.msra.mxu0 %v9448_v62  ;;  %v8856_v62 = vld [vmem:[%s13429_s5 + $0x1b8] sm:$0xff] }
0x2f4f   : > { %9451 = vmatprep.subr.bf16.mxu0 %v9450_v60  ;;  %v9478_v60 = vpack.c.bf16 %v8856_v62, %v8854_v50  ;;  %v13446_v62 = vld [vmem:[#allocation90_spill] sm:$0xff] }
0x2f50   : > { %v7602_v7 = vpop.f32.mrb[88].mxu1 }
0x2f51   : > { %v9358_v9 = vpop.f32.mrb[89].mxu1 }
0x2f52   : > { %9453 = vmatpush1.bf16.msra.mxu0 %v9452_v45  ;;  %v7605_v24 = vpop.f32.mrb[90].mxu1  ;;  %v9480_v45 = vpack.c.bf16 %v8855_v6, %v8853_v25  ;;  %v9484_v9 = vpack.c.bf16 %v8859_v54, %v8857_v2 }
0x2f53   : > { %9455 = vmatprep.subr.bf16.mxu0 %v9454_v43  ;;  %v9359_v12 = vpop.f32.mrb[91].mxu1  ;;  %v9482_v43 = vpack.c.bf16 %v8860_v19, %v8858_v26  ;;  %v8861_v24 = vld [vmem:[%s13429_s5 + $0x1e0] sm:$0xff] }
0x2f54   : > { %v7990_v26 = vld [vmem:[%s13441_s1] sm:$0xf] }
0x2f56   : > { %9457 = vmatpush1.bf16.msra.mxu0 %v9456_v5  ;;  %v9486_v5 = vpack.c.bf16 %v8864_v4, %v8862_v47  ;;  %v13449_v4 = vld [vmem:[#allocation84_spill] sm:$0xff] }
0x2f57   : > { %9459 = vmatprep.subr.bf16.mxu0 %v9458_v57  ;;  %v8863_v57 = vld [vmem:[%s13429_s5 + $0x1f0] sm:$0xff] }
0x2f58   : > { %v7740_v11 = vpop.f32.mrb[92].mxu1  ;;  %v9488_v30 = vpack.c.bf16 %v8863_v57, %v8861_v24 }
0x2f59   : > { %8827 = vmatmul.mubr.msk.f32.vlgmr.msra.gmra.mrb[68].mxu0 %vm13433_vm15, %v7331_v17  ;;  %v9364_v56 = vpop.f32.mrb[93].mxu1  ;;  %v8845_v17 = vld [vmem:[%s13429_s5 + $0x178] sm:$0xff]  ;;  %vm13458_vm15 = vcmask 900096  }
0x2f5a   : > { %9461 = vmatpush1.bf16.msra.mxu0 %v9460_v33  ;;  %7692 = vmatprep.mubr.f32.mxu0 %v13405_v16  ;;  %v7743_v38 = vpop.f32.mrb[94].mxu1  ;;  %v9470_v46 = vpack.c.bf16 %v8845_v17, %v8843_v55  ;;  %v7848_v33 = vrot.slane %v11991_v0, 4 }
0x2f5b   : > { %9463 = vmatprep.subr.bf16.mxu0 %v9462_v61  ;;  %v9365_v3 = vpop.f32.mrb[95].mxu1 }
0x2f5e   : > { %9465 = vmatpush1.bf16.msra.mxu0 %v9464_v27 }
0x2f5f   : > { %9467 = vmatprep.subr.bf16.mxu0 %v9466_v35 }
0x2f62   : > { %9469 = vmatpush1.bf16.msra.mxu0 %v9468_v18 }
0x2f63   : > { %9471 = vmatprep.subr.bf16.mxu0 %v9470_v46 }
0x2f66   : > { %9473 = vmatpush1.bf16.msra.mxu0 %v9472_v20  ;;  %v13443_v20 = vld [vmem:[#allocation86_spill] sm:$0xff] }
0x2f67   : > { %9475 = vmatprep.subr.bf16.mxu0 %v9474_v39 }
0x2f69   : > { %8846 = vmatmul.mubr.msk.f32.vlgmr.msra.gmra.mrb[68].mxu0 %vm13434_vm3, %v7602_v7  ;;  %v7843_v7 = vpop.permute.xlu0 %7842  ;;  %vm13459_vm3 = vmmov %vm13457_vm14 }
0x2f6a   : > { %9477 = vmatpush1.bf16.msra.mxu0 %v9476_v42  ;;  %7830 = vmatprep.mubr.f32.mxu0 %v13405_v16 }
0x2f6b   : > { %9479 = vmatprep.subr.bf16.mxu0 %v9478_v60  ;;  %v13447_v60 = vld [vmem:[#allocation88_spill] sm:$0xff] }
0x2f6e   : > { %9481 = vmatpush1.bf16.msra.mxu0 %v9480_v45 }
0x2f6f   : > { %9483 = vmatprep.subr.bf16.mxu0 %v9482_v43 }
0x2f72   : > { %9485 = vmatpush1.bf16.msra.mxu0 %v9484_v9 }
0x2f73   : > { %9487 = vmatprep.subr.bf16.mxu0 %v9486_v5  ;;  %v13450_v5 = vld [vmem:[#allocation85_spill] sm:$0xff] }
0x2f76   : > { %9489 = vmatpush1.bf16.msra.mxu0 %v9488_v30 }
0x2f79   : > { %8865 = vmatmul.mubr.msk.f32.vlgmr.msra.gmra.mrb[68].mxu0 %vm13435_vm7, %v7740_v11  ;;  %vm13460_vm7 = vmmov %vm13458_vm15 }
0x304c   : > { %v7832_v16 = vpop.f32.mrb[68].mxu0 }
0x304d   : > { %v7845_v52 = vadd.f32 %v7843_v7, %v7832_v16  ;;  %v7834_v12 = vpop.f32.mrb[69].mxu0 }
0x304e   : > { %v7846_v58 = vadd.f32 %v7843_v7, %v7834_v12 }
0x304f   : > { %v7851_v61 = vsel %vm2200_vm8, %v7845_v52, %v7847_v13 }
0x3050   : > { %7855 = vrot.lane.b32.xlu1 %v7851_v61, %s13436_s15  ;;  %v7852_v10 = vsel %vm2200_vm8, %v7846_v58, %v7848_v33 }
0x3051   : > { %7857 = vrot.lane.b32.xlu0 %v7852_v10, %s13436_s15 }
0x30c2   : > { %v7856_v53 = vpop.permute.xlu1 %7855 }
0x30c3   : > { %v7863_v36 = vsel %vm13437_vm10, 0.0, %v7856_v53  ;;  %v7858_v22 = vpop.permute.xlu0 %7857  ;;  %vm13461_vm10 = vcmask 777216  }
0x30c4   : > { %v7859_v11 = vsel %vm13438_vm0, %v7856_v53, %v7858_v22  ;;  %v7864_v56 = vsel %vm13439_vm13, %v7858_v22, 0.0  ;;  %7920 = vrot.lane.b32.xlu1 %v7863_v36, %s13425_s0  ;;  %7884 = vrot.lane.b32.xlu0 %v7863_v36, %s13383_s10  ;;  %v7870_v0 = vmul.f32 %v7863_v36, %v11743_v21  ;;  %v7873_v27 = vmul.f32 %v7863_v36, %v11774_v34 }
0x30c5   : > { %v10394_v59 = vpack.i.bf16 %v7864_v56, %v7859_v11  ;;  %v7867_v38 = vmul.f32 %v7863_v36, %v11761_v29  ;;  %v7871_v35 = vmul.f32 %v7859_v11, %v11788_v40  ;;  %v7872_v15 = vmul.f32 %v7864_v56, %v11758_v28 }
0x30c6   : > { %v7868_v1 = vmul.f32 %v7859_v11, %v11770_v32  ;;  %v7869_v3 = vmul.f32 %v7864_v56, %v11764_v31  ;;  %v7874_v18 = vmul.f32 %v7859_v11, %v11792_v41  ;;  %v7875_v46 = vmul.f32 %v7864_v56, %v11780_v37 }
0x30c7   : > { %v10404_v55 = vpack.i.bf16 %v7872_v15, %v7871_v35  ;;  %v7876_v51 = vmul.f32 %v7863_v36, %v11799_v44  ;;  %v7877_v8 = vmul.f32 %v7859_v11, %v13442_v23  ;;  %v7878_v39 = vmul.f32 %v7864_v56, %v13443_v20 }
0x30c8   : > { %10395 = vrot.lane.b32.xlu0 %v10394_v59, %s13440_s3  ;;  %10385 = vrot.lane.b32.xlu1 %v10394_v59, %s13383_s10  ;;  %v10399_v17 = vpack.i.bf16 %v7869_v3, %v7868_v1  ;;  %v10409_v49 = vpack.i.bf16 %v7875_v46, %v7874_v18  ;;  %v7879_v50 = vmul.f32 %v7863_v36, %v13445_v63  ;;  %vm13462_vm0 = vcmask 785408  }
0x30c9   : > { %v10414_v14 = vpack.i.bf16 %v7878_v39, %v7877_v8  ;;  %v7880_v42 = vmul.f32 %v7859_v11, %v13446_v62  ;;  %v7881_v25 = vmul.f32 %v7864_v56, %v13447_v60  ;;  %v7865_v9 = vmul.f32 %v7863_v36, %v13449_v4  ;;  %vm13463_vm13 = vmmov %vm13462_vm0 }
0x30ca   : > { %v7866_v24 = vmul.f32 %v7859_v11, %v13450_v5 }
0x30cb   : > { %v10419_v6 = vpack.i.bf16 %v7880_v42, %v7879_v50 }
0x30cc   : > { %7910 = vrot.lane.b32.xlu0 %v7870_v0, %s13376_s18  ;;  %10390 = vrot.lane.b32.xlu1 %v10394_v59, %s13425_s0 }
0x30d0   : > { %7933 = vrot.lane.b32.xlu0 %v7873_v27, %s13426_s22  ;;  %7897 = vrot.lane.b32.xlu1 %v7867_v38, %s13393_s8 }
0x30d4   : > { %10405 = vrot.lane.b32.xlu0 %v10404_v55, %s13376_s18  ;;  %10400 = vrot.lane.b32.xlu1 %v10399_v17, %s13393_s8 }
0x30d8   : > { %10410 = vrot.lane.b32.xlu0 %v10409_v49, %s13426_s22  ;;  %7946 = vrot.lane.b32.xlu1 %v7876_v51, %s13444_s13 }
0x30dc   : > { %7956 = vrot.lane.b32.xlu0 %v7863_v36, %s13440_s3  ;;  %10415 = vrot.lane.b32.xlu1 %v10414_v14, %s13444_s13 }
0x30e0   : > { %7973 = vrot.lane.b32.xlu0 %v7881_v25, %s13448_s4  ;;  %10420 = vrot.lane.b32.xlu1 %v10419_v6, %s13448_s4 }
0x30e4   : > { %7993 = vperm.xlu1 %9863, %v7990_v26  }
0x3136   : > { %v7921_v19 = vpop.permute.xlu1 %7920  ;;  %v7885_v45 = vpop.permute.xlu0 %7884 }
0x313a   : > { %v10396_v43 = vpop.permute.xlu0 %10395  ;;  %v10386_v2 = vpop.permute.xlu1 %10385 }
0x313b   : > { %v10388_v54 = vunpack.i.h.bf16 %v10386_v2  ;;  %v10387_v47 = vunpack.i.l.bf16 %v10386_v2  ;;  %v10398_v18 = vunpack.i.h.bf16 %v10396_v43  ;;  %v10397_v46 = vunpack.i.l.bf16 %v10396_v43 }
0x313d   : > { %v7890_v57 = vsel %vm13451_vm1, %v7885_v45, %v10387_v47  ;;  %v7891_v30 = vsel %vm13452_vm12, %v10387_v47, %v10388_v54  ;;  %vm13464_vm1 = vmmov %vm13461_vm10  ;;  %vm13465_vm12 = vcmask 769024  }
0x313e   : > { %v7979_v7 = vpack.c.bf16 %v7890_v57, %v7865_v9  ;;  %v7911_v16 = vpop.permute.xlu0 %7910  ;;  %v10391_v52 = vpop.permute.xlu1 %10390  ;;  %v7980_v12 = vpack.c.bf16 %v7891_v30, %v7866_v24  ;;  %v7963_v2 = vsel %vm13464_vm1, %v10397_v46, %v10398_v18 }
0x313f   : > { %v10393_v56 = vunpack.i.h.bf16 %v10391_v52  ;;  %v10392_v11 = vunpack.i.l.bf16 %v10391_v52 }
0x3140   : > { %8005 = vmatprep.subr.bf16.mxu1 %v7980_v12 }
0x3141   : > { %8006 = vmatpush1.bf16.msra.mxu1 %v7979_v7  ;;  %v7926_v49 = vsel %vm13457_vm14, %v7921_v19, %v10392_v11  ;;  %v7927_v8 = vsel %vm13459_vm3, %v10392_v11, %v10393_v56 }
0x3142   : > { %v7934_v13 = vpop.permute.xlu0 %7933  ;;  %v7898_v58 = vpop.permute.xlu1 %7897 }
0x3146   : > { %v10406_v33 = vpop.permute.xlu0 %10405  ;;  %v10401_v61 = vpop.permute.xlu1 %10400 }
0x3147   : > { %v10408_v10 = vunpack.i.h.bf16 %v10406_v33  ;;  %v10407_v53 = vunpack.i.l.bf16 %v10406_v33  ;;  %v10403_v22 = vunpack.i.h.bf16 %v10401_v61  ;;  %v10402_v36 = vunpack.i.l.bf16 %v10401_v61 }
0x3149   : > { %v7916_v59 = vsel %vm13453_vm6, %v7911_v16, %v10407_v53  ;;  %v7903_v0 = vsel %vm13454_vm2, %v7898_v58, %v10402_v36  ;;  %v7904_v27 = vsel %vm13455_vm4, %v10402_v36, %v10403_v22  ;;  %v7917_v38 = vsel %vm13456_vm5, %v10407_v53, %v10408_v10  ;;  %vm13466_vm6 = vmmov %vm13465_vm12  ;;  %v7989_v58 = vld [vmem:[#allocation14] sm:$0x3] }
0x314a   : > { %v7981_v35 = vpack.c.bf16 %v7916_v59, %v7903_v0  ;;  %v10411_v15 = vpop.permute.xlu0 %10410  ;;  %v7947_v1 = vpop.permute.xlu1 %7946  ;;  %v7982_v3 = vpack.c.bf16 %v7917_v38, %v7904_v27  ;;  %vm13467_vm4 = vcmask 138240  }
0x314b   : > { %v10413_v55 = vunpack.i.h.bf16 %v10411_v15  ;;  %v10412_v17 = vunpack.i.l.bf16 %v10411_v15  ;;  %vm13468_vm5 = vmmov %vm13467_vm4 }
0x314c   : > { %8007 = vmatprep.subr.bf16.mxu1 %v7982_v3  ;;  %vm13469_vm14 = vmmov %vm13467_vm4 }
0x314d   : > { %v7939_v51 = vsel %vm13458_vm15, %v7934_v13, %v10412_v17  ;;  %8008 = vmatpush1.bf16.msra.mxu1 %v7981_v35  ;;  %v7940_v39 = vsel %vm13460_vm7, %v10412_v17, %v10413_v55  ;;  %vm13471_vm15 = vcmask 1039360   ;;  %vm13473_vm7 = vcmask 1031168  }
0x314e   : > { %v7983_v14 = vpack.c.bf16 %v7939_v51, %v7926_v49  ;;  %v7957_v50 = vpop.permute.xlu0 %7956  ;;  %v10416_v42 = vpop.permute.xlu1 %10415  ;;  %v7984_v25 = vpack.c.bf16 %v7940_v39, %v7927_v8  ;;  %vm13472_vm3 = vmmov %vm13471_vm15 }
0x314f   : > { %v10418_v6 = vunpack.i.h.bf16 %v10416_v42  ;;  %v10417_v26 = vunpack.i.l.bf16 %v10416_v42  ;;  %v7962_v45 = vsel %vm13461_vm10, %v7957_v50, %v10397_v46  ;;  %vm13474_vm10 = vmmov %vm13473_vm7 }
0x3150   : > { %8009 = vmatprep.subr.bf16.mxu1 %v7984_v25 }
0x3151   : > { %v7952_v43 = vsel %vm13462_vm0, %v7947_v1, %v10417_v26  ;;  %8010 = vmatpush1.bf16.msra.mxu1 %v7983_v14  ;;  %v7953_v19 = vsel %vm13463_vm13, %v10417_v26, %v10418_v6  ;;  %vm13475_vm13 = vcmask 916480  }
0x3152   : > { %v7985_v54 = vpack.c.bf16 %v7962_v45, %v7952_v43  ;;  %v10421_v47 = vpop.permute.xlu1 %10420  ;;  %v7986_v9 = vpack.c.bf16 %v7963_v2, %v7953_v19  ;;  %v7974_v30 = vpop.permute.xlu0 %7973  ;;  %vm13476_vm1 = vmmov %vm13475_vm13 }
0x3153   : > { %v10423_v24 = vunpack.i.h.bf16 %v10421_v47  ;;  %v10422_v57 = vunpack.i.l.bf16 %v10421_v47 }
0x3154   : > { %8011 = vmatprep.subr.bf16.mxu1 %v7986_v9 }
0x3155   : > { %v7976_v7 = vsel %vm13465_vm12, %v10423_v24, %v7974_v30  ;;  %8012 = vmatpush1.bf16.msra.mxu1 %v7985_v54  ;;  %v7975_v16 = vsel %vm13466_vm6, %v10422_v57, %v10423_v24  ;;  %vm13477_vm12 = vcmask 908288   ;;  %vm13478_vm6 = vcmask 777216  }
0x3156   : > { %v7988_v52 = vpack.c.bf16 %v7976_v7, %v7976_v7  ;;  %v7987_v12 = vpack.c.bf16 %v7975_v16, %v7975_v16 }
0x3158   : > { %8866 = vmatprep.subr.msk.bf16.mxu1 %vm2200_vm8, %v7988_v52  ;;  %v8000_v13 = vsel %vm2200_vm8, %v7987_v12, 0  ;;  %v8279_v52 = vld [vmem:[#allocation2] sm:$0x1] }
0x3159   : > { %8014 = vmatpush1.bf16.msra.mxu1 %v8000_v13 }
0x315c   : > { %8867 = vmatmul.mubr.msk.bf16.vlgmr.msra.gmra.mrb[96].mxu1 %vm2838_vm11, %v7989_v58 }
0x315d   : > { %8255 = vmatprep.mubr.bf16.mxu1 %v13403_v48 }
0x3163   : > { %v7994_v33 = vpop.permute.xlu1 %7993 }
0x322f   : > { %v8039_v61 = vpop.f32.mrb[96].mxu1 }
0x3230   : > { %v8040_v10 = vadd.f32 %v8039_v61, %v7994_v33  ;;  %v8041_v53 = vpop.f32.mrb[97].mxu1 }
0x3231   : > { %v8042_v22 = vadd.f32 %v8041_v53, %v7994_v33  ;;  %v8043_v36 = vpop.f32.mrb[98].mxu1 }
0x3232   : > { %v8048_v56 = vmin.f32 %v8040_v10, 0.0  ;;  %v8044_v11 = vpop.f32.mrb[99].mxu1  ;;  %vm8046_vm2 = vcmp.gt.f32.partialorder %v8040_v10, 0.0 }
0x3233   : > { %v8049_v59 = vmin.f32 %v8042_v22, 0.0  ;;  %vm8047_vm11 = vcmp.gt.f32.partialorder %v8042_v22, 0.0 }
0x3234   : > { %v8050_v0 = vmul.f32 1.442695, %v8048_v56 }
0x3235   : > { %v8052_v27 = vmul.f32 1.442695, %v8049_v59 }
0x3236   : > { %10566 = vpow2.f32 %v8050_v0 }
0x3237   : > { %10568 = vpow2.f32 %v8052_v27 }
0x3240   : > { %v10567_v38 = vpop.eup %10566 }
0x3241   : > { %v10569_v35 = vpop.eup %10568  ;;  %v8868_v15 = vadd.f32 -1.0, %v10567_v38 }
0x3242   : > { %v8869_v1 = vadd.f32 -1.0, %v10569_v35 }
0x3243   : > { %v8056_v3 = vsel %vm8046_vm2, %v8040_v10, %v8868_v15  ;;  %vm13479_vm2 = vcmask 900096  }
0x3244   : > { %8060 = vrot.lane.b32.xlu0 %v8056_v3, %s13436_s15  ;;  %v8057_v55 = vsel %vm8047_vm11, %v8042_v22, %v8869_v1  ;;  %vm13480_vm11 = vmmov %vm13477_vm12 }
0x3245   : > { %8062 = vrot.lane.b32.xlu1 %v8057_v55, %s13436_s15 }
0x32b6   : > { %v8061_v17 = vpop.permute.xlu0 %8060 }
0x32b7   : > { %v13050_v18 = vsel %vm13467_vm4, 0.0, %v8061_v17  ;;  %v8063_v46 = vpop.permute.xlu1 %8062  ;;  %vm13481_vm4 = vmmov %vm13479_vm2 }
0x32b8   : > { %v13053_v49 = vsel %vm13468_vm5, %v8061_v17, %v8063_v46  ;;  %v8069_v51 = vsel %vm13469_vm14, %v8063_v46, 0.0  ;;  %v8089_v8 = vrot.slane %v13050_v18, 4  ;;  %v8072_v26 = vmul.f32 %v13050_v18, %v11761_v29  ;;  %vm13482_vm5 = vmmov %vm13478_vm6 }
0x32b9   : > { %v10424_v39 = vpack.i.bf16 %v8069_v51, %v13053_v49  ;;  %v8073_v14 = vmul.f32 %v13053_v49, %v11770_v32  ;;  %v8074_v50 = vmul.f32 %v8069_v51, %v11764_v31  ;;  %v8090_v25 = vrot.slane %v13053_v49, 4  ;;  %vm13483_vm14 = vmmov %vm13462_vm0 }
0x32ba   : > { %8092 = vrot.lane.b32.xlu1 %v8089_v8, %s13383_s10  ;;  %v8091_v6 = vrot.slane %v8069_v51, 4  ;;  %v8075_v32 = vmul.f32 %v13050_v18, %v11743_v21  ;;  %v8082_v31 = vmul.f32 %v13053_v49, %v13442_v23  ;;  %v8083_v43 = vmul.f32 %v8069_v51, %v13443_v20 }
0x32bb   : > { %10425 = vrot.lane.b32.xlu0 %v10424_v39, %s13425_s0  ;;  %v10434_v42 = vpack.i.bf16 %v8074_v50, %v8073_v14  ;;  %v8076_v19 = vmul.f32 %v13053_v49, %v11788_v40  ;;  %v8077_v2 = vmul.f32 %v8069_v51, %v11758_v28  ;;  %v8078_v54 = vmul.f32 %v13050_v18, %v11774_v34 }
0x32bc   : > { %v10444_v45 = vpack.i.bf16 %v8091_v6, %v8090_v25  ;;  %v8118_v29 = vrot.slane %v8075_v32, 4  ;;  %v8079_v21 = vmul.f32 %v13053_v49, %v11792_v41  ;;  %v8080_v23 = vmul.f32 %v8069_v51, %v11780_v37 }
0x32bd   : > { %v10439_v47 = vpack.i.bf16 %v8083_v43, %v8082_v31  ;;  %v8119_v20 = vrot.slane %v8076_v19, 4  ;;  %v8120_v9 = vrot.slane %v8077_v2, 4  ;;  %v8144_v28 = vrot.slane %v8078_v54, 4 }
0x32be   : > { %10435 = vrot.lane.b32.xlu1 %v10434_v42, %s13393_s8  ;;  %v8145_v40 = vrot.slane %v8079_v21, 4  ;;  %v8146_v24 = vrot.slane %v8080_v23, 4  ;;  %v8081_v37 = vmul.f32 %v13050_v18, %v11799_v44  ;;  %v8084_v41 = vmul.f32 %v13050_v18, %v13445_v63 }
0x32bf   : > { %8105 = vrot.lane.b32.xlu0 %v8072_v26, %s13393_s8  ;;  %v10449_v57 = vpack.i.bf16 %v8120_v9, %v8119_v20  ;;  %v8085_v30 = vmul.f32 %v13053_v49, %v13446_v62  ;;  %v8086_v7 = vmul.f32 %v8069_v51, %v13447_v60  ;;  %v8071_v15 = vmul.f32 %v13053_v49, %v13450_v5  ;;  %s8657_s8 = sshll.u32 %s13496_s2, 1 }
0x32c0   : > { %v10454_v34 = vpack.i.bf16 %v8146_v24, %v8145_v40  ;;  %v8070_v1 = vmul.f32 %v13050_v18, %v13449_v4 }
0x32c1   : > { %v10459_v16 = vpack.i.bf16 %v8085_v30, %v8084_v41 }
0x32c2   : > { %10445 = vrot.lane.b32.xlu1 %v10444_v45, %s13440_s3 }
0x32c3   : > { %10430 = vrot.lane.b32.xlu0 %v10444_v45, %s13383_s10  ;;  %s13470_s10 = sld [smem:[#allocation65_spill]] }
0x32c6   : > { %8121 = vrot.lane.b32.xlu1 %v8118_v29, %s13376_s18 }
0x32c7   : > { %10440 = vrot.lane.b32.xlu0 %v10439_v47, %s13444_s13 }
0x32c9   : > { %v8208_v12 = vld [vmem:[%s13470_s10] sm:$0xf] }
0x32ca   : > { %8147 = vrot.lane.b32.xlu1 %v8144_v28, %s13426_s22 }
0x32cb   : > { %10450 = vrot.lane.b32.xlu0 %v10449_v57, %s13376_s18  ;;  %s13489_s18 = sld [smem:[#allocation74_spill]] }
0x32ce   : > { %10455 = vrot.lane.b32.xlu1 %v10454_v34, %s13426_s22 }
0x32cf   : > { %8131 = vrot.lane.b32.xlu0 %v13050_v18, %s13425_s0 }
0x32d2   : > { %8170 = vrot.lane.b32.xlu1 %v8089_v8, %s13440_s3 }
0x32d3   : > { %8160 = vrot.lane.b32.xlu0 %v8081_v37, %s13444_s13 }
0x32d6   : > { %8187 = vrot.lane.b32.xlu1 %v8086_v7, %s13448_s4 }
0x32d7   : > { %10460 = vrot.lane.b32.xlu0 %v10459_v16, %s13448_s4  ;;  %s1966_s4 = scalar_lea.vmem %s11455_s28, %s8657_s8 }
0x32da   : > { %8282 = vperm.xlu1 %9863, %v8279_v52  }
0x32db   : > { %8211 = vperm.xlu0 %9807, %v8208_v12  }
0x332c   : > { %v8093_v44 = vpop.permute.xlu1 %8092 }
0x332d   : > { %v10426_v63 = vpop.permute.xlu0 %10425 }
0x332e   : > { %v10428_v27 = vunpack.i.h.bf16 %v10426_v63  ;;  %v10427_v3 = vunpack.i.l.bf16 %v10426_v63 }
0x3330   : > { %v10436_v13 = vpop.permute.xlu1 %10435  ;;  %v8138_v43 = vsel %vm13477_vm12, %v10427_v3, %v10428_v27 }
0x3331   : > { %v8106_v58 = vpop.permute.xlu0 %8105  ;;  %v10438_v60 = vunpack.i.h.bf16 %v10436_v13  ;;  %v10437_v36 = vunpack.i.l.bf16 %v10436_v13  ;;  %v8207_v13 = vld [vmem:[#allocation16] sm:$0x3] }
0x3333   : > { %v8112_v55 = vsel %vm13473_vm7, %v10437_v36, %v10438_v60  ;;  %v8111_v51 = vsel %vm13474_vm10, %v8106_v58, %v10437_v36  ;;  %vm13486_vm7 = vcmask 1041408  }
0x3334   : > { %v10446_v62 = vpop.permute.xlu1 %10445  ;;  %vm13487_vm10 = vmmov %vm13486_vm7 }
0x3335   : > { %v10431_v33 = vpop.permute.xlu0 %10430  ;;  %v10448_v8 = vunpack.i.h.bf16 %v10446_v62  ;;  %v10447_v39 = vunpack.i.l.bf16 %v10446_v62 }
0x3336   : > { %v10433_v61 = vunpack.i.h.bf16 %v10431_v33  ;;  %v10432_v10 = vunpack.i.l.bf16 %v10431_v33 }
0x3337   : > { %v8177_v19 = vsel %vm13478_vm6, %v10447_v39, %v10448_v8 }
0x3338   : > { %v8122_v53 = vpop.permute.xlu1 %8121  ;;  %v8099_v56 = vsel %vm13471_vm15, %v10432_v10, %v10433_v61  ;;  %v8098_v38 = vsel %vm13472_vm3, %v8093_v44, %v10432_v10  ;;  %vm13484_vm15 = vcmask 769024  }
0x3339   : > { %v10441_v22 = vpop.permute.xlu0 %10440  ;;  %v8194_v14 = vsel %vm2200_vm8, %v8071_v15, %v8099_v56  ;;  %v8193_v4 = vsel %vm2200_vm8, %v8070_v1, %v8098_v38  ;;  %vm13485_vm3 = vmmov %vm13484_vm15 }
0x333a   : > { %v10443_v11 = vunpack.i.h.bf16 %v10441_v22  ;;  %v10442_v59 = vunpack.i.l.bf16 %v10441_v22 }
0x333c   : > { %v8148_v0 = vpop.permute.xlu1 %8147  ;;  %v8167_v50 = vsel %vm13462_vm0, %v10442_v59, %v10443_v11 }
0x333d   : > { %v10451_v35 = vpop.permute.xlu0 %10450  ;;  %v8200_v47 = vsel %vm2200_vm8, %v8167_v50, %v8177_v19 }
0x333e   : > { %v10453_v17 = vunpack.i.h.bf16 %v10451_v35  ;;  %v10452_v46 = vunpack.i.l.bf16 %v10451_v35 }
0x3340   : > { %v8127_v42 = vsel %vm13475_vm13, %v8122_v53, %v10452_v46  ;;  %v8128_v5 = vsel %vm13476_vm1, %v10452_v46, %v10453_v17  ;;  %v10456_v49 = vpop.permute.xlu1 %10455  ;;  %vm13490_vm1 = vmmov %vm13486_vm7  ;;  %v11148_v17 = vmov 1966171168  }
0x3341   : > { %v10458_v18 = vunpack.i.h.bf16 %v10456_v49  ;;  %v10457_v25 = vunpack.i.l.bf16 %v10456_v49  ;;  %v8132_v6 = vpop.permute.xlu0 %8131  ;;  %v8196_v26 = vsel %vm2200_vm8, %v8112_v55, %v8128_v5  ;;  %v8195_v45 = vsel %vm2200_vm8, %v8111_v51, %v8127_v42  ;;  %vm13491_vm12 = vmmov %vm13490_vm1  ;;  %v8276_v55 = vld [vmem:[%s13489_s18] sm:$0x1] }
0x3342   : > { %v8202_v32 = vpack.c.bf16 %v8196_v26, %v8194_v14  ;;  %v8201_v31 = vpack.c.bf16 %v8195_v45, %v8193_v4  ;;  %v8137_v29 = vsel %vm13480_vm11, %v8132_v6, %v10427_v3  ;;  %v8343_v46 = vunpack.c.l.s4 %v11148_v17  ;;  %v13493_v4 = vld [vmem:[#allocation82_spill] sm:$0xff] }
0x3343   : > { %v8154_v2 = vsel %vm13479_vm2, %v10457_v25, %v10458_v18  ;;  %v8153_v54 = vsel %vm13481_vm4, %v8148_v0, %v10457_v25 }
0x3344   : > { %v8171_v21 = vpop.permute.xlu1 %8170  ;;  %8223 = vmatprep.subr.bf16.mxu1 %v8202_v32  ;;  %v8198_v23 = vsel %vm2200_vm8, %v8138_v43, %v8154_v2  ;;  %v8197_v24 = vsel %vm2200_vm8, %v8137_v29, %v8153_v54  ;;  %v8344_v8 = vunpack.c.0.s8 %v8343_v46  ;;  %v13494_v32 = vlaneseq }
0x3345   : > { %v8176_v20 = vsel %vm13482_vm5, %v8171_v21, %v10447_v39  ;;  %v8161_v9 = vpop.permute.xlu0 %8160  ;;  %8224 = vmatpush1.bf16.msra.mxu1 %v8201_v31  ;;  %v8204_v28 = vpack.c.bf16 %v8200_v47, %v8198_v23  ;;  %v13492_v39 = vld [vmem:[#allocation83_spill] sm:$0xff] }
0x3346   : > { %v8166_v40 = vsel %vm13483_vm14, %v8161_v9, %v10442_v59  ;;  %v8347_v18 = vsub.s32 %v8344_v8, %v13493_v4 }
0x3347   : > { %v8199_v57 = vsel %vm2200_vm8, %v8166_v40, %v8176_v20  ;;  %8225 = vmatprep.subr.bf16.mxu1 %v8204_v28  ;;  %vm13488_vm8 = vcmask 293888  }
0x3348   : > { %v8203_v34 = vpack.c.bf16 %v8199_v57, %v8197_v24  ;;  %v8188_v7 = vpop.permute.xlu1 %8187 }
0x3349   : > { %v10461_v37 = vpop.permute.xlu0 %10460 }
0x334a   : > { %v10463_v41 = vunpack.i.h.bf16 %v10461_v37  ;;  %v10462_v30 = vunpack.i.l.bf16 %v10461_v37  ;;  %8226 = vmatpush1.bf16.msra.mxu1 %v8203_v34 }
0x334c   : > { %v8190_v16 = vsel %vm13484_vm15, %v10463_v41, %v8188_v7  ;;  %v8189_v52 = vsel %vm13485_vm3, %v10462_v30, %v10463_v41 }
0x334d   : > { %v8206_v12 = vpack.c.bf16 %v8190_v16, %v8190_v16  ;;  %v8205_v44 = vpack.c.bf16 %v8189_v52, %v8189_v52 }
0x334f   : > { %8870 = vmatprep.subr.msk.bf16.mxu1 %vm13486_vm7, %v8206_v12  ;;  %v8218_v63 = vsel %vm13487_vm10, %v8205_v44, 0 }
0x3350   : > { %8228 = vmatpush1.bf16.msra.mxu1 %v8218_v63 }
0x3353   : > { %8871 = vmatmul.mubr.msk.bf16.vlgmr.msra.gmra.mrb[100].mxu1 %vm13488_vm8, %v8207_v13 }
0x3354   : > { %8330 = vmatprep.mubr.bf16.mxu1 %v13403_v48 }
0x3359   : > { %v8283_v51 = vpop.permute.xlu1 %8282 }
0x335a   : > { %v8212_v58 = vpop.permute.xlu0 %8211  ;;  %v8288_v14 = vrot.slane %v8283_v51, %v13492_v39 }
0x3426   : > { %v8257_v62 = vpop.f32.mrb[100].mxu1 }
0x3427   : > { %v8258_v33 = vadd.f32 %v8257_v62, %v8212_v58  ;;  %v8259_v61 = vpop.f32.mrb[101].mxu1 }
0x3428   : > { %v8260_v10 = vadd.f32 %v8259_v61, %v8212_v58  ;;  %v8261_v53 = vpop.f32.mrb[102].mxu1 }
0x3429   : > { %v8266_v22 = vmin.f32 %v8258_v33, 0.0  ;;  %v8262_v60 = vpop.f32.mrb[103].mxu1  ;;  %vm8264_vm0 = vcmp.gt.f32.partialorder %v8258_v33, 0.0 }
0x342a   : > { %v8267_v36 = vmin.f32 %v8260_v10, 0.0  ;;  %vm8265_vm13 = vcmp.gt.f32.partialorder %v8260_v10, 0.0 }
0x342b   : > { %v8268_v56 = vmul.f32 1.442695, %v8266_v22 }
0x342c   : > { %v8270_v11 = vmul.f32 1.442695, %v8267_v36 }
0x342d   : > { %10570 = vpow2.f32 %v8268_v56 }
0x342e   : > { %10572 = vpow2.f32 %v8270_v11 }
0x3437   : > { %v10571_v59 = vpop.eup %10570 }
0x3438   : > { %v10573_v0 = vpop.eup %10572  ;;  %v8872_v27 = vadd.f32 -1.0, %v10571_v59 }
0x3439   : > { %v8873_v38 = vadd.f32 -1.0, %v10573_v0 }
0x343a   : > { %v8274_v48 = vsel %vm8264_vm0, %v8258_v33, %v8872_v27 }
0x343b   : > { %v8277_v35 = vpack.c.bf16 %v8274_v48, %v8274_v48  ;;  %v8275_v15 = vsel %vm8265_vm13, %v8260_v10, %v8873_v38 }
0x343c   : > { %v8278_v1 = vpack.c.bf16 %v8275_v15, %v8275_v15 }
0x343d   : > { %v8293_v3 = vsel %vm13490_vm1, %v8277_v35, 0 }
0x343e   : > { %8874 = vmatprep.subr.msk.bf16.mxu1 %vm13491_vm12, %v8278_v1 }
0x343f   : > { %8299 = vmatpush1.bf16.msra.mxu1 %v8293_v3 }
0x3442   : > { %8875 = vmatmul.mubr.msk.bf16.vlgmr.msra.gmra.mrb[104].mxu1 %vm3795_vm9, %v8276_v55  ;;  %vm8359_vm9 = vcmp.lt.s32.totalorder %v13494_v32, 256 }
0x3515   : > { %v8332_v50 = vpop.f32.mrb[104].mxu1 }
0x3516   : > { %v8333_v42 = vadd.f32 %v8332_v50, %v8288_v14  ;;  %v8334_v5 = vpop.f32.mrb[105].mxu1 }
0x3517   : > { %v8335_v49 = vadd.f32 %v8334_v5, %v8288_v14  ;;  %v8336_v25 = vpop.f32.mrb[106].mxu1 }
0x3518   : > { %v8337_v6 = vpop.f32.mrb[107].mxu1 }
0x3519   : > { %v8341_v26 = vcombine.low %v8333_v42, %v8335_v49 }
0x351b   : > { %v8348_v45 = vrot.slane %v8341_v26, %v8347_v18 }
0x351d   : > { %v8355_v31 = vrot.slane %v8348_v45, %v8347_v18 }
0x351f   : > { %8361 = vst.msk [vmem:[%s1966_s4] sm:$0x3] %vm8359_vm9, %v8355_v31 }
0x3520 PF: > { %s141_s7 = sadd.s32 1, %s11032_s7  }
0x3521   : > { %p138_p10 = scmp.ge.s32.totalorder %s141_s7, 4  }
0x3523   :  { %140 = sbr.rel (!%p138_p10) target bundleno = 119 (0x77), region = 435 }
0x352a   :  { %8381 = vsyncpa [#allocation4], 1 }
0x352b   :  { %8383 = vsyncpa [#allocation4 + $0x1], 1 }
0x352c   :  { %8384 = vsyncpa [#allocation6], 1 }
0x352d   :  { %8385 = vsyncpa [#allocation9], 1 }
0x352e   :  { %8386 = vsyncpa [#allocation12], 1 }
0x352f   :  { %8387 = vsyncpa [#allocation15], 1 }
0x3530   :  { %8388 = vsyncpa [#allocation18], 1 }
0x3531   :  { %8389 = vsyncpa [#allocation21], 1 }
0x3532   :  { %8390 = vsyncpa [#allocation24], 1 }

</bundles_post_ra>
